<compile_context>
chip_gen: v6e
topology: v6e:2x2x1
jax: 0.10.0
libtpu: 0.0.40
codegen_flags: <defaults>
</compile_context>

<pallas_src>
import functools

import jax
import jax.numpy as jnp
import numpy as np
from jax import lax
from jax.experimental import pallas as pl
from jax.experimental.pallas import tpu as pltpu


def _round_up(x, m):
    return (x + m - 1) // m * m


def _recursive_block_kernel(x_ref, w1_ref, w2_ref, out_ref, col3_ref, *,
                            recurse_depth):
    """One batch element per grid step.

    x_ref    : (1, H, W, Cp)   f32   VMEM  (input image; also the residual)
    w1_ref   : (3, 3*Cp, Cp)   bf16  VMEM  (ky-major; row index = kx*Cp + ci)
    w2_ref   : (3, 3*Cp, Cp)   bf16  VMEM
    out_ref  : (1, H, W, Cp)   f32   VMEM  (written once, on the last step)
    col3_ref : (H+2, W, 3*Cp)  bf16  VMEM  scratch; channel group kx holds the
               conv input shifted by kx columns inside the 1-px zero halo:
                   col3[r, w, kx*Cp + ci] = padded_input(r, w + kx, ci)
    """
    _, H, W, Cp = x_ref.shape
    C3 = 3 * Cp
    bf16 = jnp.bfloat16

    # ---- zero ONLY the halo cells the staging stores never touch ----------
    zrow = jnp.zeros((1, W, C3), bf16)
    col3_ref[0:1, :, :] = zrow                                   # top halo row
    col3_ref[H + 1:H + 2, :, :] = zrow                           # bottom halo row
    zcol = jnp.zeros((H, 1, Cp), bf16)
    col3_ref[1:H + 1, 0:1, 0:Cp] = zcol                          # left halo, kx=0 group
    col3_ref[1:H + 1, W - 1:W, 2 * Cp:3 * Cp] = zcol             # right halo, kx=2 group

    def stage(y_bf16):
        """Scatter the (H, W, Cp) bf16 activation into col3's 3 kx groups."""
        if W > 1:
            col3_ref[1:H + 1, 1:W, 0:Cp] = y_bf16[:, 0:W - 1, :]          # kx=0
        col3_ref[1:H + 1, 0:W, Cp:2 * Cp] = y_bf16                        # kx=1 (aligned)
        if W > 1:
            col3_ref[1:H + 1, 0:W - 1, 2 * Cp:3 * Cp] = y_bf16[:, 1:W, :]  # kx=2

    def conv3x3(w_ref):
        """3x3 conv = 3 MXU matmuls (K = 3*Cp), f32 accumulation."""
        acc = None
        for ky in range(3):
            patch = col3_ref[ky:ky + H, :, :].reshape(H * W, C3)   # bf16
            contrib = jnp.dot(patch, w_ref[ky],
                              preferred_element_type=jnp.float32)
            acc = contrib if acc is None else acc + contrib
        return acc.reshape(H, W, Cp)                               # f32

    # Prime col3 with the input image (also the residual for every step).
    stage(x_ref[0].astype(bf16))

    def body(step, carry):
        # x = relu(conv_1(x))
        y = jnp.maximum(conv3x3(w1_ref), 0.0)
        stage(y.astype(bf16))
        # x = relu(conv_2(x)) + identity
        y = jnp.maximum(conv3x3(w2_ref), 0.0) + x_ref[0]

        @pl.when(step == recurse_depth - 1)
        def _():
            out_ref[0] = y                       # single f32 output write

        @pl.when(step < recurse_depth - 1)
        def _():
            stage(y.astype(bf16))                # bf16 carry for next step

        return carry

    lax.fori_loop(0, recurse_depth, body, 0)


def _prep_weight(w_oihw, c_pad):
    """OIHW (Co, Ci, 3, 3) -> ky-major fused (3, 3*Cp, Cp) bf16, zero-padded.

    Row index of the fused weight is kx*Cp + ci, matching col3's channel
    groups, so each conv is 3 matmuls (one per ky) with K = 3*Cp.
    """
    c_out, c_in, _, _ = w_oihw.shape
    w = jnp.transpose(w_oihw, (2, 3, 1, 0))                 # (ky, kx, ci, co)
    w = jnp.pad(w, ((0, 0), (0, 0), (0, c_pad - c_in), (0, c_pad - c_out)))
    return w.reshape(3, 3 * c_pad, c_pad).astype(jnp.bfloat16)


def recursive_block_nhwc(x_nhwc, w1_oihw, w2_oihw, recurse_depth=1):
    """RecursiveBlock forward on NHWC activations (preferred entry point)."""
    N, H, W, C = x_nhwc.shape
    if recurse_depth <= 0:
        return x_nhwc.astype(jnp.float32)

    Cp = _round_up(max(C, 128), 128)

    x = x_nhwc.astype(jnp.float32)
    if Cp != C:
        x = jnp.pad(x, ((0, 0), (0, 0), (0, 0), (0, Cp - C)))
    w1 = _prep_weight(w1_oihw, Cp)
    w2 = _prep_weight(w2_oihw, Cp)

    kernel = functools.partial(_recursive_block_kernel,
                               recurse_depth=recurse_depth)

    # --- advisory cost estimate --------------------------------------------
    flops = 2 * recurse_depth * 2 * 9 * N * H * W * Cp * Cp
    bytes_accessed = (2 * N * H * W * Cp) * 4 + 2 * (9 * Cp * Cp) * 2

    # --- per-grid-step VMEM footprint -> explicit vmem_limit_bytes ----------
    blk_f32 = H * W * Cp * 4
    vmem_est = (
        2 * 2 * blk_f32                       # x + out blocks, double-buffered
        + 2 * 2 * (9 * Cp * Cp * 2)           # two fused weights, double-buffered
        + (H + 2) * W * 3 * Cp * 2            # col3 bf16 scratch
        + 4 * blk_f32                         # live f32 temporaries (acc, y, residual)
        + 2 * (H * W * 3 * Cp * 2)            # bf16 patch temporaries
    )
    vmem_limit = int(min(vmem_est * 1.5 + (8 << 20), 100 << 20))

    out = pl.pallas_call(
        kernel,
        out_shape=jax.ShapeDtypeStruct((N, H, W, Cp), jnp.float32),
        grid_spec=pltpu.PrefetchScalarGridSpec(
            num_scalar_prefetch=0,
            grid=(N,),
            in_specs=[
                pl.BlockSpec((1, H, W, Cp), lambda n: (n, 0, 0, 0)),
                pl.BlockSpec((3, 3 * Cp, Cp), lambda n: (0, 0, 0)),
                pl.BlockSpec((3, 3 * Cp, Cp), lambda n: (0, 0, 0)),
            ],
            out_specs=pl.BlockSpec((1, H, W, Cp), lambda n: (n, 0, 0, 0)),
            scratch_shapes=[pltpu.VMEM((H + 2, W, 3 * Cp), jnp.bfloat16)],
        ),
        compiler_params=pltpu.CompilerParams(
            dimension_semantics=("parallel",),
            vmem_limit_bytes=vmem_limit),
        cost_estimate=pl.CostEstimate(flops=flops, transcendentals=0,
                                      bytes_accessed=bytes_accessed),
    )(x, w1, w2)

    return out[..., :C]


def recursive_block(x_nchw, w1_oihw, w2_oihw, recurse_depth=1):
    """PyTorch-layout (NCHW) wrapper around the NHWC kernel."""
    out_nhwc = recursive_block_nhwc(jnp.transpose(x_nchw, (0, 2, 3, 1)),
                                    w1_oihw, w2_oihw, recurse_depth)
    return jnp.transpose(out_nhwc, (0, 3, 1, 2))


# ----------------------------- references ---------------------------------


def _reference_f32(x_nchw, w1, w2, depth):
    """Pure-f32 JAX reference mirroring the PyTorch module."""
    def conv(x, w):
        return lax.conv_general_dilated(
            x, w, window_strides=(1, 1), padding=((1, 1), (1, 1)),
            dimension_numbers=("NCHW", "OIHW", "NCHW"))
    identity = x_nchw
    y = x_nchw
    for _ in range(depth):
        y = jax.nn.relu(conv(y, w1))
        y = jax.nn.relu(conv(y, w2))
        y = y + identity
    return y


def _reference_bf16(x_nchw, w1, w2, depth):
    """Reference with the same bf16-in / f32-acc precision as the kernel."""
    def conv(x, w):
        return lax.conv_general_dilated(
            x.astype(jnp.bfloat16), w.astype(jnp.bfloat16),
            window_strides=(1, 1), padding=((1, 1), (1, 1)),
            dimension_numbers=("NCHW", "OIHW", "NCHW"),
            preferred_element_type=jnp.float32)
    identity = x_nchw
    y = x_nchw
    for _ in range(depth):
        y = jax.nn.relu(conv(y, w1))
        y = jax.nn.relu(conv(y, w2))
        y = y + identity
    return y


if __name__ == "__main__":
    N, C, H, W = 2, 8, 16, 16
    recurse_depth = 2

    key = jax.random.PRNGKey(0)
    k_x, k_1, k_2 = jax.random.split(key, 3)
    x = jax.random.normal(k_x, (N, C, H, W), dtype=jnp.float32)
    # Deterministic synthetic Conv2d weights (PyTorch OIHW layout), no bias.
    w1 = 0.1 * jax.random.normal(k_1, (C, C, 3, 3), dtype=jnp.float32)
    w2 = 0.1 * jax.random.normal(k_2, (C, C, 3, 3), dtype=jnp.float32)

    out = jax.block_until_ready(recursive_block(x, w1, w2, recurse_depth))

    # Tight check against a reference with matching (bf16-in / f32-acc) precision.
    ref_bf16 = jax.block_until_ready(_reference_bf16(x, w1, w2, recurse_depth))
    np.testing.assert_allclose(np.asarray(out), np.asarray(ref_bf16),
                               rtol=1e-3, atol=1e-3)
    # Loose sanity check against the pure-f32 PyTorch-equivalent reference.
    ref_f32 = jax.block_until_ready(_reference_f32(x, w1, w2, recurse_depth))
    np.testing.assert_allclose(np.asarray(out), np.asarray(ref_f32),
                               rtol=5e-2, atol=5e-2)

    print("KERNEL_OK")
</pallas_src>

<mosaic_0001>
module attributes {stable_mosaic.version = 11 : i64} {
  func.func @_recursive_block_kernel(%arg0: i32, %arg1: memref<1x16x16x128xf32, #tpu.memory_space<vmem>>, %arg2: memref<3x384x128xbf16, #tpu.memory_space<vmem>>, %arg3: memref<3x384x128xbf16, #tpu.memory_space<vmem>>, %arg4: memref<1x16x16x128xf32, #tpu.memory_space<vmem>>, %arg5: memref<18x16x384xbf16, #tpu.memory_space<vmem>>) attributes {dimension_semantics = [#tpu.dimension_semantics<parallel>], iteration_bounds = array<i64: 2>, scalar_prefetch = 0 : i64, scratch_operands = 1 : i64, tpu.core_type = #tpu.core_type<tc>, window_params = [{transform_indices = @transform_0, window_bounds = array<i64: 1, 16, 16, 128>}, {pipeline_mode = #tpu.pipeline_mode<synchronous>, transform_indices = @transform_1, window_bounds = array<i64: 3, 384, 128>}, {pipeline_mode = #tpu.pipeline_mode<synchronous>, transform_indices = @transform_2, window_bounds = array<i64: 3, 384, 128>}, {transform_indices = @transform_3, window_bounds = array<i64: 1, 16, 16, 128>}]} {
    %cst = arith.constant 0.000000e+00 : bf16
    %0 = vector.broadcast %cst : bf16 to vector<1x16x384xbf16>
    %c0 = arith.constant 0 : index
    %c0_0 = arith.constant 0 : index
    %c0_1 = arith.constant 0 : index
    %1 = vector.load %arg5[%c0, %c0_0, %c0_1] : memref<18x16x384xbf16, #tpu.memory_space<vmem>>, vector<1x16x384xbf16>
    tpu.vector_store %arg5[%c0, %c0_0, %c0_1], %0 {strides = array<i32>} : memref<18x16x384xbf16, #tpu.memory_space<vmem>>, vector<1x16x384xbf16>,
    %c17 = arith.constant 17 : index
    %c0_2 = arith.constant 0 : index
    %c0_3 = arith.constant 0 : index
    %2 = vector.load %arg5[%c17, %c0_2, %c0_3] : memref<18x16x384xbf16, #tpu.memory_space<vmem>>, vector<1x16x384xbf16>
    tpu.vector_store %arg5[%c17, %c0_2, %c0_3], %0 {strides = array<i32>} : memref<18x16x384xbf16, #tpu.memory_space<vmem>>, vector<1x16x384xbf16>,
    %cst_4 = arith.constant 0.000000e+00 : bf16
    %3 = vector.broadcast %cst_4 : bf16 to vector<16x1x128xbf16>
    %c1 = arith.constant 1 : index
    %c0_5 = arith.constant 0 : index
    %c0_6 = arith.constant 0 : index
    %4 = vector.load %arg5[%c1, %c0_5, %c0_6] : memref<18x16x384xbf16, #tpu.memory_space<vmem>>, vector<16x1x128xbf16>
    tpu.vector_store %arg5[%c1, %c0_5, %c0_6], %3 {strides = array<i32>} : memref<18x16x384xbf16, #tpu.memory_space<vmem>>, vector<16x1x128xbf16>,
    %c1_7 = arith.constant 1 : index
    %c15 = arith.constant 15 : index
    %c256 = arith.constant 256 : index
    %5 = vector.load %arg5[%c1_7, %c15, %c256] : memref<18x16x384xbf16, #tpu.memory_space<vmem>>, vector<16x1x128xbf16>
    tpu.vector_store %arg5[%c1_7, %c15, %c256], %3 {strides = array<i32>} : memref<18x16x384xbf16, #tpu.memory_space<vmem>>, vector<16x1x128xbf16>,
    %c0_8 = arith.constant 0 : index
    %c0_9 = arith.constant 0 : index
    %c0_10 = arith.constant 0 : index
    %c0_11 = arith.constant 0 : index
    %6 = vector.load %arg1[%c0_8, %c0_9, %c0_10, %c0_11] : memref<1x16x16x128xf32, #tpu.memory_space<vmem>>, vector<1x16x16x128xf32>
    %7 = vector.shape_cast %6 : vector<1x16x16x128xf32> to vector<16x16x128xf32>
    %8 = arith.truncf %7 : vector<16x16x128xf32> to vector<16x16x128xbf16>
    %9 = vector.extract_strided_slice %8 {offsets = [0, 0, 0], sizes = [16, 15, 128], strides = [1, 1, 1]} : vector<16x16x128xbf16> to vector<16x15x128xbf16>
    %c1_12 = arith.constant 1 : index
    %c1_13 = arith.constant 1 : index
    %c0_14 = arith.constant 0 : index
    %10 = vector.load %arg5[%c1_12, %c1_13, %c0_14] : memref<18x16x384xbf16, #tpu.memory_space<vmem>>, vector<16x15x128xbf16>
    tpu.vector_store %arg5[%c1_12, %c1_13, %c0_14], %9 {strides = array<i32>} : memref<18x16x384xbf16, #tpu.memory_space<vmem>>, vector<16x15x128xbf16>,
    %c1_15 = arith.constant 1 : index
    %c0_16 = arith.constant 0 : index
    %c128 = arith.constant 128 : index
    %11 = vector.load %arg5[%c1_15, %c0_16, %c128] : memref<18x16x384xbf16, #tpu.memory_space<vmem>>, vector<16x16x128xbf16>
    tpu.vector_store %arg5[%c1_15, %c0_16, %c128], %8 {strides = array<i32>} : memref<18x16x384xbf16, #tpu.memory_space<vmem>>, vector<16x16x128xbf16>,
    %12 = vector.extract_strided_slice %8 {offsets = [0, 1, 0], sizes = [16, 15, 128], strides = [1, 1, 1]} : vector<16x16x128xbf16> to vector<16x15x128xbf16>
    %c1_17 = arith.constant 1 : index
    %c0_18 = arith.constant 0 : index
    %c256_19 = arith.constant 256 : index
    %13 = vector.load %arg5[%c1_17, %c0_18, %c256_19] : memref<18x16x384xbf16, #tpu.memory_space<vmem>>, vector<16x15x128xbf16>
    tpu.vector_store %arg5[%c1_17, %c0_18, %c256_19], %12 {strides = array<i32>} : memref<18x16x384xbf16, #tpu.memory_space<vmem>>, vector<16x15x128xbf16>,
    %c0_i32 = arith.constant 0 : i32
    %c2_i32 = arith.constant 2 : i32
    %14 = arith.addi %c0_i32, %c2_i32 : i32
    %c1_i32 = arith.constant 1 : i32
    scf.for %arg6 = %c0_i32 to %14 step %c1_i32  : i32 {
      %c0_21 = arith.constant 0 : index
      %c0_22 = arith.constant 0 : index
      %c0_23 = arith.constant 0 : index
      %15 = vector.load %arg5[%c0_21, %c0_22, %c0_23] : memref<18x16x384xbf16, #tpu.memory_space<vmem>>, vector<16x16x384xbf16>
      %16 = vector.shape_cast %15 : vector<16x16x384xbf16> to vector<256x384xbf16>
      %c0_24 = arith.constant 0 : index
      %c0_25 = arith.constant 0 : index
      %c0_26 = arith.constant 0 : index
      %17 = vector.load %arg2[%c0_24, %c0_25, %c0_26] : memref<3x384x128xbf16, #tpu.memory_space<vmem>>, vector<1x384x128xbf16>
      %18 = vector.shape_cast %17 : vector<1x384x128xbf16> to vector<384x128xbf16>
      %cst_27 = arith.constant dense<0.000000e+00> : vector<256x128xf32>
      %19 = tpu.matmul %16, %18, %cst_27 {dimension_numbers = #tpu.dot_dimension_numbers<[1], [0], [0], [1], [0, 0, 1, 1], [], []>} : vector<256x384xbf16>, vector<384x128xbf16>, vector<256x128xf32> -> vector<256x128xf32>
      %c1_28 = arith.constant 1 : index
      %c0_29 = arith.constant 0 : index
      %c0_30 = arith.constant 0 : index
      %20 = vector.load %arg5[%c1_28, %c0_29, %c0_30] : memref<18x16x384xbf16, #tpu.memory_space<vmem>>, vector<16x16x384xbf16>
      %21 = vector.shape_cast %20 : vector<16x16x384xbf16> to vector<256x384xbf16>
      %c1_31 = arith.constant 1 : index
      %c0_32 = arith.constant 0 : index
      %c0_33 = arith.constant 0 : index
      %22 = vector.load %arg2[%c1_31, %c0_32, %c0_33] : memref<3x384x128xbf16, #tpu.memory_space<vmem>>, vector<1x384x128xbf16>
      %23 = vector.shape_cast %22 : vector<1x384x128xbf16> to vector<384x128xbf16>
      %cst_34 = arith.constant dense<0.000000e+00> : vector<256x128xf32>
      %24 = tpu.matmul %21, %23, %cst_34 {dimension_numbers = #tpu.dot_dimension_numbers<[1], [0], [0], [1], [0, 0, 1, 1], [], []>} : vector<256x384xbf16>, vector<384x128xbf16>, vector<256x128xf32> -> vector<256x128xf32>
      %25 = arith.addf %19, %24 : vector<256x128xf32>
      %c2 = arith.constant 2 : index
      %c0_35 = arith.constant 0 : index
      %c0_36 = arith.constant 0 : index
      %26 = vector.load %arg5[%c2, %c0_35, %c0_36] : memref<18x16x384xbf16, #tpu.memory_space<vmem>>, vector<16x16x384xbf16>
      %27 = vector.shape_cast %26 : vector<16x16x384xbf16> to vector<256x384xbf16>
      %c2_37 = arith.constant 2 : index
      %c0_38 = arith.constant 0 : index
      %c0_39 = arith.constant 0 : index
      %28 = vector.load %arg2[%c2_37, %c0_38, %c0_39] : memref<3x384x128xbf16, #tpu.memory_space<vmem>>, vector<1x384x128xbf16>
      %29 = vector.shape_cast %28 : vector<1x384x128xbf16> to vector<384x128xbf16>
      %cst_40 = arith.constant dense<0.000000e+00> : vector<256x128xf32>
      %30 = tpu.matmul %27, %29, %cst_40 {dimension_numbers = #tpu.dot_dimension_numbers<[1], [0], [0], [1], [0, 0, 1, 1], [], []>} : vector<256x384xbf16>, vector<384x128xbf16>, vector<256x128xf32> -> vector<256x128xf32>
      %31 = arith.addf %25, %30 : vector<256x128xf32>
      %32 = vector.shape_cast %31 : vector<256x128xf32> to vector<16x16x128xf32>
      %cst_41 = arith.constant 0.000000e+00 : f32
      %33 = vector.broadcast %cst_41 : f32 to vector<16x16x128xf32>
      %34 = arith.maximumf %32, %33 : vector<16x16x128xf32>
      %35 = arith.truncf %34 : vector<16x16x128xf32> to vector<16x16x128xbf16>
      %36 = vector.extract_strided_slice %35 {offsets = [0, 0, 0], sizes = [16, 15, 128], strides = [1, 1, 1]} : vector<16x16x128xbf16> to vector<16x15x128xbf16>
      %c1_42 = arith.constant 1 : index
      %c1_43 = arith.constant 1 : index
      %c0_44 = arith.constant 0 : index
      %37 = vector.load %arg5[%c1_42, %c1_43, %c0_44] : memref<18x16x384xbf16, #tpu.memory_space<vmem>>, vector<16x15x128xbf16>
      tpu.vector_store %arg5[%c1_42, %c1_43, %c0_44], %36 {strides = array<i32>} : memref<18x16x384xbf16, #tpu.memory_space<vmem>>, vector<16x15x128xbf16>,
      %c1_45 = arith.constant 1 : index
      %c0_46 = arith.constant 0 : index
      %c128_47 = arith.constant 128 : index
      %38 = vector.load %arg5[%c1_45, %c0_46, %c128_47] : memref<18x16x384xbf16, #tpu.memory_space<vmem>>, vector<16x16x128xbf16>
      tpu.vector_store %arg5[%c1_45, %c0_46, %c128_47], %35 {strides = array<i32>} : memref<18x16x384xbf16, #tpu.memory_space<vmem>>, vector<16x16x128xbf16>,
      %39 = vector.extract_strided_slice %35 {offsets = [0, 1, 0], sizes = [16, 15, 128], strides = [1, 1, 1]} : vector<16x16x128xbf16> to vector<16x15x128xbf16>
      %c1_48 = arith.constant 1 : index
      %c0_49 = arith.constant 0 : index
      %c256_50 = arith.constant 256 : index
      %40 = vector.load %arg5[%c1_48, %c0_49, %c256_50] : memref<18x16x384xbf16, #tpu.memory_space<vmem>>, vector<16x15x128xbf16>
      tpu.vector_store %arg5[%c1_48, %c0_49, %c256_50], %39 {strides = array<i32>} : memref<18x16x384xbf16, #tpu.memory_space<vmem>>, vector<16x15x128xbf16>,
      %c0_51 = arith.constant 0 : index
      %c0_52 = arith.constant 0 : index
      %c0_53 = arith.constant 0 : index
      %41 = vector.load %arg5[%c0_51, %c0_52, %c0_53] : memref<18x16x384xbf16, #tpu.memory_space<vmem>>, vector<16x16x384xbf16>
      %42 = vector.shape_cast %41 : vector<16x16x384xbf16> to vector<256x384xbf16>
      %c0_54 = arith.constant 0 : index
      %c0_55 = arith.constant 0 : index
      %c0_56 = arith.constant 0 : index
      %43 = vector.load %arg3[%c0_54, %c0_55, %c0_56] : memref<3x384x128xbf16, #tpu.memory_space<vmem>>, vector<1x384x128xbf16>
      %44 = vector.shape_cast %43 : vector<1x384x128xbf16> to vector<384x128xbf16>
      %cst_57 = arith.constant dense<0.000000e+00> : vector<256x128xf32>
      %45 = tpu.matmul %42, %44, %cst_57 {dimension_numbers = #tpu.dot_dimension_numbers<[1], [0], [0], [1], [0, 0, 1, 1], [], []>} : vector<256x384xbf16>, vector<384x128xbf16>, vector<256x128xf32> -> vector<256x128xf32>
      %c1_58 = arith.constant 1 : index
      %c0_59 = arith.constant 0 : index
      %c0_60 = arith.constant 0 : index
      %46 = vector.load %arg5[%c1_58, %c0_59, %c0_60] : memref<18x16x384xbf16, #tpu.memory_space<vmem>>, vector<16x16x384xbf16>
      %47 = vector.shape_cast %46 : vector<16x16x384xbf16> to vector<256x384xbf16>
      %c1_61 = arith.constant 1 : index
      %c0_62 = arith.constant 0 : index
      %c0_63 = arith.constant 0 : index
      %48 = vector.load %arg3[%c1_61, %c0_62, %c0_63] : memref<3x384x128xbf16, #tpu.memory_space<vmem>>, vector<1x384x128xbf16>
      %49 = vector.shape_cast %48 : vector<1x384x128xbf16> to vector<384x128xbf16>
      %cst_64 = arith.constant dense<0.000000e+00> : vector<256x128xf32>
      %50 = tpu.matmul %47, %49, %cst_64 {dimension_numbers = #tpu.dot_dimension_numbers<[1], [0], [0], [1], [0, 0, 1, 1], [], []>} : vector<256x384xbf16>, vector<384x128xbf16>, vector<256x128xf32> -> vector<256x128xf32>
      %51 = arith.addf %45, %50 : vector<256x128xf32>
      %c2_65 = arith.constant 2 : index
      %c0_66 = arith.constant 0 : index
      %c0_67 = arith.constant 0 : index
      %52 = vector.load %arg5[%c2_65, %c0_66, %c0_67] : memref<18x16x384xbf16, #tpu.memory_space<vmem>>, vector<16x16x384xbf16>
      %53 = vector.shape_cast %52 : vector<16x16x384xbf16> to vector<256x384xbf16>
      %c2_68 = arith.constant 2 : index
      %c0_69 = arith.constant 0 : index
      %c0_70 = arith.constant 0 : index
      %54 = vector.load %arg3[%c2_68, %c0_69, %c0_70] : memref<3x384x128xbf16, #tpu.memory_space<vmem>>, vector<1x384x128xbf16>
      %55 = vector.shape_cast %54 : vector<1x384x128xbf16> to vector<384x128xbf16>
      %cst_71 = arith.constant dense<0.000000e+00> : vector<256x128xf32>
      %56 = tpu.matmul %53, %55, %cst_71 {dimension_numbers = #tpu.dot_dimension_numbers<[1], [0], [0], [1], [0, 0, 1, 1], [], []>} : vector<256x384xbf16>, vector<384x128xbf16>, vector<256x128xf32> -> vector<256x128xf32>
      %57 = arith.addf %51, %56 : vector<256x128xf32>
      %58 = vector.shape_cast %57 : vector<256x128xf32> to vector<16x16x128xf32>
      %cst_72 = arith.constant 0.000000e+00 : f32
      %59 = vector.broadcast %cst_72 : f32 to vector<16x16x128xf32>
      %60 = arith.maximumf %58, %59 : vector<16x16x128xf32>
      %c0_73 = arith.constant 0 : index
      %c0_74 = arith.constant 0 : index
      %c0_75 = arith.constant 0 : index
      %c0_76 = arith.constant 0 : index
      %61 = vector.load %arg1[%c0_73, %c0_74, %c0_75, %c0_76] : memref<1x16x16x128xf32, #tpu.memory_space<vmem>>, vector<1x16x16x128xf32>
      %62 = vector.shape_cast %61 : vector<1x16x16x128xf32> to vector<16x16x128xf32>
      %63 = arith.addf %60, %62 : vector<16x16x128xf32>
      %c1_i32_77 = arith.constant 1 : i32
      %64 = arith.cmpi eq, %arg6, %c1_i32_77 : i32
      %65 = arith.extui %64 : i1 to i32
      %c0_i32_78 = arith.constant 0 : i32
      %66 = arith.cmpi ne, %65, %c0_i32_78 : i32
      scf.if %66 {
        %c0_81 = arith.constant 0 : index
        %c0_82 = arith.constant 0 : index
        %c0_83 = arith.constant 0 : index
        %c0_84 = arith.constant 0 : index
        %70 = vector.load %arg4[%c0_81, %c0_82, %c0_83, %c0_84] : memref<1x16x16x128xf32, #tpu.memory_space<vmem>>, vector<1x16x16x128xf32>
        %71 = vector.shape_cast %70 : vector<1x16x16x128xf32> to vector<16x16x128xf32>
        %72 = vector.shape_cast %63 : vector<16x16x128xf32> to vector<1x16x16x128xf32>
        tpu.vector_store %arg4[%c0_81, %c0_82, %c0_83, %c0_84], %72 {strides = array<i32>} : memref<1x16x16x128xf32, #tpu.memory_space<vmem>>, vector<1x16x16x128xf32>,
      } else {
      }
      %c1_i32_79 = arith.constant 1 : i32
      %67 = arith.cmpi slt, %arg6, %c1_i32_79 : i32
      %68 = arith.extui %67 : i1 to i32
      %c0_i32_80 = arith.constant 0 : i32
      %69 = arith.cmpi ne, %68, %c0_i32_80 : i32
      scf.if %69 {
        %70 = arith.truncf %63 : vector<16x16x128xf32> to vector<16x16x128xbf16>
        %71 = vector.extract_strided_slice %70 {offsets = [0, 0, 0], sizes = [16, 15, 128], strides = [1, 1, 1]} : vector<16x16x128xbf16> to vector<16x15x128xbf16>
        %c1_81 = arith.constant 1 : index
        %c1_82 = arith.constant 1 : index
        %c0_83 = arith.constant 0 : index
        %72 = vector.load %arg5[%c1_81, %c1_82, %c0_83] : memref<18x16x384xbf16, #tpu.memory_space<vmem>>, vector<16x15x128xbf16>
        tpu.vector_store %arg5[%c1_81, %c1_82, %c0_83], %71 {strides = array<i32>} : memref<18x16x384xbf16, #tpu.memory_space<vmem>>, vector<16x15x128xbf16>,
        %c1_84 = arith.constant 1 : index
        %c0_85 = arith.constant 0 : index
        %c128_86 = arith.constant 128 : index
        %73 = vector.load %arg5[%c1_84, %c0_85, %c128_86] : memref<18x16x384xbf16, #tpu.memory_space<vmem>>, vector<16x16x128xbf16>
        tpu.vector_store %arg5[%c1_84, %c0_85, %c128_86], %70 {strides = array<i32>} : memref<18x16x384xbf16, #tpu.memory_space<vmem>>, vector<16x16x128xbf16>,
        %74 = vector.extract_strided_slice %70 {offsets = [0, 1, 0], sizes = [16, 15, 128], strides = [1, 1, 1]} : vector<16x16x128xbf16> to vector<16x15x128xbf16>
        %c1_87 = arith.constant 1 : index
        %c0_88 = arith.constant 0 : index
        %c256_89 = arith.constant 256 : index
        %75 = vector.load %arg5[%c1_87, %c0_88, %c256_89] : memref<18x16x384xbf16, #tpu.memory_space<vmem>>, vector<16x15x128xbf16>
        tpu.vector_store %arg5[%c1_87, %c0_88, %c256_89], %74 {strides = array<i32>} : memref<18x16x384xbf16, #tpu.memory_space<vmem>>, vector<16x15x128xbf16>,
      } else {
      }
    }
    %c2_i32_20 = arith.constant 2 : i32
    return
  }
  func.func @transform_0(%arg0: i32) -> (i32, i32, i32, i32) {
    %c0_i32 = arith.constant 0 : i32
    %c0_i32_0 = arith.constant 0 : i32
    %c0_i32_1 = arith.constant 0 : i32
    %c0_i32_2 = arith.constant 0 : i32
    return %arg0, %c0_i32, %c0_i32_0, %c0_i32_1 : i32, i32, i32, i32
  }
  func.func @transform_1(%arg0: i32) -> (i32, i32, i32) {
    %c0_i32 = arith.constant 0 : i32
    %c0_i32_0 = arith.constant 0 : i32
    %c0_i32_1 = arith.constant 0 : i32
    %c0_i32_2 = arith.constant 0 : i32
    return %c0_i32, %c0_i32_0, %c0_i32_1 : i32, i32, i32
  }
  func.func @transform_2(%arg0: i32) -> (i32, i32, i32) {
    %c0_i32 = arith.constant 0 : i32
    %c0_i32_0 = arith.constant 0 : i32
    %c0_i32_1 = arith.constant 0 : i32
    %c0_i32_2 = arith.constant 0 : i32
    return %c0_i32, %c0_i32_0, %c0_i32_1 : i32, i32, i32
  }
  func.func @transform_3(%arg0: i32) -> (i32, i32, i32, i32) {
    %c0_i32 = arith.constant 0 : i32
    %c0_i32_0 = arith.constant 0 : i32
    %c0_i32_1 = arith.constant 0 : i32
    %c0_i32_2 = arith.constant 0 : i32
    return %arg0, %c0_i32, %c0_i32_0, %c0_i32_1 : i32, i32, i32, i32
  }
}

</mosaic_0001>

<bundles_post_ra>
// kernel: tpu_custom_call.1
= control target key start
LH: loop header
LB: loop body
LE: loop exit
PB: predicated region body
PF: predicated region fallthrough
CT: control target
= control target key end

     0   :  { %8 = vsyncpa [#allocation4], 0  ;;  %s13173_s0 = inlined_call_operand.hbm [shape: f32[2,16,16,128], index: 0, kind: input, shape index: {}]   ;;  %s13174_s1 = inlined_call_operand.hbm [shape: bf16[3,384,128], index: 1, kind: input, shape index: {}]   ;;  %s13175_s2 = inlined_call_operand.hbm [shape: bf16[3,384,128], index: 2, kind: input, shape index: {}]   ;;  %s13176_s3 = inlined_call_operand.hbm [shape: f32[2,16,16,128], index: 3, kind: output, shape index: {}]  }
   0x1   :  { %10 = vsyncpa [#allocation4 + $0x1], 0 }
   0x2   :  { %11 = vsyncpa [#allocation7], 0 }
   0x3   :  { %12 = vsyncpa [#allocation5], 0 }
   0x4   :  { %14 = vsyncpa [#allocation5 + $0x1], 0  ;;  %s10438_s12 = smov 0   ;;  %s10440_s13 = smov 0  }
   0x5   :  { %s10442_s14 = smov 0   ;;  %s10444_s15 = smov 0  }
   0x6 LB: > { %s10459_s16 = sadd.s32 4294967295, %s10401_s15   ;;  %s7986_s17 = sadd.s32 4294967294, %s10401_s15   ;;  %s10401_s15 = sphi %s10444_s15, %s13443_s15   ;;  %s10397_s14 = sphi %s10442_s14, %s13442_s14   ;;  %s10393_s13 = sphi %s10440_s13, %s13441_s13   ;;  %s10389_s12 = sphi %s10438_s12, %s13440_s12  }
   0x7   : > { %p40_p0 = scmp.ne.s32.totalorder %s10393_s13, %s10389_s12  ;;  %p13177_p1 = scmp.eq.s32.totalorder %s10459_s16, 0 }
   0x8   : > { %p112_p3 = scmp.eq.s32.totalorder %s7986_s17, 1  ;;  %p7987_p5 = scmp.ge.s32.totalorder %s10401_s15, 1 }
   0x9   : > { %p10468_p4 = por %p13177_p1, %p40_p0  ;;  %p119_p7 = scmp.lt.s32.totalorder %s10401_s15, 3 }
   0xa   : > { %p10473_p6 = por %p112_p3, %p40_p0  ;;  %s10407_s21 = smov [#allocation6]  }
   0xb   : > { %s13287_s18 = scalar_select %p10468_p4, 1, 0 }
   0xc   : > { %s13288_s19 = scalar_select %p10473_p6, 1, 0 }
   0xd   : > { %p10478_p8 = pnand %p7987_p5, %p119_p7  ;;  %s131_s22 = sshll.u32 %s10407_s21, 4  ;;  %s132_s22 = int_to_ptr.vmem [resolvable:$true] %s131_s22 }
   0xe   : > { %s10408_s24 = smov [#allocation8]   ;;  %s10260_s26 = scalar_lea.vmem %s132_s22, 9216 }
   0xf   : > { %s13289_s20 = scalar_select %p10478_p8, 1, 0 }
  0x10   : > { %p9748_p9 = pneg %p10478_p8  ;;  %s144_s25 = sshll.u32 %s10408_s24, 4  ;;  %s145_s25 = int_to_ptr.vmem [resolvable:$true] %s144_s25 }
  0x11   : > { %p10261_p13 = scmp.ne.s32.totalorder %s132_s22, %s10260_s26  ;;  %p10268_p5 = scmp.lt.s32.totalorder %s132_s22, %s132_s22 }
  0x12   : > { %p10487_p11 = pnand %p9748_p9, %p13177_p1  ;;  %p10269_p7 = scmp.lt.s32.totalorder %s10260_s26, %s10260_s26 }
  0x14   : > { %p10251_p12 = pneg %p10487_p11  ;;  %p10270_p10 = por %p10269_p7, %p10268_p5 }
  0x16   : > { %p10263_p0 = pnand %p10261_p13, %p10251_p12 }
  0x18   : > { %p10264_p3 = pneg %p10263_p0 }
  0x1a   : > { %p10271_p9 = pnand %p10270_p10, %p10264_p3 }
  0x1c   : > { %10274 = shalt.err (!%p10271_p9)
}
  0x1d   : > { %s10409_s27 = smov 64   ;;  %s10410_s28 = smov 4  }
  0x1e   : > { %9751 = dma.hbm_to_vmem [thread:$0]  (!%p10487_p11), %s13174_s1, 9216, %s132_s22, [#allocation7], %s10409_s27, %s10409_s27, %s10410_s28  }
  0x1f   : > { %s10286_s4 = scalar_lea.vmem %s145_s25, 9216  ;;  %p10294_p2 = scmp.lt.s32.totalorder %s145_s25, %s145_s25 }
  0x20   : > { %p10287_p1 = scmp.ne.s32.totalorder %s145_s25, %s10286_s4  ;;  %p10295_p6 = scmp.lt.s32.totalorder %s10286_s4, %s10286_s4 }
  0x22   : > { %p10289_p13 = pnand %p10287_p1, %p10251_p12  ;;  %p10296_p5 = por %p10295_p6, %p10294_p2 }
  0x24   : > { %p10290_p0 = pneg %p10289_p13 }
  0x26   : > { %p10297_p10 = pnand %p10296_p5, %p10290_p0 }
  0x28   : > { %10300 = shalt.err (!%p10297_p10)
}
  0x29   : > { %9754 = dma.hbm_to_vmem [thread:$0]  (!%p10487_p11), %s13175_s2, 9216, %s145_s25, [#allocation7], %s10409_s27, %s10409_s27, %s10410_s28  }
  0x2a   : > { %s10510_s7 = sadd.s32 1, %s10401_s15   ;;  %s27_s8 = sadd.s32 1, %s10397_s14 }
  0x2b   : > { %s24_s9 = ssub.s32 %s10401_s15, %s10510_s7  ;;  %p34_p1 = scmp.ne.s32.totalorder %s10397_s14, %s10393_s13 }
  0x2c   : > { %p25_p2 = scmp.eq.s32.totalorder %s24_s9, 0  ;;  %p35_p6 = scmp.eq.s32.totalorder %s10401_s15, 0 }
  0x2d   : > { %p13291_p12 = scmp.eq.s32.totalorder %s10459_s16, 1  ;;  %p9765_p7 = scmp.lt.s32.totalorder %s10401_s15, 2 }
  0x2e   : > { %s10526_s11 = scalar_select %p25_p2, %s10397_s14, %s27_s8  }
  0x2f   : > { %p10520_p3 = por %p13291_p12, %p34_p1  ;;  %p36_p9 = por %p35_p6, %p34_p1 }
  0x30   : > { %s158_s17 = sand.u32 1, %s10397_s14   ;;  %s8534_s22 = sshll.u32 %s10401_s15, 12 }
  0x31   : > { %s13292_s10 = scalar_select %p10520_p3, 1, 0 }
  0x32   : > { %s7991_s21 = sshll.u32 %s158_s17, 8  ;;  %s10533_s25 = scalar_lea.hbm %s13173_s0, %s8534_s22 }
  0x33   : > { %s162_s26 = scalar_lea.vmem [#allocation3], %s7991_s21  ;;  %p10537_p11 = pnand %p9765_p7, %p36_p9 }
  0x34   : > { %s169_s27 = sshll.u32 %s162_s26, 4  ;;  %s10541_s29 = scalar_lea.sflag [#allocation4], %s158_s17  ;;  %s10535_s27 = int_to_ptr.vmem [resolvable:$true] %s169_s27 }
  0x35   : > { %s10301_s30 = scalar_lea.hbm %s10533_s25, 4096  ;;  %p10303_p0 = pneg %p10537_p11 }
  0x36   : > { %p10302_p13 = scmp.ne.s32.totalorder %s10533_s25, %s10301_s30  ;;  %s10306_s6 = scalar_lea.hbm %s13173_s0, 8192 }
  0x37   : > { %p10307_p1 = scmp.lt.s32.totalorder %s10533_s25, %s13173_s0  ;;  %p10308_p2 = scmp.lt.s32.totalorder %s10306_s6, %s10301_s30 }
  0x38   : > { %p10304_p5 = pnand %p10303_p0, %p10302_p13 }
  0x39   : > { %p10309_p6 = por %p10308_p2, %p10307_p1 }
  0x3a   : > { %p10305_p10 = pneg %p10304_p5 }
  0x3c   : > { %p10310_p12 = pnand %p10309_p6, %p10305_p10 }
  0x3e   : > { %10313 = shalt.err (!%p10310_p12)
}
  0x3f   : > { %s10314_s17 = scalar_lea.vmem %s10535_s27, 4096  ;;  %s10411_s21 = smov [#allocation3]  }
  0x40   : > { %p10315_p7 = scmp.ne.s32.totalorder %s10535_s27, %s10314_s17  ;;  %s10319_s22 = sshll.u32 %s10411_s21, 4  ;;  %s10320_s22 = int_to_ptr.vmem [resolvable:$false] %s10319_s22 }
  0x41   : > { %s10321_s23 = scalar_lea.vmem %s10320_s22, 8192  ;;  %p10322_p5 = scmp.lt.s32.totalorder %s10535_s27, %s10320_s22 }
  0x42   : > { %p10317_p9 = pnand %p10315_p7, %p10303_p0  ;;  %p10323_p3 = scmp.lt.s32.totalorder %s10321_s23, %s10314_s17 }
  0x44   : > { %p10318_p13 = pneg %p10317_p9  ;;  %p10324_p4 = por %p10323_p3, %p10322_p5 }
  0x46   : > { %p10325_p8 = pnand %p10324_p4, %p10318_p13 }
  0x48   : > { %10328 = shalt.err (!%p10325_p8)
}
  0x49   : > { %s10412_s24 = smov 128   ;;  %s10413_s26 = smov 8  }
  0x4a   : > { %9758 = dma.hbm_to_vmem [thread:$0]  (!%p10537_p11), %s10533_s25, 4096, %s10535_s27, %s10541_s29, %s10412_s24, %s10412_s24, %s10413_s26  }
  0x4b   : > { %p13294_p0 = scmp.ne.s32.totalorder %s13289_s20, 0 }
  0x4d   : > { %181 = sbr.rel (%p13294_p0) target bundleno = 1373 (0x55d), region = 32 }
  0x52   : > { %s10565_s30 = sand.u32 1, %s10393_s13   ;;  %p13295_p4 = scmp.ne.s32.totalorder %s13287_s18, 0 }
  0x53   : > { %s7995_s4 = sshll.u32 %s10565_s30, 8  ;;  %s184_s5 = scalar_lea.sflag [#allocation4], %s10565_s30 }
  0x54   : > { %s10571_s6 = scalar_lea.vmem [#allocation3], %s7995_s4 }
  0x55   : > { %10376 = dma.done.wait (%p13295_p4), %s184_s5, 4096  }
  0x56   : > { %10378 = vsyncadd (%p13295_p4), %s184_s5, 4294963200  ;;  %p13296_p8 = scmp.eq.s32.totalorder %s10459_s16, 0 }
  0x58   : > { %10380 = dma.done.wait (%p13296_p8), [#allocation7], 18432   ;;  %p13297_p3 = pmov %p13296_p8 }
  0x59   : > { %vm229_vm0 = vcmask 1040384   ;;  %vm230_vm1 = vsmask.f32 256  ;;  %v10414_v0 = vmov 0   ;;  %vm280_vm3 = vcmask 1043459   ;;  %v331_v9 = vld [vmem:[%s10571_s6] sm:$0xff] }
  0x5a   : > { %10382 = vsyncadd (%p13297_p3), [#allocation7], 4294948864  ;;  %219 = vst [vmem:[#allocation2] sm:$0xff] %v10414_v0  ;;  %vm281_vm4 = vsmask.f32 7950  ;;  %v10595_v13 = vpack.c.bf16 %v331_v9, %v331_v9  ;;  %v332_v14 = vld [vmem:[%s10571_s6 + $0x8] sm:$0xff] }
  0x5b   : > { %220 = vst [vmem:[#allocation2 + $0x8] sm:$0xf] %v10414_v0  ;;  %221 = vst [vmem:[#allocation2 + $0xc] sm:$0xff] %v10414_v0  ;;  %v232_v2 = vld [vmem:[#allocation2 + $0x18] sm:$0x1]  ;;  %v10602_v19 = vpack.c.bf16 %v332_v14, %v332_v14  ;;  %vm749_vm6 = vcmask 1043456  }
  0x5c   : > { %222 = vst [vmem:[#allocation2 + $0x14] sm:$0xf] %v10414_v0  ;;  %224 = vst [vmem:[#allocation2 + $0x198] sm:$0xff] %v10414_v0  ;;  %v235_v3 = vld [vmem:[#allocation2 + $0x30] sm:$0x1]  ;;  %s11256_s18 = scalar_lea.vmem [#allocation9], %s7995_s4 }
  0x5d   : > { %225 = vst [vmem:[#allocation2 + $0x1a0] sm:$0xf] %v10414_v0  ;;  %226 = vst [vmem:[#allocation2 + $0x1a4] sm:$0xff] %v10414_v0  ;;  %v238_v4 = vld [vmem:[#allocation2 + $0x48] sm:$0x1]  ;;  %v470_v9 = vshrl.u32 %v10602_v19, 16 }
  0x5e   : > { %227 = vst [vmem:[#allocation2 + $0x1ac] sm:$0xf] %v10414_v0  ;;  %vm10582_vm2 = vmand %vm229_vm0, %vm230_vm1  ;;  %v241_v8 = vld [vmem:[#allocation2 + $0x60] sm:$0x1]  ;;  %v244_v11 = vld [vmem:[#allocation2 + $0x78] sm:$0x1] }
  0x5f   : > { %v233_v5 = vsel %vm10582_vm2, 0, %v232_v2  ;;  %v236_v6 = vsel %vm10582_vm2, 0, %v235_v3  ;;  %v239_v7 = vsel %vm10582_vm2, 0, %v238_v4  ;;  %v242_v10 = vsel %vm10582_vm2, 0, %v241_v8  ;;  %v247_v12 = vld [vmem:[#allocation2 + $0x90] sm:$0x1]  ;;  %vm10620_vm5 = vmand %vm280_vm3, %vm281_vm4 }
  0x60   : > { %234 = vst [vmem:[#allocation2 + $0x18] sm:$0x1] %v233_v5  ;;  %237 = vst [vmem:[#allocation2 + $0x30] sm:$0x1] %v236_v6  ;;  %v245_v15 = vsel %vm10582_vm2, 0, %v244_v11  ;;  %v248_v16 = vsel %vm10582_vm2, 0, %v247_v12 }
  0x61   : > { %240 = vst [vmem:[#allocation2 + $0x48] sm:$0x1] %v239_v7  ;;  %243 = vst [vmem:[#allocation2 + $0x60] sm:$0x1] %v242_v10  ;;  %v250_v17 = vld [vmem:[#allocation2 + $0xa8] sm:$0x1] }
  0x62   : > { %v253_v18 = vld [vmem:[#allocation2 + $0xc0] sm:$0x1]  ;;  %246 = vst [vmem:[#allocation2 + $0x78] sm:$0x1] %v245_v15  ;;  %249 = vst [vmem:[#allocation2 + $0x90] sm:$0x1] %v248_v16 }
  0x63   : > { %v251_v20 = vsel %vm10582_vm2, 0, %v250_v17  ;;  %v254_v21 = vsel %vm10582_vm2, 0, %v253_v18  ;;  %v256_v22 = vld [vmem:[#allocation2 + $0xd8] sm:$0x1]  ;;  %v259_v23 = vld [vmem:[#allocation2 + $0xf0] sm:$0x1] }
  0x64   : > { %848 = vst [vmem:[#allocation2 + $0x1c] sm:$0xf] %v10595_v13  ;;  %252 = vst [vmem:[#allocation2 + $0xa8] sm:$0x1] %v251_v20  ;;  %v257_v24 = vsel %vm10582_vm2, 0, %v256_v22  ;;  %v260_v25 = vsel %vm10582_vm2, 0, %v259_v23 }
  0x65   : > { %255 = vst [vmem:[#allocation2 + $0xc0] sm:$0x1] %v254_v21  ;;  %v262_v26 = vld [vmem:[#allocation2 + $0x108] sm:$0x1]  ;;  %v265_v27 = vld [vmem:[#allocation2 + $0x120] sm:$0x1] }
  0x66   : > { %849 = vst [vmem:[#allocation2 + $0x28] sm:$0xf] %v10602_v19  ;;  %258 = vst [vmem:[#allocation2 + $0xd8] sm:$0x1] %v257_v24  ;;  %v263_v28 = vsel %vm10582_vm2, 0, %v262_v26  ;;  %v266_v29 = vsel %vm10582_vm2, 0, %v265_v27 }
  0x67   : > { %261 = vst [vmem:[#allocation2 + $0xf0] sm:$0x1] %v260_v25  ;;  %v268_v30 = vld [vmem:[#allocation2 + $0x138] sm:$0x1]  ;;  %v271_v31 = vld [vmem:[#allocation2 + $0x150] sm:$0x1] }
  0x68   : > { %264 = vst [vmem:[#allocation2 + $0x108] sm:$0x1] %v263_v28  ;;  %267 = vst [vmem:[#allocation2 + $0x120] sm:$0x1] %v266_v29  ;;  %v269_v33 = vsel %vm10582_vm2, 0, %v268_v30  ;;  %v272_v34 = vsel %vm10582_vm2, 0, %v271_v31 }
  0x69   : > { %v274_v35 = vld [vmem:[#allocation2 + $0x168] sm:$0x1]  ;;  %v277_v36 = vld [vmem:[#allocation2 + $0x180] sm:$0x1]  ;;  %270 = vst [vmem:[#allocation2 + $0x138] sm:$0x1] %v269_v33 }
  0x6a   : > { %273 = vst [vmem:[#allocation2 + $0x150] sm:$0x1] %v272_v34  ;;  %v275_v37 = vsel %vm10582_vm2, 0, %v274_v35  ;;  %v278_v38 = vsel %vm10582_vm2, 0, %v277_v36  ;;  %v283_v39 = vld [vmem:[#allocation2 + $0x2c] sm:$0x8] }
  0x6b   : > { %v286_v40 = vld [vmem:[#allocation2 + $0x44] sm:$0x8]  ;;  %vm750_vm7 = vsmask.f32 7938  ;;  %276 = vst [vmem:[#allocation2 + $0x168] sm:$0x1] %v275_v37 }
  0x6c   : > { %279 = vst [vmem:[#allocation2 + $0x180] sm:$0x1] %v278_v38  ;;  %v284_v41 = vsel %vm10620_vm5, 0, %v283_v39  ;;  %v287_v42 = vsel %vm10620_vm5, 0, %v286_v40  ;;  %v289_v43 = vld [vmem:[#allocation2 + $0x5c] sm:$0x8]  ;;  %vm10680_vm9 = vmand %vm749_vm6, %vm750_vm7 }
  0x6d   : > { %v292_v44 = vld [vmem:[#allocation2 + $0x74] sm:$0x8]  ;;  %285 = vst [vmem:[#allocation2 + $0x2c] sm:$0x8] %v284_v41  ;;  %288 = vst [vmem:[#allocation2 + $0x44] sm:$0x8] %v287_v42 }
  0x6e   : > { %v290_v45 = vsel %vm10620_vm5, 0, %v289_v43  ;;  %v293_v46 = vsel %vm10620_vm5, 0, %v292_v44  ;;  %v295_v47 = vld [vmem:[#allocation2 + $0x8c] sm:$0x8]  ;;  %v298_v48 = vld [vmem:[#allocation2 + $0xa4] sm:$0x8] }
  0x6f   : > { %291 = vst [vmem:[#allocation2 + $0x5c] sm:$0x8] %v290_v45  ;;  %294 = vst [vmem:[#allocation2 + $0x74] sm:$0x8] %v293_v46  ;;  %v296_v49 = vsel %vm10620_vm5, 0, %v295_v47  ;;  %v299_v50 = vsel %vm10620_vm5, 0, %v298_v48 }
  0x70   : > { %v301_v51 = vld [vmem:[#allocation2 + $0xbc] sm:$0x8]  ;;  %v304_v52 = vld [vmem:[#allocation2 + $0xd4] sm:$0x8]  ;;  %297 = vst [vmem:[#allocation2 + $0x8c] sm:$0x8] %v296_v49 }
  0x71   : > { %300 = vst [vmem:[#allocation2 + $0xa4] sm:$0x8] %v299_v50  ;;  %v302_v53 = vsel %vm10620_vm5, 0, %v301_v51  ;;  %v305_v54 = vsel %vm10620_vm5, 0, %v304_v52  ;;  %v307_v55 = vld [vmem:[#allocation2 + $0xec] sm:$0x8] }
  0x72   : > { %v310_v56 = vld [vmem:[#allocation2 + $0x104] sm:$0x8]  ;;  %303 = vst [vmem:[#allocation2 + $0xbc] sm:$0x8] %v302_v53  ;;  %306 = vst [vmem:[#allocation2 + $0xd4] sm:$0x8] %v305_v54 }
  0x73   : > { %v308_v57 = vsel %vm10620_vm5, 0, %v307_v55  ;;  %v311_v58 = vsel %vm10620_vm5, 0, %v310_v56  ;;  %v313_v59 = vld [vmem:[#allocation2 + $0x11c] sm:$0x8]  ;;  %v316_v60 = vld [vmem:[#allocation2 + $0x134] sm:$0x8] }
  0x74   : > { %309 = vst [vmem:[#allocation2 + $0xec] sm:$0x8] %v308_v57  ;;  %312 = vst [vmem:[#allocation2 + $0x104] sm:$0x8] %v311_v58  ;;  %v314_v61 = vsel %vm10620_vm5, 0, %v313_v59  ;;  %v317_v62 = vsel %vm10620_vm5, 0, %v316_v60 }
  0x75   : > { %v319_v63 = vld [vmem:[#allocation2 + $0x14c] sm:$0x8]  ;;  %v322_v0 = vld [vmem:[#allocation2 + $0x164] sm:$0x8]  ;;  %315 = vst [vmem:[#allocation2 + $0x11c] sm:$0x8] %v314_v61 }
  0x76   : > { %318 = vst [vmem:[#allocation2 + $0x134] sm:$0x8] %v317_v62  ;;  %v320_v1 = vsel %vm10620_vm5, 0, %v319_v63  ;;  %v323_v2 = vsel %vm10620_vm5, 0, %v322_v0  ;;  %v325_v3 = vld [vmem:[#allocation2 + $0x17c] sm:$0x8] }
  0x77   : > { %v328_v4 = vld [vmem:[#allocation2 + $0x194] sm:$0x8]  ;;  %321 = vst [vmem:[#allocation2 + $0x14c] sm:$0x8] %v320_v1  ;;  %324 = vst [vmem:[#allocation2 + $0x164] sm:$0x8] %v323_v2 }
  0x78   : > { %v326_v5 = vsel %vm10620_vm5, 0, %v325_v3  ;;  %v329_v6 = vsel %vm10620_vm5, 0, %v328_v4  ;;  %v462_v7 = vshrl.u32 %v10595_v13, 16  ;;  %v465_v8 = vshll.u32 %v10595_v13, 16  ;;  %v333_v11 = vld [vmem:[%s10571_s6 + $0x10] sm:$0xff]  ;;  %v334_v12 = vld [vmem:[%s10571_s6 + $0x18] sm:$0xff] }
  0x79   : > { %327 = vst [vmem:[#allocation2 + $0x17c] sm:$0x8] %v326_v5  ;;  %330 = vst [vmem:[#allocation2 + $0x194] sm:$0x8] %v329_v6  ;;  %vm459_vm8 = vsmask.f32 4368  ;;  %v10670_v15 = vpack.c.bf16 %v333_v11, %v333_v11  ;;  %v10672_v16 = vpack.c.bf16 %v334_v12, %v334_v12 }
  0x7a   : > { %v473_v10 = vshll.u32 %v10602_v19, 16  ;;  %v464_v14 = vrot.slane %v462_v7, 7  ;;  %v335_v17 = vld [vmem:[%s10571_s6 + $0x20] sm:$0xff]  ;;  %v336_v18 = vld [vmem:[%s10571_s6 + $0x28] sm:$0xff]  ;;  %v10676_v20 = vrot.slane %v462_v7, 4  ;;  %v13302_v13 = vmov 0  ;;  %vm10694_vm10 = vmor %vm230_vm1, %vm459_vm8 }
  0x7b   : > { %v13303_v13 = vsel %vm10680_vm9, 4294967295, %v13302_v13  ;;  %v752_v21 = vld [vmem:[#allocation2 + $0x18] sm:$0xf]  ;;  %v472_v22 = vrot.slane %v470_v9, 7  ;;  %v10686_v23 = vpack.c.bf16 %v335_v17, %v335_v17  ;;  %v10688_v24 = vpack.c.bf16 %v336_v18, %v336_v18  ;;  %850 = vst [vmem:[#allocation2 + $0x34] sm:$0xf] %v10670_v15 }
  0x7c   : > { %13304 = vst [vmem:[#allocation13_spill] sm:$0xff] %v13303_v13  ;;  %v10690_v25 = vrot.slane %v465_v8, 5  ;;  %v467_v26 = vor.u32 %v465_v8, %v464_v14  ;;  %v13305_v27 = vmov 0  ;;  %v468_v28 = vrot.slane %v464_v14, 4  ;;  %851 = vst [vmem:[#allocation2 + $0x40] sm:$0xf] %v10672_v16 }
  0x7d   : > { %v13306_v27 = vsel %vm10694_vm10, 4294967295, %v13305_v27  ;;  %v478_v29 = vshrl.u32 %v10670_v15, 16  ;;  %v481_v30 = vshll.u32 %v10670_v15, 16  ;;  %v475_v31 = vor.u32 %v473_v10, %v472_v22  ;;  %852 = vst [vmem:[#allocation2 + $0x4c] sm:$0xf] %v10686_v23  ;;  %v337_v35 = vld [vmem:[%s10571_s6 + $0x30] sm:$0xff] }
  0x7e   : > { %13307 = vst [vmem:[#allocation14_spill] sm:$0xff] %v13306_v27  ;;  %v486_v32 = vshrl.u32 %v10672_v16, 16  ;;  %v489_v33 = vshll.u32 %v10672_v16, 16  ;;  %v494_v34 = vshrl.u32 %v10686_v23, 16  ;;  %853 = vst [vmem:[#allocation2 + $0x58] sm:$0xf] %v10688_v24  ;;  %v753_v36 = vsel %vm10680_vm9, %v467_v26, %v752_v21 }
  0x7f   : > { %v480_v37 = vrot.slane %v478_v29, 7  ;;  %v497_v38 = vshll.u32 %v10686_v23, 16  ;;  %v502_v39 = vshrl.u32 %v10688_v24, 16  ;;  %v338_v40 = vld [vmem:[%s10571_s6 + $0x38] sm:$0xff]  ;;  %754 = vst [vmem:[#allocation2 + $0x18] sm:$0xf] %v753_v36  ;;  %v476_v41 = vsel %vm10694_vm10, %v468_v28, %v475_v31 }
  0x80   : > { %v756_v42 = vld [vmem:[#allocation2 + $0x30] sm:$0xf]  ;;  %v488_v43 = vrot.slane %v486_v32, 7  ;;  %v496_v44 = vrot.slane %v494_v34, 7  ;;  %v505_v45 = vshll.u32 %v10688_v24, 16  ;;  %v10728_v50 = vpack.c.bf16 %v337_v35, %v337_v35  ;;  %v340_v56 = vld [vmem:[%s10571_s6 + $0x48] sm:$0xff] }
  0x81   : > { %755 = vst [vmem:[#allocation2 + $0x24] sm:$0xf] %v476_v41  ;;  %v483_v46 = vor.u32 %v481_v30, %v480_v37  ;;  %v484_v47 = vrot.slane %v480_v37, 4  ;;  %v760_v48 = vld [vmem:[#allocation2 + $0x48] sm:$0xf]  ;;  %v504_v49 = vrot.slane %v502_v39, 7  ;;  %v10734_v54 = vpack.c.bf16 %v338_v40, %v338_v40 }
  0x82   : > { %v491_v51 = vor.u32 %v489_v33, %v488_v43  ;;  %v499_v52 = vor.u32 %v497_v38, %v496_v44  ;;  %v500_v53 = vrot.slane %v496_v44, 4  ;;  %v339_v55 = vld [vmem:[%s10571_s6 + $0x40] sm:$0xff]  ;;  %v510_v59 = vshrl.u32 %v10728_v50, 16  ;;  %854 = vst [vmem:[#allocation2 + $0x64] sm:$0xf] %v10728_v50  ;;  %v341_v61 = vld [vmem:[%s10571_s6 + $0x50] sm:$0xff] }
  0x83   : > { %v757_v57 = vsel %vm10680_vm9, %v483_v46, %v756_v42  ;;  %v507_v58 = vor.u32 %v505_v45, %v504_v49  ;;  %v13225_v60 = vshll.u32 %v10728_v50, 16  ;;  %v342_v62 = vld [vmem:[%s10571_s6 + $0x58] sm:$0xff]  ;;  %v343_v63 = vld [vmem:[%s10571_s6 + $0x60] sm:$0xff]  ;;  %v13217_v2 = vshrl.u32 %v10734_v54, 16  ;;  %855 = vst [vmem:[#allocation2 + $0x70] sm:$0xf] %v10734_v54 }
  0x84   : > { %758 = vst [vmem:[#allocation2 + $0x30] sm:$0xf] %v757_v57  ;;  %v492_v0 = vsel %vm10694_vm10, %v484_v47, %v491_v51  ;;  %v761_v1 = vsel %vm10680_vm9, %v499_v52, %v760_v48  ;;  %v13222_v3 = vshll.u32 %v10734_v54, 16  ;;  %v512_v5 = vrot.slane %v510_v59, 7  ;;  %v764_v8 = vld [vmem:[#allocation2 + $0x60] sm:$0xf] }
  0x85   : > { %759 = vst [vmem:[#allocation2 + $0x3c] sm:$0xf] %v492_v0  ;;  %762 = vst [vmem:[#allocation2 + $0x48] sm:$0xf] %v761_v1  ;;  %v508_v4 = vsel %vm10694_vm10, %v500_v53, %v507_v58  ;;  %v10759_v6 = vpack.c.bf16 %v339_v55, %v339_v55  ;;  %v10761_v7 = vpack.c.bf16 %v340_v56, %v340_v56  ;;  %v520_v11 = vrot.slane %v13217_v2, 7  ;;  %v344_v51 = vld [vmem:[%s10571_s6 + $0x68] sm:$0xff] }
  0x86   : > { %763 = vst [vmem:[#allocation2 + $0x54] sm:$0xf] %v508_v4  ;;  %v10765_v12 = vpack.c.bf16 %v341_v61, %v341_v61  ;;  %v10767_v14 = vpack.c.bf16 %v342_v62, %v342_v62  ;;  %v10769_v17 = vpack.c.bf16 %v343_v63, %v343_v63  ;;  %v515_v18 = vor.u32 %v13225_v60, %v512_v5  ;;  %v768_v41 = vld [vmem:[#allocation2 + $0x78] sm:$0xf]  ;;  %v772_v48 = vld [vmem:[#allocation2 + $0x90] sm:$0xf] }
  0x87   : > { %v516_v21 = vrot.slane %v512_v5, 4  ;;  %v13210_v22 = vshrl.u32 %v10759_v6, 16  ;;  %v13208_v26 = vshll.u32 %v10759_v6, 16  ;;  %856 = vst [vmem:[#allocation2 + $0x7c] sm:$0xf] %v10759_v6  ;;  %v523_v28 = vor.u32 %v13222_v3, %v520_v11  ;;  %v345_v57 = vld [vmem:[%s10571_s6 + $0x70] sm:$0xff] }
  0x88   : > { %857 = vst [vmem:[#allocation2 + $0x88] sm:$0xf] %v10761_v7  ;;  %v13206_v31 = vshrl.u32 %v10761_v7, 16  ;;  %v13207_v35 = vshll.u32 %v10761_v7, 16  ;;  %v13205_v36 = vshrl.u32 %v10765_v12, 16  ;;  %v765_v37 = vsel %vm10680_vm9, %v515_v18, %v764_v8  ;;  %v346_v58 = vld [vmem:[%s10571_s6 + $0x78] sm:$0xff] }
  0x89   : > { %858 = vst [vmem:[#allocation2 + $0x94] sm:$0xf] %v10765_v12  ;;  %859 = vst [vmem:[#allocation2 + $0xa0] sm:$0xf] %v10767_v14  ;;  %v528_v40 = vrot.slane %v13210_v22, 7  ;;  %v13198_v42 = vshll.u32 %v10765_v12, 16  ;;  %v524_v44 = vsel %vm10694_vm10, %v516_v21, %v523_v28  ;;  %v10817_v8 = vpack.c.bf16 %v344_v51, %v344_v51 }
  0x8a   : > { %860 = vst [vmem:[#allocation2 + $0xac] sm:$0xf] %v10769_v17  ;;  %v13193_v43 = vshrl.u32 %v10767_v14, 16  ;;  %766 = vst [vmem:[#allocation2 + $0x60] sm:$0xf] %v765_v37  ;;  %v536_v46 = vrot.slane %v13206_v31, 7  ;;  %v10823_v28 = vpack.c.bf16 %v345_v57, %v345_v57  ;;  %v10825_v37 = vpack.c.bf16 %v346_v58, %v346_v58 }
  0x8b   : > { %v544_v47 = vrot.slane %v13205_v36, 7  ;;  %v13195_v49 = vshll.u32 %v10767_v14, 16  ;;  %767 = vst [vmem:[#allocation2 + $0x6c] sm:$0xf] %v524_v44  ;;  %v531_v52 = vor.u32 %v13208_v26, %v528_v40  ;;  %v532_v53 = vrot.slane %v528_v40, 4  ;;  %v347_v40 = vld [vmem:[%s10571_s6 + $0x80] sm:$0xff] }
  0x8c   : > { %v552_v55 = vrot.slane %v13193_v43, 7  ;;  %v13190_v56 = vshrl.u32 %v10769_v17, 16  ;;  %v539_v61 = vor.u32 %v13207_v35, %v536_v46  ;;  %v13188_v0 = vshll.u32 %v10769_v17, 16  ;;  %v776_v21 = vld [vmem:[#allocation2 + $0xa8] sm:$0xf]  ;;  %v349_v51 = vld [vmem:[%s10571_s6 + $0x90] sm:$0xff] }
  0x8d   : > { %v547_v62 = vor.u32 %v13198_v42, %v544_v47  ;;  %v548_v63 = vrot.slane %v544_v47, 4  ;;  %v769_v1 = vsel %vm10680_vm9, %v531_v52, %v768_v41  ;;  %v13183_v47 = vshrl.u32 %v10817_v8, 16  ;;  %861 = vst [vmem:[#allocation2 + $0xb8] sm:$0xf] %v10817_v8  ;;  %862 = vst [vmem:[#allocation2 + $0xc4] sm:$0xf] %v10823_v28 }
  0x8e   : > { %v555_v4 = vor.u32 %v13195_v49, %v552_v55  ;;  %v560_v5 = vrot.slane %v13190_v56, 7  ;;  %770 = vst [vmem:[#allocation2 + $0x78] sm:$0xf] %v769_v1  ;;  %v540_v11 = vsel %vm10694_vm10, %v532_v53, %v539_v61  ;;  %v13186_v52 = vshll.u32 %v10817_v8, 16  ;;  %863 = vst [vmem:[#allocation2 + $0xd0] sm:$0xf] %v10825_v37 }
  0x8f   : > { %v773_v18 = vsel %vm10680_vm9, %v547_v62, %v772_v48  ;;  %771 = vst [vmem:[#allocation2 + $0x84] sm:$0xf] %v540_v11  ;;  %v348_v48 = vld [vmem:[%s10571_s6 + $0x88] sm:$0xff]  ;;  %v13182_v53 = vshrl.u32 %v10823_v28, 16  ;;  %v13184_v55 = vshll.u32 %v10823_v28, 16  ;;  %v13181_v57 = vshrl.u32 %v10825_v37, 16 }
  0x90   : > { %774 = vst [vmem:[#allocation2 + $0x90] sm:$0xf] %v773_v18  ;;  %v556_v41 = vsel %vm10694_vm10, %v548_v63, %v555_v4  ;;  %v563_v44 = vor.u32 %v13188_v0, %v560_v5  ;;  %v564_v46 = vrot.slane %v560_v5, 4  ;;  %v350_v58 = vld [vmem:[%s10571_s6 + $0x98] sm:$0xff]  ;;  %v568_v62 = vrot.slane %v13183_v47, 7  ;;  %v359_v31 = vld [vmem:[%s10571_s6 + $0xe0] sm:$0xff] }
  0x91   : > { %775 = vst [vmem:[#allocation2 + $0x9c] sm:$0xf] %v556_v41  ;;  %v13185_v63 = vshll.u32 %v10825_v37, 16  ;;  %v10848_v1 = vpack.c.bf16 %v347_v40, %v347_v40  ;;  %v576_v4 = vrot.slane %v13182_v53, 7  ;;  %v584_v5 = vrot.slane %v13181_v57, 7  ;;  %s11258_s20 = smov 0  }
  0x92   : > { %v777_v61 = vsel %vm10680_vm9, %v563_v44, %v776_v21  ;;  %v10854_v11 = vpack.c.bf16 %v348_v48, %v348_v48  ;;  %v10856_v18 = vpack.c.bf16 %v349_v51, %v349_v51  ;;  %v571_v21 = vor.u32 %v13186_v52, %v568_v62  ;;  %v780_v41 = vld [vmem:[#allocation2 + $0xc0] sm:$0xf] }
  0x93   : > { %778 = vst [vmem:[#allocation2 + $0xa8] sm:$0xf] %v777_v61  ;;  %v13187_v44 = vshrl.u32 %v10848_v1, 16  ;;  %v13192_v40 = vshll.u32 %v10848_v1, 16  ;;  %864 = vst [vmem:[#allocation2 + $0xdc] sm:$0xf] %v10848_v1  ;;  %v10863_v61 = vpack.c.bf16 %v350_v58, %v350_v58  ;;  %v579_v48 = vor.u32 %v13184_v55, %v576_v4 }
  0x94   : > { %v580_v57 = vrot.slane %v576_v4, 4  ;;  %v587_v51 = vor.u32 %v13185_v63, %v584_v5  ;;  %v13189_v62 = vshrl.u32 %v10854_v11, 16  ;;  %865 = vst [vmem:[#allocation2 + $0xe8] sm:$0xf] %v10854_v11  ;;  %866 = vst [vmem:[#allocation2 + $0xf4] sm:$0xf] %v10856_v18  ;;  %v572_v53 = vsel %vm10694_vm10, %v564_v46, %v571_v21 }
  0x95   : > { %v592_v58 = vrot.slane %v13187_v44, 7  ;;  %v13194_v47 = vshll.u32 %v10854_v11, 16  ;;  %v13191_v55 = vshrl.u32 %v10856_v18, 16  ;;  %867 = vst [vmem:[#allocation2 + $0x100] sm:$0xf] %v10863_v61  ;;  %v351_v4 = vld [vmem:[%s10571_s6 + $0xa0] sm:$0xff]  ;;  %v781_v63 = vsel %vm10680_vm9, %v579_v48, %v780_v41 }
  0x96   : > { %v352_v5 = vld [vmem:[%s10571_s6 + $0xa8] sm:$0xff]  ;;  %779 = vst [vmem:[#allocation2 + $0xb4] sm:$0xf] %v572_v53  ;;  %v588_v52 = vsel %vm10694_vm10, %v580_v57, %v587_v51  ;;  %v600_v21 = vrot.slane %v13189_v62, 7  ;;  %v13197_v44 = vshll.u32 %v10856_v18, 16  ;;  %v13196_v48 = vshrl.u32 %v10863_v61, 16 }
  0x97   : > { %v784_v46 = vld [vmem:[#allocation2 + $0xd8] sm:$0xf]  ;;  %782 = vst [vmem:[#allocation2 + $0xc0] sm:$0xf] %v781_v63  ;;  %783 = vst [vmem:[#allocation2 + $0xcc] sm:$0xf] %v588_v52  ;;  %v595_v53 = vor.u32 %v13192_v40, %v592_v58  ;;  %v10896_v56 = vpack.c.bf16 %v351_v4, %v351_v4  ;;  %v10898_v52 = vpack.c.bf16 %v352_v5, %v352_v5 }
  0x98   : > { %v596_v0 = vrot.slane %v592_v58, 4  ;;  %v608_v41 = vrot.slane %v13191_v55, 7  ;;  %v603_v57 = vor.u32 %v13194_v47, %v600_v21  ;;  %v788_v51 = vld [vmem:[#allocation2 + $0xf0] sm:$0xf]  ;;  %v13203_v62 = vshll.u32 %v10863_v61, 16  ;;  %v353_v63 = vld [vmem:[%s10571_s6 + $0xb0] sm:$0xff] }
  0x99   : > { %v785_v58 = vsel %vm10680_vm9, %v595_v53, %v784_v46  ;;  %v616_v43 = vrot.slane %v13196_v48, 7  ;;  %v354_v21 = vld [vmem:[%s10571_s6 + $0xb8] sm:$0xff]  ;;  %v355_v47 = vld [vmem:[%s10571_s6 + $0xc0] sm:$0xff]  ;;  %v13202_v5 = vshrl.u32 %v10896_v56, 16  ;;  %v13200_v49 = vshll.u32 %v10896_v56, 16  ;;  %v356_v53 = vld [vmem:[%s10571_s6 + $0xc8] sm:$0xff] }
  0x9a   : > { %v611_v55 = vor.u32 %v13197_v44, %v608_v41  ;;  %v612_v40 = vrot.slane %v608_v41, 4  ;;  %786 = vst [vmem:[#allocation2 + $0xd8] sm:$0xf] %v785_v58  ;;  %v604_v4 = vsel %vm10694_vm10, %v596_v0, %v603_v57  ;;  %868 = vst [vmem:[#allocation2 + $0x10c] sm:$0xf] %v10896_v56  ;;  %v13199_v46 = vshrl.u32 %v10898_v52, 16 }
  0x9b   : > { %869 = vst [vmem:[#allocation2 + $0x118] sm:$0xf] %v10898_v52  ;;  %787 = vst [vmem:[#allocation2 + $0xe4] sm:$0xf] %v604_v4  ;;  %v619_v58 = vor.u32 %v13203_v62, %v616_v43  ;;  %v13201_v0 = vshll.u32 %v10898_v52, 16  ;;  %v10922_v57 = vpack.c.bf16 %v353_v63, %v353_v63  ;;  %v624_v48 = vrot.slane %v13202_v5, 7 }
  0x9c   : > { %v789_v41 = vsel %vm10680_vm9, %v611_v55, %v788_v51  ;;  %v632_v44 = vrot.slane %v13199_v46, 7  ;;  %v10928_v42 = vpack.c.bf16 %v354_v21, %v354_v21  ;;  %v10930_v4 = vpack.c.bf16 %v355_v47, %v355_v47  ;;  %v792_v51 = vld [vmem:[#allocation2 + $0x108] sm:$0xf]  ;;  %v796_v62 = vld [vmem:[#allocation2 + $0x120] sm:$0xf] }
  0x9d   : > { %790 = vst [vmem:[#allocation2 + $0xf0] sm:$0xf] %v789_v41  ;;  %v620_v55 = vsel %vm10694_vm10, %v612_v40, %v619_v58  ;;  %v13204_v43 = vshrl.u32 %v10922_v57, 16  ;;  %v13214_v63 = vshll.u32 %v10922_v57, 16  ;;  %870 = vst [vmem:[#allocation2 + $0x124] sm:$0xf] %v10922_v57  ;;  %v10937_v41 = vpack.c.bf16 %v356_v53, %v356_v53 }
  0x9e   : > { %791 = vst [vmem:[#allocation2 + $0xfc] sm:$0xf] %v620_v55  ;;  %v627_v21 = vor.u32 %v13200_v49, %v624_v48  ;;  %v628_v47 = vrot.slane %v624_v48, 4  ;;  %v635_v46 = vor.u32 %v13201_v0, %v632_v44  ;;  %v13209_v40 = vshrl.u32 %v10928_v42, 16  ;;  %871 = vst [vmem:[#allocation2 + $0x130] sm:$0xf] %v10928_v42 }
  0x9f   : > { %872 = vst [vmem:[#allocation2 + $0x13c] sm:$0xf] %v10930_v4  ;;  %v640_v58 = vrot.slane %v13204_v43, 7  ;;  %v13212_v53 = vshll.u32 %v10928_v42, 16  ;;  %v13211_v55 = vshrl.u32 %v10930_v4, 16  ;;  %v13216_v49 = vshll.u32 %v10930_v4, 16 }
  0xa0   : > { %873 = vst [vmem:[#allocation2 + $0x148] sm:$0xf] %v10937_v41  ;;  %v357_v48 = vld [vmem:[%s10571_s6 + $0xd0] sm:$0xff]  ;;  %v358_v44 = vld [vmem:[%s10571_s6 + $0xd8] sm:$0xff]  ;;  %v793_v0 = vsel %vm10680_vm9, %v627_v21, %v792_v51  ;;  %v636_v5 = vsel %vm10694_vm10, %v628_v47, %v635_v46  ;;  %v648_v43 = vrot.slane %v13209_v40, 7  ;;  %v13213_v36 = vshrl.u32 %v10937_v41, 16 }
  0xa1   : > { %794 = vst [vmem:[#allocation2 + $0x108] sm:$0xf] %v793_v0  ;;  %795 = vst [vmem:[#allocation2 + $0x114] sm:$0xf] %v636_v5  ;;  %v643_v35 = vor.u32 %v13214_v63, %v640_v58  ;;  %v644_v26 = vrot.slane %v640_v58, 4  ;;  %v656_v51 = vrot.slane %v13211_v55, 7  ;;  %v10971_v22 = vpack.c.bf16 %v357_v48, %v357_v48 }
  0xa2   : > { %v13215_v21 = vshll.u32 %v10937_v41, 16  ;;  %v651_v46 = vor.u32 %v13212_v53, %v648_v43  ;;  %v800_v47 = vld [vmem:[#allocation2 + $0x138] sm:$0xf]  ;;  %v664_v40 = vrot.slane %v13213_v36, 7  ;;  %v10973_v5 = vpack.c.bf16 %v358_v44, %v358_v44 }
  0xa3   : > { %vm880_vm11 = vsmask.f32 3328  ;;  %vm881_vm12 = vsmask.f32 7440  ;;  %v797_v0 = vsel %vm10680_vm9, %v643_v35, %v796_v62  ;;  %v659_v58 = vor.u32 %v13216_v49, %v656_v51  ;;  %v360_v53 = vld [vmem:[%s10571_s6 + $0xe8] sm:$0xff]  ;;  %v361_v35 = vld [vmem:[%s10571_s6 + $0xf0] sm:$0xff] }
  0xa4   : > { %v660_v55 = vrot.slane %v656_v51, 4  ;;  %v10979_v43 = vpack.c.bf16 %v359_v31, %v359_v31  ;;  %798 = vst [vmem:[#allocation2 + $0x120] sm:$0xf] %v797_v0  ;;  %v652_v48 = vsel %vm10694_vm10, %v644_v26, %v651_v46  ;;  %v667_v44 = vor.u32 %v13215_v21, %v664_v40  ;;  %874 = vst [vmem:[#allocation2 + $0x154] sm:$0xf] %v10971_v22  ;;  %v362_v62 = vld [vmem:[%s10571_s6 + $0xf8] sm:$0xff] }
  0xa5   : > { %v13218_v36 = vshrl.u32 %v10971_v22, 16  ;;  %v13221_v63 = vshll.u32 %v10971_v22, 16  ;;  %875 = vst [vmem:[#allocation2 + $0x160] sm:$0xf] %v10973_v5  ;;  %799 = vst [vmem:[#allocation2 + $0x12c] sm:$0xf] %v652_v48  ;;  %v801_v31 = vsel %vm10680_vm9, %v659_v58, %v800_v47  ;;  %v11003_v21 = vpack.c.bf16 %v360_v53, %v360_v53 }
  0xa6   : > { %v13219_v51 = vshrl.u32 %v10973_v5, 16  ;;  %v13224_v26 = vshll.u32 %v10973_v5, 16  ;;  %v13220_v40 = vshrl.u32 %v10979_v43, 16  ;;  %876 = vst [vmem:[#allocation2 + $0x16c] sm:$0xf] %v10979_v43  ;;  %v668_v46 = vsel %vm10694_vm10, %v660_v55, %v667_v44  ;;  %vm11050_vm13 = vmor %vm880_vm11, %vm881_vm12 }
  0xa7   : > { %802 = vst [vmem:[#allocation2 + $0x138] sm:$0xf] %v801_v31  ;;  %v672_v0 = vrot.slane %v13218_v36, 7  ;;  %v13223_v48 = vshll.u32 %v10979_v43, 16  ;;  %803 = vst [vmem:[#allocation2 + $0x144] sm:$0xf] %v668_v46  ;;  %v11009_v2 = vpack.c.bf16 %v361_v35, %v361_v35  ;;  %v11011_v31 = vpack.c.bf16 %v362_v62, %v362_v62 }
  0xa8   : > { %v804_v47 = vld [vmem:[#allocation2 + $0x150] sm:$0xf]  ;;  %v680_v58 = vrot.slane %v13219_v51, 7  ;;  %v688_v49 = vrot.slane %v13220_v40, 7  ;;  %v808_v36 = vld [vmem:[#allocation2 + $0x168] sm:$0xf]  ;;  %vm11076_vm14 = vmand %vm749_vm6, %vm880_vm11 }
  0xa9   : > { %v675_v55 = vor.u32 %v13221_v63, %v672_v0  ;;  %v676_v44 = vrot.slane %v672_v0, 4  ;;  %v694_v53 = vshrl.u32 %v11003_v21, 16  ;;  %v697_v46 = vshll.u32 %v11003_v21, 16  ;;  %877 = vst [vmem:[#allocation2 + $0x178] sm:$0xf] %v11003_v21 }
  0xaa   : > { %v683_v51 = vor.u32 %v13224_v26, %v680_v58  ;;  %v691_v35 = vor.u32 %v13223_v48, %v688_v49  ;;  %v692_v40 = vrot.slane %v688_v49, 4  ;;  %v702_v62 = vshrl.u32 %v11009_v2, 16  ;;  %878 = vst [vmem:[#allocation2 + $0x184] sm:$0xf] %v11009_v2  ;;  %879 = vst [vmem:[#allocation2 + $0x190] sm:$0xf] %v11011_v31 }
  0xab   : > { %v805_v0 = vsel %vm10680_vm9, %v675_v55, %v804_v47  ;;  %v696_v63 = vrot.slane %v694_v53, 7  ;;  %v13227_v3 = vshll.u32 %v11009_v2, 16  ;;  %v13226_v58 = vshrl.u32 %v11011_v31, 16  ;;  %v812_v55 = vld [vmem:[#allocation2 + $0x180] sm:$0xf] }
  0xac   : > { %806 = vst [vmem:[#allocation2 + $0x150] sm:$0xf] %v805_v0  ;;  %v684_v49 = vsel %vm10694_vm10, %v676_v44, %v683_v51  ;;  %v809_v48 = vsel %vm10680_vm9, %v691_v35, %v808_v36  ;;  %v704_v26 = vrot.slane %v702_v62, 7  ;;  %v713_v60 = vshll.u32 %v11011_v31, 16 }
  0xad   : > { %807 = vst [vmem:[#allocation2 + $0x15c] sm:$0xf] %v684_v49  ;;  %810 = vst [vmem:[#allocation2 + $0x168] sm:$0xf] %v809_v48  ;;  %v699_v47 = vor.u32 %v697_v46, %v696_v63  ;;  %v712_v0 = vrot.slane %v13226_v58, 7  ;;  %v885_v51 = vor.u32 %v10690_v25, %v10676_v20  ;;  %v887_v36 = vrot.slane %v473_v10, 5 }
  0xae   : > { %v707_v44 = vor.u32 %v13227_v3, %v704_v26  ;;  %v708_v35 = vrot.slane %v704_v26, 4  ;;  %v13308_v48 = vmov 0  ;;  %v889_v63 = vrot.slane %v470_v9, 4 }
  0xaf   : > { %v13309_v48 = vsel %vm11050_vm13, 4294967295, %v13308_v48  ;;  %v892_v49 = vrot.slane %v478_v29, 4  ;;  %v700_v20 = vsel %vm10694_vm10, %v692_v40, %v699_v47  ;;  %v715_v10 = vor.u32 %v713_v60, %v712_v0 }
  0xb0   : > { %13310 = vst [vmem:[#allocation15_spill] sm:$0xff] %v13309_v48  ;;  %v886_v25 = vrot.slane %v885_v51, 4  ;;  %v893_v26 = vrot.slane %v481_v30, 5  ;;  %811 = vst [vmem:[#allocation2 + $0x174] sm:$0xf] %v700_v20  ;;  %v813_v58 = vsel %vm10680_vm9, %v707_v44, %v812_v55  ;;  %v890_v3 = vor.u32 %v889_v63, %v887_v36 }
  0xb1   : > { %v896_v19 = vrot.slane %v489_v33, 5  ;;  %v898_v9 = vrot.slane %v486_v32, 4  ;;  %814 = vst [vmem:[#allocation2 + $0x180] sm:$0xf] %v813_v58  ;;  %v716_v29 = vsel %vm10694_vm10, %v708_v35, %v715_v10  ;;  %v13311_v15 = vmov 0 }
  0xb2   : > { %v888_v40 = vsel %vm11050_vm13, %v886_v25, %v887_v36  ;;  %v13312_v15 = vsel %vm11076_vm14, 4294967295, %v13311_v15  ;;  %v1061_v30 = vld [vmem:[#allocation2 + $0x2c] sm:$0xf]  ;;  %v894_v47 = vor.u32 %v893_v26, %v892_v49  ;;  %v901_v33 = vrot.slane %v494_v34, 4  ;;  %815 = vst [vmem:[#allocation2 + $0x18c] sm:$0xf] %v716_v29 }
  0xb3   : > { %13313 = vst [vmem:[#allocation16_spill] sm:$0xff] %v13312_v15  ;;  %v891_v16 = vrot.slane %v890_v3, 4  ;;  %1059 = vst [vmem:[#allocation2 + $0x20] sm:$0xf] %v888_v40  ;;  %v899_v32 = vor.u32 %v898_v9, %v896_v19  ;;  %v902_v58 = vrot.slane %v497_v38, 5  ;;  %v905_v55 = vrot.slane %v505_v45, 5 }
  0xb4   : > { %v895_v0 = vrot.slane %v894_v47, 4  ;;  %v1065_v51 = vld [vmem:[#allocation2 + $0x44] sm:$0xf]  ;;  %v907_v36 = vrot.slane %v502_v39, 4  ;;  %v910_v44 = vrot.slane %v510_v59, 4  ;;  %v13314_v34 = vshll.u32 %v10728_v50, 16 }
  0xb5   : > { %v1062_v3 = vsel %vm11076_vm14, %v891_v16, %v1061_v30  ;;  %v900_v63 = vrot.slane %v899_v32, 4  ;;  %v903_v23 = vor.u32 %v902_v58, %v901_v33  ;;  %v13315_v38 = vshll.u32 %v10734_v54, 16  ;;  %v1069_v25 = vld [vmem:[#allocation2 + $0x5c] sm:$0xf]  ;;  %v1073_v32 = vld [vmem:[#allocation2 + $0x74] sm:$0xf] }
  0xb6   : > { %v911_v35 = vrot.slane %v13314_v34, 5  ;;  %1063 = vst [vmem:[#allocation2 + $0x2c] sm:$0xf] %v1062_v3  ;;  %v897_v45 = vsel %vm11050_vm13, %v895_v0, %v896_v19  ;;  %v908_v24 = vor.u32 %v907_v36, %v905_v55  ;;  %v13316_v20 = vshrl.u32 %v10734_v54, 16 }
  0xb7   : > { %v914_v49 = vrot.slane %v13315_v38, 5  ;;  %1064 = vst [vmem:[#allocation2 + $0x38] sm:$0xf] %v897_v45  ;;  %v1066_v50 = vsel %vm11076_vm14, %v900_v63, %v1065_v51  ;;  %v904_v10 = vrot.slane %v903_v23, 4  ;;  %v13317_v26 = vshrl.u32 %v10759_v6, 16 }
  0xb8   : > { %v912_v39 = vor.u32 %v911_v35, %v910_v44  ;;  %v916_v59 = vrot.slane %v13316_v20, 4  ;;  %v13318_v29 = vshll.u32 %v10759_v6, 16  ;;  %1067 = vst [vmem:[#allocation2 + $0x44] sm:$0xf] %v1066_v50  ;;  %v909_v30 = vrot.slane %v908_v24, 4 }
  0xb9   : > { %v919_v9 = vrot.slane %v13317_v26, 4  ;;  %v13319_v33 = vshll.u32 %v10761_v7, 16  ;;  %v906_v16 = vsel %vm11050_vm13, %v904_v10, %v905_v55  ;;  %v13320_v0 = vshrl.u32 %v10761_v7, 16  ;;  %v1077_v20 = vld [vmem:[#allocation2 + $0x8c] sm:$0xf] }
  0xba   : > { %v920_v40 = vrot.slane %v13318_v29, 5  ;;  %v913_v19 = vrot.slane %v912_v39, 4  ;;  %v917_v47 = vor.u32 %v916_v59, %v914_v49  ;;  %v13321_v36 = vshrl.u32 %v10765_v12, 16  ;;  %1068 = vst [vmem:[#allocation2 + $0x50] sm:$0xf] %v906_v16 }
  0xbb   : > { %v923_v54 = vrot.slane %v13319_v33, 5  ;;  %v925_v51 = vrot.slane %v13320_v0, 4  ;;  %v1070_v6 = vsel %vm11076_vm14, %v909_v30, %v1069_v25  ;;  %v13322_v3 = vshll.u32 %v10765_v12, 16  ;;  %v1081_v30 = vld [vmem:[#allocation2 + $0xa4] sm:$0xf] }
  0xbc   : > { %v921_v58 = vor.u32 %v920_v40, %v919_v9  ;;  %v928_v44 = vrot.slane %v13321_v36, 4  ;;  %v915_v34 = vsel %vm11050_vm13, %v913_v19, %v914_v49  ;;  %v918_v35 = vrot.slane %v917_v47, 4  ;;  %1071 = vst [vmem:[#allocation2 + $0x5c] sm:$0xf] %v1070_v6 }
  0xbd   : > { %v929_v63 = vrot.slane %v13322_v3, 5  ;;  %1072 = vst [vmem:[#allocation2 + $0x68] sm:$0xf] %v915_v34  ;;  %v926_v23 = vor.u32 %v925_v51, %v923_v54  ;;  %v13323_v7 = vshll.u32 %v10767_v14, 16  ;;  %v13324_v45 = vshrl.u32 %v10767_v14, 16 }
  0xbe   : > { %v922_v55 = vrot.slane %v921_v58, 4  ;;  %v1074_v39 = vsel %vm11076_vm14, %v918_v35, %v1073_v32  ;;  %v13325_v49 = vshrl.u32 %v10769_v17, 16  ;;  %v13326_v12 = vshll.u32 %v10769_v17, 16 }
  0xbf   : > { %v932_v38 = vrot.slane %v13323_v7, 5  ;;  %v934_v24 = vrot.slane %v13324_v45, 4  ;;  %v930_v59 = vor.u32 %v929_v63, %v928_v44  ;;  %1075 = vst [vmem:[#allocation2 + $0x74] sm:$0xf] %v1074_v39  ;;  %v927_v26 = vrot.slane %v926_v23, 4 }
  0xc0   : > { %v937_v50 = vrot.slane %v13325_v49, 4  ;;  %v938_v10 = vrot.slane %v13326_v12, 5  ;;  %v924_v25 = vsel %vm11050_vm13, %v922_v55, %v923_v54  ;;  %v13327_v14 = vshll.u32 %v10817_v8, 16  ;;  %v1085_v63 = vld [vmem:[#allocation2 + $0xbc] sm:$0xf] }
  0xc1   : > { %v935_v9 = vor.u32 %v934_v24, %v932_v38  ;;  %1076 = vst [vmem:[#allocation2 + $0x80] sm:$0xf] %v924_v25  ;;  %v931_v40 = vrot.slane %v930_v59, 4  ;;  %v13328_v47 = vshrl.u32 %v10817_v8, 16  ;;  %v13329_v16 = vshrl.u32 %v10823_v28, 16 }
  0xc2   : > { %v941_v29 = vrot.slane %v13327_v14, 5  ;;  %v939_v19 = vor.u32 %v938_v10, %v937_v50  ;;  %v1078_v32 = vsel %vm11076_vm14, %v927_v26, %v1077_v20  ;;  %v13330_v54 = vshll.u32 %v10823_v28, 16  ;;  %v1089_v49 = vld [vmem:[#allocation2 + $0xd4] sm:$0xf] }
  0xc3   : > { %v943_v33 = vrot.slane %v13328_v47, 4  ;;  %v946_v17 = vrot.slane %v13329_v16, 4  ;;  %v936_v58 = vrot.slane %v935_v9, 4  ;;  %v13331_v51 = vshll.u32 %v10825_v37, 16  ;;  %1079 = vst [vmem:[#allocation2 + $0x8c] sm:$0xf] %v1078_v32 }
  0xc4   : > { %v947_v0 = vrot.slane %v13330_v54, 5  ;;  %v933_v44 = vsel %vm11050_vm13, %v931_v40, %v932_v38  ;;  %v940_v6 = vrot.slane %v939_v19, 4  ;;  %v13332_v34 = vshrl.u32 %v10825_v37, 16  ;;  %v1093_v32 = vld [vmem:[#allocation2 + $0xec] sm:$0xf] }
  0xc5   : > { %v950_v36 = vrot.slane %v13331_v51, 5  ;;  %v944_v8 = vor.u32 %v943_v33, %v941_v29  ;;  %1080 = vst [vmem:[#allocation2 + $0x98] sm:$0xf] %v933_v44  ;;  %v1082_v3 = vsel %vm11076_vm14, %v936_v58, %v1081_v30  ;;  %v13333_v28 = vshrl.u32 %v10848_v1, 16 }
  0xc6   : > { %v952_v35 = vrot.slane %v13332_v34, 4  ;;  %v948_v55 = vor.u32 %v947_v0, %v946_v17  ;;  %v13334_v7 = vshll.u32 %v10848_v1, 16  ;;  %1083 = vst [vmem:[#allocation2 + $0xa4] sm:$0xf] %v1082_v3  ;;  %v942_v38 = vsel %vm11050_vm13, %v940_v6, %v941_v29 }
  0xc7   : > { %v955_v23 = vrot.slane %v13333_v28, 4  ;;  %v945_v24 = vrot.slane %v944_v8, 4  ;;  %v13335_v37 = vshll.u32 %v10854_v11, 16  ;;  %1084 = vst [vmem:[#allocation2 + $0xb0] sm:$0xf] %v942_v38  ;;  %v13336_v12 = vshrl.u32 %v10854_v11, 16 }
  0xc8   : > { %v956_v45 = vrot.slane %v13334_v7, 5  ;;  %v953_v39 = vor.u32 %v952_v35, %v950_v36  ;;  %v949_v59 = vrot.slane %v948_v55, 4  ;;  %v13337_v25 = vshrl.u32 %v10856_v18, 16  ;;  %v1097_v35 = vld [vmem:[#allocation2 + $0x104] sm:$0xf] }
  0xc9   : > { %v959_v20 = vrot.slane %v13335_v37, 5  ;;  %v961_v10 = vrot.slane %v13336_v12, 4  ;;  %v1086_v26 = vsel %vm11076_vm14, %v945_v24, %v1085_v63  ;;  %v13338_v14 = vshll.u32 %v10856_v18, 16  ;;  %v1101_v12 = vld [vmem:[#allocation2 + $0x11c] sm:$0xf] }
  0xca   : > { %v957_v50 = vor.u32 %v956_v45, %v955_v23  ;;  %v964_v1 = vrot.slane %v13337_v25, 4  ;;  %v954_v9 = vrot.slane %v953_v39, 4  ;;  %v13339_v40 = vshll.u32 %v10863_v61, 16  ;;  %1087 = vst [vmem:[#allocation2 + $0xbc] sm:$0xf] %v1086_v26 }
  0xcb   : > { %v965_v29 = vrot.slane %v13338_v14, 5  ;;  %v951_v19 = vsel %vm11050_vm13, %v949_v59, %v950_v36  ;;  %v962_v11 = vor.u32 %v961_v10, %v959_v20  ;;  %v13340_v33 = vshrl.u32 %v10863_v61, 16 }
  0xcc   : > { %v968_v30 = vrot.slane %v13339_v40, 5  ;;  %v958_v47 = vrot.slane %v957_v50, 4  ;;  %1088 = vst [vmem:[#allocation2 + $0xc8] sm:$0xf] %v951_v19  ;;  %v1090_v17 = vsel %vm11076_vm14, %v954_v9, %v1089_v49  ;;  %v13341_v18 = vshrl.u32 %v10896_v56, 16 }
  0xcd   : > { %v970_v16 = vrot.slane %v13340_v33, 4  ;;  %v966_v58 = vor.u32 %v965_v29, %v964_v1  ;;  %v13342_v0 = vshll.u32 %v10896_v56, 16  ;;  %1091 = vst [vmem:[#allocation2 + $0xd4] sm:$0xf] %v1090_v17  ;;  %v963_v44 = vrot.slane %v962_v11, 4 }
  0xce   : > { %v973_v54 = vrot.slane %v13341_v18, 4  ;;  %v960_v36 = vsel %vm11050_vm13, %v958_v47, %v959_v20  ;;  %v13343_v61 = vshll.u32 %v10898_v52, 16  ;;  %v13344_v63 = vshrl.u32 %v10898_v52, 16  ;;  %v1105_v19 = vld [vmem:[#allocation2 + $0x134] sm:$0xf] }
  0xcf   : > { %v974_v51 = vrot.slane %v13342_v0, 5  ;;  %v971_v6 = vor.u32 %v970_v16, %v968_v30  ;;  %1092 = vst [vmem:[#allocation2 + $0xe0] sm:$0xf] %v960_v36  ;;  %v967_v34 = vrot.slane %v966_v58, 4  ;;  %v13345_v28 = vshrl.u32 %v10922_v57, 16 }
  0xd0   : > { %v977_v8 = vrot.slane %v13343_v61, 5  ;;  %v979_v55 = vrot.slane %v13344_v63, 4  ;;  %v1094_v23 = vsel %vm11076_vm14, %v963_v44, %v1093_v32  ;;  %v13346_v45 = vshll.u32 %v10922_v57, 16 }
  0xd1   : > { %v975_v3 = vor.u32 %v974_v51, %v973_v54  ;;  %v982_v56 = vrot.slane %v13345_v28, 4  ;;  %v972_v7 = vrot.slane %v971_v6, 4  ;;  %v13347_v24 = vshll.u32 %v10928_v42, 16  ;;  %1095 = vst [vmem:[#allocation2 + $0xec] sm:$0xf] %v1094_v23 }
  0xd2   : > { %v983_v38 = vrot.slane %v13346_v45, 5  ;;  %v969_v37 = vsel %vm11050_vm13, %v967_v34, %v968_v30  ;;  %v980_v52 = vor.u32 %v979_v55, %v977_v8  ;;  %v13348_v59 = vshrl.u32 %v10928_v42, 16 }
  0xd3   : > { %v986_v39 = vrot.slane %v13347_v24, 5  ;;  %v976_v20 = vrot.slane %v975_v3, 4  ;;  %1096 = vst [vmem:[#allocation2 + $0xf8] sm:$0xf] %v969_v37  ;;  %v1098_v50 = vsel %vm11076_vm14, %v972_v7, %v1097_v35  ;;  %v13349_v57 = vshrl.u32 %v10930_v4, 16 }
  0xd4   : > { %v988_v49 = vrot.slane %v13348_v59, 4  ;;  %v984_v10 = vor.u32 %v983_v38, %v982_v56  ;;  %v13350_v1 = vshll.u32 %v10930_v4, 16  ;;  %1099 = vst [vmem:[#allocation2 + $0x104] sm:$0xf] %v1098_v50  ;;  %v981_v14 = vrot.slane %v980_v52, 4 }
  0xd5   : > { %v991_v25 = vrot.slane %v13349_v57, 4  ;;  %v978_v9 = vsel %vm11050_vm13, %v976_v20, %v977_v8  ;;  %v13351_v42 = vshll.u32 %v10937_v41, 16  ;;  %v13352_v11 = vshrl.u32 %v10937_v41, 16  ;;  %v1109_v8 = vld [vmem:[#allocation2 + $0x14c] sm:$0xf] }
  0xd6   : > { %v992_v26 = vrot.slane %v13350_v1, 5  ;;  %v989_v29 = vor.u32 %v988_v49, %v986_v39  ;;  %1100 = vst [vmem:[#allocation2 + $0x110] sm:$0xf] %v978_v9  ;;  %v985_v30 = vrot.slane %v984_v10, 4  ;;  %v13353_v16 = vshrl.u32 %v10971_v22, 16 }
  0xd7   : > { %v995_v40 = vrot.slane %v13351_v42, 5  ;;  %v997_v33 = vrot.slane %v13352_v11, 4  ;;  %v1102_v17 = vsel %vm11076_vm14, %v981_v14, %v1101_v12  ;;  %v13354_v58 = vshll.u32 %v10971_v22, 16  ;;  %v1113_v7 = vld [vmem:[#allocation2 + $0x164] sm:$0xf] }
  0xd8   : > { %v993_v47 = vor.u32 %v992_v26, %v991_v25  ;;  %v1000_v4 = vrot.slane %v13353_v16, 4  ;;  %v990_v32 = vrot.slane %v989_v29, 4  ;;  %v13355_v54 = vshll.u32 %v10973_v5, 16  ;;  %1103 = vst [vmem:[#allocation2 + $0x11c] sm:$0xf] %v1102_v17 }
  0xd9   : > { %v1001_v18 = vrot.slane %v13354_v58, 5  ;;  %v987_v51 = vsel %vm11050_vm13, %v985_v30, %v986_v39  ;;  %v998_v41 = vor.u32 %v997_v33, %v995_v40  ;;  %v13356_v44 = vshrl.u32 %v10973_v5, 16  ;;  %v1117_v50 = vld [vmem:[#allocation2 + $0x17c] sm:$0xf]  ;;  %v1121_v25 = vld [vmem:[#allocation2 + $0x194] sm:$0xf] }
  0xda   : > { %v1004_v0 = vrot.slane %v13355_v54, 5  ;;  %v994_v36 = vrot.slane %v993_v47, 4  ;;  %1104 = vst [vmem:[#allocation2 + $0x128] sm:$0xf] %v987_v51  ;;  %v1106_v61 = vsel %vm11076_vm14, %v990_v32, %v1105_v19  ;;  %v13357_v22 = vshrl.u32 %v10979_v43, 16 }
  0xdb   : > { %v1006_v6 = vrot.slane %v13356_v44, 4  ;;  %v1002_v34 = vor.u32 %v1001_v18, %v1000_v4  ;;  %v13358_v3 = vshll.u32 %v10979_v43, 16  ;;  %1107 = vst [vmem:[#allocation2 + $0x134] sm:$0xf] %v1106_v61  ;;  %v999_v28 = vrot.slane %v998_v41, 4 }
  0xdc   : > { %v1009_v35 = vrot.slane %v13357_v22, 4  ;;  %v996_v55 = vsel %vm11050_vm13, %v994_v36, %v995_v40  ;;  %v1013_v5 = vrot.slane %v697_v46, 5  ;;  %v1015_v38 = vrot.slane %v694_v53, 4 }
  0xdd   : > { %v1010_v63 = vrot.slane %v13358_v3, 5  ;;  %v1007_v56 = vor.u32 %v1006_v6, %v1004_v0  ;;  %1108 = vst [vmem:[#allocation2 + $0x140] sm:$0xf] %v996_v55  ;;  %v1003_v23 = vrot.slane %v1002_v34, 4  ;;  %v1018_v43 = vrot.slane %v702_v62, 4 }
  0xde   : > { %v1110_v24 = vsel %vm11076_vm14, %v999_v28, %v1109_v8  ;;  %v13359_v37 = vshll.u32 %v11009_v2, 16  ;;  %v1022_v46 = vrot.slane %v713_v60, 5  ;;  %v1016_v21 = vor.u32 %v1015_v38, %v1013_v5 }
  0xdf   : > { %v1011_v45 = vor.u32 %v1010_v63, %v1009_v35  ;;  %v1008_v39 = vrot.slane %v1007_v56, 4  ;;  %1111 = vst [vmem:[#allocation2 + $0x14c] sm:$0xf] %v1110_v24  ;;  %v1005_v52 = vsel %vm11050_vm13, %v1003_v23, %v1004_v0  ;;  %v13360_v53 = vshrl.u32 %v11011_v31, 16 }
  0xe0   : > { %v1019_v20 = vrot.slane %v13359_v37, 5  ;;  %1112 = vst [vmem:[#allocation2 + $0x158] sm:$0xf] %v1005_v52  ;;  %v1017_v12 = vrot.slane %v1016_v21, 4 }
  0xe1   : > { %v1012_v59 = vrot.slane %v1011_v45, 4  ;;  %v1024_v49 = vrot.slane %v13360_v53, 4  ;;  %v1114_v62 = vsel %vm11076_vm14, %v1008_v39, %v1113_v7 }
  0xe2   : > { %v1020_v2 = vor.u32 %v1019_v20, %v1018_v43  ;;  %1115 = vst [vmem:[#allocation2 + $0x164] sm:$0xf] %v1114_v62  ;;  %v1118_v31 = vsel %vm11076_vm14, %v1017_v12, %v1117_v50 }
  0xe3   : > { %v1014_v60 = vsel %vm11050_vm13, %v1012_v59, %v1013_v5  ;;  %v1025_v10 = vor.u32 %v1024_v49, %v1022_v46  ;;  %1119 = vst [vmem:[#allocation2 + $0x17c] sm:$0xf] %v1118_v31 }
  0xe4   : > { %1116 = vst [vmem:[#allocation2 + $0x170] sm:$0xf] %v1014_v60  ;;  %v1021_v57 = vrot.slane %v1020_v2, 4 }
  0xe5   : > { %v1026_v1 = vrot.slane %v1025_v10, 4 }
  0xe6   : > { %v1023_v26 = vsel %vm11050_vm13, %v1021_v57, %v1022_v46 }
  0xe7   : > { %1120 = vst [vmem:[#allocation2 + $0x188] sm:$0xf] %v1023_v26  ;;  %v1122_v9 = vsel %vm11076_vm14, %v1026_v1, %v1121_v25 }
  0xe8   : > { %1123 = vst [vmem:[#allocation2 + $0x194] sm:$0xf] %v1122_v9 }
  0xe9 LB: >> { %v9818_v14 = vld [vmem:[#allocation6 + $0x138] sm:$0xff]   ;;  %v9821_v40 = vld [vmem:[#allocation6 + $0x130] sm:$0xff]   ;;  %v9824_v47 = vld [vmem:[#allocation6 + $0x128] sm:$0xff]   ;;  %p8495_p11 = scmp.ne.s32.totalorder %s10405_s20, 1  ;;  %s10405_s20 = sphi %s11258_s20, %s1129_s20  }
  0xea   : >> { %v9819_v29 = vld [vmem:[#allocation6 + $0x178] sm:$0xff]   ;;  %8632 = vmatprep.subr.bf16.mxu0 %v9818_v14  ;;  %v9822_v30 = vld [vmem:[#allocation6 + $0x170] sm:$0xff]   ;;  %v9825_v11 = vld [vmem:[#allocation6 + $0x168] sm:$0xff]  }
  0xeb   : >> { %v9820_v42 = vld [vmem:[#allocation6 + $0xf8] sm:$0xff]   ;;  %9448 = vmatprep.subr.bf16.mxu1 %v9819_v29  ;;  %v9823_v19 = vld [vmem:[#allocation6 + $0xf0] sm:$0xff]   ;;  %v9826_v33 = vld [vmem:[#allocation6 + $0xe8] sm:$0xff]  }
  0xec   : >> { %8633 = vmatpush3.bf16.msra.mxu0 %v9820_v42  ;;  %9449 = vmatpush3.bf16.msra.mxu1 %v9819_v29  ;;  %v9827_v16 = vld [vmem:[#allocation6 + $0x120] sm:$0xff]   ;;  %v9830_v32 = vld [vmem:[#allocation6 + $0x118] sm:$0xff]   ;;  %v9833_v54 = vld [vmem:[#allocation6 + $0x110] sm:$0xff]  }
  0xed   : >> { %8634 = vmatprep.subr.bf16.mxu0 %v9821_v40  ;;  %9450 = vmatprep.subr.bf16.mxu1 %v9822_v30  ;;  %v9828_v4 = vld [vmem:[#allocation6 + $0x160] sm:$0xff]   ;;  %v9831_v58 = vld [vmem:[#allocation6 + $0x158] sm:$0xff]   ;;  %v9834_v0 = vld [vmem:[#allocation6 + $0x150] sm:$0xff]  }
  0xee   : >> { %v9829_v17 = vld [vmem:[#allocation6 + $0xe0] sm:$0xff]   ;;  %v9832_v18 = vld [vmem:[#allocation6 + $0xd8] sm:$0xff]   ;;  %v9835_v51 = vld [vmem:[#allocation6 + $0xd0] sm:$0xff]  }
  0xef   : >> { %v9836_v36 = vld [vmem:[#allocation6 + $0x108] sm:$0xff]   ;;  %v9839_v6 = vld [vmem:[#allocation6 + $0x100] sm:$0xff]   ;;  %v9844_v34 = vld [vmem:[#allocation2 + $0x20] ss:$12 sps:$4 sm:$0xff]  }
  0xf0   : >> { %8635 = vmatpush3.bf16.msra.mxu0 %v9823_v19  ;;  %9451 = vmatpush3.bf16.msra.mxu1 %v9822_v30  ;;  %v9837_v41 = vld [vmem:[#allocation6 + $0x148] sm:$0xff]   ;;  %v9840_v61 = vld [vmem:[#allocation6 + $0x140] sm:$0xff]   ;;  %v9847_v35 = vld [vmem:[#allocation6 + $0xb8] sm:$0xff]  }
  0xf1   : >> { %8636 = vmatprep.subr.bf16.mxu0 %v9824_v47  ;;  %9452 = vmatprep.subr.bf16.mxu1 %v9825_v11  ;;  %v9838_v44 = vld [vmem:[#allocation6 + $0xc8] sm:$0xff]   ;;  %v9841_v22 = vld [vmem:[#allocation6 + $0xc0] sm:$0xff]   ;;  %v9848_v3 = vld [vmem:[#allocation6 + $0x78] sm:$0xff]  }
  0xf2   : >> { %v11263_v8 = vld [vmem:[#allocation2 + $0x1c] ss:$12 sps:$4 sm:$0xff]   ;;  %9464 = vmatprep.mubr.bf16.mxu1 %v9844_v34  ;;  %v11266_v63 = vld [vmem:[#allocation2 + $0x18] ss:$12 sps:$4 sm:$0xff]   ;;  %v11268_v56 = vld [vmem:[#allocation2 + $0x34] ss:$12 sps:$4 sm:$0xff]  }
  0xf3   : >> { %1787 = vmatprep.mubr.bf16.mxu0 %v11263_v8  ;;  %v9846_v55 = vld [vmem:[#allocation2 + $0x38] ss:$12 sps:$4 sm:$0xff]   ;;  %v9849_v28 = vld [vmem:[#allocation6 + $0x38] sm:$0xff]   ;;  %v9852_v5 = vld [vmem:[#allocation2 + $0x50] ss:$12 sps:$4 sm:$0xff]  }
  0xf4   : >> { %8637 = vmatpush3.bf16.msra.mxu0 %v9826_v33  ;;  %9453 = vmatpush3.bf16.msra.mxu1 %v9825_v11  ;;  %v9855_v23 = vld [vmem:[#allocation6 + $0x70] sm:$0xff]   ;;  %v11272_v45 = vld [vmem:[#allocation2 + $0x30] ss:$12 sps:$4 sm:$0xff]   ;;  %v9854_v38 = vld [vmem:[#allocation2 + $0x68] ss:$12 sps:$4 sm:$0xff]  }
  0xf5   : >> { %8638 = vmatprep.subr.bf16.mxu0 %v9827_v16  ;;  %9454 = vmatprep.subr.bf16.mxu1 %v9828_v4  ;;  %v9856_v7 = vld [vmem:[#allocation6 + $0x30] sm:$0xff]   ;;  %v11274_v43 = vld [vmem:[#allocation2 + $0x4c] ss:$12 sps:$4 sm:$0xff]   ;;  %v11278_v46 = vld [vmem:[#allocation2 + $0x48] ss:$12 sps:$4 sm:$0xff]  }
  0xf6   : >> { %v9859_v24 = vld [vmem:[#allocation2 + $0x80] ss:$12 sps:$4 sm:$0xff]   ;;  %v9863_v37 = vld [vmem:[#allocation6 + $0x68] sm:$0xff]   ;;  %v11280_v59 = vld [vmem:[#allocation2 + $0x64] ss:$12 sps:$4 sm:$0xff]  }
  0xf7   : >> { %v9862_v39 = vld [vmem:[#allocation6 + $0xb0] sm:$0xff]   ;;  %v9864_v20 = vld [vmem:[#allocation6 + $0x28] sm:$0xff]   ;;  %v9870_v21 = vld [vmem:[#allocation6 + $0x60] sm:$0xff]  }
  0xf8   : >> { %8639 = vmatpush3.bf16.msra.mxu0 %v9829_v17  ;;  %9455 = vmatpush3.bf16.msra.mxu1 %v9828_v4  ;;  %v9861_v52 = vld [vmem:[#allocation2 + $0x98] ss:$12 sps:$4 sm:$0xff]   ;;  %v9871_v53 = vld [vmem:[#allocation6 + $0x20] sm:$0xff]   ;;  %v9878_v50 = vld [vmem:[#allocation6 + $0x58] sm:$0xff]  }
  0xf9   : >> { %8640 = vmatprep.subr.bf16.mxu0 %v9830_v32  ;;  %9456 = vmatprep.subr.bf16.mxu1 %v9831_v58  ;;  %v9867_v49 = vld [vmem:[#allocation2 + $0xb0] ss:$12 sps:$4 sm:$0xff]   ;;  %v9879_v2 = vld [vmem:[#allocation6 + $0x18] sm:$0xff]   ;;  %v9885_v25 = vld [vmem:[#allocation6 + $0x50] sm:$0xff]  }
  0xfa   : >> { %v9877_v62 = vld [vmem:[#allocation6 + $0xa8] sm:$0xff]   ;;  %v11284_v60 = vld [vmem:[#allocation2 + $0x60] ss:$12 sps:$4 sm:$0xff]   ;;  %v9869_v12 = vld [vmem:[#allocation2 + $0xc8] ss:$12 sps:$4 sm:$0xff]  }
  0xfb   : >> { %v11286_v10 = vld [vmem:[#allocation2 + $0x7c] ss:$12 sps:$4 sm:$0xff]   ;;  %v9874_v57 = vld [vmem:[#allocation2 + $0xe0] ss:$12 sps:$4 sm:$0xff]   ;;  %v11290_v1 = vld [vmem:[#allocation2 + $0x78] ss:$12 sps:$4 sm:$0xff]  }
  0xfc   : >> { %8641 = vmatpush3.bf16.msra.mxu0 %v9832_v18  ;;  %9457 = vmatpush3.bf16.msra.mxu1 %v9831_v58  ;;  %v9886_v31 = vld [vmem:[#allocation6 + $0x10] sm:$0xff]   ;;  %v9882_v14 = vld [vmem:[#allocation2 + $0x110] ss:$12 sps:$4 sm:$0xff]   ;;  %v9884_v11 = vld [vmem:[#allocation2 + $0x128] ss:$12 sps:$4 sm:$0xff]  }
  0xfd   : >> { %8642 = vmatprep.subr.bf16.mxu0 %v9833_v54  ;;  %9458 = vmatprep.subr.bf16.mxu1 %v9834_v0  ;;  %v9876_v26 = vld [vmem:[#allocation2 + $0xf8] ss:$12 sps:$4 sm:$0xff]   ;;  %v11292_v9 = vld [vmem:[#allocation2 + $0x94] ss:$12 sps:$4 sm:$0xff]   ;;  %v11296_v30 = vld [vmem:[#allocation2 + $0x90] ss:$12 sps:$4 sm:$0xff]  }
  0xfe   : >> { %v9892_v29 = vld [vmem:[#allocation6 + $0xa0] sm:$0xff]   ;;  %v9893_v42 = vld [vmem:[#allocation6 + $0x48] sm:$0xff]   ;;  %v9889_v16 = vld [vmem:[#allocation2 + $0x140] ss:$12 sps:$4 sm:$0xff]  }
  0xff   : >> { %v9894_v40 = vld [vmem:[#allocation6 + $0x8] sm:$0xff]   ;;  %v9900_v19 = vld [vmem:[#allocation6 + $0x40] sm:$0xff]   ;;  %v9908_v4 = vld [vmem:[#allocation6 + $0x98] sm:$0xff]  }
 0x100   : >> { %8643 = vmatpush3.bf16.msra.mxu0 %v9835_v51  ;;  %9459 = vmatpush3.bf16.msra.mxu1 %v9834_v0  ;;  %v9901_v47 = vld [vmem:[#allocation6] sm:$0xff]   ;;  %v11298_v33 = vld [vmem:[#allocation2 + $0xac] ss:$12 sps:$4 sm:$0xff]   ;;  %v9916_v18 = vld [vmem:[#allocation6 + $0x90] sm:$0xff]  }
 0x101   : >> { %8644 = vmatprep.subr.bf16.mxu0 %v9836_v36  ;;  %9460 = vmatprep.subr.bf16.mxu1 %v9837_v41  ;;  %v9909_v17 = vld [vmem:[#allocation6 + $0x238] sm:$0xff]   ;;  %v9891_v58 = vld [vmem:[#allocation2 + $0x158] ss:$12 sps:$4 sm:$0xff]   ;;  %v9897_v0 = vld [vmem:[#allocation2 + $0x170] ss:$12 sps:$4 sm:$0xff]  }
 0x102   : >> { %v11302_v32 = vld [vmem:[#allocation2 + $0xa8] ss:$12 sps:$4 sm:$0xff]   ;;  %v11304_v54 = vld [vmem:[#allocation2 + $0xc4] ss:$12 sps:$4 sm:$0xff]   ;;  %v9924_v51 = vld [vmem:[#allocation6 + $0x88] sm:$0xff]  }
 0x103   : >> { %v11308_v36 = vld [vmem:[#allocation2 + $0xc0] ss:$12 sps:$4 sm:$0xff]  }
 0x104   : >> { %8645 = vmatpush3.bf16.msra.mxu0 %v9838_v44  ;;  %9461 = vmatpush3.bf16.msra.mxu1 %v9837_v41  ;;  %v9899_v41 = vld [vmem:[#allocation2 + $0x188] ss:$12 sps:$4 sm:$0xff]  }
 0x105   : >> { %8646 = vmatprep.subr.bf16.mxu0 %v9839_v6  ;;  %9462 = vmatprep.subr.bf16.mxu1 %v9840_v61  ;;  %v11310_v44 = vld [vmem:[#allocation2 + $0xdc] ss:$12 sps:$4 sm:$0xff]   ;;  %v9906_v6 = vld [vmem:[#allocation2 + $0x4] ss:$12 sps:$4 sm:$0xff]  }
 0x106   : >> { %v9939_v34 = vld [vmem:[#allocation6 + $0x1f8] sm:$0xff]  }
 0x108   : >> { %8647 = vmatpush3.bf16.msra.mxu0 %v9841_v22  ;;  %9463 = vmatpush3.bf16.msra.mxu1 %v9840_v61  ;;  %v9932_v61 = vld [vmem:[#allocation6 + $0x80] sm:$0xff]   ;;  %v9904_v22 = vld [vmem:[#allocation2] ss:$12 sps:$4 sm:$0xff]  }
 0x109   : >> { %9496 = vmatprep.subr.bf16.mxu0 %v9847_v35  ;;  %8768 = vmatprep.subr.bf16.mxu1 %v9848_v3  ;;  %v11316_v3 = vld [vmem:[#allocation2 + $0xf4] ss:$12 sps:$4 sm:$0xff]  }
 0x10b   : >> { %1788 = vmatmul.mubr.bf16.vlgmr.msra.gmra.mxu0 %v11266_v63  ;;  %9465 = vmatmul.mubr.bf16.vlgmr.msra.gmra.mxu1 %v9846_v55  ;;  %v9917_v55 = vld [vmem:[#allocation6 + $0x230] sm:$0xff]  }
 0x10c   : >> { %9497 = vmatpush3.bf16.msra.mxu0 %v9847_v35  ;;  %8769 = vmatpush3.bf16.msra.mxu1 %v9849_v28  ;;  %v11314_v35 = vld [vmem:[#allocation2 + $0xd8] ss:$12 sps:$4 sm:$0xff]  }
 0x10d   : >> { %1795 = vmatprep.mubr.bf16.mxu0 %v11268_v56  ;;  %9468 = vmatprep.mubr.bf16.mxu1 %v9852_v5  ;;  %v9925_v28 = vld [vmem:[#allocation6 + $0x228] sm:$0xff]  }
 0x10e   : >> { %8770 = vmatprep.subr.bf16.mxu1 %v9855_v23  ;;  %9498 = vmatprep.subr.bf16.mxu0 %v9862_v39  ;;  %v11321_v5 = vld [vmem:[#allocation2 + $0xf0] ss:$12 sps:$4 sm:$0xff]   ;;  %v11323_v23 = vld [vmem:[#allocation2 + $0x10c] ss:$12 sps:$4 sm:$0xff]  }
 0x110   : >> { %8771 = vmatpush3.bf16.msra.mxu1 %v9856_v7  ;;  %9499 = vmatpush3.bf16.msra.mxu0 %v9862_v39  ;;  %v9933_v7 = vld [vmem:[#allocation6 + $0x220] sm:$0xff]   ;;  %v9950_v39 = vld [vmem:[#allocation6 + $0x210] sm:$0xff]  }
 0x111   : >> { %8772 = vmatprep.subr.bf16.mxu1 %v9863_v37  ;;  %9500 = vmatprep.subr.bf16.mxu0 %v9877_v62  ;;  %v11339_v37 = vld [vmem:[#allocation2 + $0x13c] ss:$12 sps:$4 sm:$0xff]  }
 0x113   : >> { %1796 = vmatmul.mubr.bf16.gmra.mxu0 %v11272_v45  ;;  %9469 = vmatmul.mubr.bf16.gmra.mxu1 %v9854_v38  ;;  %v11329_v38 = vld [vmem:[#allocation2 + $0x108] ss:$12 sps:$4 sm:$0xff]  }
 0x114   : >> { %1803 = vmatprep.mubr.bf16.mxu0 %v11274_v43  ;;  %9472 = vmatprep.mubr.bf16.mxu1 %v9859_v24  ;;  %v11331_v24 = vld [vmem:[#allocation2 + $0x124] ss:$12 sps:$4 sm:$0xff]  }
 0x115   : >> { %8773 = vmatpush3.bf16.msra.mxu1 %v9864_v20  ;;  %9501 = vmatpush3.bf16.msra.mxu0 %v9877_v62  ;;  %v9968_v20 = vld [vmem:[#allocation6 + $0x200] sm:$0xff]   ;;  %v9938_v62 = vld [vmem:[#allocation2 + $0x20] ss:$12 sps:$4 sm:$0xff]  }
 0x116   : >> { %8774 = vmatprep.subr.bf16.mxu1 %v9870_v21  ;;  %9502 = vmatprep.subr.bf16.mxu0 %v9892_v29  ;;  %v9934_v21 = vld [vmem:[#allocation2 + $0x184] ss:$12 sps:$4 sm:$0xff]  }
 0x119   : >> { %8775 = vmatpush3.bf16.msra.mxu1 %v9871_v53  ;;  %9503 = vmatpush3.bf16.msra.mxu0 %v9892_v29  ;;  %v9936_v53 = vld [vmem:[#allocation2 + $0x180] ss:$12 sps:$4 sm:$0xff]   ;;  %v9951_v29 = vld [vmem:[#allocation2 + $0x98] ss:$12 sps:$4 sm:$0xff]  }
 0x11a   : >> { %8776 = vmatprep.subr.bf16.mxu1 %v9878_v50  ;;  %9504 = vmatprep.subr.bf16.mxu0 %v9908_v4  ;;  %v9940_v50 = vld [vmem:[#allocation6 + $0x1b8] sm:$0xff]  }
 0x11b   : >> { %1804 = vmatmul.mubr.bf16.gmra.mxu0 %v11278_v46  ;;  %9473 = vmatmul.mubr.bf16.gmra.mxu1 %v9861_v52  ;;  %v11355_v52 = vld [vmem:[#allocation2 + $0x16c] ss:$12 sps:$4 sm:$0xff]  }
 0x11c   : >> { %1811 = vmatprep.mubr.bf16.mxu0 %v11280_v59  ;;  %9476 = vmatprep.mubr.bf16.mxu1 %v9867_v49  ;;  %v9937_v49 = vld [vmem:[#allocation2 + $0x8] ss:$12 sps:$4 sm:$0xff]  }
 0x11d   : >> { %8777 = vmatpush3.bf16.msra.mxu1 %v9879_v2  ;;  %9505 = vmatpush3.bf16.msra.mxu0 %v9908_v4  ;;  %v9942_v2 = vld [vmem:[#allocation2 + $0x38] ss:$12 sps:$4 sm:$0xff]   ;;  %v9956_v4 = vld [vmem:[#allocation2 + $0xe0] ss:$12 sps:$4 sm:$0xff]  }
 0x11e   : >> { %8778 = vmatprep.subr.bf16.mxu1 %v9885_v25  ;;  %9506 = vmatprep.subr.bf16.mxu0 %v9916_v18  ;;  %v9946_v25 = vld [vmem:[#allocation2 + $0x68] ss:$12 sps:$4 sm:$0xff]  }
 0x121   : >> { %8779 = vmatpush3.bf16.msra.mxu1 %v9886_v31  ;;  %9507 = vmatpush3.bf16.msra.mxu0 %v9916_v18  ;;  %v9949_v31 = vld [vmem:[#allocation6 + $0x1a8] sm:$0xff]   ;;  %v9964_v18 = vld [vmem:[#allocation2 + $0x128] ss:$12 sps:$4 sm:$0xff]  }
 0x122   : >> { %8780 = vmatprep.subr.bf16.mxu1 %v9893_v42  ;;  %9508 = vmatprep.subr.bf16.mxu0 %v9924_v51  ;;  %v9958_v42 = vld [vmem:[#allocation6 + $0x198] sm:$0xff]  }
 0x123   : >> { %1812 = vmatmul.mubr.bf16.gmra.mxu0 %v11284_v60  ;;  %9477 = vmatmul.mubr.bf16.gmra.mxu1 %v9869_v12  ;;  %v9945_v12 = vld [vmem:[#allocation6 + $0x1b0] sm:$0xff]  }
 0x124   : >> { %1819 = vmatprep.mubr.bf16.mxu0 %v11286_v10  ;;  %9480 = vmatprep.mubr.bf16.mxu1 %v9874_v57  ;;  %v9943_v57 = vld [vmem:[#allocation2 + $0x50] ss:$12 sps:$4 sm:$0xff]  }
 0x125   : >> { %8781 = vmatpush3.bf16.msra.mxu1 %v9894_v40  ;;  %9509 = vmatpush3.bf16.msra.mxu0 %v9924_v51  ;;  %v9962_v40 = vld [vmem:[#allocation6 + $0x1d0] sm:$0xff]   ;;  %v9970_v51 = vld [vmem:[#allocation2 + $0x170] ss:$12 sps:$4 sm:$0xff]  }
 0x126   : >> { %8782 = vmatprep.subr.bf16.mxu1 %v9900_v19  ;;  %9510 = vmatprep.subr.bf16.mxu0 %v9932_v61  ;;  %v9966_v19 = vld [vmem:[#allocation6 + $0x1c8] sm:$0xff]  }
 0x129   : >> { %8783 = vmatpush3.bf16.msra.mxu1 %v9901_v47  ;;  %9511 = vmatpush3.bf16.msra.mxu0 %v9932_v61  ;;  %v9952_v47 = vld [vmem:[#allocation2 + $0xb0] ss:$12 sps:$4 sm:$0xff]  }
 0x12a   : >> { %9544 = vmatprep.subr.bf16.mxu1 %v9909_v17  ;;  %8904 = vmatprep.subr.bf16.mxu0 %v9939_v34 }
 0x12b   : >> { %1820 = vmatmul.mubr.bf16.gmra.mxu0 %v11290_v1  ;;  %9481 = vmatmul.mubr.bf16.gmra.mxu1 %v9876_v26  ;;  %v9954_v26 = vld [vmem:[#allocation6 + $0x1a0] sm:$0xff]  }
 0x12c   : >> { %1827 = vmatprep.mubr.bf16.mxu0 %v11292_v9  ;;  %9484 = vmatprep.mubr.bf16.mxu1 %v9882_v14  ;;  %v9957_v14 = vld [vmem:[#allocation6 + $0x1d8] sm:$0xff]  }
 0x133   : >> { %1828 = vmatmul.mubr.bf16.gmra.mxu0 %v11296_v30  ;;  %9485 = vmatmul.mubr.bf16.gmra.mxu1 %v9884_v11  ;;  %v9955_v11 = vld [vmem:[#allocation2 + $0xc8] ss:$12 sps:$4 sm:$0xff]  }
 0x134   : >> { %1835 = vmatprep.mubr.bf16.mxu0 %v11298_v33  ;;  %9488 = vmatprep.mubr.bf16.mxu1 %v9889_v16  ;;  %v9971_v16 = vld [vmem:[#allocation6 + $0x1c0] sm:$0xff]  }
 0x13b   : >> { %1836 = vmatmul.mubr.bf16.gmra.mxu0 %v11302_v32  ;;  %9489 = vmatmul.mubr.bf16.gmra.mxu1 %v9891_v58  ;;  %v9961_v58 = vld [vmem:[#allocation2 + $0x110] ss:$12 sps:$4 sm:$0xff]  }
 0x13c   : >> { %1843 = vmatprep.mubr.bf16.mxu0 %v11304_v54  ;;  %9492 = vmatprep.mubr.bf16.mxu1 %v9897_v0  ;;  %v9969_v0 = vld [vmem:[#allocation2 + $0x158] ss:$12 sps:$4 sm:$0xff]  }
 0x143   : >> { %1844 = vmatmul.mubr.bf16.gmra.mxu0 %v11308_v36  ;;  %9493 = vmatmul.mubr.bf16.gmra.mxu1 %v9899_v41  ;;  %v10226_v41 = vld [vmem:[#allocation2 + $0x34] ss:$12 sps:$4 sm:$0xff]  }
 0x144   : >> { %1851 = vmatprep.mubr.bf16.mxu0 %v11310_v44  ;;  %2509 = vmatprep.mubr.bf16.mxu1 %v9906_v6  ;;  %v9975_v6 = vld [vmem:[#allocation2 + $0x68] ss:$12 sps:$4 sm:$0xff]  }
 0x14b   : >> { %1852 = vmatmul.mubr.bf16.gmra.mxu0 %v11314_v35  ;;  %2510 = vmatmul.mubr.bf16.vlgmr.msra.gmra.mxu1 %v9904_v22  ;;  %v10227_v22 = vld [vmem:[#allocation2 + $0x30] ss:$12 sps:$4 sm:$0xff]  }
 0x14c   : >> { %9545 = vmatpush3.bf16.msra.mxu1 %v9909_v17  ;;  %1859 = vmatprep.mubr.bf16.mxu0 %v11316_v3  ;;  %v9972_v17 = vld [vmem:[#allocation6 + $0x180] sm:$0xff]  }
 0x14d   : >> { %2517 = vmatprep.mubr.bf16.mxu1 %v11263_v8  ;;  %9546 = vmatprep.subr.bf16.mxu1 %v9917_v55  ;;  %v9941_v8 = vld [vmem:[#allocation6 + $0x218] sm:$0xff]  }
 0x150   : >> { %9547 = vmatpush3.bf16.msra.mxu1 %v9917_v55 }
 0x151   : >> { %9548 = vmatprep.subr.bf16.mxu1 %v9925_v28 }
 0x153   : >> { %1860 = vmatmul.mubr.bf16.gmra.mxu0 %v11321_v5  ;;  %2518 = vmatmul.mubr.bf16.gmra.mxu1 %v11266_v63  ;;  %v9959_v63 = vld [vmem:[#allocation6 + $0x208] sm:$0xff]  }
 0x154   : >> { %1867 = vmatprep.mubr.bf16.mxu0 %v11323_v23  ;;  %2525 = vmatprep.mubr.bf16.mxu1 %v11268_v56  ;;  %v11337_v56 = vld [vmem:[#allocation2 + $0x120] ss:$12 sps:$4 sm:$0xff]  }
 0x155   : >> { %9549 = vmatpush3.bf16.msra.mxu1 %v9925_v28 }
 0x156   : >> { %9550 = vmatprep.subr.bf16.mxu1 %v9933_v7 }
 0x159   : >> { %9551 = vmatpush3.bf16.msra.mxu1 %v9933_v7  ;;  %v9976_v7 = vld [vmem:[#allocation2 + $0x80] ss:$12 sps:$4 sm:$0xff]  }
 0x15a   : >> { %9552 = vmatprep.subr.bf16.mxu1 %v9941_v8 }
 0x15b   : >> { %1868 = vmatmul.mubr.bf16.gmra.mxu0 %v11329_v38  ;;  %2526 = vmatmul.mubr.bf16.gmra.mxu1 %v11272_v45  ;;  %v11345_v45 = vld [vmem:[#allocation2 + $0x138] ss:$12 sps:$4 sm:$0xff]  }
 0x15c   : >> { %1875 = vmatprep.mubr.bf16.mxu0 %v11331_v24  ;;  %2533 = vmatprep.mubr.bf16.mxu1 %v11274_v43  ;;  %v11347_v43 = vld [vmem:[#allocation2 + $0x154] ss:$12 sps:$4 sm:$0xff]  }
 0x15d   : >> { %9553 = vmatpush3.bf16.msra.mxu1 %v9941_v8 }
 0x15e   : >> { %9554 = vmatprep.subr.bf16.mxu1 %v9950_v39 }
 0x161   : >> { %9555 = vmatpush3.bf16.msra.mxu1 %v9950_v39 }
 0x162   : >> { %9556 = vmatprep.subr.bf16.mxu1 %v9959_v63 }
 0x163   : >> { %1876 = vmatmul.mubr.bf16.gmra.mxu0 %v11337_v56  ;;  %2534 = vmatmul.mubr.bf16.gmra.mxu1 %v11278_v46  ;;  %v11353_v46 = vld [vmem:[#allocation2 + $0x150] ss:$12 sps:$4 sm:$0xff]  }
 0x164   : >> { %1883 = vmatprep.mubr.bf16.mxu0 %v11339_v37  ;;  %2541 = vmatprep.mubr.bf16.mxu1 %v11280_v59  ;;  %v11361_v59 = vld [vmem:[#allocation2 + $0x168] ss:$12 sps:$4 sm:$0xff]  }
 0x165   : >> { %9557 = vmatpush3.bf16.msra.mxu1 %v9959_v63 }
 0x166   : >> { %9558 = vmatprep.subr.bf16.mxu1 %v9968_v20 }
 0x169   : >> { %9559 = vmatpush3.bf16.msra.mxu1 %v9968_v20  ;;  %v10229_v20 = vld [vmem:[#allocation2 + $0x48] ss:$12 sps:$4 sm:$0xff]  }
 0x16b   : >> { %1884 = vmatmul.mubr.bf16.gmra.mxu0 %v11345_v45  ;;  %2542 = vmatmul.mubr.bf16.gmra.mxu1 %v11284_v60  ;;  %v9944_v60 = vld [vmem:[#allocation6 + $0x1f0] sm:$0xff]  }
 0x16c   : >> { %1891 = vmatprep.mubr.bf16.mxu0 %v11347_v43  ;;  %2549 = vmatprep.mubr.bf16.mxu1 %v11286_v10  ;;  %v9948_v10 = vld [vmem:[#allocation6 + $0x1e8] sm:$0xff]  }
 0x173   : >> { %1892 = vmatmul.mubr.bf16.gmra.mxu0 %v11353_v46  ;;  %2550 = vmatmul.mubr.bf16.gmra.mxu1 %v11290_v1  ;;  %v9953_v1 = vld [vmem:[#allocation6 + $0x1e0] sm:$0xff]  }
 0x174   : >> { %1899 = vmatprep.mubr.bf16.mxu0 %v11355_v52  ;;  %2557 = vmatprep.mubr.bf16.mxu1 %v11292_v9  ;;  %v9947_v9 = vld [vmem:[#allocation2 + $0x80] ss:$12 sps:$4 sm:$0xff]  }
 0x17b   : >> { %1900 = vmatmul.mubr.bf16.gmra.mxu0 %v11361_v59  ;;  %2558 = vmatmul.mubr.bf16.gmra.mxu1 %v11296_v30  ;;  %v9963_v30 = vld [vmem:[#allocation6 + $0x190] sm:$0xff]  }
 0x17c   : >> { %1907 = vmatprep.mubr.bf16.mxu0 %v9934_v21  ;;  %2565 = vmatprep.mubr.bf16.mxu1 %v11298_v33  ;;  %v9967_v33 = vld [vmem:[#allocation6 + $0x188] sm:$0xff]  }
 0x183   : >> { %1908 = vmatmul.mubr.bf16.gmra.mxu0 %v9936_v53  ;;  %2566 = vmatmul.mubr.bf16.gmra.mxu1 %v11302_v32  ;;  %v9960_v32 = vld [vmem:[#allocation2 + $0xf8] ss:$12 sps:$4 sm:$0xff]  }
 0x184   : >> { %2573 = vmatprep.mubr.bf16.mxu1 %v11304_v54  ;;  %9512 = vmatprep.mubr.bf16.mxu0 %v9937_v49  ;;  %v9965_v54 = vld [vmem:[#allocation2 + $0x140] ss:$12 sps:$4 sm:$0xff]   ;;  %v9978_v49 = vld [vmem:[#allocation2 + $0xb0] ss:$12 sps:$4 sm:$0xff]  }
 0x18b   : >> { %2574 = vmatmul.mubr.bf16.gmra.mxu1 %v11308_v36  ;;  %9513 = vmatmul.mubr.bf16.vlgmr.msra.gmra.mxu0 %v9938_v62  ;;  %v9973_v36 = vld [vmem:[#allocation2 + $0x38] ss:$12 sps:$4 sm:$0xff]  }
 0x18c   : >> { %8905 = vmatpush3.bf16.msra.mxu0 %v9940_v50  ;;  %2581 = vmatprep.mubr.bf16.mxu1 %v11310_v44  ;;  %v9974_v44 = vld [vmem:[#allocation2 + $0x50] ss:$12 sps:$4 sm:$0xff]   ;;  %v9979_v50 = vld [vmem:[#allocation2 + $0xc8] ss:$12 sps:$4 sm:$0xff]  }
 0x18d   : >> { %9516 = vmatprep.mubr.bf16.mxu0 %v9942_v2  ;;  %8906 = vmatprep.subr.bf16.mxu0 %v9944_v60 }
 0x190   : >> { %8907 = vmatpush3.bf16.msra.mxu0 %v9945_v12 }
 0x191   : >> { %8908 = vmatprep.subr.bf16.mxu0 %v9948_v10 }
 0x193   : >> { %2582 = vmatmul.mubr.bf16.gmra.mxu1 %v11314_v35  ;;  %9517 = vmatmul.mubr.bf16.gmra.mxu0 %v9943_v57  ;;  %v10228_v35 = vld [vmem:[#allocation2 + $0x4c] ss:$12 sps:$4 sm:$0xff]  }
 0x194   : >> { %2589 = vmatprep.mubr.bf16.mxu1 %v11316_v3  ;;  %9520 = vmatprep.mubr.bf16.mxu0 %v9946_v25  ;;  %v10231_v25 = vld [vmem:[#allocation2 + $0x60] ss:$12 sps:$4 sm:$0xff]  }
 0x195   : >> { %8909 = vmatpush3.bf16.msra.mxu0 %v9949_v31 }
 0x196   : >> { %8910 = vmatprep.subr.bf16.mxu0 %v9953_v1  ;;  %v10232_v1 = vld [vmem:[#allocation2 + $0x7c] ss:$12 sps:$4 sm:$0xff]  }
 0x199   : >> { %8911 = vmatpush3.bf16.msra.mxu0 %v9954_v26 }
 0x19a   : >> { %8912 = vmatprep.subr.bf16.mxu0 %v9957_v14 }
 0x19b   : >> { %2590 = vmatmul.mubr.bf16.gmra.mxu1 %v11321_v5  ;;  %9521 = vmatmul.mubr.bf16.gmra.mxu0 %v9947_v9 }
 0x19c   : >> { %2597 = vmatprep.mubr.bf16.mxu1 %v11323_v23  ;;  %9524 = vmatprep.mubr.bf16.mxu0 %v9951_v29 }
 0x19d   : >> { %8913 = vmatpush3.bf16.msra.mxu0 %v9958_v42 }
 0x19e   : >> { %8914 = vmatprep.subr.bf16.mxu0 %v9962_v40  ;;  %v9980_v40 = vld [vmem:[#allocation2 + $0xe0] ss:$12 sps:$4 sm:$0xff]  }
 0x1a1   : >> { %8915 = vmatpush3.bf16.msra.mxu0 %v9963_v30 }
 0x1a2   : >> { %8916 = vmatprep.subr.bf16.mxu0 %v9966_v19  ;;  %v9981_v19 = vld [vmem:[#allocation2 + $0xf8] ss:$12 sps:$4 sm:$0xff]  }
 0x1a3   : >> { %2598 = vmatmul.mubr.bf16.gmra.mxu1 %v11329_v38  ;;  %9525 = vmatmul.mubr.bf16.gmra.mxu0 %v9952_v47  ;;  %v9977_v38 = vld [vmem:[#allocation2 + $0x98] ss:$12 sps:$4 sm:$0xff]  }
 0x1a4   : >> { %2605 = vmatprep.mubr.bf16.mxu1 %v11331_v24  ;;  %9528 = vmatprep.mubr.bf16.mxu0 %v9955_v11 }
 0x1a5   : >> { %8917 = vmatpush3.bf16.msra.mxu0 %v9967_v33 }
 0x1a6   : >> { %8918 = vmatprep.subr.bf16.mxu0 %v9971_v16 }
 0x1a9   : >> { %8919 = vmatpush3.bf16.msra.mxu0 %v9972_v17  ;;  %v10233_v17 = vld [vmem:[#allocation2 + $0x78] ss:$12 sps:$4 sm:$0xff]  }
 0x1ab   : >> { %2606 = vmatmul.mubr.bf16.gmra.mxu1 %v11337_v56  ;;  %9529 = vmatmul.mubr.bf16.gmra.mxu0 %v9956_v4 }
 0x1ac   : >> { %2613 = vmatprep.mubr.bf16.mxu1 %v11339_v37  ;;  %9532 = vmatprep.mubr.bf16.mxu0 %v9960_v32 }
 0x1b3   : >> { %2614 = vmatmul.mubr.bf16.gmra.mxu1 %v11345_v45  ;;  %9533 = vmatmul.mubr.bf16.gmra.mxu0 %v9961_v58  ;;  %v10234_v58 = vld [vmem:[#allocation2 + $0x94] ss:$12 sps:$4 sm:$0xff]  }
 0x1b4   : >> { %2621 = vmatprep.mubr.bf16.mxu1 %v11347_v43  ;;  %9536 = vmatprep.mubr.bf16.mxu0 %v9964_v18  ;;  %v10230_v43 = vld [vmem:[#allocation2 + $0x64] ss:$12 sps:$4 sm:$0xff]  }
 0x1bb   : >> { %2622 = vmatmul.mubr.bf16.gmra.mxu1 %v11353_v46  ;;  %9537 = vmatmul.mubr.bf16.gmra.mxu0 %v9965_v54 }
 0x1bc   : >> { %2629 = vmatprep.mubr.bf16.mxu1 %v11355_v52  ;;  %9540 = vmatprep.mubr.bf16.mxu0 %v9969_v0 }
 0x1c3   : >> { %2630 = vmatmul.mubr.bf16.gmra.mxu1 %v11361_v59  ;;  %9541 = vmatmul.mubr.bf16.gmra.mxu0 %v9970_v51 }
 0x1c4   : >> { %3345 = vmatprep.mubr.bf16.mxu0 %v10226_v41  ;;  %9560 = vmatprep.mubr.bf16.mxu1 %v9973_v36  ;;  %v9982_v41 = vld [vmem:[#allocation2 + $0x110] ss:$12 sps:$4 sm:$0xff]  }
 0x1cb   : >> { %v8648_v61 = vpop.f32.mrf.mxu0  ;;  %v9466_v34 = vpop.f32.mrf.mxu1  ;;  %3346 = vmatmul.mubr.bf16.vlgmr.msra.gmra.mxu0 %v10227_v22  ;;  %9561 = vmatmul.mubr.bf16.vlgmr.msra.gmra.mxu1 %v9974_v44 }
 0x1cc   : >> { %3353 = vmatprep.mubr.bf16.mxu0 %v10228_v35  ;;  %9564 = vmatprep.mubr.bf16.mxu1 %v9975_v6  ;;  %v9983_v6 = vld [vmem:[#allocation2 + $0x128] ss:$12 sps:$4 sm:$0xff]  }
 0x1cd   : >> { %v8649_v3 = vpop.f32.mrf.mxu0  ;;  %v1950_v55 = vpop.f32.mrf.mxu1 }
 0x1ce   : >> { %v8650_v28 = vadd.f32 %v8649_v3, %v8648_v61 }
 0x1cf   : >> { %v8651_v5 = vpop.f32.mrf.mxu0  ;;  %v9467_v23 = vpop.f32.mrf.mxu1 }
 0x1d0   : >> { %v11383_v8 = vadd.f32 %v8650_v28, %v1950_v55  ;;  %v10235_v55 = vld [vmem:[#allocation2 + $0x90] ss:$12 sps:$4 sm:$0xff]  }
 0x1d1   : >> { %v8652_v24 = vpop.f32.mrf.mxu0  ;;  %v1953_v39 = vpop.f32.mrf.mxu1 }
 0x1d2   : >> { %v8653_v63 = vadd.f32 %v8652_v24, %v8651_v5  ;;  %v10236_v5 = vld [vmem:[#allocation2 + $0xac] ss:$12 sps:$4 sm:$0xff]  }
 0x1d3   : >> { %v8654_v56 = vpop.f32.mrf.mxu0  ;;  %v9470_v37 = vpop.f32.mrf.mxu1  ;;  %3354 = vmatmul.mubr.bf16.gmra.mxu0 %v10229_v20  ;;  %9565 = vmatmul.mubr.bf16.gmra.mxu1 %v9976_v7  ;;  %v10004_v24 = vld [vmem:[#allocation8 + $0x138] sm:$0xff]   ;;  %v9988_v20 = vld [vmem:[#allocation2 + $0x158] ss:$12 sps:$4 sm:$0xff]  }
 0x1d4   : >> { %v11385_v45 = vadd.f32 %v8653_v63, %v1953_v39  ;;  %3361 = vmatprep.mubr.bf16.mxu0 %v10230_v43  ;;  %9568 = vmatprep.mubr.bf16.mxu1 %v9977_v38  ;;  %v10005_v43 = vld [vmem:[#allocation8 + $0xf8] sm:$0xff]  }
 0x1d5   : >> { %v8655_v46 = vpop.f32.mrf.mxu0  ;;  %v1966_v52 = vpop.f32.mrf.mxu1  ;;  %9040 = vmatprep.subr.bf16.mxu1 %v10004_v24 }
 0x1d6   : >> { %v8656_v59 = vadd.f32 %v8655_v46, %v8654_v56  ;;  %v9984_v56 = vld [vmem:[#allocation2 + $0x140] ss:$12 sps:$4 sm:$0xff]   ;;  %9041 = vmatpush3.bf16.msra.mxu1 %v10005_v43 }
 0x1d7   : >> { %v8657_v21 = vpop.f32.mrf.mxu0  ;;  %v9471_v53 = vpop.f32.mrf.mxu1  ;;  %v10006_v46 = vld [vmem:[#allocation8 + $0x178] sm:$0xff]  }
 0x1d8   : >> { %v11387_v62 = vadd.f32 %v9466_v34, %v8656_v59  ;;  %9592 = vmatprep.subr.bf16.mxu0 %v10006_v46 }
 0x1d9   : >> { %v8658_v2 = vpop.f32.mrf.mxu0  ;;  %v1969_v60 = vpop.f32.mrf.mxu1  ;;  %9593 = vmatpush3.bf16.msra.mxu0 %v10006_v46 }
 0x1da   : >> { %v8659_v12 = vadd.f32 %v8658_v2, %v8657_v21 }
 0x1db   : >> { %v8660_v10 = vpop.f32.mrf.mxu0  ;;  %v11389_v57 = vpop.f32.mrf.mxu1  ;;  %3362 = vmatmul.mubr.bf16.gmra.mxu0 %v10231_v25  ;;  %9569 = vmatmul.mubr.bf16.gmra.mxu1 %v9978_v49 }
 0x1dc   : >> { %v11391_v31 = vadd.f32 %v9467_v23, %v8659_v12  ;;  %3369 = vmatprep.mubr.bf16.mxu0 %v10232_v1  ;;  %9572 = vmatprep.mubr.bf16.mxu1 %v9979_v50  ;;  %v10237_v50 = vld [vmem:[#allocation2 + $0xa8] ss:$12 sps:$4 sm:$0xff]   ;;  %v10007_v1 = vld [vmem:[#allocation8 + $0x130] sm:$0xff]  }
 0x1dd   : >> { %v8661_v26 = vpop.f32.mrf.mxu0  ;;  %v1982_v9 = vpop.f32.mrf.mxu1  ;;  %9042 = vmatprep.subr.bf16.mxu1 %v10007_v1 }
 0x1de   : >> { %v8662_v14 = vadd.f32 %v8661_v26, %v8660_v10 }
 0x1df   : >> { %v8663_v29 = vpop.f32.mrf.mxu0  ;;  %v11393_v42 = vpop.f32.mrf.mxu1 }
 0x1e0   : >> { %v11395_v30 = vadd.f32 %v8662_v14, %v1966_v52  ;;  %v9989_v14 = vld [vmem:[#allocation2 + $0x170] ss:$12 sps:$4 sm:$0xff]  }
 0x1e1   : >> { %v8664_v47 = vpop.f32.mrf.mxu0  ;;  %v1985_v11 = vpop.f32.mrf.mxu1 }
 0x1e2   : >> { %v8665_v33 = vadd.f32 %v8664_v47, %v8663_v29 }
 0x1e3   : >> { %v8666_v16 = vpop.f32.mrf.mxu0  ;;  %v11397_v4 = vpop.f32.mrf.mxu1  ;;  %3370 = vmatmul.mubr.bf16.gmra.mxu0 %v10233_v17  ;;  %9573 = vmatmul.mubr.bf16.gmra.mxu1 %v9980_v40  ;;  %v9996_v40 = vld [vmem:[#allocation2 + $0x188] ss:$12 sps:$4 sm:$0xff]  }
 0x1e4   : >> { %v11399_v32 = vadd.f32 %v8665_v33, %v1969_v60  ;;  %3377 = vmatprep.mubr.bf16.mxu0 %v10234_v58  ;;  %9576 = vmatprep.mubr.bf16.mxu1 %v9981_v19  ;;  %v10238_v60 = vld [vmem:[#allocation2 + $0xc4] ss:$12 sps:$4 sm:$0xff]   ;;  %v10239_v58 = vld [vmem:[#allocation2 + $0xc0] ss:$12 sps:$4 sm:$0xff]  }
 0x1e5   : >> { %v8667_v18 = vpop.f32.mrf.mxu0  ;;  %v11401_v54 = vpop.f32.mrf.mxu1  ;;  %v10008_v19 = vld [vmem:[#allocation8 + $0xf0] sm:$0xff]  }
 0x1e6   : >> { %v8668_v0 = vadd.f32 %v8667_v18, %v8666_v16  ;;  %9043 = vmatpush3.bf16.msra.mxu1 %v10008_v19  ;;  %v10243_v19 = vld [vmem:[#allocation2 + $0xf0] ss:$12 sps:$4 sm:$0xff]  }
 0x1e7   : >> { %v8669_v51 = vpop.f32.mrf.mxu0  ;;  %v11403_v36 = vpop.f32.mrf.mxu1 }
 0x1e8   : >> { %v11405_v44 = vadd.f32 %v9470_v37, %v8668_v0  ;;  %v10240_v0 = vld [vmem:[#allocation2 + $0xdc] ss:$12 sps:$4 sm:$0xff]  }
 0x1e9   : >> { %v8670_v61 = vpop.f32.mrf.mxu0  ;;  %v11407_v34 = vpop.f32.mrf.mxu1 }
 0x1ea   : >> { %v8671_v22 = vadd.f32 %v8670_v61, %v8669_v51 }
 0x1eb   : >> { %v8672_v35 = vpop.f32.mrf.mxu0  ;;  %v11409_v3 = vpop.f32.mrf.mxu1  ;;  %3378 = vmatmul.mubr.bf16.gmra.mxu0 %v10235_v55  ;;  %9577 = vmatmul.mubr.bf16.gmra.mxu1 %v9982_v41 }
 0x1ec   : >> { %v11411_v28 = vadd.f32 %v9471_v53, %v8671_v22  ;;  %3385 = vmatprep.mubr.bf16.mxu0 %v10236_v5  ;;  %9580 = vmatprep.mubr.bf16.mxu1 %v9983_v6  ;;  %v10009_v6 = vld [vmem:[#allocation8 + $0x128] sm:$0xff]  }
 0x1ed   : >> { %v8673_v23 = vpop.f32.mrf.mxu0  ;;  %v11413_v7 = vpop.f32.mrf.mxu1  ;;  %9044 = vmatprep.subr.bf16.mxu1 %v10009_v6  ;;  %v10010_v5 = vld [vmem:[#allocation8 + $0xe8] sm:$0xff]  }
 0x1ee   : >> { %v8674_v38 = vadd.f32 %v8673_v23, %v8672_v35  ;;  %v9997_v35 = vld [vmem:[#allocation2 + $0x1a0] ss:$12 sps:$4 sm:$0xff]   ;;  %9045 = vmatpush3.bf16.msra.mxu1 %v10010_v5 }
 0x1ef   : >> { %v8675_v39 = vpop.f32.mrf.mxu0  ;;  %v11415_v63 = vpop.f32.mrf.mxu1  ;;  %v10011_v23 = vld [vmem:[#allocation8 + $0x170] sm:$0xff]  }
 0x1f0   : >> { %v11417_v37 = vadd.f32 %v8674_v38, %v1982_v9  ;;  %9594 = vmatprep.subr.bf16.mxu0 %v10011_v23 }
 0x1f1   : >> { %v8676_v52 = vpop.f32.mrf.mxu0  ;;  %v11419_v59 = vpop.f32.mrf.mxu1  ;;  %9595 = vmatpush3.bf16.msra.mxu0 %v10011_v23 }
 0x1f2   : >> { %v8677_v21 = vadd.f32 %v8676_v52, %v8675_v39 }
 0x1f3   : >> { %v8678_v53 = vpop.f32.mrf.mxu0  ;;  %v11421_v49 = vpop.f32.mrf.mxu1  ;;  %3386 = vmatmul.mubr.bf16.gmra.mxu0 %v10237_v50  ;;  %9581 = vmatmul.mubr.bf16.gmra.mxu1 %v9984_v56 }
 0x1f4   : >> { %v11423_v2 = vadd.f32 %v8677_v21, %v1985_v11  ;;  %3393 = vmatprep.mubr.bf16.mxu0 %v10238_v60  ;;  %9584 = vmatprep.mubr.bf16.mxu1 %v9988_v20  ;;  %v10241_v20 = vld [vmem:[#allocation2 + $0xd8] ss:$12 sps:$4 sm:$0xff]  }
 0x1f5   : >> { %v8679_v12 = vpop.f32.mrf.mxu0  ;;  %v11425_v10 = vpop.f32.mrf.mxu1 }
 0x1f6   : >> { %v8680_v25 = vadd.f32 %v8679_v12, %v8678_v53 }
 0x1f7   : >> { %v8681_v26 = vpop.f32.mrf.mxu0  ;;  %v11427_v9 = vpop.f32.mrf.mxu1 }
 0x1f8   : >> { %v11430_v29 = vadd.f32 %v11389_v57, %v8680_v25 }
 0x1f9   : >> { %v8682_v47 = vpop.f32.mrf.mxu0  ;;  %v11432_v11 = vpop.f32.mrf.mxu1 }
 0x1fa   : >> { %v8683_v33 = vadd.f32 %v8682_v47, %v8681_v26  ;;  %v10012_v26 = vld [vmem:[#allocation8 + $0x120] sm:$0xff]  }
 0x1fb   : >> { %v8684_v16 = vpop.f32.mrf.mxu0  ;;  %v11434_v17 = vpop.f32.mrf.mxu1  ;;  %3394 = vmatmul.mubr.bf16.gmra.mxu0 %v10239_v58  ;;  %9585 = vmatmul.mubr.bf16.gmra.mxu1 %v9989_v14 }
 0x1fc   : >> { %v11437_v18 = vadd.f32 %v11393_v42, %v8683_v33  ;;  %3401 = vmatprep.mubr.bf16.mxu0 %v10240_v0  ;;  %9588 = vmatprep.mubr.bf16.mxu1 %v9996_v40  ;;  %v10244_v33 = vld [vmem:[#allocation2 + $0x10c] ss:$12 sps:$4 sm:$0xff]  }
 0x1fd   : >> { %v8685_v57 = vpop.f32.mrf.mxu0  ;;  %v11439_v51 = vpop.f32.mrf.mxu1  ;;  %9046 = vmatprep.subr.bf16.mxu1 %v10012_v26  ;;  %v9985_v26 = vld [vmem:[#allocation2 + $0x13c] ss:$12 sps:$4 sm:$0xff]  }
 0x1fe   : >> { %v8686_v41 = vadd.f32 %v8685_v57, %v8684_v16 }
 0x1ff   : >> { %v8687_v61 = vpop.f32.mrf.mxu0  ;;  %v11441_v22 = vpop.f32.mrf.mxu1 }
 0x200   : >> { %v11444_v55 = vadd.f32 %v8686_v41, %v11401_v54  ;;  %v10242_v54 = vld [vmem:[#allocation2 + $0xf4] ss:$12 sps:$4 sm:$0xff]  }
 0x201   : >> { %v8688_v42 = vpop.f32.mrf.mxu0  ;;  %v11446_v38 = vpop.f32.mrf.mxu1 }
 0x202   : >> { %v8689_v24 = vadd.f32 %v8688_v42, %v8687_v61 }
 0x203   : >> { %v8690_v39 = vpop.f32.mrf.mxu0  ;;  %v11448_v56 = vpop.f32.mrf.mxu1  ;;  %3402 = vmatmul.mubr.bf16.gmra.mxu0 %v10241_v20  ;;  %9589 = vmatmul.mubr.bf16.gmra.mxu1 %v9997_v35  ;;  %v10246_v20 = vld [vmem:[#allocation2 + $0x124] ss:$12 sps:$4 sm:$0xff]  }
 0x204   : >> { %v11451_v43 = vadd.f32 %v8689_v24, %v11407_v34  ;;  %3409 = vmatprep.mubr.bf16.mxu0 %v10242_v54  ;;  %v10013_v34 = vld [vmem:[#allocation8 + $0xe0] sm:$0xff]  }
 0x205   : >> { %v8691_v46 = vpop.f32.mrf.mxu0  ;;  %v11453_v52 = vpop.f32.mrf.mxu1  ;;  %9047 = vmatpush3.bf16.msra.mxu1 %v10013_v34 }
 0x206   : >> { %v8692_v21 = vadd.f32 %v8691_v46, %v8690_v39  ;;  %v10245_v39 = vld [vmem:[#allocation2 + $0x108] ss:$12 sps:$4 sm:$0xff]  }
 0x207   : >> { %v8693_v53 = vpop.f32.mrf.mxu0  ;;  %v11455_v50 = vpop.f32.mrf.mxu1 }
 0x208   : >> { %v11458_v60 = vadd.f32 %v11397_v4, %v8692_v21 }
 0x209   : >> { %v8694_v12 = vpop.f32.mrf.mxu0  ;;  %v11460_v25 = vpop.f32.mrf.mxu1 }
 0x20a   : >> { %v8695_v1 = vadd.f32 %v8694_v12, %v8693_v53 }
 0x20b   : >> { %v8696_v14 = vpop.f32.mrf.mxu0  ;;  %v8784_v40 = vpop.f32.mrf.mxu1  ;;  %3410 = vmatmul.mubr.bf16.gmra.mxu0 %v10243_v19 }
 0x20c   : >> { %v11463_v47 = vadd.f32 %v11403_v36, %v8695_v1  ;;  %3417 = vmatprep.mubr.bf16.mxu0 %v10244_v33 }
 0x20d   : >> { %v8697_v16 = vpop.f32.mrf.mxu0  ;;  %v8785_v58 = vpop.f32.mrf.mxu1 }
 0x20e   : >> { %v8698_v4 = vadd.f32 %v8697_v16, %v8696_v14  ;;  %v8786_v0 = vadd.f32 %v8785_v58, %v8784_v40  ;;  %v10247_v58 = vld [vmem:[#allocation2 + $0x120] ss:$12 sps:$4 sm:$0xff]  }
 0x20f   : >> { %v8699_v57 = vpop.f32.mrf.mxu0  ;;  %v8787_v41 = vpop.f32.mrf.mxu1 }
 0x210   : >> { %v11466_v6 = vadd.f32 %v8698_v4, %v11413_v7  ;;  %v11469_v61 = vadd.f32 %v8786_v0, %v11383_v8  ;;  %v10014_v4 = vld [vmem:[#allocation8 + $0x118] sm:$0xff]  }
 0x211   : >> { %v8700_v35 = vpop.f32.mrf.mxu0  ;;  %v8788_v5 = vpop.f32.mrf.mxu1  ;;  %9048 = vmatprep.subr.bf16.mxu1 %v10014_v4 }
 0x212   : >> { %v11471_v36 = vadd.f32 %v8700_v35, %v8699_v57  ;;  %v8789_v23 = vadd.f32 %v8788_v5, %v8787_v41  ;;  %v10015_v57 = vld [vmem:[#allocation8 + $0xd8] sm:$0xff]   ;;  %v10016_v41 = vld [vmem:[#allocation8 + $0x168] sm:$0xff]  }
 0x213   : >> { %v8702_v42 = vpop.f32.mrf.mxu0  ;;  %v8790_v24 = vpop.f32.mrf.mxu1  ;;  %3418 = vmatmul.mubr.bf16.gmra.mxu0 %v10245_v39  ;;  %9049 = vmatpush3.bf16.msra.mxu1 %v10015_v57  ;;  %v9987_v39 = vld [vmem:[#allocation2 + $0x138] ss:$12 sps:$4 sm:$0xff]   ;;  %v9992_v57 = vld [vmem:[#allocation2 + $0x150] ss:$12 sps:$4 sm:$0xff]  }
 0x214   : >> { %3425 = vmatprep.mubr.bf16.mxu0 %v10246_v20  ;;  %v11474_v54 = vadd.f32 %v8789_v23, %v11385_v45  ;;  %9596 = vmatprep.subr.bf16.mxu0 %v10016_v41  ;;  %v9990_v20 = vld [vmem:[#allocation2 + $0x154] ss:$12 sps:$4 sm:$0xff]  }
 0x215   : >> { %v8703_v46 = vpop.f32.mrf.mxu0  ;;  %v8791_v7 = vpop.f32.mrf.mxu1  ;;  %9597 = vmatpush3.bf16.msra.mxu0 %v10016_v41  ;;  %v10020_v41 = vld [vmem:[#allocation8 + $0xc8] sm:$0xff]  }
 0x216   : >> { %v8704_v21 = vadd.f32 %v8703_v46, %v8702_v42  ;;  %v8792_v53 = vadd.f32 %v8791_v7, %v8790_v24  ;;  %v10017_v46 = vld [vmem:[#allocation8 + $0x110] sm:$0xff]  }
 0x217   : >> { %v8705_v8 = vpop.f32.mrf.mxu0  ;;  %v8793_v12 = vpop.f32.mrf.mxu1  ;;  %9050 = vmatprep.subr.bf16.mxu1 %v10017_v46 }
 0x218   : >> { %v11477_v1 = vadd.f32 %v11409_v3, %v8704_v21  ;;  %v11480_v34 = vadd.f32 %v8792_v53, %v11387_v62  ;;  %v10018_v53 = vld [vmem:[#allocation8 + $0xd0] sm:$0xff]  }
 0x219   : >> { %v8706_v14 = vpop.f32.mrf.mxu0  ;;  %v8794_v40 = vpop.f32.mrf.mxu1  ;;  %9051 = vmatpush3.bf16.msra.mxu1 %v10018_v53  ;;  %v10025_v53 = vld [vmem:[#allocation8 + $0x150] sm:$0xff]  }
 0x21a   : >> { %v8707_v19 = vadd.f32 %v8706_v14, %v8705_v8  ;;  %v8795_v33 = vadd.f32 %v8794_v40, %v8793_v12  ;;  %v10021_v40 = vld [vmem:[#allocation8 + $0x160] sm:$0xff]  }
 0x21b   : >> { %v8708_v16 = vpop.f32.mrf.mxu0  ;;  %v8796_v45 = vpop.f32.mrf.mxu1  ;;  %3426 = vmatmul.mubr.bf16.gmra.mxu0 %v10247_v58  ;;  %9598 = vmatprep.subr.bf16.mxu0 %v10021_v40 }
 0x21c   : >> { %v11483_v0 = vadd.f32 %v11415_v63, %v8707_v19  ;;  %3433 = vmatprep.mubr.bf16.mxu0 %v9985_v26  ;;  %v11486_v3 = vadd.f32 %v8795_v33, %v11391_v31  ;;  %9599 = vmatpush3.bf16.msra.mxu0 %v10021_v40 }
 0x21d   : >> { %v8709_v62 = vpop.f32.mrf.mxu0  ;;  %v8797_v35 = vpop.f32.mrf.mxu1 }
 0x21e   : >> { %v8710_v5 = vadd.f32 %v8709_v62, %v8708_v16  ;;  %v8798_v23 = vadd.f32 %v8797_v35, %v8796_v45  ;;  %v10019_v45 = vld [vmem:[#allocation8 + $0x108] sm:$0xff]   ;;  %v10024_v62 = vld [vmem:[#allocation8 + $0x158] sm:$0xff]  }
 0x21f   : >> { %v8711_v42 = vpop.f32.mrf.mxu0  ;;  %v8799_v24 = vpop.f32.mrf.mxu1  ;;  %9052 = vmatprep.subr.bf16.mxu1 %v10019_v45  ;;  %9600 = vmatprep.subr.bf16.mxu0 %v10024_v62  ;;  %v9998_v45 = vld [vmem:[#allocation2 + $0x184] ss:$12 sps:$4 sm:$0xff]  }
 0x220   : >> { %v11489_v63 = vadd.f32 %v8710_v5, %v11425_v10  ;;  %v11492_v31 = vadd.f32 %v8798_v23, %v11395_v30  ;;  %v9993_v5 = vld [vmem:[#allocation2 + $0x16c] ss:$12 sps:$4 sm:$0xff]   ;;  %9053 = vmatpush3.bf16.msra.mxu1 %v10020_v41  ;;  %9601 = vmatpush3.bf16.msra.mxu0 %v10024_v62 }
 0x221   : >> { %v8712_v7 = vpop.f32.mrf.mxu0  ;;  %v8800_v21 = vpop.f32.mrf.mxu1  ;;  %9602 = vmatprep.subr.bf16.mxu0 %v10025_v53 }
 0x222   : >> { %v11494_v8 = vadd.f32 %v8712_v7, %v8711_v42  ;;  %v8801_v12 = vadd.f32 %v8800_v21, %v8799_v24  ;;  %v10023_v21 = vld [vmem:[#allocation8 + $0xc0] sm:$0xff]  }
 0x223   : >> { %v8714_v26 = vpop.f32.mrf.mxu0  ;;  %v8802_v14 = vpop.f32.mrf.mxu1  ;;  %3434 = vmatmul.mubr.bf16.gmra.mxu0 %v9987_v39 }
 0x224   : >> { %3441 = vmatprep.mubr.bf16.mxu0 %v9990_v20  ;;  %v11497_v10 = vadd.f32 %v8801_v12, %v11399_v32  ;;  %v10022_v20 = vld [vmem:[#allocation8 + $0x100] sm:$0xff]   ;;  %9603 = vmatpush3.bf16.msra.mxu0 %v10025_v53 }
 0x225   : >> { %v8715_v19 = vpop.f32.mrf.mxu0  ;;  %v8803_v30 = vpop.f32.mrf.mxu1  ;;  %9054 = vmatprep.subr.bf16.mxu1 %v10022_v20 }
 0x226   : >> { %v8716_v33 = vadd.f32 %v8715_v19, %v8714_v26  ;;  %v8804_v16 = vadd.f32 %v8803_v30, %v8802_v14  ;;  %9055 = vmatpush3.bf16.msra.mxu1 %v10023_v21  ;;  %v10003_v21 = vld [vmem:[#allocation2 + $0x19c] ss:$12 sps:$4 sm:$0xff]  }
 0x227   : >> { %v8717_v58 = vpop.f32.mrf.mxu0  ;;  %v8805_v4 = vpop.f32.mrf.mxu1 }
 0x228   : >> { %v11500_v35 = vadd.f32 %v11421_v49, %v8716_v33  ;;  %v11503_v23 = vadd.f32 %v8804_v16, %v11405_v44  ;;  %v9995_v33 = vld [vmem:[#allocation2 + $0x168] ss:$12 sps:$4 sm:$0xff]   ;;  %v10030_v16 = vld [vmem:[#allocation8 + $0x148] sm:$0xff]  }
 0x229   : >> { %v8718_v32 = vpop.f32.mrf.mxu0  ;;  %v8806_v42 = vpop.f32.mrf.mxu1  ;;  %9604 = vmatprep.subr.bf16.mxu0 %v10030_v16 }
 0x22a   : >> { %v8719_v24 = vadd.f32 %v8718_v32, %v8717_v58  ;;  %v8807_v39 = vadd.f32 %v8806_v42, %v8805_v4  ;;  %9605 = vmatpush3.bf16.msra.mxu0 %v10030_v16 }
 0x22b   : >> { %v8720_v46 = vpop.f32.mrf.mxu0  ;;  %v8808_v7 = vpop.f32.mrf.mxu1  ;;  %3442 = vmatmul.mubr.bf16.gmra.mxu0 %v9992_v57 }
 0x22c   : >> { %v11506_v49 = vadd.f32 %v11427_v9, %v8719_v24  ;;  %3449 = vmatprep.mubr.bf16.mxu0 %v9993_v5  ;;  %v11509_v44 = vadd.f32 %v8807_v39, %v11411_v28  ;;  %v10032_v5 = vld [vmem:[#allocation8 + $0x140] sm:$0xff]  }
 0x22d   : >> { %v8721_v12 = vpop.f32.mrf.mxu0  ;;  %v8809_v26 = vpop.f32.mrf.mxu1  ;;  %9606 = vmatprep.subr.bf16.mxu0 %v10032_v5 }
 0x22e   : >> { %v8722_v14 = vadd.f32 %v8721_v12, %v8720_v46  ;;  %v8810_v40 = vadd.f32 %v8809_v26, %v8808_v7  ;;  %9607 = vmatpush3.bf16.msra.mxu0 %v10032_v5  ;;  %v10000_v46 = vld [vmem:[#allocation2 + $0x180] ss:$12 sps:$4 sm:$0xff]  }
 0x22f   : >> { %v11511_v19 = vpop.f32.mrf.mxu0  ;;  %v8811_v30 = vpop.f32.mrf.mxu1 }
 0x230   : >> { %v11514_v9 = vadd.f32 %v8722_v14, %v11439_v51  ;;  %v11517_v28 = vadd.f32 %v8810_v40, %v11417_v37 }
 0x231   : >> { %v11519_v58 = vpop.f32.mrf.mxu0  ;;  %v8812_v4 = vpop.f32.mrf.mxu1 }
 0x232   : >> { %v8813_v57 = vadd.f32 %v8812_v4, %v8811_v30 }
 0x233   : >> { %v8726_v41 = vpop.f32.mrf.mxu0  ;;  %v8814_v62 = vpop.f32.mrf.mxu1  ;;  %3450 = vmatmul.mubr.bf16.gmra.mxu0 %v9995_v33 }
 0x234   : >> { %3457 = vmatprep.mubr.bf16.mxu0 %v9998_v45  ;;  %v11522_v32 = vadd.f32 %v8813_v57, %v11423_v2 }
 0x235   : >> { %v8727_v51 = vpop.f32.mrf.mxu0  ;;  %v8815_v42 = vpop.f32.mrf.mxu1 }
 0x236   : >> { %v8728_v24 = vadd.f32 %v8727_v51, %v8726_v41  ;;  %v8816_v37 = vadd.f32 %v8815_v42, %v8814_v62  ;;  %v10001_v62 = vld [vmem:[#allocation2 + $0x198] ss:$12 sps:$4 sm:$0xff]  }
 0x237   : >> { %v8729_v39 = vpop.f32.mrf.mxu0  ;;  %v8817_v20 = vpop.f32.mrf.mxu1 }
 0x238   : >> { %v11525_v7 = vadd.f32 %v11434_v17, %v8728_v24  ;;  %v11528_v53 = vadd.f32 %v8816_v37, %v11430_v29 }
 0x239   : >> { %v8730_v12 = vpop.f32.mrf.mxu0  ;;  %v8818_v26 = vpop.f32.mrf.mxu1 }
 0x23a   : >> { %v8731_v2 = vadd.f32 %v8730_v12, %v8729_v39  ;;  %v8819_v14 = vadd.f32 %v8818_v26, %v8817_v20 }
 0x23b   : >> { %v8732_v40 = vpop.f32.mrf.mxu0  ;;  %v8820_v30 = vpop.f32.mrf.mxu1  ;;  %3458 = vmatmul.mubr.bf16.gmra.mxu0 %v10000_v46 }
 0x23c   : >> { %v11531_v33 = vadd.f32 %v11441_v22, %v8731_v2  ;;  %3465 = vmatprep.mubr.bf16.mxu0 %v10003_v21  ;;  %v11534_v16 = vadd.f32 %v8819_v14, %v11437_v18  ;;  %v11546_v18 = vld [vmem:[#allocation8 + $0xb8] sm:$0xff]  }
 0x23d   : >> { %v8733_v17 = vpop.f32.mrf.mxu0  ;;  %v8821_v45 = vpop.f32.mrf.mxu1  ;;  %9640 = vmatprep.subr.bf16.mxu1 %v11546_v18 }
 0x23e   : >> { %v8734_v4 = vadd.f32 %v8733_v17, %v8732_v40  ;;  %v8822_v57 = vadd.f32 %v8821_v45, %v8820_v30 }
 0x23f   : >> { %v11536_v29 = vpop.f32.mrf.mxu0  ;;  %v8823_v41 = vpop.f32.mrf.mxu1 }
 0x240   : >> { %v11539_v5 = vadd.f32 %v8734_v4, %v11453_v52  ;;  %v11542_v51 = vadd.f32 %v8822_v57, %v11444_v55 }
 0x241   : >> { %v11544_v22 = vpop.f32.mrf.mxu0  ;;  %v8824_v42 = vpop.f32.mrf.mxu1 }
 0x242   : >> { %v8825_v24 = vadd.f32 %v8824_v42, %v8823_v41 }
 0x243   : >> { %v8738_v37 = vpop.f32.mrf.mxu0  ;;  %v8826_v39 = vpop.f32.mrf.mxu1  ;;  %3466 = vmatmul.mubr.bf16.gmra.mxu0 %v10001_v62 }
 0x244   : >> { %v11549_v20 = vadd.f32 %v8825_v24, %v11451_v43 }
 0x245   : >> { %v8739_v46 = vpop.f32.mrf.mxu0  ;;  %v8827_v52 = vpop.f32.mrf.mxu1 }
 0x246   : >> { %v11552_v21 = vadd.f32 %v8739_v46, %v8738_v37  ;;  %v8828_v55 = vadd.f32 %v8827_v52, %v8826_v39 }
 0x247   : >> { %v11554_v12 = vpop.f32.mrf.mxu0  ;;  %v8829_v26 = vpop.f32.mrf.mxu1 }
 0x248   : >> { %v2568_v2 = vadd.f32 %v8828_v55, %v11458_v60 }
 0x249   : >> { %v11557_v14 = vpop.f32.mrf.mxu0  ;;  %v8830_v40 = vpop.f32.mrf.mxu1 }
 0x24a   : >> { %v8831_v30 = vadd.f32 %v8830_v40, %v8829_v26 }
 0x24b   : >> { %v8832_v17 = vpop.f32.mrf.mxu1  ;;  %v9514_v45 = vpop.f32.mrf.mxu0 }
 0x24c   : >> { %v11560_v43 = vadd.f32 %v9514_v45, %v11480_v34  ;;  %v2571_v4 = vadd.f32 %v8831_v30, %v11463_v47  ;;  %v2018_v34 = vadd.f32 %v11471_v36, %v11419_v59 }
 0x24d   : >> { %v8833_v57 = vpop.f32.mrf.mxu1  ;;  %v2672_v41 = vpop.f32.mrf.mxu0 }
 0x24e   : >> { %v8834_v62 = vadd.f32 %v8833_v57, %v8832_v17  ;;  %v11564_v42 = vadd.f32 %v2672_v41, %v11469_v61 }
 0x24f   : >> { %v8835_v24 = vpop.f32.mrf.mxu1  ;;  %v9515_v37 = vpop.f32.mrf.mxu0 }
 0x250   : >> { %v11567_v60 = vadd.f32 %v9515_v37, %v11486_v3  ;;  %v2576_v39 = vadd.f32 %v8834_v62, %v11466_v6 }
 0x251   : >> { %v8836_v46 = vpop.f32.mrf.mxu1  ;;  %v11570_v52 = vpop.f32.mrf.mxu0 }
 0x252   : >> { %v8837_v47 = vadd.f32 %v8836_v46, %v8835_v24 }
 0x253   : >> { %v8838_v55 = vpop.f32.mrf.mxu1  ;;  %v9518_v26 = vpop.f32.mrf.mxu0 }
 0x254   : >> { %v11575_v40 = vadd.f32 %v9518_v26, %v11503_v23  ;;  %v11577_v61 = vadd.f32 %v8837_v47, %v2018_v34 }
 0x255   : >> { %v8839_v30 = vpop.f32.mrf.mxu1  ;;  %v2688_v17 = vpop.f32.mrf.mxu0 }
 0x256   : >> { %v8840_v3 = vadd.f32 %v8839_v30, %v8838_v55  ;;  %v11580_v45 = vadd.f32 %v2688_v17, %v11492_v31 }
 0x257   : >> { %v8841_v6 = vpop.f32.mrf.mxu1  ;;  %v9519_v57 = vpop.f32.mrf.mxu0 }
 0x258   : >> { %v11583_v41 = vadd.f32 %v9519_v57, %v11509_v44  ;;  %v2584_v59 = vadd.f32 %v8840_v3, %v11477_v1 }
 0x259   : >> { %v8842_v36 = vpop.f32.mrf.mxu1  ;;  %v11586_v62 = vpop.f32.mrf.mxu0 }
 0x25a   : >> { %v8843_v23 = vadd.f32 %v8842_v36, %v8841_v6 }
 0x25b   : >> { %v8844_v24 = vpop.f32.mrf.mxu1  ;;  %v9522_v37 = vpop.f32.mrf.mxu0 }
 0x25c   : >> { %v11589_v46 = vadd.f32 %v9522_v37, %v11528_v53  ;;  %v2587_v34 = vadd.f32 %v8843_v23, %v11483_v0  ;;  %v2034_v53 = vadd.f32 %v11494_v8, %v11432_v11 }
 0x25d   : >> { %v8845_v31 = vpop.f32.mrf.mxu1  ;;  %v2704_v47 = vpop.f32.mrf.mxu0 }
 0x25e   : >> { %v8846_v55 = vadd.f32 %v8845_v31, %v8844_v24  ;;  %v11593_v26 = vadd.f32 %v2704_v47, %v11517_v28 }
 0x25f   : >> { %v8847_v44 = vpop.f32.mrf.mxu1  ;;  %v9523_v30 = vpop.f32.mrf.mxu0 }
 0x260   : >> { %v11596_v1 = vadd.f32 %v9523_v30, %v11534_v16  ;;  %v2592_v17 = vadd.f32 %v8846_v55, %v11489_v63 }
 0x261   : >> { %v8848_v3 = vpop.f32.mrf.mxu1  ;;  %v11599_v6 = vpop.f32.mrf.mxu0 }
 0x262   : >> { %v8849_v0 = vadd.f32 %v8848_v3, %v8847_v44 }
 0x263   : >> { %v8850_v57 = vpop.f32.mrf.mxu1  ;;  %v9526_v36 = vpop.f32.mrf.mxu0 }
 0x264   : >> { %v11603_v23 = vadd.f32 %v9526_v36, %v2568_v2  ;;  %v11605_v28 = vadd.f32 %v8849_v0, %v2034_v53 }
 0x265   : >> { %v8851_v24 = vpop.f32.mrf.mxu1  ;;  %v2720_v37 = vpop.f32.mrf.mxu0 }
 0x266   : >> { %13365 = vst [vmem:[#allocation17_spill] sm:$0xff] %v11605_v28  ;;  %v8852_v31 = vadd.f32 %v8851_v24, %v8850_v57  ;;  %v11608_v16 = vadd.f32 %v2720_v37, %v11542_v51  ;;  %v8725_v51 = vadd.f32 %v11519_v58, %v11511_v19 }
 0x267   : >> { %v8853_v63 = vpop.f32.mrf.mxu1  ;;  %v9527_v47 = vpop.f32.mrf.mxu0 }
 0x268   : >> { %v11610_v55 = vadd.f32 %v9527_v47, %v2571_v4  ;;  %v2600_v30 = vadd.f32 %v8852_v31, %v11500_v35 }
 0x269   : >> { %v8854_v11 = vpop.f32.mrf.mxu1  ;;  %v11613_v8 = vpop.f32.mrf.mxu0 }
 0x26a   : >> { %v8855_v44 = vadd.f32 %v8854_v11, %v8853_v63 }
 0x26b   : >> { %v8856_v2 = vpop.f32.mrf.mxu1  ;;  %v9530_v3 = vpop.f32.mrf.mxu0 }
 0x26c   : >> { %v11615_v53 = vadd.f32 %v9530_v3, %v2584_v59  ;;  %v2603_v0 = vadd.f32 %v8855_v44, %v11506_v49  ;;  %v2050_v59 = vadd.f32 %v8725_v51, %v11446_v38 }
 0x26d   : >> { %v8857_v57 = vpop.f32.mrf.mxu1  ;;  %v2736_v36 = vpop.f32.mrf.mxu0 }
 0x26e   : >> { %v8858_v24 = vadd.f32 %v8857_v57, %v8856_v2  ;;  %v11620_v4 = vadd.f32 %v2736_v36, %v2576_v39 }
 0x26f   : >> { %v8859_v37 = vpop.f32.mrf.mxu1  ;;  %v9531_v35 = vpop.f32.mrf.mxu0 }
 0x270   : >> { %v11622_v31 = vadd.f32 %v9531_v35, %v2587_v34  ;;  %v2608_v63 = vadd.f32 %v8858_v24, %v11514_v9 }
 0x271   : >> { %v8860_v47 = vpop.f32.mrf.mxu1  ;;  %v11625_v11 = vpop.f32.mrf.mxu0 }
 0x272   : >> { %v8861_v49 = vadd.f32 %v8860_v47, %v8859_v37 }
 0x273   : >> { %v8862_v44 = vpop.f32.mrf.mxu1  ;;  %v9534_v3 = vpop.f32.mrf.mxu0 }
 0x274   : >> { %v11628_v28 = vadd.f32 %v9534_v3, %v2600_v30  ;;  %v11630_v19 = vadd.f32 %v8861_v49, %v2050_v59 }
 0x275   : >> { %v8863_v58 = vpop.f32.mrf.mxu1  ;;  %v2752_v39 = vpop.f32.mrf.mxu0 }
 0x276   : >> { %v8864_v2 = vadd.f32 %v8863_v58, %v8862_v44  ;;  %v11632_v57 = vadd.f32 %v2752_v39, %v2592_v17  ;;  %v8737_v17 = vadd.f32 %v11544_v22, %v11536_v29 }
 0x277   : >> { %v8865_v34 = vpop.f32.mrf.mxu1  ;;  %v9535_v36 = vpop.f32.mrf.mxu0 }
 0x278   : >> { %v11634_v9 = vadd.f32 %v9535_v36, %v2603_v0  ;;  %v2616_v24 = vadd.f32 %v8864_v2, %v11525_v7 }
 0x279   : >> { %v8866_v35 = vpop.f32.mrf.mxu1  ;;  %v11637_v38 = vpop.f32.mrf.mxu0 }
 0x27a   : >> { %v8867_v51 = vadd.f32 %v8866_v35, %v8865_v34  ;;  %v10069_v35 = vld [vmem:[#allocation8 + $0x78] sm:$0xff]  }
 0x27b   : >> { %v8868_v37 = vpop.f32.mrf.mxu1  ;;  %v9538_v30 = vpop.f32.mrf.mxu0  ;;  %9176 = vmatprep.subr.bf16.mxu0 %v10069_v35 }
 0x27c   : >> { %v11639_v47 = vadd.f32 %v9538_v30, %v2616_v24  ;;  %v2619_v59 = vadd.f32 %v8867_v51, %v11531_v33  ;;  %v2066_v24 = vadd.f32 %v8737_v17, %v11460_v25 }
 0x27d   : >> { %v8869_v49 = vpop.f32.mrf.mxu1  ;;  %v2768_v44 = vpop.f32.mrf.mxu0 }
 0x27e   : >> { %13366 = vst [vmem:[#allocation18_spill] sm:$0xff] %v11639_v47  ;;  %v8870_v3 = vadd.f32 %v8869_v49, %v8868_v37  ;;  %v11644_v0 = vadd.f32 %v2768_v44, %v2608_v63  ;;  %v2071_v63 = vadd.f32 %v11448_v56, %v11552_v21 }
 0x27f   : >> { %v8871_v58 = vpop.f32.mrf.mxu1  ;;  %v9539_v7 = vpop.f32.mrf.mxu0 }
 0x280   : >> { %v11646_v39 = vadd.f32 %v9539_v7, %v2619_v59  ;;  %v2624_v2 = vadd.f32 %v8870_v3, %v11539_v5  ;;  %v8743_v5 = vadd.f32 %v11557_v14, %v11554_v12 }
 0x281   : >> { %v8872_v34 = vpop.f32.mrf.mxu1  ;;  %v11649_v36 = vpop.f32.mrf.mxu0 }
 0x282   : >> { %v8873_v33 = vadd.f32 %v8872_v34, %v8871_v58  ;;  %v2074_v58 = vadd.f32 %v11455_v50, %v8743_v5 }
 0x283   : >> { %v8874_v51 = vpop.f32.mrf.mxu1  ;;  %v9542_v30 = vpop.f32.mrf.mxu0 }
 0x284   : >> { %v11652_v47 = vadd.f32 %v8873_v33, %v2066_v24 }
 0x285   : >> { %v8875_v29 = vpop.f32.mrf.mxu1  ;;  %v2784_v22 = vpop.f32.mrf.mxu0 }
 0x286   : >> { %v8876_v37 = vadd.f32 %v8875_v29, %v8874_v51  ;;  %v11658_v59 = vadd.f32 %v2784_v22, %v2624_v2 }
 0x287   : >> { %v8877_v49 = vpop.f32.mrf.mxu1  ;;  %v9543_v25 = vpop.f32.mrf.mxu0 }
 0x288   : >> { %13367 = vst [vmem:[#allocation19_spill] sm:$0xff] %v11658_v59  ;;  %v2632_v44 = vadd.f32 %v8876_v37, %v2071_v63 }
 0x289   : >> { %v8878_v17 = vpop.f32.mrf.mxu1  ;;  %v11660_v3 = vpop.f32.mrf.mxu0 }
 0x28a   : >> { %v11663_v7 = vadd.f32 %v9542_v30, %v2632_v44  ;;  %v8879_v34 = vadd.f32 %v8878_v17, %v8877_v49  ;;  %v2676_v30 = vadd.f32 %v11570_v52, %v11474_v54  ;;  %v4083_v54 = vld [vmem:[#allocation2 + $0x18] sm:$0xf] }
 0x28b   : >> { %v8920_v24 = vpop.f32.mrf.mxu0  ;;  %v9562_v33 = vpop.f32.mrf.mxu1 }
 0x28c   : >> { %13368 = vst [vmem:[#allocation20_spill] sm:$0xff] %v11663_v7  ;;  %v2635_v56 = vadd.f32 %v8879_v34, %v2074_v58 }
 0x28d   : >> { %v8921_v21 = vpop.f32.mrf.mxu0  ;;  %v3508_v35 = vpop.f32.mrf.mxu1 }
 0x28e   : >> { %v11665_v12 = vadd.f32 %v9543_v25, %v2635_v56  ;;  %v8922_v14 = vadd.f32 %v8921_v21, %v8920_v24 }
 0x28f   : >> { %v8923_v2 = vpop.f32.mrf.mxu0  ;;  %v9563_v51 = vpop.f32.mrf.mxu1 }
 0x290   : >> { %13369 = vst [vmem:[#allocation21_spill] sm:$0xff] %v11665_v12  ;;  %v3509_v29 = vadd.f32 %v8922_v14, %v3508_v35 }
 0x291   : >> { %v8924_v22 = vpop.f32.mrf.mxu0  ;;  %v3511_v59 = vpop.f32.mrf.mxu1 }
 0x292   : >> { %v3635_v63 = vadd.f32 %v3509_v29, %v11564_v42  ;;  %v8925_v37 = vadd.f32 %v8924_v22, %v8923_v2 }
 0x293   : >> { %v8926_v50 = vpop.f32.mrf.mxu0  ;;  %v11670_v24 = vpop.f32.mrf.mxu1 }
 0x294   : >> { %v3667_v5 = vmax.f32 %v3635_v63, 0.0  ;;  %v3512_v49 = vadd.f32 %v8925_v37, %v3511_v59 }
 0x295   : >> { %v8927_v44 = vpop.f32.mrf.mxu0  ;;  %v3524_v63 = vpop.f32.mrf.mxu1 }
 0x296   : >> { %v8567_v17 = vpack.c.bf16 %v3667_v5, %v3667_v5  ;;  %v3636_v58 = vadd.f32 %v3512_v49, %v2676_v30  ;;  %v8928_v25 = vadd.f32 %v8927_v44, %v8926_v50 }
 0x297   : >> { %v8929_v34 = vpop.f32.mrf.mxu0 }
 0x298   : >> { %v3796_v56 = vshrl.u32 %v8567_v17, 16  ;;  %v3799_v21 = vshll.u32 %v8567_v17, 16  ;;  %4179 = vst [vmem:[#allocation2 + $0x1c] sm:$0xf] %v8567_v17  ;;  %v3668_v35 = vmax.f32 %v3636_v58, 0.0  ;;  %v3517_v42 = vadd.f32 %v9562_v33, %v8928_v25 }
 0x299   : >> { %v8930_v14 = vpop.f32.mrf.mxu0 }
 0x29a   : >> { %v3798_v2 = vrot.slane %v3796_v56, 7  ;;  %v4211_v29 = vrot.slane %v3796_v56, 4  ;;  %v4212_v22 = vrot.slane %v3799_v21, 5  ;;  %v8568_v12 = vpack.c.bf16 %v3668_v35, %v3668_v35 }
 0x29b   : >> { %v3637_v52 = vadd.f32 %v3517_v42, %v11560_v43  ;;  %v8931_v59 = vadd.f32 %v8930_v14, %v8929_v34  ;;  %v8932_v37 = vpop.f32.mrf.mxu0  ;;  %v11676_v42 = vpop.f32.mrf.mxu1 }
 0x29c   : >> { %v3801_v50 = vor.u32 %v3799_v21, %v3798_v2  ;;  %v4213_v30 = vor.u32 %v4212_v22, %v4211_v29  ;;  %v3804_v5 = vshrl.u32 %v8568_v12, 16  ;;  %4180 = vst [vmem:[#allocation2 + $0x28] sm:$0xf] %v8568_v12  ;;  %v3807_v49 = vshll.u32 %v8568_v12, 16 }
 0x29d   : >> { %v3669_v44 = vmax.f32 %v3637_v52, 0.0  ;;  %v3520_v17 = vadd.f32 %v9563_v51, %v8931_v59  ;;  %v8933_v58 = vpop.f32.mrf.mxu0  ;;  %v3802_v29 = vrot.slane %v3798_v2, 4 }
 0x29e   : >> { %v4084_v33 = vsel %vm10680_vm9, %v3801_v50, %v4083_v54  ;;  %v4214_v25 = vrot.slane %v4213_v30, 4  ;;  %v3806_v56 = vrot.slane %v3804_v5, 7  ;;  %v4217_v35 = vrot.slane %v3804_v5, 4  ;;  %v4388_v30 = vld [vmem:[#allocation2 + $0x2c] sm:$0xf] }
 0x29f   : >> { %4085 = vst [vmem:[#allocation2 + $0x18] sm:$0xf] %v4084_v33  ;;  %v4215_v7 = vrot.slane %v3807_v49, 5  ;;  %v8569_v43 = vpack.c.bf16 %v3669_v44, %v3669_v44  ;;  %v3638_v34 = vadd.f32 %v3520_v17, %v11567_v60  ;;  %v8934_v21 = vadd.f32 %v8933_v58, %v8932_v37  ;;  %v8935_v14 = vpop.f32.mrf.mxu0  ;;  %v3527_v58 = vpop.f32.mrf.mxu1 }
 0x2a0   : >> { %v3809_v12 = vor.u32 %v3807_v49, %v3806_v56 }
 0x2a1   : >> { %v4216_v51 = vsel %vm11050_vm13, %v4214_v25, %v4215_v7  ;;  %v4218_v22 = vor.u32 %v4217_v35, %v4215_v7  ;;  %v3812_v52 = vshrl.u32 %v8569_v43, 16  ;;  %v3815_v54 = vshll.u32 %v8569_v43, 16  ;;  %4181 = vst [vmem:[#allocation2 + $0x34] sm:$0xf] %v8569_v43  ;;  %v8936_v59 = vpop.f32.mrf.mxu0  ;;  %v4087_v25 = vld [vmem:[#allocation2 + $0x30] sm:$0xf] }
 0x2a2   : >> { %v3810_v50 = vsel %vm10694_vm10, %v3802_v29, %v3809_v12  ;;  %4387 = vst [vmem:[#allocation2 + $0x20] sm:$0xf] %v4216_v51  ;;  %v3670_v60 = vmax.f32 %v3638_v34, 0.0  ;;  %v3525_v5 = vadd.f32 %v8934_v21, %v3524_v63  ;;  %v8937_v44 = vadd.f32 %v8936_v59, %v8935_v14 }
 0x2a3   : >> { %4086 = vst [vmem:[#allocation2 + $0x24] sm:$0xf] %v3810_v50  ;;  %v4219_v37 = vrot.slane %v4218_v22, 4  ;;  %v3814_v2 = vrot.slane %v3812_v52, 7  ;;  %v4220_v49 = vrot.slane %v3812_v52, 4  ;;  %v4221_v17 = vrot.slane %v3815_v54, 5  ;;  %v8938_v33 = vpop.f32.mrf.mxu0 }
 0x2a4   : >> { %v2692_v7 = vadd.f32 %v11586_v62, %v11497_v10  ;;  %v8570_v56 = vpack.c.bf16 %v3670_v60, %v3670_v60  ;;  %v3639_v35 = vadd.f32 %v3525_v5, %v11580_v45  ;;  %v3528_v43 = vadd.f32 %v8937_v44, %v3527_v58 }
 0x2a5   : >> { %v4389_v34 = vsel %vm11076_vm14, %v4219_v37, %v4388_v30  ;;  %v3817_v63 = vor.u32 %v3815_v54, %v3814_v2  ;;  %v4222_v21 = vor.u32 %v4221_v17, %v4220_v49  ;;  %v8939_v14 = vpop.f32.mrf.mxu0  ;;  %v11689_v54 = vpop.f32.mrf.mxu1  ;;  %v3818_v5 = vrot.slane %v3814_v2, 4 }
 0x2a6   : >> { %4390 = vst [vmem:[#allocation2 + $0x2c] sm:$0xf] %v4389_v34  ;;  %v3820_v29 = vshrl.u32 %v8570_v56, 16  ;;  %v3823_v12 = vshll.u32 %v8570_v56, 16  ;;  %4182 = vst [vmem:[#allocation2 + $0x40] sm:$0xf] %v8570_v56  ;;  %v3640_v22 = vadd.f32 %v3528_v43, %v2692_v7  ;;  %v8940_v52 = vadd.f32 %v8939_v14, %v8938_v33 }
 0x2a7   : >> { %v3671_v51 = vmax.f32 %v3639_v35, 0.0  ;;  %v4088_v10 = vsel %vm10680_vm9, %v3817_v63, %v4087_v25  ;;  %v4223_v62 = vrot.slane %v4222_v21, 4  ;;  %v8941_v59 = vpop.f32.mrf.mxu0  ;;  %v10028_v56 = vld [vmem:[#allocation2 + $0x1c] ss:$12 sps:$4 sm:$0xff]   ;;  %v4392_v35 = vld [vmem:[#allocation2 + $0x44] sm:$0xf] }
 0x2a8   : >> { %4089 = vst [vmem:[#allocation2 + $0x30] sm:$0xf] %v4088_v10  ;;  %v3822_v45 = vrot.slane %v3820_v29, 7  ;;  %v4224_v50 = vrot.slane %v3823_v12, 5  ;;  %v4226_v60 = vrot.slane %v3820_v29, 4  ;;  %v3672_v44 = vmax.f32 %v3640_v22, 0.0  ;;  %v3540_v10 = vpop.f32.mrf.mxu1  ;;  %5108 = vmatprep.mubr.bf16.mxu1 %v10028_v56 }
 0x2a9   : >> { %v8571_v30 = vpack.c.bf16 %v3671_v51, %v3671_v51  ;;  %v3533_v37 = vadd.f32 %v11670_v24, %v8940_v52  ;;  %v8942_v49 = vpop.f32.mrf.mxu0  ;;  %v10040_v14 = vld [vmem:[#allocation8 + $0xb0] sm:$0xff]   ;;  %v4091_v51 = vld [vmem:[#allocation2 + $0x48] sm:$0xf] }
 0x2aa   : >> { %v3825_v17 = vor.u32 %v3823_v12, %v3822_v45  ;;  %v4225_v58 = vsel %vm11050_vm13, %v4223_v62, %v4224_v50  ;;  %v4227_v7 = vor.u32 %v4226_v60, %v4224_v50  ;;  %v10026_v33 = vld [vmem:[#allocation2 + $0x18] ss:$12 sps:$4 sm:$0xff]   ;;  %v8572_v34 = vpack.c.bf16 %v3672_v44, %v3672_v44 }
 0x2ab   : >> { %v3828_v25 = vshrl.u32 %v8571_v30, 16  ;;  %4183 = vst [vmem:[#allocation2 + $0x4c] sm:$0xf] %v8571_v30  ;;  %4391 = vst [vmem:[#allocation2 + $0x38] sm:$0xf] %v4225_v58  ;;  %v3831_v43 = vshll.u32 %v8571_v30, 16  ;;  %v3641_v63 = vadd.f32 %v3533_v37, %v11575_v40  ;;  %v8943_v2 = vadd.f32 %v8942_v49, %v8941_v59  ;;  %v8944_v21 = vpop.f32.mrf.mxu0  ;;  %5109 = vmatmul.mubr.bf16.vlgmr.msra.gmra.mxu1 %v10026_v33 }
 0x2ac   : >> { %v3826_v24 = vsel %vm10694_vm10, %v3818_v5, %v3825_v17  ;;  %v4228_v29 = vrot.slane %v4227_v7, 4  ;;  %v3836_v52 = vshrl.u32 %v8572_v34, 16  ;;  %v3839_v45 = vshll.u32 %v8572_v34, 16  ;;  %4184 = vst [vmem:[#allocation2 + $0x58] sm:$0xf] %v8572_v34  ;;  %9641 = vmatpush3.bf16.msra.mxu1 %v11546_v18  ;;  %v10049_v44 = vld [vmem:[#allocation8 + $0xa8] sm:$0xff]  }
 0x2ad   : >> { %v3830_v12 = vrot.slane %v3828_v25, 7  ;;  %v4229_v22 = vrot.slane %v3828_v25, 4  ;;  %4090 = vst [vmem:[#allocation2 + $0x3c] sm:$0xf] %v3826_v24  ;;  %v4230_v62 = vrot.slane %v3831_v43, 5  ;;  %v3673_v50 = vmax.f32 %v3641_v63, 0.0  ;;  %v8945_v60 = vpop.f32.mrf.mxu0  ;;  %9642 = vmatprep.subr.bf16.mxu1 %v10040_v14 }
 0x2ae   : >> { %v4393_v40 = vsel %vm11076_vm14, %v4228_v29, %v4392_v35  ;;  %v3536_v30 = vadd.f32 %v11676_v42, %v8943_v2  ;;  %v10031_v5 = vld [vmem:[#allocation2 + $0x20] ss:$12 sps:$4 sm:$0xff]   ;;  %v3838_v49 = vrot.slane %v3836_v52, 7  ;;  %v4233_v17 = vrot.slane %v3839_v45, 5  ;;  %v11704_v35 = vpop.f32.mrf.mxu1  ;;  %v4396_v2 = vld [vmem:[#allocation2 + $0x5c] sm:$0xf] }
 0x2af   : >> { %v3833_v59 = vor.u32 %v3831_v43, %v3830_v12  ;;  %4394 = vst [vmem:[#allocation2 + $0x44] sm:$0xf] %v4393_v40  ;;  %v4231_v37 = vor.u32 %v4230_v62, %v4229_v22  ;;  %v4235_v58 = vrot.slane %v3836_v52, 4  ;;  %v8947_v7 = vpop.f32.mrf.mxu0  ;;  %v8573_v33 = vpack.c.bf16 %v3673_v50, %v3673_v50  ;;  %9608 = vmatprep.mubr.bf16.mxu0 %v10031_v5 }
 0x2b0   : >> { %v3642_v56 = vadd.f32 %v3536_v30, %v11583_v41  ;;  %v8946_v42 = vadd.f32 %v8945_v60, %v8944_v21  ;;  %v3834_v43 = vrot.slane %v3830_v12, 4  ;;  %v3841_v34 = vor.u32 %v3839_v45, %v3838_v49  ;;  %9643 = vmatpush3.bf16.msra.mxu1 %v10040_v14  ;;  %v10058_v45 = vld [vmem:[#allocation8 + $0xa0] sm:$0xff]   ;;  %v4095_v49 = vld [vmem:[#allocation2 + $0x60] sm:$0xf] }
 0x2b1   : >> { %v4092_v25 = vsel %vm10680_vm9, %v3833_v59, %v4091_v51  ;;  %v4232_v18 = vrot.slane %v4231_v37, 4  ;;  %v4236_v63 = vor.u32 %v4235_v58, %v4233_v17  ;;  %v8948_v24 = vpop.f32.mrf.mxu0  ;;  %v3844_v29 = vshrl.u32 %v8573_v33, 16  ;;  %4185 = vst [vmem:[#allocation2 + $0x64] sm:$0xf] %v8573_v33  ;;  %9644 = vmatprep.subr.bf16.mxu1 %v10049_v44 }
 0x2b2   : >> { %4093 = vst [vmem:[#allocation2 + $0x48] sm:$0xf] %v4092_v25  ;;  %v3847_v22 = vshll.u32 %v8573_v33, 16  ;;  %v3674_v62 = vmax.f32 %v3642_v56, 0.0  ;;  %v3541_v52 = vadd.f32 %v8946_v42, %v3540_v10  ;;  %v3842_v41 = vsel %vm10694_vm10, %v3834_v43, %v3841_v34  ;;  %v3543_v10 = vpop.f32.mrf.mxu1  ;;  %v10035_v25 = vld [vmem:[#allocation2 + $0x34] ss:$12 sps:$4 sm:$0xff]  }
 0x2b3   : >> { %v4234_v21 = vsel %vm11050_vm13, %v4232_v18, %v4233_v17  ;;  %v4237_v51 = vrot.slane %v4236_v63, 4  ;;  %v8949_v12 = vadd.f32 %v8948_v24, %v8947_v7  ;;  %v8950_v50 = vpop.f32.mrf.mxu0  ;;  %4094 = vst [vmem:[#allocation2 + $0x54] sm:$0xf] %v3842_v41  ;;  %v11710_v60 = vrot.slane %v3844_v29, 7  ;;  %v10070_v33 = vld [vmem:[#allocation8 + $0x38] sm:$0xff]   ;;  %v10075_v34 = vld [vmem:[#allocation8 + $0x70] sm:$0xff]   ;;  %5116 = vmatprep.mubr.bf16.mxu1 %v10035_v25 }
 0x2b4   : >> { %4395 = vst [vmem:[#allocation2 + $0x50] sm:$0xf] %v4234_v21  ;;  %v4238_v40 = vrot.slane %v3844_v29, 4  ;;  %v4239_v59 = vrot.slane %v3847_v22, 5  ;;  %v8574_v30 = vpack.c.bf16 %v3674_v62, %v3674_v62  ;;  %v10033_v14 = vld [vmem:[#allocation2 + $0x30] ss:$12 sps:$4 sm:$0xff]   ;;  %v2708_v5 = vadd.f32 %v11599_v6, %v11522_v32  ;;  %9645 = vmatpush3.bf16.msra.mxu1 %v10049_v44 }
 0x2b5   : >> { %v4397_v37 = vsel %vm11076_vm14, %v4237_v51, %v4396_v2  ;;  %v3643_v17 = vadd.f32 %v3541_v52, %v11593_v26  ;;  %v3544_v58 = vadd.f32 %v8949_v12, %v3543_v10  ;;  %v8951_v7 = vpop.f32.mrf.mxu0  ;;  %v3849_v56 = vor.u32 %v3847_v22, %v11710_v60  ;;  %9646 = vmatprep.subr.bf16.mxu1 %v10058_v45  ;;  %v10067_v26 = vld [vmem:[#allocation8 + $0x98] sm:$0xff]   ;;  %v11721_v12 = vpop.f32.mrf.mxu1 }
 0x2b6   : >> { %4398 = vst [vmem:[#allocation2 + $0x5c] sm:$0xf] %v4397_v37  ;;  %v4240_v42 = vor.u32 %v4239_v59, %v4238_v40  ;;  %v3852_v43 = vshrl.u32 %v8574_v30, 16  ;;  %4186 = vst [vmem:[#allocation2 + $0x70] sm:$0xf] %v8574_v30  ;;  %v3855_v32 = vshll.u32 %v8574_v30, 16  ;;  %v8952_v2 = vadd.f32 %v8951_v7, %v8950_v50  ;;  %5117 = vmatmul.mubr.bf16.gmra.mxu1 %v10033_v14 }
 0x2b7   : >> { %v10036_v18 = vld [vmem:[#allocation2 + $0x38] ss:$12 sps:$4 sm:$0xff]   ;;  %v3675_v6 = vmax.f32 %v3643_v17, 0.0  ;;  %v3644_v63 = vadd.f32 %v3544_v58, %v2708_v5  ;;  %v8953_v24 = vpop.f32.mrf.mxu0  ;;  %v4096_v29 = vsel %vm10680_vm9, %v3849_v56, %v4095_v49  ;;  %v11725_v59 = vadd.f32 %v11613_v8, %v11549_v20  ;;  %v4400_v14 = vld [vmem:[#allocation2 + $0x74] sm:$0xf] }
 0x2b8   : >> { %v4241_v62 = vrot.slane %v4240_v42, 4  ;;  %v3854_v52 = vrot.slane %v3852_v43, 7  ;;  %v4244_v22 = vrot.slane %v3852_v43, 4  ;;  %9609 = vmatmul.mubr.bf16.vlgmr.msra.gmra.mxu0 %v10036_v18  ;;  %4097 = vst [vmem:[#allocation2 + $0x60] sm:$0xf] %v4096_v29  ;;  %v4242_v41 = vrot.slane %v3855_v32, 5  ;;  %9647 = vmatpush3.bf16.msra.mxu1 %v10058_v45 }
 0x2b9   : >> { %v8575_v44 = vpack.c.bf16 %v3675_v6, %v3675_v6  ;;  %v3676_v21 = vmax.f32 %v3644_v63, 0.0  ;;  %v3549_v51 = vadd.f32 %v11689_v54, %v8952_v2  ;;  %v8954_v50 = vpop.f32.mrf.mxu0  ;;  %9177 = vmatpush3.bf16.msra.mxu0 %v10070_v33  ;;  %v10076_v40 = vld [vmem:[#allocation8 + $0x30] sm:$0xff]   ;;  %v3850_v30 = vrot.slane %v11710_v60, 4  ;;  %v10082_v49 = vld [vmem:[#allocation8 + $0x68] sm:$0xff]   ;;  %9648 = vmatprep.subr.bf16.mxu1 %v10067_v26  ;;  %v3556_v63 = vpop.f32.mrf.mxu1 }
 0x2ba   : >> { %v3857_v10 = vor.u32 %v3855_v32, %v3854_v52  ;;  %v8955_v5 = vadd.f32 %v8954_v50, %v8953_v24  ;;  %9178 = vmatprep.subr.bf16.mxu0 %v10075_v34  ;;  %v11728_v37 = vld [vmem:[#allocation8 + $0x90] sm:$0xff]   ;;  %v4243_v54 = vsel %vm11050_vm13, %v4241_v62, %v4242_v41  ;;  %v4245_v17 = vor.u32 %v4244_v22, %v4242_v41  ;;  %v10037_v20 = vld [vmem:[#allocation2 + $0x48] ss:$12 sps:$4 sm:$0xff]   ;;  %v10083_v8 = vld [vmem:[#allocation8 + $0x28] sm:$0xff]  }
 0x2bb   : >> { %v3860_v58 = vshrl.u32 %v8575_v44, 16  ;;  %v3863_v7 = vshll.u32 %v8575_v44, 16  ;;  %4187 = vst [vmem:[#allocation2 + $0x7c] sm:$0xf] %v8575_v44  ;;  %v8956_v25 = vpop.f32.mrf.mxu0  ;;  %4399 = vst [vmem:[#allocation2 + $0x68] sm:$0xf] %v4243_v54  ;;  %v8576_v33 = vpack.c.bf16 %v3676_v21, %v3676_v21  ;;  %v3645_v56 = vadd.f32 %v3549_v51, %v11589_v46 }
 0x2bc   : >> { %v3858_v60 = vsel %vm10694_vm10, %v3850_v30, %v3857_v10  ;;  %v4099_v45 = vld [vmem:[#allocation2 + $0x78] sm:$0xf]  ;;  %v3552_v42 = vadd.f32 %v11704_v35, %v8955_v5  ;;  %v4246_v18 = vrot.slane %v4245_v17, 4  ;;  %9649 = vmatpush3.bf16.msra.mxu1 %v10067_v26  ;;  %v10088_v46 = vld [vmem:[#allocation8 + $0x60] sm:$0xff]   ;;  %v11742_v17 = vpop.f32.mrf.mxu1 }
 0x2bd   : >> { %v10039_v43 = vld [vmem:[#allocation2 + $0x4c] ss:$12 sps:$4 sm:$0xff]   ;;  %4098 = vst [vmem:[#allocation2 + $0x6c] sm:$0xf] %v3858_v60  ;;  %v3862_v34 = vrot.slane %v3860_v58, 7  ;;  %v4247_v32 = vrot.slane %v3860_v58, 4  ;;  %v8957_v2 = vpop.f32.mrf.mxu0  ;;  %9179 = vmatpush3.bf16.msra.mxu0 %v10076_v40  ;;  %9650 = vmatprep.subr.bf16.mxu1 %v11728_v37 }
 0x2be   : >> { %v4248_v6 = vrot.slane %v3863_v7, 5  ;;  %v3868_v24 = vshrl.u32 %v8576_v33, 16  ;;  %v3871_v29 = vshll.u32 %v8576_v33, 16  ;;  %4188 = vst [vmem:[#allocation2 + $0x88] sm:$0xf] %v8576_v33  ;;  %v3677_v62 = vmax.f32 %v3645_v56, 0.0  ;;  %5124 = vmatprep.mubr.bf16.mxu1 %v10039_v43  ;;  %9180 = vmatprep.subr.bf16.mxu0 %v10082_v49 }
 0x2bf   : >> { %v3646_v52 = vadd.f32 %v3552_v42, %v11596_v1  ;;  %v10041_v22 = vld [vmem:[#allocation2 + $0x50] ss:$12 sps:$4 sm:$0xff]   ;;  %v4401_v35 = vsel %vm11076_vm14, %v4246_v18, %v4400_v14  ;;  %v3865_v41 = vor.u32 %v3863_v7, %v3862_v34  ;;  %v3866_v44 = vrot.slane %v3862_v34, 4  ;;  %v8959_v51 = vpop.f32.mrf.mxu0  ;;  %5125 = vmatmul.mubr.bf16.gmra.mxu1 %v10037_v20  ;;  %v4404_v14 = vld [vmem:[#allocation2 + $0x8c] sm:$0xf] }
 0x2c0   : >> { %v4249_v21 = vor.u32 %v4248_v6, %v4247_v32  ;;  %v10093_v50 = vld [vmem:[#allocation8 + $0x88] sm:$0xff]   ;;  %4402 = vst [vmem:[#allocation2 + $0x74] sm:$0xf] %v4401_v35  ;;  %v3870_v40 = vrot.slane %v3868_v24, 7  ;;  %v4251_v30 = vrot.slane %v3871_v29, 5  ;;  %v4253_v10 = vrot.slane %v3868_v24, 4  ;;  %9612 = vmatprep.mubr.bf16.mxu0 %v10041_v22  ;;  %9651 = vmatpush3.bf16.msra.mxu1 %v11728_v37 }
 0x2c1   : >> { %v8577_v1 = vpack.c.bf16 %v3677_v62, %v3677_v62  ;;  %v4100_v26 = vsel %vm10680_vm9, %v3865_v41, %v4099_v45  ;;  %v3678_v54 = vmax.f32 %v3646_v52, 0.0  ;;  %v8958_v58 = vadd.f32 %v8957_v2, %v8956_v25  ;;  %v8960_v7 = vpop.f32.mrf.mxu0  ;;  %9181 = vmatpush3.bf16.msra.mxu0 %v10083_v8  ;;  %v10089_v49 = vld [vmem:[#allocation8 + $0x20] sm:$0xff]   ;;  %v10095_v60 = vld [vmem:[#allocation8 + $0x58] sm:$0xff]   ;;  %9652 = vmatprep.subr.bf16.mxu1 %v10093_v50 }
 0x2c2   : >> { %v4250_v5 = vrot.slane %v4249_v21, 4  ;;  %4101 = vst [vmem:[#allocation2 + $0x78] sm:$0xf] %v4100_v26  ;;  %v3873_v33 = vor.u32 %v3871_v29, %v3870_v40  ;;  %v4254_v56 = vor.u32 %v4253_v10, %v4251_v30  ;;  %9182 = vmatprep.subr.bf16.mxu0 %v10088_v46  ;;  %v4103_v45 = vld [vmem:[#allocation2 + $0x90] sm:$0xf]  ;;  %v8961_v25 = vadd.f32 %v8960_v7, %v8959_v51  ;;  %v10096_v21 = vld [vmem:[#allocation8 + $0x18] sm:$0xff]  }
 0x2c3   : >> { %v3876_v42 = vshrl.u32 %v8577_v1, 16  ;;  %v3879_v43 = vshll.u32 %v8577_v1, 16  ;;  %4189 = vst [vmem:[#allocation2 + $0x94] sm:$0xf] %v8577_v1  ;;  %v8578_v18 = vpack.c.bf16 %v3678_v54, %v3678_v54  ;;  %v3557_v34 = vadd.f32 %v8958_v58, %v3556_v63  ;;  %v8962_v32 = vpop.f32.mrf.mxu0  ;;  %v10106_v8 = vld [vmem:[#allocation8 + $0x80] sm:$0xff]   ;;  %v3559_v63 = vpop.f32.mrf.mxu1 }
 0x2c4   : >> { %v4252_v20 = vsel %vm11050_vm13, %v4250_v5, %v4251_v30  ;;  %v3874_v6 = vsel %vm10694_vm10, %v3866_v44, %v3873_v33  ;;  %v4255_v2 = vrot.slane %v4254_v56, 4  ;;  %v10042_v62 = vld [vmem:[#allocation2 + $0x60] ss:$12 sps:$4 sm:$0xff]   ;;  %v10044_v41 = vld [vmem:[#allocation2 + $0x64] ss:$12 sps:$4 sm:$0xff]   ;;  %v3560_v40 = vadd.f32 %v8961_v25, %v3559_v63  ;;  %9653 = vmatpush3.bf16.msra.mxu1 %v10093_v50  ;;  %v10109_v63 = vld [vmem:[#allocation8 + $0x8] sm:$0xff]  }
 0x2c5   : >> { %4403 = vst [vmem:[#allocation2 + $0x80] sm:$0xf] %v4252_v20  ;;  %v3878_v24 = vrot.slane %v3876_v42, 7  ;;  %v4256_v29 = vrot.slane %v3876_v42, 4  ;;  %4102 = vst [vmem:[#allocation2 + $0x84] sm:$0xf] %v3874_v6  ;;  %v3647_v46 = vadd.f32 %v3557_v34, %v11608_v16  ;;  %v8963_v35 = vpop.f32.mrf.mxu0  ;;  %9183 = vmatpush3.bf16.msra.mxu0 %v10089_v49  ;;  %5132 = vmatprep.mubr.bf16.mxu1 %v10044_v41  ;;  %v11755_v20 = vpop.f32.mrf.mxu1 }
 0x2c6   : >> { %v4257_v37 = vrot.slane %v3879_v43, 5  ;;  %v3884_v52 = vshrl.u32 %v8578_v18, 16  ;;  %v3887_v22 = vshll.u32 %v8578_v18, 16  ;;  %4190 = vst [vmem:[#allocation2 + $0xa0] sm:$0xf] %v8578_v18  ;;  %v4405_v44 = vsel %vm11076_vm14, %v4255_v2, %v4404_v14  ;;  %9184 = vmatprep.subr.bf16.mxu0 %v10095_v60  ;;  %v10101_v30 = vld [vmem:[#allocation8 + $0x50] sm:$0xff]   ;;  %9654 = vmatprep.subr.bf16.mxu1 %v10106_v8 }
 0x2c7   : >> { %v3881_v51 = vor.u32 %v3879_v43, %v3878_v24  ;;  %4406 = vst [vmem:[#allocation2 + $0x8c] sm:$0xf] %v4405_v44  ;;  %v8965_v16 = vpop.f32.mrf.mxu0  ;;  %v3679_v58 = vmax.f32 %v3647_v46, 0.0  ;;  %v3648_v7 = vadd.f32 %v3560_v40, %v11725_v59  ;;  %v8964_v14 = vadd.f32 %v8963_v35, %v8962_v32  ;;  %5133 = vmatmul.mubr.bf16.gmra.mxu1 %v10042_v62  ;;  %v10045_v49 = vld [vmem:[#allocation2 + $0x68] ss:$12 sps:$4 sm:$0xff]   ;;  %v10102_v34 = vld [vmem:[#allocation8 + $0x10] sm:$0xff]   ;;  %v3572_v44 = vpop.f32.mrf.mxu1 }
 0x2c8   : >> { %v4258_v10 = vor.u32 %v4257_v37, %v4256_v29  ;;  %v3886_v1 = vrot.slane %v3884_v52, 7  ;;  %v4260_v26 = vrot.slane %v3887_v22, 5  ;;  %v4262_v5 = vrot.slane %v3884_v52, 4  ;;  %v10121_v50 = vld [vmem:[#allocation8 + $0x1f8] sm:$0xff]   ;;  %v4408_v43 = vld [vmem:[#allocation2 + $0xa4] sm:$0xf]  ;;  %9613 = vmatmul.mubr.bf16.gmra.mxu0 %v10045_v49  ;;  %9655 = vmatpush3.bf16.msra.mxu1 %v10106_v8 }
 0x2c9   : >> { %v4104_v54 = vsel %vm10680_vm9, %v3881_v51, %v4103_v45  ;;  %v3882_v60 = vrot.slane %v3878_v24, 4  ;;  %v8966_v18 = vpop.f32.mrf.mxu0  ;;  %9185 = vmatpush3.bf16.msra.mxu0 %v10096_v21  ;;  %v8579_v25 = vpack.c.bf16 %v3679_v58, %v3679_v58  ;;  %v3680_v45 = vmax.f32 %v3648_v7, 0.0  ;;  %v10108_v32 = vld [vmem:[#allocation8 + $0x48] sm:$0xff]   ;;  %9312 = vmatprep.subr.bf16.mxu1 %v10121_v50  ;;  %v4107_v21 = vld [vmem:[#allocation2 + $0xa8] sm:$0xf] }
 0x2ca   : >> { %4105 = vst [vmem:[#allocation2 + $0x90] sm:$0xf] %v4104_v54  ;;  %v4259_v33 = vrot.slane %v4258_v10, 4  ;;  %v3889_v56 = vor.u32 %v3887_v22, %v3886_v1  ;;  %v4263_v42 = vor.u32 %v4262_v5, %v4260_v26  ;;  %v3565_v6 = vadd.f32 %v11721_v12, %v8964_v14  ;;  %9186 = vmatprep.subr.bf16.mxu0 %v10101_v30  ;;  %v10048_v40 = vld [vmem:[#allocation2 + $0x7c] ss:$12 sps:$4 sm:$0xff]   ;;  %v10114_v30 = vld [vmem:[#allocation8 + $0x40] sm:$0xff]  }
 0x2cb   : >> { %v8967_v59 = vadd.f32 %v8966_v18, %v8965_v16  ;;  %v8968_v62 = vpop.f32.mrf.mxu0  ;;  %v3892_v37 = vshrl.u32 %v8579_v25, 16  ;;  %v3895_v52 = vshll.u32 %v8579_v25, 16  ;;  %4191 = vst [vmem:[#allocation2 + $0xac] sm:$0xf] %v8579_v25  ;;  %v8580_v22 = vpack.c.bf16 %v3680_v45, %v3680_v45  ;;  %5140 = vmatprep.mubr.bf16.mxu1 %v10048_v40  ;;  %v10115_v18 = vld [vmem:[#allocation8] sm:$0xff]  }
 0x2cc   : >> { %v3890_v2 = vsel %vm10694_vm10, %v3882_v60, %v3889_v56  ;;  %v4261_v24 = vsel %vm11050_vm13, %v4259_v33, %v4260_v26  ;;  %v4264_v29 = vrot.slane %v4263_v42, 4  ;;  %v3649_v12 = vadd.f32 %v3565_v6, %v11603_v23  ;;  %v10046_v46 = vld [vmem:[#allocation2 + $0x78] ss:$12 sps:$4 sm:$0xff]   ;;  %v11771_v42 = vpop.f32.mrf.mxu1  ;;  %v4412_v45 = vld [vmem:[#allocation2 + $0xbc] sm:$0xf] }
 0x2cd   : >> { %4106 = vst [vmem:[#allocation2 + $0x9c] sm:$0xf] %v3890_v2  ;;  %4407 = vst [vmem:[#allocation2 + $0x98] sm:$0xf] %v4261_v24  ;;  %v11765_v35 = vadd.f32 %v11625_v11, %v11577_v61  ;;  %v3568_v8 = vadd.f32 %v11742_v17, %v8967_v59  ;;  %v8969_v51 = vpop.f32.mrf.mxu0  ;;  %9187 = vmatpush3.bf16.msra.mxu0 %v10102_v34  ;;  %v3894_v23 = vrot.slane %v3892_v37, 7  ;;  %v4265_v10 = vrot.slane %v3892_v37, 4 }
 0x2ce   : >> { %v4409_v41 = vsel %vm11076_vm14, %v4264_v29, %v4408_v43  ;;  %v4266_v1 = vrot.slane %v3895_v52, 5  ;;  %v3900_v26 = vshrl.u32 %v8580_v22, 16  ;;  %4192 = vst [vmem:[#allocation2 + $0xb8] sm:$0xf] %v8580_v22  ;;  %9188 = vmatprep.subr.bf16.mxu0 %v10108_v32  ;;  %v3903_v61 = vshll.u32 %v8580_v22, 16  ;;  %v10127_v59 = vld [vmem:[#allocation8 + $0x238] sm:$0xff]   ;;  %v3575_v40 = vpop.f32.mrf.mxu1 }
 0x2cf   : >> { %4410 = vst [vmem:[#allocation2 + $0xa4] sm:$0xf] %v4409_v41  ;;  %v3681_v11 = vmax.f32 %v3649_v12, 0.0  ;;  %v3650_v5 = vadd.f32 %v3568_v8, %v11610_v55  ;;  %v8970_v16 = vadd.f32 %v8969_v51, %v8968_v62  ;;  %v8971_v54 = vpop.f32.mrf.mxu0  ;;  %v10050_v17 = vld [vmem:[#allocation2 + $0x80] ss:$12 sps:$4 sm:$0xff]   ;;  %v3897_v58 = vor.u32 %v3895_v52, %v3894_v23  ;;  %5141 = vmatmul.mubr.bf16.gmra.mxu1 %v10046_v46 }
 0x2d0   : >> { %v3898_v7 = vrot.slane %v3894_v23, 4  ;;  %v4267_v14 = vor.u32 %v4266_v1, %v4265_v10  ;;  %v3902_v49 = vrot.slane %v3900_v26, 7  ;;  %v4269_v50 = vrot.slane %v3903_v61, 5  ;;  %9616 = vmatprep.mubr.bf16.mxu0 %v10050_v17  ;;  %v4111_v12 = vld [vmem:[#allocation2 + $0xc0] sm:$0xf] }
 0x2d1   : >> { %v4271_v60 = vrot.slane %v3900_v26, 4  ;;  %v8581_v33 = vpack.c.bf16 %v3681_v11, %v3681_v11  ;;  %v3682_v56 = vmax.f32 %v3650_v5, 0.0  ;;  %v8972_v43 = vpop.f32.mrf.mxu0  ;;  %9189 = vmatpush3.bf16.msra.mxu0 %v10109_v63  ;;  %v4108_v55 = vsel %vm10680_vm9, %v3897_v58, %v4107_v21  ;;  %v10053_v41 = vld [vmem:[#allocation2 + $0x94] ss:$12 sps:$4 sm:$0xff]  }
 0x2d2   : >> { %v4268_v34 = vrot.slane %v4267_v14, 4  ;;  %v3905_v25 = vor.u32 %v3903_v61, %v3902_v49  ;;  %v3573_v6 = vadd.f32 %v8970_v16, %v3572_v44  ;;  %9190 = vmatprep.subr.bf16.mxu0 %v10114_v30  ;;  %4109 = vst [vmem:[#allocation2 + $0xa8] sm:$0xf] %v4108_v55  ;;  %v8973_v63 = vadd.f32 %v8972_v43, %v8971_v54  ;;  %v11782_v49 = vpop.f32.mrf.mxu1 }
 0x2d3   : >> { %v4272_v32 = vor.u32 %v4271_v60, %v4269_v50  ;;  %v3908_v2 = vshrl.u32 %v8581_v33, 16  ;;  %v3911_v24 = vshll.u32 %v8581_v33, 16  ;;  %4193 = vst [vmem:[#allocation2 + $0xc4] sm:$0xf] %v8581_v33  ;;  %v8582_v29 = vpack.c.bf16 %v3682_v56, %v3682_v56  ;;  %v8974_v62 = vpop.f32.mrf.mxu0  ;;  %5148 = vmatprep.mubr.bf16.mxu1 %v10053_v41  ;;  %v4416_v33 = vld [vmem:[#allocation2 + $0xd4] sm:$0xf] }
 0x2d4   : >> { %v10051_v37 = vld [vmem:[#allocation2 + $0x90] ss:$12 sps:$4 sm:$0xff]   ;;  %v3906_v52 = vsel %vm10694_vm10, %v3898_v7, %v3905_v25  ;;  %v4270_v22 = vsel %vm11050_vm13, %v4268_v34, %v4269_v50  ;;  %v3651_v46 = vadd.f32 %v3573_v6, %v11620_v4  ;;  %v3576_v26 = vadd.f32 %v8973_v63, %v3575_v40 }
 0x2d5   : >> { %4110 = vst [vmem:[#allocation2 + $0xb4] sm:$0xf] %v3906_v52  ;;  %v4273_v21 = vrot.slane %v4272_v32, 4  ;;  %4411 = vst [vmem:[#allocation2 + $0xb0] sm:$0xf] %v4270_v22  ;;  %v3910_v8 = vrot.slane %v3908_v2, 7  ;;  %v8975_v30 = vpop.f32.mrf.mxu0  ;;  %9191 = vmatpush3.bf16.msra.mxu0 %v10115_v18  ;;  %v3588_v22 = vpop.f32.mrf.mxu1 }
 0x2d6   : >> { %v4274_v44 = vrot.slane %v3908_v2, 4  ;;  %v4275_v51 = vrot.slane %v3911_v24, 5  ;;  %4194 = vst [vmem:[#allocation2 + $0xd0] sm:$0xf] %v8582_v29  ;;  %v3916_v23 = vshrl.u32 %v8582_v29, 16  ;;  %v3919_v10 = vshll.u32 %v8582_v29, 16  ;;  %9688 = vmatprep.subr.bf16.mxu0 %v10127_v59 }
 0x2d7   : >> { %v3683_v1 = vmax.f32 %v3651_v46, 0.0  ;;  %v10054_v61 = vld [vmem:[#allocation2 + $0x98] ss:$12 sps:$4 sm:$0xff]   ;;  %v4413_v4 = vsel %vm11076_vm14, %v4273_v21, %v4412_v45  ;;  %v3913_v11 = vor.u32 %v3911_v24, %v3910_v8  ;;  %v3914_v5 = vrot.slane %v3910_v8, 4  ;;  %v8977_v54 = vpop.f32.mrf.mxu0  ;;  %5149 = vmatmul.mubr.bf16.gmra.mxu1 %v10051_v37 }
 0x2d8   : >> { %v4276_v16 = vor.u32 %v4275_v51, %v4274_v44  ;;  %4414 = vst [vmem:[#allocation2 + $0xbc] sm:$0xf] %v4413_v4  ;;  %v3918_v17 = vrot.slane %v3916_v23, 7  ;;  %v4278_v58 = vrot.slane %v3919_v10, 5  ;;  %v4280_v7 = vrot.slane %v3916_v23, 4  ;;  %9617 = vmatmul.mubr.bf16.gmra.mxu0 %v10054_v61  ;;  %v11799_v61 = vpop.f32.mrf.mxu1 }
 0x2d9   : >> { %v8583_v14 = vpack.c.bf16 %v3683_v1, %v3683_v1  ;;  %v4112_v50 = vsel %vm10680_vm9, %v3913_v11, %v4111_v12  ;;  %v3652_v56 = vadd.f32 %v3576_v26, %v11765_v35  ;;  %v8976_v43 = vadd.f32 %v8975_v30, %v8974_v62  ;;  %v8978_v18 = vpop.f32.mrf.mxu0  ;;  %v4115_v59 = vld [vmem:[#allocation2 + $0xd8] sm:$0xf] }
 0x2da   : >> { %v4277_v60 = vrot.slane %v4276_v16, 4  ;;  %4113 = vst [vmem:[#allocation2 + $0xc0] sm:$0xf] %v4112_v50  ;;  %v3921_v55 = vor.u32 %v3919_v10, %v3918_v17  ;;  %v4281_v34 = vor.u32 %v4280_v7, %v4278_v58  ;;  %v8979_v24 = vadd.f32 %v8978_v18, %v8977_v54  ;;  %v4420_v7 = vld [vmem:[#allocation2 + $0xec] sm:$0xf] }
 0x2db   : >> { %v3924_v25 = vshrl.u32 %v8583_v14, 16  ;;  %v3927_v45 = vshll.u32 %v8583_v14, 16  ;;  %4195 = vst [vmem:[#allocation2 + $0xdc] sm:$0xf] %v8583_v14  ;;  %v3684_v32 = vmax.f32 %v3652_v56, 0.0  ;;  %v3581_v2 = vadd.f32 %v11755_v20, %v8976_v43  ;;  %v8980_v29 = vpop.f32.mrf.mxu0 }
 0x2dc   : >> { %v4279_v6 = vsel %vm11050_vm13, %v4277_v60, %v4278_v58  ;;  %v3922_v35 = vsel %vm10694_vm10, %v3914_v5, %v3921_v55  ;;  %v4282_v62 = vrot.slane %v4281_v34, 4  ;;  %v10055_v12 = vld [vmem:[#allocation2 + $0xa8] ss:$12 sps:$4 sm:$0xff]   ;;  %v3584_v21 = vadd.f32 %v11771_v42, %v8979_v24  ;;  %v10057_v20 = vld [vmem:[#allocation2 + $0xac] ss:$12 sps:$4 sm:$0xff]  }
 0x2dd   : >> { %4415 = vst [vmem:[#allocation2 + $0xc8] sm:$0xf] %v4279_v6  ;;  %v3926_v37 = vrot.slane %v3924_v25, 7  ;;  %v4283_v52 = vrot.slane %v3924_v25, 4  ;;  %4114 = vst [vmem:[#allocation2 + $0xcc] sm:$0xf] %v3922_v35  ;;  %v8584_v63 = vpack.c.bf16 %v3684_v32, %v3684_v32  ;;  %v3653_v41 = vadd.f32 %v3581_v2, %v11615_v53  ;;  %v8981_v8 = vpop.f32.mrf.mxu0  ;;  %5156 = vmatprep.mubr.bf16.mxu1 %v10057_v20 }
 0x2de   : >> { %v4284_v46 = vrot.slane %v3927_v45, 5  ;;  %v4417_v44 = vsel %vm11076_vm14, %v4282_v62, %v4416_v33  ;;  %v8982_v40 = vadd.f32 %v8981_v8, %v8980_v29  ;;  %v3654_v42 = vadd.f32 %v3584_v21, %v11622_v31  ;;  %v13370_v2 = vld [vmem:[#allocation17_spill] sm:$0xff] }
 0x2df   : >> { %v3929_v51 = vor.u32 %v3927_v45, %v3926_v37  ;;  %4418 = vst [vmem:[#allocation2 + $0xd4] sm:$0xf] %v4417_v44  ;;  %v3932_v23 = vshrl.u32 %v8584_v63, 16  ;;  %v3935_v10 = vshll.u32 %v8584_v63, 16  ;;  %4196 = vst [vmem:[#allocation2 + $0xe8] sm:$0xf] %v8584_v63  ;;  %v8983_v26 = vpop.f32.mrf.mxu0  ;;  %5157 = vmatmul.mubr.bf16.gmra.mxu1 %v10055_v12 }
 0x2e0   : >> { %v4285_v30 = vor.u32 %v4284_v46, %v4283_v52  ;;  %v3685_v1 = vmax.f32 %v3653_v41, 0.0  ;;  %v3589_v4 = vadd.f32 %v8982_v40, %v3588_v22  ;;  %v10059_v11 = vld [vmem:[#allocation2 + $0xb0] ss:$12 sps:$4 sm:$0xff]   ;;  %v3686_v50 = vmax.f32 %v3654_v42, 0.0 }
 0x2e1   : >> { %v4116_v53 = vsel %vm10680_vm9, %v3929_v51, %v4115_v59  ;;  %v3934_v16 = vrot.slane %v3932_v23, 7  ;;  %v4287_v54 = vrot.slane %v3935_v10, 5  ;;  %v4289_v17 = vrot.slane %v3932_v23, 4  ;;  %v8984_v58 = vpop.f32.mrf.mxu0  ;;  %9620 = vmatprep.mubr.bf16.mxu0 %v10059_v11  ;;  %v3591_v59 = vpop.f32.mrf.mxu1  ;;  %v4119_v35 = vld [vmem:[#allocation2 + $0xf0] sm:$0xf] }
 0x2e2   : >> { %4117 = vst [vmem:[#allocation2 + $0xd8] sm:$0xf] %v4116_v53  ;;  %v4286_v5 = vrot.slane %v4285_v30, 4  ;;  %v8585_v14 = vpack.c.bf16 %v3685_v1, %v3685_v1  ;;  %v3655_v60 = vadd.f32 %v3589_v4, %v11632_v57  ;;  %v8985_v33 = vadd.f32 %v8984_v58, %v8983_v26  ;;  %v10062_v52 = vld [vmem:[#allocation2 + $0xc4] ss:$12 sps:$4 sm:$0xff]  }
 0x2e3   : >> { %v3930_v56 = vrot.slane %v3926_v37, 4  ;;  %v3937_v31 = vor.u32 %v3935_v10, %v3934_v16  ;;  %v4290_v18 = vor.u32 %v4289_v17, %v4287_v54  ;;  %v8986_v55 = vpop.f32.mrf.mxu0  ;;  %v8586_v45 = vpack.c.bf16 %v3686_v50, %v3686_v50  ;;  %5164 = vmatprep.mubr.bf16.mxu1 %v10062_v52  ;;  %v11810_v10 = vpop.f32.mrf.mxu1 }
 0x2e4   : >> { %v4288_v43 = vsel %vm11050_vm13, %v4286_v5, %v4287_v54  ;;  %v3940_v34 = vshrl.u32 %v8585_v14, 16  ;;  %v3943_v25 = vshll.u32 %v8585_v14, 16  ;;  %4197 = vst [vmem:[#allocation2 + $0xf4] sm:$0xf] %v8585_v14  ;;  %v3687_v6 = vmax.f32 %v3655_v60, 0.0 }
 0x2e5   : >> { %4419 = vst [vmem:[#allocation2 + $0xe0] sm:$0xf] %v4288_v43  ;;  %v10060_v32 = vld [vmem:[#allocation2 + $0xc0] ss:$12 sps:$4 sm:$0xff]   ;;  %v2756_v57 = vadd.f32 %v11637_v38, %v13370_v2  ;;  %v3938_v24 = vsel %vm10694_vm10, %v3930_v56, %v3937_v31  ;;  %v4291_v29 = vrot.slane %v4290_v18, 4  ;;  %v3592_v62 = vadd.f32 %v8985_v33, %v3591_v59  ;;  %v8987_v37 = vpop.f32.mrf.mxu0 }
 0x2e6   : >> { %4118 = vst [vmem:[#allocation2 + $0xe4] sm:$0xf] %v3938_v24  ;;  %v3942_v22 = vrot.slane %v3940_v34, 7  ;;  %v4292_v12 = vrot.slane %v3940_v34, 4  ;;  %v4293_v46 = vrot.slane %v3943_v25, 5  ;;  %v3948_v63 = vshrl.u32 %v8586_v45, 16  ;;  %v3604_v34 = vpop.f32.mrf.mxu1 }
 0x2e7   : >> { %4198 = vst [vmem:[#allocation2 + $0x100] sm:$0xf] %v8586_v45  ;;  %v4421_v41 = vsel %vm11076_vm14, %v4291_v29, %v4420_v7  ;;  %v3951_v21 = vshll.u32 %v8586_v45, 16  ;;  %v8587_v8 = vpack.c.bf16 %v3687_v6, %v3687_v6  ;;  %v3656_v38 = vadd.f32 %v3592_v62, %v2756_v57  ;;  %v8989_v20 = vpop.f32.mrf.mxu0  ;;  %v10063_v44 = vld [vmem:[#allocation2 + $0xc8] ss:$12 sps:$4 sm:$0xff]   ;;  %5165 = vmatmul.mubr.bf16.gmra.mxu1 %v10060_v32 }
 0x2e8   : >> { %4422 = vst [vmem:[#allocation2 + $0xec] sm:$0xf] %v4421_v41  ;;  %v3945_v51 = vor.u32 %v3943_v25, %v3942_v22  ;;  %v3946_v40 = vrot.slane %v3942_v22, 4  ;;  %v4294_v30 = vor.u32 %v4293_v46, %v4292_v12  ;;  %v3950_v23 = vrot.slane %v3948_v63, 7  ;;  %9621 = vmatmul.mubr.bf16.gmra.mxu0 %v10063_v44  ;;  %v4424_v54 = vld [vmem:[#allocation2 + $0x104] sm:$0xf] }
 0x2e9   : >> { %v4296_v1 = vrot.slane %v3951_v21, 5  ;;  %v4298_v26 = vrot.slane %v3948_v63, 4  ;;  %v3956_v53 = vshrl.u32 %v8587_v8, 16  ;;  %v3959_v42 = vshll.u32 %v8587_v8, 16  ;;  %4199 = vst [vmem:[#allocation2 + $0x10c] sm:$0xf] %v8587_v8  ;;  %v8990_v4 = vpop.f32.mrf.mxu0 }
 0x2ea   : >> { %v4120_v11 = vsel %vm10680_vm9, %v3945_v51, %v4119_v35  ;;  %v4295_v5 = vrot.slane %v4294_v30, 4  ;;  %v3953_v16 = vor.u32 %v3951_v21, %v3950_v23  ;;  %v3688_v17 = vmax.f32 %v3656_v38, 0.0  ;;  %v4123_v31 = vld [vmem:[#allocation2 + $0x108] sm:$0xf] }
 0x2eb   : >> { %4121 = vst [vmem:[#allocation2 + $0xf0] sm:$0xf] %v4120_v11  ;;  %v4299_v58 = vor.u32 %v4298_v26, %v4296_v1  ;;  %v3958_v7 = vrot.slane %v3956_v53, 7  ;;  %v4301_v14 = vrot.slane %v3956_v53, 4  ;;  %v4302_v50 = vrot.slane %v3959_v42, 5  ;;  %v8992_v60 = vpop.f32.mrf.mxu0 }
 0x2ec   : >> { %v3954_v33 = vsel %vm10694_vm10, %v3946_v40, %v3953_v16  ;;  %v4297_v56 = vsel %vm11050_vm13, %v4295_v5, %v4296_v1  ;;  %v8588_v43 = vpack.c.bf16 %v3688_v17, %v3688_v17  ;;  %v8988_v18 = vadd.f32 %v8987_v37, %v8986_v55  ;;  %v10066_v35 = vld [vmem:[#allocation2 + $0xdc] ss:$12 sps:$4 sm:$0xff]  }
 0x2ed   : >> { %4122 = vst [vmem:[#allocation2 + $0xfc] sm:$0xf] %v3954_v33  ;;  %v4300_v25 = vrot.slane %v4299_v58, 4  ;;  %4423 = vst [vmem:[#allocation2 + $0xf8] sm:$0xf] %v4297_v56  ;;  %v3961_v45 = vor.u32 %v3959_v42, %v3958_v7  ;;  %v4303_v6 = vor.u32 %v4302_v50, %v4301_v14  ;;  %v8993_v59 = vpop.f32.mrf.mxu0  ;;  %v8991_v29 = vadd.f32 %v8990_v4, %v8989_v20 }
 0x2ee   : >> { %v10064_v32 = vld [vmem:[#allocation2 + $0xd8] ss:$12 sps:$4 sm:$0xff]   ;;  %v3964_v2 = vshrl.u32 %v8588_v43, 16  ;;  %v3967_v57 = vshll.u32 %v8588_v43, 16  ;;  %4200 = vst [vmem:[#allocation2 + $0x118] sm:$0xf] %v8588_v43  ;;  %v3597_v24 = vadd.f32 %v11782_v49, %v8988_v18  ;;  %v8994_v52 = vadd.f32 %v8993_v59, %v8992_v60  ;;  %v11824_v49 = vpop.f32.mrf.mxu1  ;;  %5172 = vmatprep.mubr.bf16.mxu1 %v10066_v35 }
 0x2ef   : >> { %v4425_v62 = vsel %vm11076_vm14, %v4300_v25, %v4424_v54  ;;  %v4124_v55 = vsel %vm10680_vm9, %v3961_v45, %v4123_v31  ;;  %v4304_v37 = vrot.slane %v4303_v6, 4  ;;  %v8995_v22 = vpop.f32.mrf.mxu0  ;;  %v10068_v12 = vld [vmem:[#allocation2 + $0xe0] ss:$12 sps:$4 sm:$0xff]   ;;  %v3962_v8 = vrot.slane %v3958_v7, 4  ;;  %5173 = vmatmul.mubr.bf16.gmra.mxu1 %v10064_v32  ;;  %v4428_v1 = vld [vmem:[#allocation2 + $0x11c] sm:$0xf] }
 0x2f0   : >> { %4426 = vst [vmem:[#allocation2 + $0x104] sm:$0xf] %v4425_v62  ;;  %4125 = vst [vmem:[#allocation2 + $0x108] sm:$0xf] %v4124_v55  ;;  %v3966_v46 = vrot.slane %v3964_v2, 7  ;;  %v4305_v63 = vrot.slane %v3967_v57, 5  ;;  %v3657_v21 = vadd.f32 %v3597_v24, %v11628_v28  ;;  %v3600_v38 = vadd.f32 %v11799_v61, %v8991_v29  ;;  %9624 = vmatprep.mubr.bf16.mxu0 %v10068_v12  ;;  %v3607_v5 = vpop.f32.mrf.mxu1 }
 0x2f1   : >> { %v4307_v41 = vrot.slane %v3964_v2, 4  ;;  %v3605_v20 = vadd.f32 %v8994_v52, %v3604_v34  ;;  %v8996_v44 = vpop.f32.mrf.mxu0  ;;  %v11835_v54 = vld [vmem:[#allocation2 + $0xf4] ss:$12 sps:$4 sm:$0xff]   ;;  %v2772_v17 = vadd.f32 %v11649_v36, %v11630_v19 }
 0x2f2   : >> { %v3969_v51 = vor.u32 %v3967_v57, %v3966_v46  ;;  %v4306_v40 = vsel %vm11050_vm13, %v4304_v37, %v4305_v63  ;;  %v3689_v23 = vmax.f32 %v3657_v21, 0.0  ;;  %v3658_v28 = vadd.f32 %v3600_v38, %v11634_v9  ;;  %5180 = vmatprep.mubr.bf16.mxu1 %v11835_v54  ;;  %v11842_v45 = vpop.f32.mrf.mxu1  ;;  %v4127_v6 = vld [vmem:[#allocation2 + $0x120] sm:$0xf]  ;;  %v4432_v21 = vld [vmem:[#allocation2 + $0x134] sm:$0xf] }
 0x2f3   : >> { %v4308_v30 = vor.u32 %v4307_v41, %v4305_v63  ;;  %4427 = vst [vmem:[#allocation2 + $0x110] sm:$0xf] %v4306_v40  ;;  %v3659_v26 = vadd.f32 %v3605_v20, %v11644_v0  ;;  %v8997_v53 = vadd.f32 %v8996_v44, %v8995_v22  ;;  %v8998_v42 = vpop.f32.mrf.mxu0 }
 0x2f4   : >> { %v3970_v61 = vsel %vm10694_vm10, %v3962_v8, %v3969_v51  ;;  %v8589_v11 = vpack.c.bf16 %v3689_v23, %v3689_v23  ;;  %v11833_v16 = vld [vmem:[#allocation2 + $0xf0] ss:$12 sps:$4 sm:$0xff]   ;;  %v3690_v58 = vmax.f32 %v3658_v28, 0.0  ;;  %v4131_v8 = vld [vmem:[#allocation2 + $0x138] sm:$0xf]  ;;  %v3620_v44 = vpop.f32.mrf.mxu1 }
 0x2f5   : >> { %v4309_v4 = vrot.slane %v4308_v30, 4  ;;  %4126 = vst [vmem:[#allocation2 + $0x114] sm:$0xf] %v3970_v61  ;;  %v3691_v9 = vmax.f32 %v3659_v26, 0.0  ;;  %v3608_v7 = vadd.f32 %v8997_v53, %v3607_v5  ;;  %v8999_v0 = vpop.f32.mrf.mxu0  ;;  %v11853_v28 = vld [vmem:[#allocation2 + $0x10c] ss:$12 sps:$4 sm:$0xff]  }
 0x2f6   : >> { %v3972_v50 = vshrl.u32 %v8589_v11, 16  ;;  %v3975_v60 = vshll.u32 %v8589_v11, 16  ;;  %4201 = vst [vmem:[#allocation2 + $0x124] sm:$0xf] %v8589_v11  ;;  %v9000_v33 = vadd.f32 %v8999_v0, %v8998_v42  ;;  %v8590_v56 = vpack.c.bf16 %v3690_v58, %v3690_v58  ;;  %v13371_v61 = vld [vmem:[#allocation18_spill] sm:$0xff] }
 0x2f7   : >> { %v4429_v14 = vsel %vm11076_vm14, %v4309_v4, %v4428_v1  ;;  %v8591_v31 = vpack.c.bf16 %v3691_v9, %v3691_v9  ;;  %v3660_v43 = vadd.f32 %v3608_v7, %v2772_v17  ;;  %v9001_v18 = vpop.f32.mrf.mxu0  ;;  %v10074_v19 = vld [vmem:[#allocation2 + $0xf8] ss:$12 sps:$4 sm:$0xff]   ;;  %5181 = vmatmul.mubr.bf16.gmra.mxu1 %v11833_v16 }
 0x2f8   : >> { %4430 = vst [vmem:[#allocation2 + $0x11c] sm:$0xf] %v4429_v14  ;;  %v3974_v36 = vrot.slane %v3972_v50, 7  ;;  %v4310_v34 = vrot.slane %v3972_v50, 4  ;;  %v4311_v25 = vrot.slane %v3975_v60, 5  ;;  %v3980_v59 = vshrl.u32 %v8590_v56, 16  ;;  %9625 = vmatmul.mubr.bf16.gmra.mxu0 %v10074_v19  ;;  %5188 = vmatprep.mubr.bf16.mxu1 %v11853_v28 }
 0x2f9   : >> { %v3983_v32 = vshll.u32 %v8590_v56, 16  ;;  %4202 = vst [vmem:[#allocation2 + $0x130] sm:$0xf] %v8590_v56  ;;  %v3988_v2 = vshrl.u32 %v8591_v31, 16  ;;  %v3991_v57 = vshll.u32 %v8591_v31, 16  ;;  %v9002_v24 = vpop.f32.mrf.mxu0  ;;  %v3692_v62 = vmax.f32 %v3660_v43, 0.0 }
 0x2fa   : >> { %4203 = vst [vmem:[#allocation2 + $0x13c] sm:$0xf] %v8591_v31  ;;  %v3977_v29 = vor.u32 %v3975_v60, %v3974_v36  ;;  %v4312_v35 = vor.u32 %v4311_v25, %v4310_v34  ;;  %v3613_v55 = vadd.f32 %v11810_v10, %v9000_v33  ;;  %v3982_v37 = vrot.slane %v3980_v59, 7  ;;  %v11863_v33 = vpop.f32.mrf.mxu1 }
 0x2fb   : >> { %v4314_v52 = vrot.slane %v3983_v32, 5  ;;  %v4316_v22 = vrot.slane %v3980_v59, 4  ;;  %v11846_v12 = vrot.slane %v3988_v2, 7  ;;  %v9004_v46 = vpop.f32.mrf.mxu0  ;;  %v4319_v38 = vrot.slane %v3988_v2, 4 }
 0x2fc   : >> { %v4128_v63 = vsel %vm10680_vm9, %v3977_v29, %v4127_v6  ;;  %v4313_v41 = vrot.slane %v4312_v35, 4  ;;  %v4320_v20 = vrot.slane %v3991_v57, 5  ;;  %v3978_v51 = vrot.slane %v3974_v36, 4  ;;  %v11851_v1 = vld [vmem:[#allocation2 + $0x108] ss:$12 sps:$4 sm:$0xff]   ;;  %v3623_v35 = vpop.f32.mrf.mxu1 }
 0x2fd   : >> { %4129 = vst [vmem:[#allocation2 + $0x120] sm:$0xf] %v4128_v63  ;;  %v3985_v40 = vor.u32 %v3983_v32, %v3982_v37  ;;  %v4317_v30 = vor.u32 %v4316_v22, %v4314_v52  ;;  %v3993_v10 = vor.u32 %v3991_v57, %v11846_v12  ;;  %v9005_v23 = vpop.f32.mrf.mxu0  ;;  %v8592_v42 = vpack.c.bf16 %v3692_v62, %v3692_v62  ;;  %v4436_v62 = vld [vmem:[#allocation2 + $0x14c] sm:$0xf]  ;;  %v4135_v37 = vld [vmem:[#allocation2 + $0x150] sm:$0xf] }
 0x2fe   : >> { %v4315_v26 = vsel %vm11050_vm13, %v4313_v41, %v4314_v52  ;;  %v4321_v53 = vor.u32 %v4320_v20, %v4319_v38  ;;  %v3661_v4 = vadd.f32 %v3613_v55, %v13371_v61  ;;  %v9003_v9 = vadd.f32 %v9002_v24, %v9001_v18  ;;  %v13372_v22 = vld [vmem:[#allocation19_spill] sm:$0xff] }
 0x2ff   : >> { %v10081_v11 = vld [vmem:[#allocation2 + $0x110] ss:$12 sps:$4 sm:$0xff]   ;;  %v3986_v5 = vsel %vm10694_vm10, %v3978_v51, %v3985_v40  ;;  %v4318_v17 = vrot.slane %v4317_v30, 4  ;;  %4431 = vst [vmem:[#allocation2 + $0x128] sm:$0xf] %v4315_v26  ;;  %v4132_v58 = vsel %vm10680_vm9, %v3993_v10, %v4131_v8  ;;  %v9007_v7 = vpop.f32.mrf.mxu0  ;;  %v3996_v14 = vshrl.u32 %v8592_v42, 16  ;;  %5189 = vmatmul.mubr.bf16.gmra.mxu1 %v11851_v1 }
 0x300   : >> { %4130 = vst [vmem:[#allocation2 + $0x12c] sm:$0xf] %v3986_v5  ;;  %4133 = vst [vmem:[#allocation2 + $0x138] sm:$0xf] %v4132_v58  ;;  %v4322_v0 = vrot.slane %v4321_v53, 4  ;;  %v3999_v50 = vshll.u32 %v8592_v42, 16  ;;  %9628 = vmatprep.mubr.bf16.mxu0 %v10081_v11  ;;  %v2788_v56 = vadd.f32 %v11660_v3, %v11652_v47  ;;  %v3616_v43 = vadd.f32 %v11824_v49, %v9003_v9 }
 0x301   : >> { %4204 = vst [vmem:[#allocation2 + $0x148] sm:$0xf] %v8592_v42  ;;  %v3693_v60 = vmax.f32 %v3661_v4, 0.0  ;;  %v4433_v31 = vsel %vm11076_vm14, %v4318_v17, %v4432_v21  ;;  %v9006_v18 = vadd.f32 %v9005_v23, %v9004_v46  ;;  %v9008_v19 = vpop.f32.mrf.mxu0  ;;  %v3998_v36 = vrot.slane %v3996_v14, 7  ;;  %v11882_v42 = vld [vmem:[#allocation2 + $0x124] ss:$12 sps:$4 sm:$0xff]  }
 0x302   : >> { %4434 = vst [vmem:[#allocation2 + $0x134] sm:$0xf] %v4433_v31  ;;  %v4323_v34 = vrot.slane %v3999_v50, 5  ;;  %v4325_v25 = vrot.slane %v3996_v14, 4  ;;  %v3994_v59 = vrot.slane %v11846_v12, 4  ;;  %v3662_v32 = vadd.f32 %v3616_v43, %v11646_v39  ;;  %5196 = vmatprep.mubr.bf16.mxu1 %v11882_v42 }
 0x303   : >> { %v8593_v6 = vpack.c.bf16 %v3693_v60, %v3693_v60  ;;  %v3621_v2 = vadd.f32 %v9006_v18, %v3620_v44  ;;  %v9009_v47 = vadd.f32 %v9008_v19, %v9007_v7  ;;  %v9010_v3 = vpop.f32.mrf.mxu0  ;;  %v4001_v57 = vor.u32 %v3999_v50, %v3998_v36  ;;  %v4440_v43 = vld [vmem:[#allocation2 + $0x164] sm:$0xf] }
 0x304   : >> { %v4324_v49 = vsel %vm11050_vm13, %v4322_v0, %v4323_v34  ;;  %v4326_v24 = vor.u32 %v4325_v25, %v4323_v34  ;;  %v3694_v52 = vmax.f32 %v3662_v32, 0.0  ;;  %v13373_v34 = vld [vmem:[#allocation20_spill] sm:$0xff] }
 0x305   : >> { %v4004_v29 = vshrl.u32 %v8593_v6, 16  ;;  %4205 = vst [vmem:[#allocation2 + $0x154] sm:$0xf] %v8593_v6  ;;  %4435 = vst [vmem:[#allocation2 + $0x140] sm:$0xf] %v4324_v49  ;;  %v4007_v55 = vshll.u32 %v8593_v6, 16  ;;  %v3663_v12 = vadd.f32 %v3621_v2, %v13372_v22  ;;  %v3624_v46 = vadd.f32 %v9009_v47, %v3623_v35  ;;  %v9011_v39 = vpop.f32.mrf.mxu0 }
 0x306   : >> { %v4002_v63 = vsel %vm10694_vm10, %v3994_v59, %v4001_v57  ;;  %v4327_v41 = vrot.slane %v4326_v24, 4  ;;  %v8594_v20 = vpack.c.bf16 %v3694_v52, %v3694_v52  ;;  %v9012_v53 = vadd.f32 %v9011_v39, %v9010_v3  ;;  %v4139_v32 = vld [vmem:[#allocation2 + $0x168] sm:$0xf] }
 0x307   : >> { %v4006_v21 = vrot.slane %v4004_v29, 7  ;;  %v4328_v8 = vrot.slane %v4004_v29, 4  ;;  %4134 = vst [vmem:[#allocation2 + $0x144] sm:$0xf] %v4002_v63  ;;  %v4329_v38 = vrot.slane %v4007_v55, 5  ;;  %v3695_v44 = vmax.f32 %v3663_v12, 0.0  ;;  %v9013_v30 = vpop.f32.mrf.mxu0 }
 0x308   : >> { %v3664_v51 = vadd.f32 %v3624_v46, %v2788_v56  ;;  %v11878_v40 = vld [vmem:[#allocation2 + $0x120] ss:$12 sps:$4 sm:$0xff]   ;;  %v4437_v10 = vsel %vm11076_vm14, %v4327_v41, %v4436_v62  ;;  %v4012_v4 = vshrl.u32 %v8594_v20, 16  ;;  %v4015_v11 = vshll.u32 %v8594_v20, 16  ;;  %4206 = vst [vmem:[#allocation2 + $0x160] sm:$0xf] %v8594_v20 }
 0x309   : >> { %v4009_v23 = vor.u32 %v4007_v55, %v4006_v21  ;;  %v4010_v26 = vrot.slane %v4006_v21, 4  ;;  %4438 = vst [vmem:[#allocation2 + $0x14c] sm:$0xf] %v4437_v10  ;;  %v4330_v61 = vor.u32 %v4329_v38, %v4328_v8  ;;  %v8595_v5 = vpack.c.bf16 %v3695_v44, %v3695_v44  ;;  %v10087_v17 = vld [vmem:[#allocation2 + $0x128] ss:$12 sps:$4 sm:$0xff]   ;;  %v9014_v58 = vpop.f32.mrf.mxu0  ;;  %5197 = vmatmul.mubr.bf16.gmra.mxu1 %v11878_v40 }
 0x30a   : >> { %v3696_v7 = vmax.f32 %v3664_v51, 0.0  ;;  %v3629_v0 = vadd.f32 %v11842_v45, %v9012_v53  ;;  %v9015_v14 = vadd.f32 %v9014_v58, %v9013_v30  ;;  %v4014_v60 = vrot.slane %v4012_v4, 7  ;;  %9629 = vmatmul.mubr.bf16.gmra.mxu0 %v10087_v17  ;;  %v13374_v44 = vld [vmem:[#allocation21_spill] sm:$0xff] }
 0x30b   : >> { %v4136_v9 = vsel %vm10680_vm9, %v4009_v23, %v4135_v37  ;;  %v4331_v50 = vrot.slane %v4330_v61, 4  ;;  %v4332_v56 = vrot.slane %v4015_v11, 5  ;;  %v4334_v31 = vrot.slane %v4012_v4, 4  ;;  %4207 = vst [vmem:[#allocation2 + $0x16c] sm:$0xf] %v8595_v5 }
 0x30c   : >> { %4137 = vst [vmem:[#allocation2 + $0x150] sm:$0xf] %v4136_v9  ;;  %v4020_v18 = vshrl.u32 %v8595_v5, 16  ;;  %v4023_v19 = vshll.u32 %v8595_v5, 16  ;;  %v8596_v36 = vpack.c.bf16 %v3696_v7, %v3696_v7  ;;  %v3665_v25 = vadd.f32 %v3629_v0, %v13373_v34  ;;  %v4444_v61 = vld [vmem:[#allocation2 + $0x17c] sm:$0xf] }
 0x30d   : >> { %v4017_v6 = vor.u32 %v4015_v11, %v4014_v60  ;;  %v4333_v45 = vsel %vm11050_vm13, %v4331_v50, %v4332_v56  ;;  %v4335_v59 = vor.u32 %v4334_v31, %v4332_v56  ;;  %v3632_v2 = vadd.f32 %v11863_v33, %v9015_v14  ;;  %v11897_v33 = vld [vmem:[#allocation2 + $0x13c] ss:$12 sps:$4 sm:$0xff]   ;;  %v4143_v9 = vld [vmem:[#allocation2 + $0x180] sm:$0xf] }
 0x30e   : >> { %4439 = vst [vmem:[#allocation2 + $0x158] sm:$0xf] %v4333_v45  ;;  %v4022_v47 = vrot.slane %v4020_v18, 7  ;;  %v4337_v3 = vrot.slane %v4020_v18, 4  ;;  %v4338_v57 = vrot.slane %v4023_v19, 5  ;;  %v4028_v49 = vshrl.u32 %v8596_v36, 16  ;;  %5204 = vmatprep.mubr.bf16.mxu1 %v11897_v33 }
 0x30f   : >> { %4208 = vst [vmem:[#allocation2 + $0x178] sm:$0xf] %v8596_v36  ;;  %v4018_v24 = vsel %vm10694_vm10, %v4010_v26, %v4017_v6  ;;  %v4336_v29 = vrot.slane %v4335_v59, 4  ;;  %v4031_v35 = vshll.u32 %v8596_v36, 16  ;;  %v3697_v62 = vmax.f32 %v3665_v25, 0.0 }
 0x310   : >> { %v11895_v55 = vld [vmem:[#allocation2 + $0x138] ss:$12 sps:$4 sm:$0xff]   ;;  %4138 = vst [vmem:[#allocation2 + $0x15c] sm:$0xf] %v4018_v24  ;;  %v4025_v37 = vor.u32 %v4023_v19, %v4022_v47  ;;  %v4026_v52 = vrot.slane %v4022_v47, 4  ;;  %v4339_v22 = vor.u32 %v4338_v57, %v4337_v3  ;;  %v4030_v12 = vrot.slane %v4028_v49, 7 }
 0x311   : >> { %v4441_v46 = vsel %vm11076_vm14, %v4336_v29, %v4440_v43  ;;  %v4341_v39 = vrot.slane %v4031_v35, 5  ;;  %v4343_v63 = vrot.slane %v4028_v49, 4  ;;  %v8597_v41 = vpack.c.bf16 %v3697_v62, %v3697_v62  ;;  %v10094_v21 = vld [vmem:[#allocation2 + $0x140] ss:$12 sps:$4 sm:$0xff]   ;;  %5205 = vmatmul.mubr.bf16.gmra.mxu1 %v11895_v55  ;;  %v4448_v47 = vld [vmem:[#allocation2 + $0x194] sm:$0xf] }
 0x312   : >> { %4442 = vst [vmem:[#allocation2 + $0x164] sm:$0xf] %v4441_v46  ;;  %v4140_v8 = vsel %vm10680_vm9, %v4025_v37, %v4139_v32  ;;  %v4340_v38 = vrot.slane %v4339_v22, 4  ;;  %v4033_v20 = vor.u32 %v4031_v35, %v4030_v12  ;;  %v3666_v51 = vadd.f32 %v3632_v2, %v13374_v44  ;;  %9632 = vmatprep.mubr.bf16.mxu0 %v10094_v21  ;;  %v11914_v56 = vld [vmem:[#allocation2 + $0x154] ss:$12 sps:$4 sm:$0xff]   ;;  %v10248_v44 = vld [vmem:[#allocation8 + $0x238] sm:$0xff]  }
 0x313   : >> { %4141 = vst [vmem:[#allocation2 + $0x168] sm:$0xf] %v4140_v8  ;;  %v4344_v30 = vor.u32 %v4343_v63, %v4341_v39  ;;  %v4036_v10 = vshrl.u32 %v8597_v41, 16  ;;  %v4039_v23 = vshll.u32 %v8597_v41, 16  ;;  %4209 = vst [vmem:[#allocation2 + $0x184] sm:$0xf] %v8597_v41  ;;  %5212 = vmatprep.mubr.bf16.mxu1 %v11914_v56 }
 0x314   : >> { %v4034_v26 = vsel %vm10694_vm10, %v4026_v52, %v4033_v20  ;;  %v4342_v53 = vsel %vm11050_vm13, %v4340_v38, %v4341_v39  ;;  %v3698_v4 = vmax.f32 %v3666_v51, 0.0  ;;  %v10116_v37 = vld [vmem:[#allocation2 + $0x8] ss:$12 sps:$4 sm:$0xff]   ;;  %v10119_v22 = vld [vmem:[#allocation2 + $0x4] ss:$12 sps:$4 sm:$0xff]   ;;  %v10136_v51 = vld [vmem:[#allocation8 + $0x1e8] sm:$0xff]  }
 0x315   : >> { %4142 = vst [vmem:[#allocation2 + $0x174] sm:$0xf] %v4034_v26  ;;  %v4345_v11 = vrot.slane %v4344_v30, 4  ;;  %4443 = vst [vmem:[#allocation2 + $0x170] sm:$0xf] %v4342_v53  ;;  %v4038_v5 = vrot.slane %v4036_v10, 7 }
 0x316   : >> { %v4346_v17 = vrot.slane %v4036_v10, 4  ;;  %v4347_v58 = vrot.slane %v4039_v23, 5  ;;  %v8598_v7 = vpack.c.bf16 %v3698_v4, %v3698_v4  ;;  %v11922_v3 = vld [vmem:[#allocation2 + $0x16c] ss:$12 sps:$4 sm:$0xff]   ;;  %v10126_v41 = vld [vmem:[#allocation2 + $0x1c] ss:$12 sps:$4 sm:$0xff]  }
 0x317   : >> { %v4445_v0 = vsel %vm11076_vm14, %v4345_v11, %v4444_v61  ;;  %v4041_v14 = vor.u32 %v4039_v23, %v4038_v5  ;;  %v11912_v60 = vld [vmem:[#allocation2 + $0x150] ss:$12 sps:$4 sm:$0xff]   ;;  %v4042_v45 = vrot.slane %v4038_v5, 4  ;;  %v10117_v46 = vld [vmem:[#allocation2] ss:$12 sps:$4 sm:$0xff]  }
 0x318   : >> { %v4348_v50 = vor.u32 %v4347_v58, %v4346_v17  ;;  %4446 = vst [vmem:[#allocation2 + $0x17c] sm:$0xf] %v4445_v0  ;;  %v4044_v31 = vshrl.u32 %v8598_v7, 16  ;;  %v4047_v43 = vshll.u32 %v8598_v7, 16  ;;  %4210 = vst [vmem:[#allocation2 + $0x190] sm:$0xf] %v8598_v7 }
 0x319   : >> { %v4144_v18 = vsel %vm10680_vm9, %v4041_v14, %v4143_v9  ;;  %v10100_v36 = vld [vmem:[#allocation2 + $0x158] ss:$12 sps:$4 sm:$0xff]   ;;  %5213 = vmatmul.mubr.bf16.gmra.mxu1 %v11912_v60  ;;  %v10123_v39 = vld [vmem:[#allocation8 + $0x1b8] sm:$0xff]   ;;  %v10128_v26 = vld [vmem:[#allocation2 + $0x50] ss:$12 sps:$4 sm:$0xff]  }
 0x31a   : >> { %v4349_v19 = vrot.slane %v4348_v50, 4  ;;  %4145 = vst [vmem:[#allocation2 + $0x180] sm:$0xf] %v4144_v18  ;;  %v4046_v34 = vrot.slane %v4044_v31, 7  ;;  %v4350_v25 = vrot.slane %v4047_v43, 5  ;;  %v4352_v6 = vrot.slane %v4044_v31, 4  ;;  %9633 = vmatmul.mubr.bf16.gmra.mxu0 %v10100_v36  ;;  %5220 = vmatprep.mubr.bf16.mxu1 %v11922_v3 }
 0x31b   : >> { %v10120_v63 = vld [vmem:[#allocation2 + $0x20] ss:$12 sps:$4 sm:$0xff]   ;;  %v10122_v8 = vld [vmem:[#allocation2 + $0x38] ss:$12 sps:$4 sm:$0xff]   ;;  %v10144_v61 = vld [vmem:[#allocation8 + $0x1e0] sm:$0xff]  }
 0x31c   : >> { %v4049_v59 = vor.u32 %v4047_v43, %v4046_v34  ;;  %v4351_v32 = vsel %vm11050_vm13, %v4349_v19, %v4350_v25  ;;  %v4353_v2 = vor.u32 %v4352_v6, %v4350_v25  ;;  %v11926_v24 = vld [vmem:[#allocation2 + $0x168] ss:$12 sps:$4 sm:$0xff]   ;;  %v10129_v21 = vld [vmem:[#allocation8 + $0x1f0] sm:$0xff]   ;;  %v10157_v30 = vld [vmem:[#allocation8 + $0x228] sm:$0xff]  }
 0x31d   : >> { %4447 = vst [vmem:[#allocation2 + $0x188] sm:$0xf] %v4351_v32  ;;  %v10142_v38 = vld [vmem:[#allocation8 + $0x230] sm:$0xff]   ;;  %v10138_v23 = vld [vmem:[#allocation8 + $0x1a8] sm:$0xff]   ;;  %v10130_v4 = vld [vmem:[#allocation2 + $0x68] ss:$12 sps:$4 sm:$0xff]  }
 0x31e   : >> { %v4050_v57 = vsel %vm10694_vm10, %v4042_v45, %v4049_v59  ;;  %v4354_v49 = vrot.slane %v4353_v2, 4  ;;  %v10131_v20 = vld [vmem:[#allocation8 + $0x1b0] sm:$0xff]   ;;  %v10172_v11 = vld [vmem:[#allocation8 + $0x220] sm:$0xff]   ;;  %v10151_v17 = vld [vmem:[#allocation8 + $0x1d8] sm:$0xff]  }
 0x31f   : >> { %4146 = vst [vmem:[#allocation2 + $0x18c] sm:$0xf] %v4050_v57  ;;  %v10107_v29 = vld [vmem:[#allocation2 + $0x170] ss:$12 sps:$4 sm:$0xff]   ;;  %v10124_v10 = vld [vmem:[#allocation2 + $0x18] ss:$12 sps:$4 sm:$0xff]  }
 0x320   : >> { %v4449_v35 = vsel %vm11076_vm14, %v4354_v49, %v4448_v47  ;;  %9636 = vmatprep.mubr.bf16.mxu0 %v10107_v29  ;;  %v10112_v62 = vld [vmem:[#allocation2 + $0x184] ss:$12 sps:$4 sm:$0xff]   ;;  %v11932_v53 = vld [vmem:[#allocation2 + $0x34] ss:$12 sps:$4 sm:$0xff]   ;;  %v10182_v58 = vld [vmem:[#allocation8 + $0x218] sm:$0xff]  }
 0x321   : >> { %4450 = vst [vmem:[#allocation2 + $0x194] sm:$0xf] %v4449_v35  ;;  %5221 = vmatmul.mubr.bf16.gmra.mxu1 %v11926_v24  ;;  %v10146_v5 = vld [vmem:[#allocation8 + $0x1a0] sm:$0xff]   ;;  %v10153_v7 = vld [vmem:[#allocation8 + $0x198] sm:$0xff]   ;;  %v10159_v50 = vld [vmem:[#allocation8 + $0x1d0] sm:$0xff]  }
 0x322   : >> { %5228 = vmatprep.mubr.bf16.mxu1 %v10112_v62  ;;  %v11935_v9 = vld [vmem:[#allocation2 + $0x30] ss:$12 sps:$4 sm:$0xff]   ;;  %v10135_v0 = vld [vmem:[#allocation2 + $0x80] ss:$12 sps:$4 sm:$0xff]   ;;  %v10137_v31 = vld [vmem:[#allocation2 + $0x98] ss:$12 sps:$4 sm:$0xff]  }
 0x323   : >> { %v11937_v14 = vld [vmem:[#allocation2 + $0x4c] ss:$12 sps:$4 sm:$0xff]   ;;  %v10183_v43 = vld [vmem:[#allocation8 + $0x210] sm:$0xff]   ;;  %v11941_v34 = vld [vmem:[#allocation2 + $0x48] ss:$12 sps:$4 sm:$0xff]  }
 0x324   : >> { %v10161_v18 = vld [vmem:[#allocation8 + $0x190] sm:$0xff]   ;;  %v10166_v19 = vld [vmem:[#allocation8 + $0x1c8] sm:$0xff]   ;;  %v10174_v59 = vld [vmem:[#allocation8 + $0x1c0] sm:$0xff]  }
 0x325   : >> { %v10184_v36 = vld [vmem:[#allocation8 + $0x208] sm:$0xff]   ;;  %v11943_v45 = vld [vmem:[#allocation2 + $0x64] ss:$12 sps:$4 sm:$0xff]   ;;  %v10145_v32 = vld [vmem:[#allocation2 + $0xc8] ss:$12 sps:$4 sm:$0xff]  }
 0x326   : >> { %v10110_v52 = vld [vmem:[#allocation2 + $0x180] ss:$12 sps:$4 sm:$0xff]   ;;  %v10168_v25 = vld [vmem:[#allocation8 + $0x188] sm:$0xff]   ;;  %v10185_v2 = vld [vmem:[#allocation8 + $0x200] sm:$0xff]  }
 0x327   : >> { %v10143_v6 = vld [vmem:[#allocation2 + $0xb0] ss:$12 sps:$4 sm:$0xff]   ;;  %v11947_v57 = vld [vmem:[#allocation2 + $0x60] ss:$12 sps:$4 sm:$0xff]   ;;  %v10152_v35 = vld [vmem:[#allocation2 + $0xf8] ss:$12 sps:$4 sm:$0xff]  }
 0x328   : >> { %v10113_v12 = vld [vmem:[#allocation2 + $0x188] ss:$12 sps:$4 sm:$0xff]   ;;  %v10150_v49 = vld [vmem:[#allocation2 + $0xe0] ss:$12 sps:$4 sm:$0xff]   ;;  %v11953_v62 = vld [vmem:[#allocation2 + $0x78] ss:$12 sps:$4 sm:$0xff]  }
 0x329   : >> { %9637 = vmatmul.mubr.bf16.gmra.mxu0 %v10113_v12  ;;  %5229 = vmatmul.mubr.bf16.gmra.mxu1 %v10110_v52  ;;  %v10175_v47 = vld [vmem:[#allocation8 + $0x180] sm:$0xff]   ;;  %v11949_v29 = vld [vmem:[#allocation2 + $0x7c] ss:$12 sps:$4 sm:$0xff]  }
 0x32a   : >> { %5830 = vmatprep.mubr.bf16.mxu0 %v10119_v22  ;;  %9656 = vmatprep.mubr.bf16.mxu1 %v10116_v37  ;;  %v10158_v37 = vld [vmem:[#allocation2 + $0x110] ss:$12 sps:$4 sm:$0xff]   ;;  %v11955_v52 = vld [vmem:[#allocation2 + $0x94] ss:$12 sps:$4 sm:$0xff]  }
 0x32b   : >> { %v10160_v22 = vld [vmem:[#allocation2 + $0x128] ss:$12 sps:$4 sm:$0xff]   ;;  %v11959_v12 = vld [vmem:[#allocation2 + $0x90] ss:$12 sps:$4 sm:$0xff]  }
 0x331   : >> { %5831 = vmatmul.mubr.bf16.vlgmr.msra.gmra.mxu0 %v10117_v46  ;;  %9657 = vmatmul.mubr.bf16.vlgmr.msra.gmra.mxu1 %v10120_v63  ;;  %v10165_v46 = vld [vmem:[#allocation2 + $0x140] ss:$12 sps:$4 sm:$0xff]   ;;  %v10167_v63 = vld [vmem:[#allocation2 + $0x158] ss:$12 sps:$4 sm:$0xff]  }
 0x332   : >> { %5838 = vmatprep.mubr.bf16.mxu0 %v10126_v41  ;;  %9660 = vmatprep.mubr.bf16.mxu1 %v10122_v8  ;;  %v11965_v41 = vld [vmem:[#allocation2 + $0xa8] ss:$12 sps:$4 sm:$0xff]   ;;  %v11967_v8 = vld [vmem:[#allocation2 + $0xc4] ss:$12 sps:$4 sm:$0xff]  }
 0x333   : >> { %9313 = vmatpush3.bf16.msra.mxu1 %v10123_v39  ;;  %9689 = vmatpush3.bf16.msra.mxu0 %v10248_v44  ;;  %v11961_v39 = vld [vmem:[#allocation2 + $0xac] ss:$12 sps:$4 sm:$0xff]  }
 0x334   : >> { %9314 = vmatprep.subr.bf16.mxu1 %v10129_v21  ;;  %9690 = vmatprep.subr.bf16.mxu0 %v10142_v38  ;;  %v10173_v21 = vld [vmem:[#allocation2 + $0x170] ss:$12 sps:$4 sm:$0xff]   ;;  %v11972_v44 = vld [vmem:[#allocation2 + $0xc0] ss:$12 sps:$4 sm:$0xff]  }
 0x337   : >> { %9315 = vmatpush3.bf16.msra.mxu1 %v10131_v20  ;;  %9691 = vmatpush3.bf16.msra.mxu0 %v10142_v38 }
 0x338   : >> { %9316 = vmatprep.subr.bf16.mxu1 %v10136_v51  ;;  %9692 = vmatprep.subr.bf16.mxu0 %v10157_v30 }
 0x339   : >> { %5839 = vmatmul.mubr.bf16.gmra.mxu0 %v10124_v10  ;;  %9661 = vmatmul.mubr.bf16.gmra.mxu1 %v10128_v26 }
 0x33a   : >> { %5846 = vmatprep.mubr.bf16.mxu0 %v11932_v53  ;;  %9664 = vmatprep.mubr.bf16.mxu1 %v10130_v4 }
 0x33b   : >> { %9317 = vmatpush3.bf16.msra.mxu1 %v10138_v23  ;;  %9693 = vmatpush3.bf16.msra.mxu0 %v10157_v30  ;;  %v11974_v30 = vld [vmem:[#allocation2 + $0xdc] ss:$12 sps:$4 sm:$0xff]  }
 0x33c   : >> { %9318 = vmatprep.subr.bf16.mxu1 %v10144_v61  ;;  %9694 = vmatprep.subr.bf16.mxu0 %v10172_v11 }
 0x33f   : >> { %9319 = vmatpush3.bf16.msra.mxu1 %v10146_v5  ;;  %9695 = vmatpush3.bf16.msra.mxu0 %v10172_v11 }
 0x340   : >> { %9320 = vmatprep.subr.bf16.mxu1 %v10151_v17  ;;  %9696 = vmatprep.subr.bf16.mxu0 %v10182_v58 }
 0x341   : >> { %5847 = vmatmul.mubr.bf16.gmra.mxu0 %v11935_v9  ;;  %9665 = vmatmul.mubr.bf16.gmra.mxu1 %v10135_v0 }
 0x342   : >> { %5854 = vmatprep.mubr.bf16.mxu0 %v11937_v14  ;;  %9668 = vmatprep.mubr.bf16.mxu1 %v10137_v31 }
 0x343   : >> { %9321 = vmatpush3.bf16.msra.mxu1 %v10153_v7  ;;  %9697 = vmatpush3.bf16.msra.mxu0 %v10182_v58 }
 0x344   : >> { %9322 = vmatprep.subr.bf16.mxu1 %v10159_v50  ;;  %9698 = vmatprep.subr.bf16.mxu0 %v10183_v43 }
 0x347   : >> { %9323 = vmatpush3.bf16.msra.mxu1 %v10161_v18  ;;  %9699 = vmatpush3.bf16.msra.mxu0 %v10183_v43 }
 0x348   : >> { %9324 = vmatprep.subr.bf16.mxu1 %v10166_v19  ;;  %9700 = vmatprep.subr.bf16.mxu0 %v10184_v36 }
 0x349   : >> { %5855 = vmatmul.mubr.bf16.gmra.mxu0 %v11941_v34  ;;  %9669 = vmatmul.mubr.bf16.gmra.mxu1 %v10143_v6 }
 0x34a   : >> { %5862 = vmatprep.mubr.bf16.mxu0 %v11943_v45  ;;  %9672 = vmatprep.mubr.bf16.mxu1 %v10145_v32 }
 0x34b   : >> { %9325 = vmatpush3.bf16.msra.mxu1 %v10168_v25  ;;  %9701 = vmatpush3.bf16.msra.mxu0 %v10184_v36 }
 0x34c   : >> { %9326 = vmatprep.subr.bf16.mxu1 %v10174_v59  ;;  %9702 = vmatprep.subr.bf16.mxu0 %v10185_v2 }
 0x34f   : >> { %9327 = vmatpush3.bf16.msra.mxu1 %v10175_v47  ;;  %9703 = vmatpush3.bf16.msra.mxu0 %v10185_v2 }
 0x351   : >> { %5863 = vmatmul.mubr.bf16.gmra.mxu0 %v11947_v57  ;;  %9673 = vmatmul.mubr.bf16.gmra.mxu1 %v10150_v49 }
 0x352   : >> { %5870 = vmatprep.mubr.bf16.mxu0 %v11949_v29  ;;  %9676 = vmatprep.mubr.bf16.mxu1 %v10152_v35 }
 0x359   : >> { %5871 = vmatmul.mubr.bf16.gmra.mxu0 %v11953_v62  ;;  %9677 = vmatmul.mubr.bf16.gmra.mxu1 %v10158_v37 }
 0x35a   : >> { %5878 = vmatprep.mubr.bf16.mxu0 %v11955_v52  ;;  %9680 = vmatprep.mubr.bf16.mxu1 %v10160_v22 }
 0x361   : >> { %5879 = vmatmul.mubr.bf16.gmra.mxu0 %v11959_v12  ;;  %9681 = vmatmul.mubr.bf16.gmra.mxu1 %v10165_v46 }
 0x362   : >> { %5886 = vmatprep.mubr.bf16.mxu0 %v11961_v39  ;;  %9684 = vmatprep.mubr.bf16.mxu1 %v10167_v63 }
 0x369   : >> { %5887 = vmatmul.mubr.bf16.gmra.mxu0 %v11965_v41  ;;  %9685 = vmatmul.mubr.bf16.gmra.mxu1 %v10173_v21 }
 0x36a   : >> { %5894 = vmatprep.mubr.bf16.mxu0 %v11967_v8  ;;  %6665 = vmatprep.mubr.bf16.mxu1 %v11932_v53  ;;  %v11982_v53 = vld [vmem:[#allocation2 + $0xd8] ss:$12 sps:$4 sm:$0xff]  }
 0x36b   : >> { %v9056_v38 = vpop.f32.mrf.mxu1 }
 0x36d   : >> { %v9057_v20 = vpop.f32.mrf.mxu1 }
 0x36e   : >> { %v9058_v51 = vadd.f32 %v9057_v20, %v9056_v38 }
 0x36f   : >> { %v9059_v10 = vpop.f32.mrf.mxu1 }
 0x371   : >> { %5895 = vmatmul.mubr.bf16.gmra.mxu0 %v11972_v44  ;;  %6666 = vmatmul.mubr.bf16.vlgmr.msra.gmra.mxu1 %v11935_v9  ;;  %v9060_v23 = vpop.f32.mrf.mxu1 }
 0x372   : >> { %5902 = vmatprep.mubr.bf16.mxu0 %v11974_v30  ;;  %6673 = vmatprep.mubr.bf16.mxu1 %v11937_v14  ;;  %v11980_v26 = vadd.f32 %v9060_v23, %v9059_v10 }
 0x376   : >> { %v9062_v61 = vpop.f32.mrf.mxu1 }
 0x378   : >> { %v9610_v4 = vpop.f32.mrf.mxu0  ;;  %v9063_v11 = vpop.f32.mrf.mxu1 }
 0x379   : >> { %5903 = vmatmul.mubr.bf16.gmra.mxu0 %v11982_v53  ;;  %6674 = vmatmul.mubr.bf16.gmra.mxu1 %v11941_v34  ;;  %v9064_v17 = vadd.f32 %v9063_v11, %v9062_v61 }
 0x37a   : >> { %v5271_v5 = vpop.f32.mrf.mxu0  ;;  %5910 = vmatprep.mubr.bf16.mxu0 %v11835_v54  ;;  %6681 = vmatprep.mubr.bf16.mxu1 %v11943_v45  ;;  %v9065_v9 = vpop.f32.mrf.mxu1 }
 0x37b   : >> { %v11987_v58 = vadd.f32 %v9058_v51, %v5271_v5  ;;  %v11990_v7 = vadd.f32 %v9610_v4, %v9064_v17 }
 0x37c   : >> { %v9066_v0 = vpop.f32.mrf.mxu1  ;;  %v9611_v50 = vpop.f32.mrf.mxu0 }
 0x37d   : >> { %v9067_v14 = vadd.f32 %v9066_v0, %v9065_v9  ;;  %v10189_v0 = vld [vmem:[#allocation2 + $0x38] ss:$12 sps:$4 sm:$0xff]  }
 0x37e   : >> { %v12000_v25 = vpop.f32.mrf.mxu0 }
 0x37f   : >> { %v9068_v31 = vpop.f32.mrf.mxu1  ;;  %v11992_v43 = vadd.f32 %v9611_v50, %v9067_v14  ;;  %v10188_v14 = vld [vmem:[#allocation2 + $0xf4] ss:$12 sps:$4 sm:$0xff]  }
 0x381   : >> { %5911 = vmatmul.mubr.bf16.gmra.mxu0 %v11833_v16  ;;  %v9069_v18 = vpop.f32.mrf.mxu1  ;;  %6682 = vmatmul.mubr.bf16.gmra.mxu1 %v11947_v57 }
 0x382   : >> { %v9070_v19 = vadd.f32 %v9069_v18, %v9068_v31  ;;  %5918 = vmatprep.mubr.bf16.mxu0 %v11853_v28  ;;  %6689 = vmatprep.mubr.bf16.mxu1 %v11949_v29 }
 0x383   : >> { %v9071_v54 = vpop.f32.mrf.mxu1 }
 0x385   : >> { %v9072_v36 = vpop.f32.mrf.mxu1 }
 0x386   : >> { %v11998_v34 = vadd.f32 %v9072_v36, %v9071_v54 }
 0x387   : >> { %v9074_v6 = vpop.f32.mrf.mxu1 }
 0x388   : >> { %v9614_v45 = vpop.f32.mrf.mxu0 }
 0x389   : >> { %5919 = vmatmul.mubr.bf16.gmra.mxu0 %v11851_v1  ;;  %v9075_v59 = vpop.f32.mrf.mxu1  ;;  %6690 = vmatmul.mubr.bf16.gmra.mxu1 %v11953_v62 }
 0x38a   : >> { %v9076_v16 = vadd.f32 %v9075_v59, %v9074_v6  ;;  %5926 = vmatprep.mubr.bf16.mxu0 %v11882_v42  ;;  %6697 = vmatprep.mubr.bf16.mxu1 %v11955_v52  ;;  %v5287_v28 = vpop.f32.mrf.mxu0 }
 0x38b   : >> { %v9077_v32 = vpop.f32.mrf.mxu1  ;;  %v12008_v47 = vadd.f32 %v9070_v19, %v5287_v28  ;;  %v10192_v28 = vld [vmem:[#allocation2 + $0x10c] ss:$12 sps:$4 sm:$0xff]  }
 0x38c   : >> { %v12006_v2 = vadd.f32 %v9614_v45, %v9076_v16  ;;  %v9615_v29 = vpop.f32.mrf.mxu0  ;;  %v10186_v45 = vld [vmem:[#allocation2 + $0xf0] ss:$12 sps:$4 sm:$0xff]   ;;  %v10194_v16 = vld [vmem:[#allocation2 + $0x68] ss:$12 sps:$4 sm:$0xff]  }
 0x38d   : >> { %v9078_v57 = vpop.f32.mrf.mxu1 }
 0x38e   : >> { %v9079_v49 = vadd.f32 %v9078_v57, %v9077_v32  ;;  %v12016_v52 = vpop.f32.mrf.mxu0 }
 0x38f   : >> { %v9080_v35 = vpop.f32.mrf.mxu1 }
 0x390   : >> { %v12010_v37 = vadd.f32 %v9615_v29, %v9079_v49 }
 0x391   : >> { %5927 = vmatmul.mubr.bf16.gmra.mxu0 %v11878_v40  ;;  %v9081_v1 = vpop.f32.mrf.mxu1  ;;  %6698 = vmatmul.mubr.bf16.gmra.mxu1 %v11959_v12 }
 0x392   : >> { %v9082_v42 = vadd.f32 %v9081_v1, %v9080_v35  ;;  %5934 = vmatprep.mubr.bf16.mxu0 %v11897_v33  ;;  %6705 = vmatprep.mubr.bf16.mxu1 %v11961_v39  ;;  %v10198_v1 = vld [vmem:[#allocation2 + $0x80] ss:$12 sps:$4 sm:$0xff]  }
 0x393   : >> { %v9083_v62 = vpop.f32.mrf.mxu1 }
 0x395   : >> { %v9084_v22 = vpop.f32.mrf.mxu1 }
 0x396   : >> { %v12018_v46 = vadd.f32 %v9084_v22, %v9083_v62 }
 0x397   : >> { %v9086_v63 = vpop.f32.mrf.mxu1 }
 0x398   : >> { %v9618_v21 = vpop.f32.mrf.mxu0 }
 0x399   : >> { %5935 = vmatmul.mubr.bf16.gmra.mxu0 %v11895_v55  ;;  %v9087_v38 = vpop.f32.mrf.mxu1  ;;  %6706 = vmatmul.mubr.bf16.gmra.mxu1 %v11965_v41 }
 0x39a   : >> { %v5303_v40 = vpop.f32.mrf.mxu0  ;;  %v9088_v12 = vadd.f32 %v9087_v38, %v9086_v63  ;;  %5942 = vmatprep.mubr.bf16.mxu0 %v11914_v56  ;;  %6713 = vmatprep.mubr.bf16.mxu1 %v11967_v8  ;;  %v10199_v63 = vld [vmem:[#allocation2 + $0x98] ss:$12 sps:$4 sm:$0xff]  }
 0x39b   : >> { %v12023_v33 = vadd.f32 %v9082_v42, %v5303_v40  ;;  %v9089_v39 = vpop.f32.mrf.mxu1  ;;  %v10190_v42 = vld [vmem:[#allocation2 + $0x108] ss:$12 sps:$4 sm:$0xff]  }
 0x39c   : >> { %v12026_v20 = vadd.f32 %v9618_v21, %v9088_v12  ;;  %v9619_v23 = vpop.f32.mrf.mxu0  ;;  %v10197_v21 = vld [vmem:[#allocation2 + $0x124] ss:$12 sps:$4 sm:$0xff]  }
 0x39d   : >> { %v9090_v51 = vpop.f32.mrf.mxu1 }
 0x39e   : >> { %v9091_v10 = vadd.f32 %v9090_v51, %v9089_v39  ;;  %v12034_v11 = vpop.f32.mrf.mxu0 }
 0x39f   : >> { %v9092_v61 = vpop.f32.mrf.mxu1 }
 0x3a0   : >> { %v12028_v4 = vadd.f32 %v9619_v23, %v9091_v10 }
 0x3a1   : >> { %5943 = vmatmul.mubr.bf16.gmra.mxu0 %v11912_v60  ;;  %v9093_v55 = vpop.f32.mrf.mxu1  ;;  %6714 = vmatmul.mubr.bf16.gmra.mxu1 %v11972_v44 }
 0x3a2   : >> { %v9094_v41 = vadd.f32 %v9093_v55, %v9092_v61  ;;  %5950 = vmatprep.mubr.bf16.mxu0 %v11922_v3  ;;  %6721 = vmatprep.mubr.bf16.mxu1 %v11974_v30 }
 0x3a3   : >> { %v9095_v56 = vpop.f32.mrf.mxu1 }
 0x3a5   : >> { %v9096_v8 = vpop.f32.mrf.mxu1 }
 0x3a6   : >> { %v9097_v5 = vadd.f32 %v9096_v8, %v9095_v56  ;;  %v10203_v8 = vld [vmem:[#allocation2 + $0xb0] ss:$12 sps:$4 sm:$0xff]  }
 0x3a7   : >> { %v9098_v17 = vpop.f32.mrf.mxu1 }
 0x3a8   : >> { %v9622_v9 = vpop.f32.mrf.mxu0 }
 0x3a9   : >> { %5951 = vmatmul.mubr.bf16.gmra.mxu0 %v11926_v24  ;;  %v9099_v60 = vpop.f32.mrf.mxu1  ;;  %6722 = vmatmul.mubr.bf16.gmra.mxu1 %v11982_v53  ;;  %v10193_v24 = vld [vmem:[#allocation2 + $0x50] ss:$12 sps:$4 sm:$0xff]  }
 0x3aa   : >> { %v9100_v44 = vadd.f32 %v9099_v60, %v9098_v17  ;;  %9704 = vmatprep.mubr.bf16.mxu0 %v10189_v0  ;;  %v5319_v50 = vpop.f32.mrf.mxu0  ;;  %6729 = vmatprep.mubr.bf16.mxu1 %v10188_v14  ;;  %v10202_v14 = vld [vmem:[#allocation2 + $0x13c] ss:$12 sps:$4 sm:$0xff]  }
 0x3ab   : >> { %v12038_v3 = vadd.f32 %v9094_v41, %v5319_v50  ;;  %v9101_v30 = vpop.f32.mrf.mxu1 }
 0x3ac   : >> { %v12040_v31 = vadd.f32 %v9622_v9, %v9100_v44  ;;  %v9623_v18 = vpop.f32.mrf.mxu0  ;;  %v10204_v9 = vld [vmem:[#allocation2 + $0xc8] ss:$12 sps:$4 sm:$0xff]  }
 0x3ad   : >> { %v9102_v19 = vpop.f32.mrf.mxu1 }
 0x3ae   : >> { %v9103_v54 = vadd.f32 %v9102_v19, %v9101_v30  ;;  %v5322_v36 = vpop.f32.mrf.mxu0  ;;  %v10208_v19 = vld [vmem:[#allocation2 + $0xe0] ss:$12 sps:$4 sm:$0xff]  }
 0x3af   : >> { %v12042_v6 = vadd.f32 %v9097_v5, %v5322_v36  ;;  %v9104_v53 = vpop.f32.mrf.mxu1  ;;  %v10195_v5 = vld [vmem:[#allocation2 + $0x120] ss:$12 sps:$4 sm:$0xff]   ;;  %v10209_v36 = vld [vmem:[#allocation2 + $0xf8] ss:$12 sps:$4 sm:$0xff]  }
 0x3b0   : >> { %v12044_v59 = vadd.f32 %v9623_v18, %v9103_v54  ;;  %v10200_v54 = vld [vmem:[#allocation2 + $0x138] ss:$12 sps:$4 sm:$0xff]  }
 0x3b1   : >> { %9705 = vmatmul.mubr.bf16.vlgmr.msra.gmra.mxu0 %v10193_v24  ;;  %6730 = vmatmul.mubr.bf16.gmra.mxu1 %v10186_v45  ;;  %v9105_v32 = vpop.f32.mrf.mxu1  ;;  %v10207_v24 = vld [vmem:[#allocation2 + $0x154] ss:$12 sps:$4 sm:$0xff]  }
 0x3b2   : >> { %9708 = vmatprep.mubr.bf16.mxu0 %v10194_v16  ;;  %6737 = vmatprep.mubr.bf16.mxu1 %v10192_v28  ;;  %v9106_v57 = vadd.f32 %v9105_v32, %v9104_v53 }
 0x3b3   : >> { %v9107_v49 = vpop.f32.mrf.mxu1 }
 0x3b5   : >> { %v9108_v29 = vpop.f32.mrf.mxu1 }
 0x3b6   : >> { %v9109_v35 = vadd.f32 %v9108_v29, %v9107_v49 }
 0x3b7   : >> { %v9110_v62 = vpop.f32.mrf.mxu1 }
 0x3b8   : >> { %v9626_v22 = vpop.f32.mrf.mxu0 }
 0x3b9   : >> { %9709 = vmatmul.mubr.bf16.gmra.mxu0 %v10198_v1  ;;  %6738 = vmatmul.mubr.bf16.gmra.mxu1 %v10190_v42  ;;  %v9111_v38 = vpop.f32.mrf.mxu1  ;;  %v10213_v1 = vld [vmem:[#allocation2 + $0x110] ss:$12 sps:$4 sm:$0xff]  }
 0x3ba   : >> { %9712 = vmatprep.mubr.bf16.mxu0 %v10199_v63  ;;  %v5335_v40 = vpop.f32.mrf.mxu0  ;;  %6745 = vmatprep.mubr.bf16.mxu1 %v10197_v21  ;;  %v9112_v12 = vadd.f32 %v9111_v38, %v9110_v62  ;;  %v10205_v42 = vld [vmem:[#allocation2 + $0x150] ss:$12 sps:$4 sm:$0xff]   ;;  %v10214_v63 = vld [vmem:[#allocation2 + $0x128] ss:$12 sps:$4 sm:$0xff]  }
 0x3bb   : >> { %v12046_v39 = vadd.f32 %v9106_v57, %v5335_v40  ;;  %v9113_v51 = vpop.f32.mrf.mxu1  ;;  %v10212_v40 = vld [vmem:[#allocation2 + $0x16c] ss:$12 sps:$4 sm:$0xff]  }
 0x3bc   : >> { %v9627_v10 = vpop.f32.mrf.mxu0  ;;  %v12048_v23 = vadd.f32 %v9626_v22, %v9112_v12 }
 0x3bd   : >> { %v9114_v61 = vpop.f32.mrf.mxu1 }
 0x3be   : >> { %v5338_v55 = vpop.f32.mrf.mxu0  ;;  %v9115_v41 = vadd.f32 %v9114_v61, %v9113_v51 }
 0x3bf   : >> { %v12050_v56 = vadd.f32 %v9109_v35, %v5338_v55  ;;  %v9116_v17 = vpop.f32.mrf.mxu1 }
 0x3c0   : >> { %v12052_v0 = vadd.f32 %v9627_v10, %v9115_v41  ;;  %v10218_v41 = vld [vmem:[#allocation2 + $0x140] ss:$12 sps:$4 sm:$0xff]  }
 0x3c1   : >> { %9713 = vmatmul.mubr.bf16.gmra.mxu0 %v10203_v8  ;;  %6746 = vmatmul.mubr.bf16.gmra.mxu1 %v10195_v5  ;;  %v9117_v60 = vpop.f32.mrf.mxu1  ;;  %v10210_v8 = vld [vmem:[#allocation2 + $0x168] ss:$12 sps:$4 sm:$0xff]  }
 0x3c2   : >> { %9716 = vmatprep.mubr.bf16.mxu0 %v10204_v9  ;;  %6753 = vmatprep.mubr.bf16.mxu1 %v10202_v14  ;;  %v9118_v44 = vadd.f32 %v9117_v60, %v9116_v17  ;;  %v10219_v17 = vld [vmem:[#allocation2 + $0x158] ss:$12 sps:$4 sm:$0xff]  }
 0x3c3   : >> { %v9119_v50 = vpop.f32.mrf.mxu1  ;;  %v10217_v14 = vld [vmem:[#allocation2 + $0x184] ss:$12 sps:$4 sm:$0xff]  }
 0x3c5   : >> { %v9120_v30 = vpop.f32.mrf.mxu1 }
 0x3c6   : >> { %v9121_v18 = vadd.f32 %v9120_v30, %v9119_v50 }
 0x3c9   : >> { %9717 = vmatmul.mubr.bf16.gmra.mxu0 %v10208_v19  ;;  %v9122_v45 = vpop.f32.mrf.mxu1  ;;  %6754 = vmatmul.mubr.bf16.gmra.mxu1 %v10200_v54 }
 0x3ca   : >> { %v9630_v53 = vpop.f32.mrf.mxu0  ;;  %9720 = vmatprep.mubr.bf16.mxu0 %v10209_v36  ;;  %6761 = vmatprep.mubr.bf16.mxu1 %v10207_v24 }
 0x3cb   : >> { %v9123_v16 = vpop.f32.mrf.mxu1 }
 0x3cc   : >> { %v5351_v28 = vpop.f32.mrf.mxu0  ;;  %v9124_v32 = vadd.f32 %v9123_v16, %v9122_v45  ;;  %v10220_v45 = vld [vmem:[#allocation2 + $0x170] ss:$12 sps:$4 sm:$0xff]   ;;  %v10215_v16 = vld [vmem:[#allocation2 + $0x180] ss:$12 sps:$4 sm:$0xff]  }
 0x3cd   : >> { %v12054_v57 = vadd.f32 %v9118_v44, %v5351_v28  ;;  %v9125_v49 = vpop.f32.mrf.mxu1 }
 0x3ce   : >> { %v9631_v29 = vpop.f32.mrf.mxu0  ;;  %v12056_v35 = vadd.f32 %v9630_v53, %v9124_v32  ;;  %v10224_v53 = vld [vmem:[#allocation2 + $0x19c] ss:$12 sps:$4 sm:$0xff]  }
 0x3cf   : >> { %v9126_v62 = vpop.f32.mrf.mxu1 }
 0x3d0   : >> { %v5354_v22 = vpop.f32.mrf.mxu0  ;;  %v9127_v21 = vadd.f32 %v9126_v62, %v9125_v49  ;;  %v10221_v49 = vld [vmem:[#allocation2 + $0x188] ss:$12 sps:$4 sm:$0xff]  }
 0x3d1   : >> { %v12058_v38 = vadd.f32 %v9121_v18, %v5354_v22  ;;  %9721 = vmatmul.mubr.bf16.gmra.mxu0 %v10213_v1  ;;  %v9128_v12 = vpop.f32.mrf.mxu1  ;;  %6762 = vmatmul.mubr.bf16.gmra.mxu1 %v10205_v42 }
 0x3d2   : >> { %9724 = vmatprep.mubr.bf16.mxu0 %v10214_v63  ;;  %v12060_v51 = vadd.f32 %v9631_v29, %v9127_v21  ;;  %6769 = vmatprep.mubr.bf16.mxu1 %v10212_v40  ;;  %v10225_v21 = vld [vmem:[#allocation2 + $0x1a0] ss:$12 sps:$4 sm:$0xff]  }
 0x3d3   : >> { %v9129_v10 = vpop.f32.mrf.mxu1 }
 0x3d4   : >> { %v9130_v61 = vadd.f32 %v9129_v10, %v9128_v12  ;;  %v10222_v12 = vld [vmem:[#allocation2 + $0x198] ss:$12 sps:$4 sm:$0xff]  }
 0x3d5   : >> { %v9131_v55 = vpop.f32.mrf.mxu1 }
 0x3d7   : >> { %v9132_v5 = vpop.f32.mrf.mxu1 }
 0x3d8   : >> { %v9133_v9 = vadd.f32 %v9132_v5, %v9131_v55 }
 0x3d9   : >> { %9725 = vmatmul.mubr.bf16.gmra.mxu0 %v10218_v41  ;;  %v9134_v60 = vpop.f32.mrf.mxu1  ;;  %6770 = vmatmul.mubr.bf16.gmra.mxu1 %v10210_v8 }
 0x3da   : >> { %v9634_v44 = vpop.f32.mrf.mxu0  ;;  %9728 = vmatprep.mubr.bf16.mxu0 %v10219_v17  ;;  %6777 = vmatprep.mubr.bf16.mxu1 %v10217_v14 }
 0x3db   : >> { %v9135_v50 = vpop.f32.mrf.mxu1 }
 0x3dc   : >> { %v5367_v30 = vpop.f32.mrf.mxu0  ;;  %v9136_v18 = vadd.f32 %v9135_v50, %v9134_v60 }
 0x3dd   : >> { %v12062_v19 = vadd.f32 %v9130_v61, %v5367_v30  ;;  %v9137_v54 = vpop.f32.mrf.mxu1 }
 0x3de   : >> { %v9635_v36 = vpop.f32.mrf.mxu0  ;;  %v12064_v24 = vadd.f32 %v9634_v44, %v9136_v18 }
 0x3df   : >> { %v9138_v28 = vpop.f32.mrf.mxu1 }
 0x3e0   : >> { %v5370_v32 = vpop.f32.mrf.mxu0  ;;  %v9139_v29 = vadd.f32 %v9138_v28, %v9137_v54 }
 0x3e1   : >> { %v12066_v1 = vadd.f32 %v9133_v9, %v5370_v32  ;;  %9729 = vmatmul.mubr.bf16.gmra.mxu0 %v10220_v45  ;;  %v9140_v42 = vpop.f32.mrf.mxu1  ;;  %6778 = vmatmul.mubr.bf16.gmra.mxu1 %v10215_v16 }
 0x3e2   : >> { %9732 = vmatprep.mubr.bf16.mxu0 %v10221_v49  ;;  %v12068_v62 = vadd.f32 %v9635_v36, %v9139_v29  ;;  %6785 = vmatprep.mubr.bf16.mxu1 %v10224_v53 }
 0x3e3   : >> { %v9141_v22 = vpop.f32.mrf.mxu1 }
 0x3e4   : >> { %v9142_v63 = vadd.f32 %v9141_v22, %v9140_v42 }
 0x3e5   : >> { %v9143_v40 = vpop.f32.mrf.mxu1 }
 0x3e7   : >> { %v9144_v10 = vpop.f32.mrf.mxu1 }
 0x3e8   : >> { %v9145_v61 = vadd.f32 %v9144_v10, %v9143_v40 }
 0x3e9   : >> { %v9638_v55 = vpop.f32.mrf.mxu0  ;;  %9733 = vmatmul.mubr.bf16.gmra.mxu0 %v10225_v21  ;;  %v9146_v41 = vpop.f32.mrf.mxu1  ;;  %6786 = vmatmul.mubr.bf16.gmra.mxu1 %v10222_v12 }
 0x3eb   : >> { %v5383_v8 = vpop.f32.mrf.mxu0  ;;  %v9147_v5 = vpop.f32.mrf.mxu1 }
 0x3ec   : >> { %v12070_v17 = vadd.f32 %v9142_v63, %v5383_v8  ;;  %v9148_v9 = vadd.f32 %v9147_v5, %v9146_v41  ;;  %v5275_v63 = vadd.f32 %v11980_v26, %v12000_v25 }
 0x3ed   : >> { %v9639_v14 = vpop.f32.mrf.mxu0  ;;  %v9149_v60 = vpop.f32.mrf.mxu1 }
 0x3ee   : >> { %v12072_v44 = vadd.f32 %v9638_v55, %v9148_v9 }
 0x3ef   : >> { %v5386_v50 = vpop.f32.mrf.mxu0  ;;  %v9150_v30 = vpop.f32.mrf.mxu1 }
 0x3f0   : >> { %v12074_v18 = vadd.f32 %v9145_v61, %v5386_v50  ;;  %v9151_v54 = vadd.f32 %v9150_v30, %v9149_v60 }
 0x3f1   : >> { %v9192_v36 = vpop.f32.mrf.mxu0  ;;  %v9658_v45 = vpop.f32.mrf.mxu1 }
 0x3f2   : >> { %v12076_v53 = vadd.f32 %v9639_v14, %v9151_v54 }
 0x3f3   : >> { %v9193_v16 = vpop.f32.mrf.mxu0  ;;  %v5993_v28 = vpop.f32.mrf.mxu1 }
 0x3f4   : >> { %13375 = vst [vmem:[#allocation17_spill] sm:$0xff] %v12076_v53  ;;  %v9194_v32 = vadd.f32 %v9193_v16, %v9192_v36 }
 0x3f5   : >> { %v9195_v49 = vpop.f32.mrf.mxu0  ;;  %v9659_v42 = vpop.f32.mrf.mxu1 }
 0x3f6   : >> { %v5833_v29 = vadd.f32 %v9194_v32, %v11987_v58 }
 0x3f7   : >> { %v9196_v22 = vpop.f32.mrf.mxu0  ;;  %v5996_v21 = vpop.f32.mrf.mxu1 }
 0x3f8   : >> { %v9197_v40 = vadd.f32 %v9196_v22, %v9195_v49  ;;  %v12081_v12 = vadd.f32 %v5993_v28, %v5833_v29 }
 0x3f9   : >> { %v9198_v10 = vpop.f32.mrf.mxu0  ;;  %v9662_v55 = vpop.f32.mrf.mxu1 }
 0x3fa   : >> { %v5836_v61 = vadd.f32 %v9197_v40, %v5275_v63  ;;  %v5291_v40 = vadd.f32 %v11998_v34, %v12016_v52 }
 0x3fb   : >> { %v9199_v41 = vpop.f32.mrf.mxu0  ;;  %v6009_v8 = vpop.f32.mrf.mxu1 }
 0x3fc   : >> { %v9200_v5 = vadd.f32 %v9199_v41, %v9198_v10  ;;  %v12083_v9 = vadd.f32 %v5996_v21, %v5836_v61 }
 0x3fd   : >> { %v9201_v14 = vpop.f32.mrf.mxu0  ;;  %v9663_v60 = vpop.f32.mrf.mxu1 }
 0x3fe   : >> { %v5841_v58 = vadd.f32 %v9200_v5, %v11990_v7 }
 0x3ff   : >> { %v9202_v50 = vpop.f32.mrf.mxu0  ;;  %v6012_v30 = vpop.f32.mrf.mxu1 }
 0x400   : >> { %v9203_v54 = vadd.f32 %v9202_v50, %v9201_v14  ;;  %v12086_v26 = vadd.f32 %v9658_v45, %v5841_v58 }
 0x401   : >> { %v9204_v25 = vpop.f32.mrf.mxu0  ;;  %v9666_v16 = vpop.f32.mrf.mxu1 }
 0x402   : >> { %v5844_v36 = vadd.f32 %v9203_v54, %v11992_v43 }
 0x403   : >> { %v9205_v28 = vpop.f32.mrf.mxu0  ;;  %v6025_v32 = vpop.f32.mrf.mxu1 }
 0x404   : >> { %v9206_v49 = vadd.f32 %v9205_v28, %v9204_v25  ;;  %v12089_v29 = vadd.f32 %v9659_v42, %v5844_v36 }
 0x405   : >> { %v9207_v22 = vpop.f32.mrf.mxu0  ;;  %v9667_v21 = vpop.f32.mrf.mxu1 }
 0x406   : >> { %v5849_v63 = vadd.f32 %v9206_v49, %v12008_v47 }
 0x407   : >> { %v9208_v7 = vpop.f32.mrf.mxu0  ;;  %v6028_v10 = vpop.f32.mrf.mxu1 }
 0x408   : >> { %v9209_v45 = vadd.f32 %v9208_v7, %v9207_v22  ;;  %v12094_v61 = vadd.f32 %v6009_v8, %v5849_v63 }
 0x409   : >> { %v9210_v41 = vpop.f32.mrf.mxu0  ;;  %v12096_v5 = vpop.f32.mrf.mxu1 }
 0x40a   : >> { %v5852_v43 = vadd.f32 %v9209_v45, %v5291_v40 }
 0x40b   : >> { %v9211_v14 = vpop.f32.mrf.mxu0  ;;  %v6041_v58 = vpop.f32.mrf.mxu1 }
 0x40c   : >> { %v9212_v42 = vadd.f32 %v9211_v14, %v9210_v41  ;;  %v12098_v50 = vadd.f32 %v6012_v30, %v5852_v43 }
 0x40d   : >> { %v9213_v54 = vpop.f32.mrf.mxu0  ;;  %v12101_v25 = vpop.f32.mrf.mxu1 }
 0x40e   : >> { %v5857_v47 = vadd.f32 %v9212_v42, %v12006_v2 }
 0x40f   : >> { %v9214_v36 = vpop.f32.mrf.mxu0  ;;  %v6044_v34 = vpop.f32.mrf.mxu1 }
 0x410   : >> { %v9215_v52 = vadd.f32 %v9214_v36, %v9213_v54  ;;  %v12103_v28 = vadd.f32 %v9662_v55, %v5857_v47  ;;  %v5307_v55 = vadd.f32 %v12018_v46, %v12034_v11 }
 0x411   : >> { %v9216_v8 = vpop.f32.mrf.mxu0  ;;  %v12106_v22 = vpop.f32.mrf.mxu1 }
 0x412   : >> { %v5860_v49 = vadd.f32 %v9215_v52, %v12010_v37 }
 0x413   : >> { %v9217_v63 = vpop.f32.mrf.mxu0  ;;  %v12108_v7 = vpop.f32.mrf.mxu1 }
 0x414   : >> { %v9218_v30 = vadd.f32 %v9217_v63, %v9216_v8  ;;  %v12110_v40 = vadd.f32 %v9663_v60, %v5860_v49 }
 0x415   : >> { %v9219_v45 = vpop.f32.mrf.mxu0  ;;  %v12113_v41 = vpop.f32.mrf.mxu1 }
 0x416   : >> { %v5865_v2 = vadd.f32 %v9218_v30, %v12023_v33 }
 0x417   : >> { %v9220_v43 = vpop.f32.mrf.mxu0  ;;  %v12117_v14 = vpop.f32.mrf.mxu1 }
 0x418   : >> { %v9221_v37 = vadd.f32 %v9220_v43, %v9219_v45  ;;  %v12119_v42 = vadd.f32 %v6025_v32, %v5865_v2 }
 0x419   : >> { %v9222_v54 = vpop.f32.mrf.mxu0  ;;  %v12121_v36 = vpop.f32.mrf.mxu1 }
 0x41a   : >> { %v5868_v47 = vadd.f32 %v9221_v37, %v5307_v55 }
 0x41b   : >> { %v9223_v60 = vpop.f32.mrf.mxu0  ;;  %v12123_v52 = vpop.f32.mrf.mxu1 }
 0x41c   : >> { %v9224_v8 = vadd.f32 %v9223_v60, %v9222_v54  ;;  %v12125_v33 = vadd.f32 %v6028_v10, %v5868_v47 }
 0x41d   : >> { %v9225_v49 = vpop.f32.mrf.mxu0  ;;  %v12128_v30 = vpop.f32.mrf.mxu1 }
 0x41e   : >> { %v5873_v63 = vadd.f32 %v9224_v8, %v12026_v20 }
 0x41f   : >> { %v9226_v46 = vpop.f32.mrf.mxu0  ;;  %v12130_v11 = vpop.f32.mrf.mxu1 }
 0x420   : >> { %v9227_v32 = vadd.f32 %v9226_v46, %v9225_v49  ;;  %v12132_v45 = vadd.f32 %v9666_v16, %v5873_v63 }
 0x421   : >> { %v9228_v2 = vpop.f32.mrf.mxu0  ;;  %v12135_v55 = vpop.f32.mrf.mxu1 }
 0x422   : >> { %v5876_v43 = vadd.f32 %v9227_v32, %v12028_v4 }
 0x423   : >> { %v9229_v37 = vpop.f32.mrf.mxu0  ;;  %v12137_v54 = vpop.f32.mrf.mxu1 }
 0x424   : >> { %v9230_v10 = vadd.f32 %v9229_v37, %v9228_v2  ;;  %v12139_v47 = vadd.f32 %v9667_v21, %v5876_v43 }
 0x425   : >> { %v9231_v20 = vpop.f32.mrf.mxu0  ;;  %v12142_v8 = vpop.f32.mrf.mxu1 }
 0x426   : >> { %v5881_v60 = vadd.f32 %v9230_v10, %v12038_v3 }
 0x427   : >> { %v9232_v15 = vpop.f32.mrf.mxu0  ;;  %v12144_v49 = vpop.f32.mrf.mxu1 }
 0x428   : >> { %v9233_v16 = vadd.f32 %v9232_v15, %v9231_v20  ;;  %v12146_v63 = vadd.f32 %v6041_v58, %v5881_v60 }
 0x429   : >> { %v9234_v4 = vpop.f32.mrf.mxu0  ;;  %v12149_v32 = vpop.f32.mrf.mxu1 }
 0x42a   : >> { %v5884_v46 = vadd.f32 %v9233_v16, %v12042_v6  ;;  %13376 = vst [vmem:[#allocation18_spill] sm:$0xff] %v12149_v32 }
 0x42b   : >> { %v9235_v48 = vpop.f32.mrf.mxu0  ;;  %v12151_v2 = vpop.f32.mrf.mxu1 }
 0x42c   : >> { %v9236_v21 = vadd.f32 %v9235_v48, %v9234_v4  ;;  %v12153_v43 = vadd.f32 %v6044_v34, %v5884_v46 }
 0x42d   : >> { %v9237_v3 = vpop.f32.mrf.mxu0  ;;  %v12156_v10 = vpop.f32.mrf.mxu1 }
 0x42e   : >> { %v5889_v37 = vadd.f32 %v9236_v21, %v12040_v31  ;;  %13377 = vst [vmem:[#allocation19_spill] sm:$0xff] %v12156_v10 }
 0x42f   : >> { %v9238_v27 = vpop.f32.mrf.mxu0  ;;  %v12158_v15 = vpop.f32.mrf.mxu1 }
 0x430   : >> { %v9239_v58 = vadd.f32 %v9238_v27, %v9237_v3  ;;  %v12161_v20 = vadd.f32 %v12096_v5, %v5889_v37 }
 0x431   : >> { %v9240_v6 = vpop.f32.mrf.mxu0  ;;  %v9328_v16 = vpop.f32.mrf.mxu1 }
 0x432   : >> { %v5892_v60 = vadd.f32 %v9239_v58, %v12044_v59 }
 0x433   : >> { %v9241_v13 = vpop.f32.mrf.mxu0  ;;  %v9329_v48 = vpop.f32.mrf.mxu1 }
 0x434   : >> { %v9242_v34 = vadd.f32 %v9241_v13, %v9240_v6  ;;  %v12165_v4 = vadd.f32 %v12101_v25, %v5892_v60  ;;  %v12167_v31 = vadd.f32 %v9329_v48, %v9328_v16 }
 0x435   : >> { %v9243_v46 = vpop.f32.mrf.mxu0  ;;  %v9331_v10 = vpop.f32.mrf.mxu1 }
 0x436   : >> { %v5897_v21 = vadd.f32 %v9242_v34, %v12046_v39 }
 0x437   : >> { %v9244_v27 = vpop.f32.mrf.mxu0  ;;  %v9332_v3 = vpop.f32.mrf.mxu1 }
 0x438   : >> { %v9245_v5 = vadd.f32 %v9244_v27, %v9243_v46  ;;  %v12171_v37 = vadd.f32 %v12108_v7, %v5897_v21  ;;  %v12173_v59 = vadd.f32 %v9332_v3, %v9331_v10 }
 0x439   : >> { %v9246_v58 = vpop.f32.mrf.mxu0  ;;  %v9334_v6 = vpop.f32.mrf.mxu1 }
 0x43a   : >> { %v5900_v13 = vadd.f32 %v9245_v5, %v12050_v56 }
 0x43b   : >> { %v9247_v25 = vpop.f32.mrf.mxu0  ;;  %v9335_v60 = vpop.f32.mrf.mxu1 }
 0x43c   : >> { %v9248_v16 = vadd.f32 %v9247_v25, %v9246_v58  ;;  %v12177_v48 = vadd.f32 %v12117_v14, %v5900_v13  ;;  %v12179_v39 = vadd.f32 %v9335_v60, %v9334_v6 }
 0x43d   : >> { %v9249_v34 = vpop.f32.mrf.mxu0  ;;  %v9337_v27 = vpop.f32.mrf.mxu1 }
 0x43e   : >> { %v5905_v46 = vadd.f32 %v9248_v16, %v12048_v23 }
 0x43f   : >> { %v9250_v7 = vpop.f32.mrf.mxu0  ;;  %v9338_v21 = vpop.f32.mrf.mxu1 }
 0x440   : >> { %v9251_v10 = vadd.f32 %v9250_v7, %v9249_v34  ;;  %v12183_v3 = vadd.f32 %v12106_v22, %v5905_v46  ;;  %v12185_v56 = vadd.f32 %v9338_v21, %v9337_v27 }
 0x441   : >> { %v9252_v5 = vpop.f32.mrf.mxu0  ;;  %v9340_v25 = vpop.f32.mrf.mxu1 }
 0x442   : >> { %v5908_v58 = vadd.f32 %v9251_v10, %v12052_v0 }
 0x443   : >> { %v9253_v14 = vpop.f32.mrf.mxu0  ;;  %v9341_v13 = vpop.f32.mrf.mxu1 }
 0x444   : >> { %v9254_v6 = vadd.f32 %v9253_v14, %v9252_v5  ;;  %v12189_v60 = vadd.f32 %v12113_v41, %v5908_v58  ;;  %v12191_v23 = vadd.f32 %v9341_v13, %v9340_v25 }
 0x445   : >> { %v9255_v16 = vpop.f32.mrf.mxu0  ;;  %v9343_v7 = vpop.f32.mrf.mxu1 }
 0x446   : >> { %v5913_v34 = vadd.f32 %v9254_v6, %v12054_v57 }
 0x447   : >> { %v9256_v22 = vpop.f32.mrf.mxu0  ;;  %v9344_v46 = vpop.f32.mrf.mxu1 }
 0x448   : >> { %v9257_v27 = vadd.f32 %v9256_v22, %v9255_v16  ;;  %v12195_v21 = vadd.f32 %v12123_v52, %v5913_v34  ;;  %v12197_v0 = vadd.f32 %v9344_v46, %v9343_v7 }
 0x449   : >> { %v9258_v10 = vpop.f32.mrf.mxu0  ;;  %v9346_v14 = vpop.f32.mrf.mxu1 }
 0x44a   : >> { %v5916_v5 = vadd.f32 %v9257_v27, %v12058_v38 }
 0x44b   : >> { %v9259_v41 = vpop.f32.mrf.mxu0  ;;  %v9347_v58 = vpop.f32.mrf.mxu1 }
 0x44c   : >> { %v9260_v25 = vadd.f32 %v9259_v41, %v9258_v10  ;;  %v12201_v13 = vadd.f32 %v12130_v11, %v5916_v5  ;;  %v12203_v57 = vadd.f32 %v9347_v58, %v9346_v14 }
 0x44d   : >> { %v9261_v6 = vpop.f32.mrf.mxu0  ;;  %v9349_v22 = vpop.f32.mrf.mxu1 }
 0x44e   : >> { %v5921_v16 = vadd.f32 %v9260_v25, %v12056_v35 }
 0x44f   : >> { %v9262_v52 = vpop.f32.mrf.mxu0  ;;  %v9350_v34 = vpop.f32.mrf.mxu1 }
 0x450   : >> { %v9263_v7 = vadd.f32 %v9262_v52, %v9261_v6  ;;  %v12207_v46 = vadd.f32 %v12121_v36, %v5921_v16  ;;  %v12209_v38 = vadd.f32 %v9350_v34, %v9349_v22 }
 0x451   : >> { %v9264_v27 = vpop.f32.mrf.mxu0  ;;  %v9352_v41 = vpop.f32.mrf.mxu1 }
 0x452   : >> { %v5924_v10 = vadd.f32 %v9263_v7, %v12060_v51 }
 0x453   : >> { %v9265_v11 = vpop.f32.mrf.mxu0  ;;  %v9353_v5 = vpop.f32.mrf.mxu1 }
 0x454   : >> { %v9266_v14 = vadd.f32 %v9265_v11, %v9264_v27  ;;  %v12213_v58 = vadd.f32 %v12128_v30, %v5924_v10  ;;  %v12215_v35 = vadd.f32 %v9353_v5, %v9352_v41 }
 0x455   : >> { %v9267_v25 = vpop.f32.mrf.mxu0  ;;  %v9355_v52 = vpop.f32.mrf.mxu1 }
 0x456   : >> { %v5929_v6 = vadd.f32 %v9266_v14, %v12062_v19 }
 0x457   : >> { %v9268_v36 = vpop.f32.mrf.mxu0  ;;  %v9356_v16 = vpop.f32.mrf.mxu1 }
 0x458   : >> { %v9269_v22 = vadd.f32 %v9268_v36, %v9267_v25  ;;  %v12219_v34 = vadd.f32 %v12137_v54, %v5929_v6  ;;  %v12221_v51 = vadd.f32 %v9356_v16, %v9355_v52 }
 0x459   : >> { %v9270_v7 = vpop.f32.mrf.mxu0  ;;  %v9358_v11 = vpop.f32.mrf.mxu1 }
 0x45a   : >> { %v5932_v27 = vadd.f32 %v9269_v22, %v12066_v1 }
 0x45b   : >> { %v9271_v30 = vpop.f32.mrf.mxu0  ;;  %v9359_v10 = vpop.f32.mrf.mxu1 }
 0x45c   : >> { %v9272_v41 = vadd.f32 %v9271_v30, %v9270_v7  ;;  %v12225_v5 = vadd.f32 %v12144_v49, %v5932_v27  ;;  %v12227_v19 = vadd.f32 %v9359_v10, %v9358_v11 }
 0x45d   : >> { %v9273_v14 = vpop.f32.mrf.mxu0  ;;  %v9361_v36 = vpop.f32.mrf.mxu1 }
 0x45e   : >> { %v5937_v25 = vadd.f32 %v9272_v41, %v12064_v24 }
 0x45f   : >> { %v9274_v54 = vpop.f32.mrf.mxu0  ;;  %v9362_v6 = vpop.f32.mrf.mxu1 }
 0x460   : >> { %v9275_v52 = vadd.f32 %v9274_v54, %v9273_v14  ;;  %v12231_v16 = vadd.f32 %v12135_v55, %v5937_v25  ;;  %v12233_v1 = vadd.f32 %v9362_v6, %v9361_v36 }
 0x461   : >> { %v9276_v22 = vpop.f32.mrf.mxu0  ;;  %v9364_v30 = vpop.f32.mrf.mxu1 }
 0x462   : >> { %v5940_v7 = vadd.f32 %v9275_v52, %v12068_v62 }
 0x463   : >> { %v9277_v49 = vpop.f32.mrf.mxu0  ;;  %v9365_v27 = vpop.f32.mrf.mxu1 }
 0x464   : >> { %v9278_v11 = vadd.f32 %v9277_v49, %v9276_v22  ;;  %v12237_v10 = vadd.f32 %v12142_v8, %v5940_v7  ;;  %v12239_v24 = vadd.f32 %v9365_v27, %v9364_v30 }
 0x465   : >> { %v9279_v41 = vpop.f32.mrf.mxu0  ;;  %v9367_v54 = vpop.f32.mrf.mxu1 }
 0x466   : >> { %v5945_v14 = vadd.f32 %v9278_v11, %v12070_v17 }
 0x467   : >> { %v9280_v55 = vpop.f32.mrf.mxu0  ;;  %v9368_v25 = vpop.f32.mrf.mxu1 }
 0x468   : >> { %v9281_v36 = vadd.f32 %v9280_v55, %v9279_v41  ;;  %v12243_v6 = vadd.f32 %v12151_v2, %v5945_v14  ;;  %v12245_v62 = vadd.f32 %v9368_v25, %v9367_v54 }
 0x469   : >> { %v9282_v52 = vpop.f32.mrf.mxu0  ;;  %v9370_v49 = vpop.f32.mrf.mxu1 }
 0x46a   : >> { %v5948_v22 = vadd.f32 %v9281_v36, %v12074_v18 }
 0x46b   : >> { %v9283_v8 = vpop.f32.mrf.mxu0  ;;  %v9371_v7 = vpop.f32.mrf.mxu1 }
 0x46c   : >> { %v9284_v30 = vadd.f32 %v9283_v8, %v9282_v52  ;;  %v12249_v27 = vadd.f32 %v12158_v15, %v5948_v22  ;;  %v12251_v17 = vadd.f32 %v9371_v7, %v9370_v49  ;;  %v7021_v49 = vld [vmem:[%s10571_s6 + $0x10] sm:$0xff] }
 0x46d   : >> { %v12253_v11 = vpop.f32.mrf.mxu0  ;;  %v9373_v41 = vpop.f32.mrf.mxu1 }
 0x46e   : >> { %13378 = vst [vmem:[#allocation20_spill] sm:$0xff] %v12249_v27  ;;  %v12256_v2 = vadd.f32 %v9284_v30, %v12072_v44  ;;  %v7019_v27 = vld [vmem:[%s10571_s6] sm:$0xff] }
 0x46f   : >> { %v12258_v14 = vpop.f32.mrf.mxu0  ;;  %v9374_v18 = vpop.f32.mrf.mxu1 }
 0x470   : >> { %v12260_v54 = vadd.f32 %v9374_v18, %v9373_v41 }
 0x471   : >> { %v9706_v55 = vpop.f32.mrf.mxu0  ;;  %v12262_v25 = vpop.f32.mrf.mxu1 }
 0x472   : >> { %v6837_v15 = vadd.f32 %v9706_v55, %v12179_v39 }
 0x473   : >> { %v6828_v36 = vpop.f32.mrf.mxu0  ;;  %v12266_v22 = vpop.f32.mrf.mxu1 }
 0x474   : >> { %v6957_v52 = vadd.f32 %v6837_v15, %v12086_v26  ;;  %v6829_v44 = vadd.f32 %v12167_v31, %v6828_v36  ;;  %v7022_v36 = vld [vmem:[%s10571_s6 + $0x18] sm:$0xff] }
 0x475   : >> { %v9707_v8 = vpop.f32.mrf.mxu0  ;;  %v12271_v41 = vpop.f32.mrf.mxu1 }
 0x476   : >> { %v6989_v7 = vmax.f32 %v6957_v52, 0.0  ;;  %v6955_v30 = vadd.f32 %v6829_v44, %v12081_v12  ;;  %v6840_v18 = vadd.f32 %v9707_v8, %v12185_v56  ;;  %v7020_v8 = vld [vmem:[%s10571_s6 + $0x8] sm:$0xff] }
 0x477   : >> { %v6831_v39 = vpop.f32.mrf.mxu0  ;;  %v12278_v53 = vpop.f32.mrf.mxu1 }
 0x478   : >> { %v12275_v55 = vadd.f32 %v7021_v49, %v6989_v7  ;;  %v6987_v26 = vmax.f32 %v6955_v30, 0.0  ;;  %v6958_v15 = vadd.f32 %v6840_v18, %v12089_v29  ;;  %v6832_v31 = vadd.f32 %v12173_v59, %v6831_v39  ;;  %v7025_v39 = vld [vmem:[%s10571_s6 + $0x30] sm:$0xff] }
 0x479   : >> { %v9710_v52 = vpop.f32.mrf.mxu0  ;;  %v12285_v56 = vpop.f32.mrf.mxu1 }
 0x47a   : >> { %v12282_v12 = vadd.f32 %v7019_v27, %v6987_v26  ;;  %v6990_v44 = vmax.f32 %v6958_v15, 0.0  ;;  %v6956_v32 = vadd.f32 %v6832_v31, %v12083_v9  ;;  %v6853_v49 = vadd.f32 %v9710_v52, %v12203_v57 }
 0x47b   : >> { %v6844_v7 = vpop.f32.mrf.mxu0  ;;  %v12292_v59 = vpop.f32.mrf.mxu1 }
 0x47c   : >> { %v12289_v29 = vadd.f32 %v7022_v36, %v6990_v44  ;;  %v6988_v30 = vmax.f32 %v6956_v32, 0.0  ;;  %v6961_v18 = vadd.f32 %v6853_v49, %v12103_v28  ;;  %v6845_v27 = vadd.f32 %v12191_v23, %v6844_v7  ;;  %v7023_v32 = vld [vmem:[%s10571_s6 + $0x20] sm:$0xff]  ;;  %v7026_v7 = vld [vmem:[%s10571_s6 + $0x38] sm:$0xff] }
 0x47d   : >> { %v9711_v26 = vpop.f32.mrf.mxu0  ;;  %v12299_v57 = vpop.f32.mrf.mxu1 }
 0x47e   : >> { %v12296_v9 = vadd.f32 %v7020_v8, %v6988_v30  ;;  %v6993_v15 = vmax.f32 %v6961_v18, 0.0  ;;  %v6959_v31 = vadd.f32 %v6845_v27, %v12094_v61  ;;  %v6856_v36 = vadd.f32 %v9711_v26, %v12209_v38  ;;  %v7024_v26 = vld [vmem:[%s10571_s6 + $0x28] sm:$0xff] }
 0x47f   : >> { %v6847_v52 = vpop.f32.mrf.mxu0  ;;  %v12306_v23 = vpop.f32.mrf.mxu1 }
 0x480   : >> { %v12303_v28 = vadd.f32 %v7025_v39, %v6993_v15  ;;  %v6991_v44 = vmax.f32 %v6959_v31, 0.0  ;;  %v6962_v49 = vadd.f32 %v6856_v36, %v12110_v40  ;;  %v6848_v8 = vadd.f32 %v12197_v0, %v6847_v52  ;;  %v7029_v52 = vld [vmem:[%s10571_s6 + $0x50] sm:$0xff] }
 0x481   : >> { %v9714_v30 = vpop.f32.mrf.mxu0  ;;  %v12313_v38 = vpop.f32.mrf.mxu1 }
 0x482   : >> { %v12310_v61 = vadd.f32 %v7023_v32, %v6991_v44  ;;  %v6994_v18 = vmax.f32 %v6962_v49, 0.0  ;;  %v6960_v27 = vadd.f32 %v6848_v8, %v12098_v50  ;;  %v6869_v39 = vadd.f32 %v9714_v30, %v12227_v19  ;;  %v7027_v30 = vld [vmem:[%s10571_s6 + $0x40] sm:$0xff] }
 0x483   : >> { %v6860_v15 = vpop.f32.mrf.mxu0  ;;  %v12320_v0 = vpop.f32.mrf.mxu1 }
 0x484   : >> { %v12317_v40 = vadd.f32 %v7026_v7, %v6994_v18  ;;  %v6992_v31 = vmax.f32 %v6960_v27, 0.0  ;;  %v6965_v36 = vadd.f32 %v6869_v39, %v12132_v45  ;;  %v6861_v32 = vadd.f32 %v12215_v35, %v6860_v15  ;;  %v7030_v15 = vld [vmem:[%s10571_s6 + $0x58] sm:$0xff] }
 0x485   : >> { %v9715_v44 = vpop.f32.mrf.mxu0  ;;  %v12327_v19 = vpop.f32.mrf.mxu1 }
 0x486   : >> { %v12324_v50 = vadd.f32 %v7024_v26, %v6992_v31  ;;  %v6997_v49 = vmax.f32 %v6965_v36, 0.0  ;;  %v6963_v8 = vadd.f32 %v6861_v32, %v12119_v42  ;;  %v6872_v7 = vadd.f32 %v9715_v44, %v12233_v1 }
 0x487   : >> { %v6863_v18 = vpop.f32.mrf.mxu0  ;;  %v12334_v35 = vpop.f32.mrf.mxu1 }
 0x488   : >> { %v12331_v45 = vadd.f32 %v7029_v52, %v6997_v49  ;;  %v6995_v27 = vmax.f32 %v6963_v8, 0.0  ;;  %v6966_v39 = vadd.f32 %v6872_v7, %v12139_v47  ;;  %v6864_v26 = vadd.f32 %v12221_v51, %v6863_v18  ;;  %v7028_v52 = vld [vmem:[%s10571_s6 + $0x48] sm:$0xff]  ;;  %v7033_v18 = vld [vmem:[%s10571_s6 + $0x70] sm:$0xff] }
 0x489   : >> { %v9718_v31 = vpop.f32.mrf.mxu0  ;;  %v9394_v1 = vpop.f32.mrf.mxu1 }
 0x48a   : >> { %13379 = vst [vmem:[#allocation21_spill] sm:$0xff] %v12331_v45  ;;  %v12338_v42 = vadd.f32 %v7027_v30, %v6995_v27  ;;  %v6998_v36 = vmax.f32 %v6966_v39, 0.0  ;;  %v6964_v32 = vadd.f32 %v6864_v26, %v12125_v33  ;;  %v6885_v44 = vadd.f32 %v9718_v31, %v12251_v17  ;;  %v7031_v31 = vld [vmem:[%s10571_s6 + $0x60] sm:$0xff] }
 0x48b   : >> { %v6876_v49 = vpop.f32.mrf.mxu0  ;;  %v9395_v45 = vpop.f32.mrf.mxu1 }
 0x48c   : >> { %v12343_v8 = vadd.f32 %v7030_v15, %v6998_v36  ;;  %v6996_v47 = vmax.f32 %v6964_v32, 0.0  ;;  %v6969_v7 = vadd.f32 %v6885_v44, %v12161_v20  ;;  %v6877_v51 = vadd.f32 %v12239_v24, %v6876_v49  ;;  %v7034_v49 = vld [vmem:[%s10571_s6 + $0x78] sm:$0xff] }
 0x48d   : >> { %v9719_v30 = vpop.f32.mrf.mxu0  ;;  %v9397_v17 = vpop.f32.mrf.mxu1  ;;  %v9384_v15 = vadd.f32 %v12292_v59, %v12285_v56 }
 0x48e   : >> { %v12348_v27 = vadd.f32 %v7028_v52, %v6996_v47  ;;  %v7001_v33 = vmax.f32 %v6969_v7, 0.0  ;;  %v6967_v39 = vadd.f32 %v6877_v51, %v12146_v63  ;;  %v6888_v26 = vadd.f32 %v9719_v30, %v12260_v54 }
 0x48f   : >> { %v6879_v20 = vpop.f32.mrf.mxu0  ;;  %v9398_v44 = vpop.f32.mrf.mxu1  ;;  %v9378_v63 = vadd.f32 %v12266_v22, %v12262_v25 }
 0x490   : >> { %v12355_v36 = vadd.f32 %v7033_v18, %v7001_v33  ;;  %v6999_v24 = vmax.f32 %v6967_v39, 0.0  ;;  %v6970_v32 = vadd.f32 %v6888_v26, %v12165_v4  ;;  %v6880_v52 = vadd.f32 %v12245_v62, %v6879_v20  ;;  %v7032_v4 = vld [vmem:[%s10571_s6 + $0x68] sm:$0xff] }
 0x491   : >> { %v9722_v54 = vpop.f32.mrf.mxu0  ;;  %v9400_v7 = vpop.f32.mrf.mxu1  ;;  %v9387_v18 = vadd.f32 %v12306_v23, %v12299_v57  ;;  %v9381_v26 = vadd.f32 %v12278_v53, %v12271_v41 }
 0x492   : >> { %v12362_v47 = vadd.f32 %v7031_v31, %v6999_v24  ;;  %v7002_v56 = vmax.f32 %v6970_v32, 0.0  ;;  %v6968_v59 = vadd.f32 %v6880_v52, %v12153_v43  ;;  %v6901_v51 = vadd.f32 %v9722_v54, %v9384_v15  ;;  %v7037_v31 = vld [vmem:[%s10571_s6 + $0x90] sm:$0xff]  ;;  %v7035_v52 = vld [vmem:[%s10571_s6 + $0x80] sm:$0xff] }
 0x493   : >> { %v6892_v30 = vpop.f32.mrf.mxu0  ;;  %v9401_v22 = vpop.f32.mrf.mxu1  ;;  %v9396_v32 = vadd.f32 %v9395_v45, %v9394_v1 }
 0x494   : >> { %v12368_v62 = vadd.f32 %v7034_v49, %v7002_v56  ;;  %v7000_v33 = vmax.f32 %v6968_v59, 0.0  ;;  %v6973_v25 = vadd.f32 %v6901_v51, %v12183_v3  ;;  %v6893_v39 = vadd.f32 %v9378_v63, %v6892_v30  ;;  %v7038_v59 = vld [vmem:[%s10571_s6 + $0x98] sm:$0xff] }
 0x495   : >> { %v9723_v43 = vpop.f32.mrf.mxu0  ;;  %v9403_v23 = vpop.f32.mrf.mxu1  ;;  %v9390_v56 = vadd.f32 %v12320_v0, %v12313_v38  ;;  %v9399_v30 = vadd.f32 %v9398_v44, %v9397_v17 }
 0x496   : >> { %v12374_v15 = vadd.f32 %v7032_v4, %v7000_v33  ;;  %v7005_v20 = vmax.f32 %v6973_v25, 0.0  ;;  %v6971_v57 = vadd.f32 %v6893_v39, %v12171_v37  ;;  %v6904_v24 = vadd.f32 %v9723_v43, %v9387_v18  ;;  %v7036_v33 = vld [vmem:[%s10571_s6 + $0x88] sm:$0xff]  ;;  %v7041_v43 = vld [vmem:[%s10571_s6 + $0xb0] sm:$0xff] }
 0x497   : >> { %v6895_v49 = vpop.f32.mrf.mxu0  ;;  %v9404_v53 = vpop.f32.mrf.mxu1 }
 0x498   : >> { %v12378_v3 = vadd.f32 %v7037_v31, %v7005_v20  ;;  %v7003_v63 = vmax.f32 %v6971_v57, 0.0  ;;  %v6974_v54 = vadd.f32 %v6904_v24, %v12189_v60  ;;  %v6896_v41 = vadd.f32 %v9381_v26, %v6895_v49 }
 0x499   : >> { %v9726_v51 = vpop.f32.mrf.mxu0  ;;  %v9406_v1 = vpop.f32.mrf.mxu1  ;;  %v9393_v31 = vadd.f32 %v12334_v35, %v12327_v19 }
 0x49a   : >> { %v12384_v37 = vadd.f32 %v7035_v52, %v7003_v63  ;;  %v7006_v18 = vmax.f32 %v6974_v54, 0.0  ;;  %v6972_v45 = vadd.f32 %v6896_v41, %v12177_v48  ;;  %v6917_v4 = vadd.f32 %v9726_v51, %v9396_v32  ;;  %v7039_v52 = vld [vmem:[%s10571_s6 + $0xa0] sm:$0xff] }
 0x49b   : >> { %v6908_v25 = vpop.f32.mrf.mxu0  ;;  %v9407_v38 = vpop.f32.mrf.mxu1  ;;  %v9402_v41 = vadd.f32 %v9401_v22, %v9400_v7 }
 0x49c   : >> { %v12388_v60 = vadd.f32 %v7038_v59, %v7006_v18  ;;  %v7004_v39 = vmax.f32 %v6972_v45, 0.0  ;;  %v6977_v26 = vadd.f32 %v6917_v4, %v12207_v46  ;;  %v6909_v0 = vadd.f32 %v9390_v56, %v6908_v25  ;;  %v7042_v56 = vld [vmem:[%s10571_s6 + $0xb8] sm:$0xff] }
 0x49d   : >> { %v9727_v20 = vpop.f32.mrf.mxu0  ;;  %v9409_v44 = vpop.f32.mrf.mxu1  ;;  %v9408_v32 = vadd.f32 %v9407_v38, %v9406_v1  ;;  %v7045_v38 = vld [vmem:[%s10571_s6 + $0xd0] sm:$0xff] }
 0x49e   : >> { %v12394_v48 = vadd.f32 %v7036_v33, %v7004_v39  ;;  %v7009_v57 = vmax.f32 %v6977_v26, 0.0  ;;  %v6975_v17 = vadd.f32 %v6909_v0, %v12195_v21  ;;  %v6920_v24 = vadd.f32 %v9727_v20, %v9399_v30  ;;  %v7040_v30 = vld [vmem:[%s10571_s6 + $0xa8] sm:$0xff] }
 0x49f   : >> { %v6911_v49 = vpop.f32.mrf.mxu0  ;;  %v9410_v19 = vpop.f32.mrf.mxu1  ;;  %v9405_v26 = vadd.f32 %v9404_v53, %v9403_v23  ;;  %v7046_v23 = vld [vmem:[%s10571_s6 + $0xd8] sm:$0xff] }
 0x4a0   : >> { %v12398_v46 = vadd.f32 %v7041_v43, %v7009_v57  ;;  %v7007_v63 = vmax.f32 %v6975_v17, 0.0  ;;  %v6978_v54 = vadd.f32 %v6920_v24, %v12213_v58  ;;  %v6912_v35 = vadd.f32 %v9393_v31, %v6911_v49  ;;  %v7043_v17 = vld [vmem:[%s10571_s6 + $0xc0] sm:$0xff] }
 0x4a1   : >> { %v9730_v59 = vpop.f32.mrf.mxu0  ;;  %v9412_v45 = vpop.f32.mrf.mxu1  ;;  %v9411_v4 = vadd.f32 %v9410_v19, %v9409_v44 }
 0x4a2   : >> { %v12402_v51 = vadd.f32 %v7039_v52, %v7007_v63  ;;  %v7010_v21 = vmax.f32 %v6978_v54, 0.0  ;;  %v6976_v18 = vadd.f32 %v6912_v35, %v12201_v13  ;;  %v6933_v1 = vadd.f32 %v9730_v59, %v9408_v32 }
 0x4a3   : >> { %v6924_v33 = vpop.f32.mrf.mxu0  ;;  %v9413_v7 = vpop.f32.mrf.mxu1 }
 0x4a4   : >> { %v12406_v25 = vadd.f32 %v7042_v56, %v7010_v21  ;;  %v7008_v58 = vmax.f32 %v6976_v18, 0.0  ;;  %v6981_v39 = vadd.f32 %v6933_v1, %v12231_v16  ;;  %v6925_v22 = vadd.f32 %v9402_v41, %v6924_v33  ;;  %v7044_v56 = vld [vmem:[%s10571_s6 + $0xc8] sm:$0xff] }
 0x4a5   : >> { %v9731_v0 = vpop.f32.mrf.mxu0  ;;  %v9415_v20 = vpop.f32.mrf.mxu1  ;;  %v9414_v63 = vadd.f32 %v9413_v7, %v9412_v45  ;;  %v9287_v41 = vadd.f32 %v12258_v14, %v12253_v11  ;;  %v13381_v14 = vld [vmem:[#allocation17_spill] sm:$0xff] }
 0x4a6   : >> { %v12410_v31 = vadd.f32 %v7040_v30, %v7008_v58  ;;  %v7013_v13 = vmax.f32 %v6981_v39, 0.0  ;;  %v6979_v43 = vadd.f32 %v6925_v22, %v12219_v34  ;;  %v6936_v57 = vadd.f32 %v9731_v0, %v9411_v4  ;;  %v13380_v39 = vld [vmem:[#allocation18_spill] sm:$0xff] }
 0x4a7   : >> { %v6927_v44 = vpop.f32.mrf.mxu0  ;;  %v9416_v52 = vpop.f32.mrf.mxu1  ;;  %v6114_v11 = vadd.f32 %v13380_v39, %v12256_v2  ;;  %v5956_v7 = vadd.f32 %v9287_v41, %v13381_v14 }
 0x4a8   : >> { %v12414_v24 = vadd.f32 %v7045_v38, %v7013_v13  ;;  %v7011_v32 = vmax.f32 %v6979_v43, 0.0  ;;  %v6982_v16 = vadd.f32 %v6936_v57, %v12237_v10  ;;  %v6928_v49 = vadd.f32 %v9405_v26, %v6927_v44  ;;  %v7047_v26 = vld [vmem:[%s10571_s6 + $0xe0] sm:$0xff] }
 0x4a9   : >> { %v9734_v53 = vpop.f32.mrf.mxu0  ;;  %v9418_v35 = vpop.f32.mrf.mxu1  ;;  %v9417_v30 = vadd.f32 %v9416_v52, %v9415_v20 }
 0x4aa   : >> { %v12418_v54 = vadd.f32 %v7043_v17, %v7011_v32  ;;  %v7014_v19 = vmax.f32 %v6982_v16, 0.0  ;;  %v6980_v34 = vadd.f32 %v6928_v49, %v12225_v5  ;;  %v7049_v17 = vld [vmem:[%s10571_s6 + $0xf0] sm:$0xff] }
 0x4ab   : >> { %v6940_v59 = vpop.f32.mrf.mxu0  ;;  %v9419_v18 = vpop.f32.mrf.mxu1  ;;  %v13383_v16 = vld [vmem:[#allocation19_spill] sm:$0xff] }
 0x4ac   : >> { %v12424_v21 = vadd.f32 %v7046_v23, %v7014_v19  ;;  %v7012_v10 = vmax.f32 %v6980_v34, 0.0  ;;  %v6941_v1 = vadd.f32 %v9414_v63, %v6940_v59  ;;  %v9420_v4 = vadd.f32 %v9419_v18, %v9418_v35  ;;  %v7048_v23 = vld [vmem:[%s10571_s6 + $0xe8] sm:$0xff]  ;;  %v7050_v34 = vld [vmem:[%s10571_s6 + $0xf8] sm:$0xff] }
 0x4ad   : >> { %v9735_v45 = vpop.f32.mrf.mxu0  ;;  %v9421_v58 = vpop.f32.mrf.mxu1  ;;  %v6117_v52 = vadd.f32 %v13383_v16, %v5956_v7 }
 0x4ae   : >> { %v12426_v33 = vadd.f32 %v7044_v56, %v7012_v10  ;;  %v6983_v5 = vadd.f32 %v6941_v1, %v12243_v6  ;;  %v6949_v22 = vadd.f32 %v9734_v53, %v9420_v4  ;;  %v13382_v6 = vld [vmem:[#allocation20_spill] sm:$0xff] }
 0x4af   : >> { %v6943_v38 = vpop.f32.mrf.mxu0  ;;  %v9422_v13 = vpop.f32.mrf.mxu1 }
 0x4b0   : >> { %v7015_v0 = vmax.f32 %v6983_v5, 0.0  ;;  %v6944_v43 = vadd.f32 %v9417_v30, %v6943_v38  ;;  %v6985_v57 = vadd.f32 %v6949_v22, %v6114_v11  ;;  %v9423_v20 = vadd.f32 %v9422_v13, %v9421_v58 }
 0x4b2   : >> { %v12434_v44 = vadd.f32 %v7047_v26, %v7015_v0  ;;  %v6984_v32 = vadd.f32 %v6944_v43, %v13382_v6  ;;  %v7017_v2 = vmax.f32 %v6985_v57, 0.0  ;;  %v6952_v49 = vadd.f32 %v9735_v45, %v9423_v20 }
 0x4b4   : >> { %v7016_v63 = vmax.f32 %v6984_v32, 0.0  ;;  %v12439_v53 = vadd.f32 %v7049_v17, %v7017_v2  ;;  %v6986_v19 = vadd.f32 %v6952_v49, %v6117_v52  ;;  %7086 = sbr.rel (%p8495_p11) target bundleno = 1225 (0x4c9), region = 55 }
 0x4b6   : >> { %v12442_v35 = vadd.f32 %v7048_v23, %v7016_v63  ;;  %v7018_v41 = vmax.f32 %v6986_v19, 0.0 }
 0x4b8   : >> { %v12444_v56 = vadd.f32 %v7050_v34, %v7018_v41 }
 0x4b9   : >> { %7087 = vst [vmem:[%s11256_s18] sm:$0xff] %v12282_v12  ;;  %7088 = vst [vmem:[%s11256_s18 + $0x8] sm:$0xff] %v12296_v9  ;;  %v13384_v59 = vld [vmem:[#allocation21_spill] sm:$0xff] }
 0x4ba   : >> { %7089 = vst [vmem:[%s11256_s18 + $0x10] sm:$0xff] %v12275_v55  ;;  %7090 = vst [vmem:[%s11256_s18 + $0x18] sm:$0xff] %v12289_v29 }
 0x4bb   : >> { %7091 = vst [vmem:[%s11256_s18 + $0x20] sm:$0xff] %v12310_v61  ;;  %7092 = vst [vmem:[%s11256_s18 + $0x28] sm:$0xff] %v12324_v50 }
 0x4bc   : >> { %7093 = vst [vmem:[%s11256_s18 + $0x30] sm:$0xff] %v12303_v28  ;;  %7094 = vst [vmem:[%s11256_s18 + $0x38] sm:$0xff] %v12317_v40 }
 0x4bd   : >> { %7095 = vst [vmem:[%s11256_s18 + $0x40] sm:$0xff] %v12338_v42  ;;  %7096 = vst [vmem:[%s11256_s18 + $0x48] sm:$0xff] %v12348_v27 }
 0x4be   : >> { %7097 = vst [vmem:[%s11256_s18 + $0x50] sm:$0xff] %v13384_v59  ;;  %7098 = vst [vmem:[%s11256_s18 + $0x58] sm:$0xff] %v12343_v8 }
 0x4bf   : >> { %7099 = vst [vmem:[%s11256_s18 + $0x60] sm:$0xff] %v12362_v47  ;;  %7100 = vst [vmem:[%s11256_s18 + $0x68] sm:$0xff] %v12374_v15 }
 0x4c0   : >> { %7101 = vst [vmem:[%s11256_s18 + $0x70] sm:$0xff] %v12355_v36  ;;  %7102 = vst [vmem:[%s11256_s18 + $0x78] sm:$0xff] %v12368_v62 }
 0x4c1   : >> { %7103 = vst [vmem:[%s11256_s18 + $0x80] sm:$0xff] %v12384_v37  ;;  %7104 = vst [vmem:[%s11256_s18 + $0x88] sm:$0xff] %v12394_v48 }
 0x4c2   : >> { %7105 = vst [vmem:[%s11256_s18 + $0x90] sm:$0xff] %v12378_v3  ;;  %7106 = vst [vmem:[%s11256_s18 + $0x98] sm:$0xff] %v12388_v60 }
 0x4c3   : >> { %7107 = vst [vmem:[%s11256_s18 + $0xa0] sm:$0xff] %v12402_v51  ;;  %7108 = vst [vmem:[%s11256_s18 + $0xa8] sm:$0xff] %v12410_v31 }
 0x4c4   : >> { %7109 = vst [vmem:[%s11256_s18 + $0xb0] sm:$0xff] %v12398_v46  ;;  %7110 = vst [vmem:[%s11256_s18 + $0xb8] sm:$0xff] %v12406_v25 }
 0x4c5   : >> { %7111 = vst [vmem:[%s11256_s18 + $0xc0] sm:$0xff] %v12418_v54  ;;  %7112 = vst [vmem:[%s11256_s18 + $0xc8] sm:$0xff] %v12426_v33 }
 0x4c6   : >> { %7113 = vst [vmem:[%s11256_s18 + $0xd0] sm:$0xff] %v12414_v24  ;;  %7114 = vst [vmem:[%s11256_s18 + $0xd8] sm:$0xff] %v12424_v21 }
 0x4c7   : >> { %7115 = vst [vmem:[%s11256_s18 + $0xe0] sm:$0xff] %v12434_v44  ;;  %7116 = vst [vmem:[%s11256_s18 + $0xe8] sm:$0xff] %v12442_v35 }
 0x4c8   : >> { %7117 = vst [vmem:[%s11256_s18 + $0xf0] sm:$0xff] %v12439_v53  ;;  %7118 = vst [vmem:[%s11256_s18 + $0xf8] sm:$0xff] %v12444_v56 }
 0x4c9 PF: >> { %p8496_p10 = scmp.ge.s32.totalorder %s10405_s20, 1 }
 0x4cb   : >> { %7122 = sbr.rel (%p8496_p10) target bundleno = 1345 (0x541), region = 59 }
 0x4d0   : >> { %v12514_v10 = vpack.c.bf16 %v12282_v12, %v12282_v12  ;;  %v12518_v18 = vpack.c.bf16 %v12296_v9, %v12296_v9  ;;  %v12522_v1 = vpack.c.bf16 %v12275_v55, %v12275_v55  ;;  %v12526_v4 = vpack.c.bf16 %v12289_v29, %v12289_v29  ;;  %v7507_v22 = vld [vmem:[#allocation2 + $0x18] sm:$0xf]  ;;  %v7511_v17 = vld [vmem:[#allocation2 + $0x30] sm:$0xf]  ;;  %v7515_v2 = vld [vmem:[#allocation2 + $0x48] sm:$0xf] }
 0x4d1   : >> { %v12530_v45 = vpack.c.bf16 %v12310_v61, %v12310_v61  ;;  %v12534_v12 = vpack.c.bf16 %v12324_v50, %v12324_v50  ;;  %v12538_v9 = vpack.c.bf16 %v12303_v28, %v12303_v28  ;;  %v12542_v55 = vpack.c.bf16 %v12317_v40, %v12317_v40 }
 0x4d2   : >> { %v7220_v30 = vshrl.u32 %v12514_v10, 16  ;;  %v7223_v29 = vshll.u32 %v12514_v10, 16  ;;  %7603 = vst [vmem:[#allocation2 + $0x1c] sm:$0xf] %v12514_v10  ;;  %v7228_v61 = vshrl.u32 %v12518_v18, 16  ;;  %v7231_v5 = vshll.u32 %v12518_v18, 16 }
 0x4d3   : >> { %7604 = vst [vmem:[#allocation2 + $0x28] sm:$0xf] %v12518_v18  ;;  %7605 = vst [vmem:[#allocation2 + $0x34] sm:$0xf] %v12522_v1  ;;  %v7236_v28 = vshrl.u32 %v12522_v1, 16  ;;  %v7239_v40 = vshll.u32 %v12522_v1, 16 }
 0x4d4   : >> { %7606 = vst [vmem:[#allocation2 + $0x40] sm:$0xf] %v12526_v4  ;;  %v7244_v50 = vshrl.u32 %v12526_v4, 16  ;;  %v7247_v58 = vshll.u32 %v12526_v4, 16  ;;  %7607 = vst [vmem:[#allocation2 + $0x4c] sm:$0xf] %v12530_v45 }
 0x4d5   : >> { %7608 = vst [vmem:[#allocation2 + $0x58] sm:$0xf] %v12534_v12  ;;  %7609 = vst [vmem:[#allocation2 + $0x64] sm:$0xf] %v12538_v9  ;;  %v7222_v39 = vrot.slane %v7220_v30, 7  ;;  %v7230_v11 = vrot.slane %v7228_v61, 7 }
 0x4d6   : >> { %7610 = vst [vmem:[#allocation2 + $0x70] sm:$0xf] %v12542_v55  ;;  %v7252_v14 = vshrl.u32 %v12530_v45, 16  ;;  %v7255_v7 = vshll.u32 %v12530_v45, 16  ;;  %v7238_v26 = vrot.slane %v7236_v28, 7  ;;  %v7246_v38 = vrot.slane %v7244_v50, 7 }
 0x4d7   : >> { %v13247_v0 = vshrl.u32 %v12534_v12, 16  ;;  %v7263_v13 = vshll.u32 %v12534_v12, 16  ;;  %v7225_v43 = vor.u32 %v7223_v29, %v7222_v39  ;;  %v7226_v57 = vrot.slane %v7222_v39, 4  ;;  %v7816_v45 = vld [vmem:[#allocation2 + $0x44] sm:$0xf] }
 0x4d8   : >> { %v7233_v20 = vor.u32 %v7231_v5, %v7230_v11  ;;  %v7254_v6 = vrot.slane %v7252_v14, 7  ;;  %v7241_v32 = vor.u32 %v7239_v40, %v7238_v26  ;;  %v7242_v16 = vrot.slane %v7238_v26, 4 }
 0x4d9   : >> { %v7249_v52 = vor.u32 %v7247_v58, %v7246_v38  ;;  %v7262_v49 = vrot.slane %v13247_v0, 7  ;;  %v7508_v63 = vsel %vm10680_vm9, %v7225_v43, %v7507_v22  ;;  %v13244_v22 = vshrl.u32 %v12538_v9, 16 }
 0x4da   : >> { %v7234_v34 = vsel %vm10694_vm10, %v7226_v57, %v7233_v20  ;;  %v7257_v41 = vor.u32 %v7255_v7, %v7254_v6  ;;  %v7258_v59 = vrot.slane %v7254_v6, 4  ;;  %7509 = vst [vmem:[#allocation2 + $0x18] sm:$0xf] %v7508_v63  ;;  %v7512_v39 = vsel %vm10680_vm9, %v7241_v32, %v7511_v17 }
 0x4db   : >> { %7510 = vst [vmem:[#allocation2 + $0x24] sm:$0xf] %v7234_v34  ;;  %v7250_v11 = vsel %vm10694_vm10, %v7242_v16, %v7249_v52  ;;  %v7265_v26 = vor.u32 %v7263_v13, %v7262_v49  ;;  %7513 = vst [vmem:[#allocation2 + $0x30] sm:$0xf] %v7512_v39  ;;  %v13242_v43 = vshll.u32 %v12538_v9, 16  ;;  %v13240_v57 = vshrl.u32 %v12542_v55, 16 }
 0x4dc   : >> { %7514 = vst [vmem:[#allocation2 + $0x3c] sm:$0xf] %v7250_v11  ;;  %v7516_v38 = vsel %vm10680_vm9, %v7257_v41, %v7515_v2  ;;  %v13241_v20 = vshll.u32 %v12542_v55, 16  ;;  %v7270_v6 = vrot.slane %v13244_v22, 7  ;;  %v12608_v32 = vpack.c.bf16 %v12338_v42, %v12338_v42  ;;  %v7519_v52 = vld [vmem:[#allocation2 + $0x60] sm:$0xf] }
 0x4dd   : >> { %7517 = vst [vmem:[#allocation2 + $0x48] sm:$0xf] %v7516_v38  ;;  %v7266_v17 = vsel %vm10694_vm10, %v7258_v59, %v7265_v26  ;;  %v12612_v16 = vpack.c.bf16 %v12348_v27, %v12348_v27  ;;  %v7278_v2 = vrot.slane %v13240_v57, 7  ;;  %v13387_v49 = vld [vmem:[#allocation21_spill] sm:$0xff]  ;;  %v12622_v34 = vpack.c.bf16 %v12343_v8, %v12343_v8  ;;  %v7523_v57 = vld [vmem:[#allocation2 + $0x78] sm:$0xf] }
 0x4de   : >> { %7518 = vst [vmem:[#allocation2 + $0x54] sm:$0xf] %v7266_v17  ;;  %v12618_v63 = vpack.c.bf16 %v13387_v49, %v13387_v49  ;;  %v12626_v42 = vpack.c.bf16 %v12362_v47, %v12362_v47  ;;  %v7273_v27 = vor.u32 %v13242_v43, %v7270_v6  ;;  %v7274_v41 = vrot.slane %v7270_v6, 4  ;;  %7611 = vst [vmem:[#allocation2 + $0x7c] sm:$0xf] %v12608_v32 }
 0x4df   : >> { %v13243_v59 = vshrl.u32 %v12608_v32, 16  ;;  %v13249_v39 = vshll.u32 %v12608_v32, 16  ;;  %7612 = vst [vmem:[#allocation2 + $0x88] sm:$0xf] %v12612_v16  ;;  %v7281_v8 = vor.u32 %v13241_v20, %v7278_v2  ;;  %v13245_v11 = vshrl.u32 %v12612_v16, 16 }
 0x4e0   : >> { %v7295_v47 = vshll.u32 %v12612_v16, 16  ;;  %v13246_v26 = vshrl.u32 %v12618_v63, 16  ;;  %7613 = vst [vmem:[#allocation2 + $0x94] sm:$0xf] %v12618_v63  ;;  %7614 = vst [vmem:[#allocation2 + $0xa0] sm:$0xf] %v12622_v34  ;;  %v7520_v38 = vsel %vm10680_vm9, %v7273_v27, %v7519_v52 }
 0x4e1   : >> { %7615 = vst [vmem:[#allocation2 + $0xac] sm:$0xf] %v12626_v42  ;;  %v7286_v17 = vrot.slane %v13243_v59, 7  ;;  %v13250_v6 = vshll.u32 %v12618_v63, 16  ;;  %v13248_v2 = vshrl.u32 %v12622_v34, 16  ;;  %v7282_v49 = vsel %vm10694_vm10, %v7274_v41, %v7281_v8 }
 0x4e2   : >> { %7521 = vst [vmem:[#allocation2 + $0x60] sm:$0xf] %v7520_v38  ;;  %v7294_v20 = vrot.slane %v13245_v11, 7  ;;  %v7302_v43 = vrot.slane %v13246_v26, 7  ;;  %v13272_v52 = vshll.u32 %v12622_v34, 16  ;;  %v13259_v41 = vshrl.u32 %v12626_v42, 16 }
 0x4e3   : >> { %7522 = vst [vmem:[#allocation2 + $0x6c] sm:$0xf] %v7282_v49  ;;  %v7289_v27 = vor.u32 %v13249_v39, %v7286_v17  ;;  %v7290_v59 = vrot.slane %v7286_v17, 4  ;;  %v7527_v22 = vld [vmem:[#allocation2 + $0x90] sm:$0xf]  ;;  %v7310_v38 = vrot.slane %v13248_v2, 7  ;;  %v12673_v39 = vpack.c.bf16 %v12374_v15, %v12374_v15 }
 0x4e4   : >> { %v7297_v8 = vor.u32 %v7295_v47, %v7294_v20  ;;  %v7305_v11 = vor.u32 %v13250_v6, %v7302_v43  ;;  %v7306_v26 = vrot.slane %v7302_v43, 4  ;;  %v13255_v0 = vshll.u32 %v12626_v42, 16  ;;  %v7531_v6 = vld [vmem:[#allocation2 + $0xa8] sm:$0xf] }
 0x4e5   : >> { %v7524_v49 = vsel %vm10680_vm9, %v7289_v27, %v7523_v57  ;;  %v7313_v17 = vor.u32 %v13272_v52, %v7310_v38  ;;  %v7318_v2 = vrot.slane %v13259_v41, 7  ;;  %v12681_v57 = vpack.c.bf16 %v12355_v36, %v12355_v36  ;;  %7616 = vst [vmem:[#allocation2 + $0xb8] sm:$0xf] %v12673_v39 }
 0x4e6   : >> { %7525 = vst [vmem:[#allocation2 + $0x78] sm:$0xf] %v7524_v49  ;;  %v7298_v20 = vsel %vm10694_vm10, %v7290_v59, %v7297_v8  ;;  %v7528_v43 = vsel %vm10680_vm9, %v7305_v11, %v7527_v22  ;;  %v12685_v27 = vpack.c.bf16 %v12368_v62, %v12368_v62  ;;  %v13251_v22 = vshrl.u32 %v12673_v39, 16 }
 0x4e7   : >> { %7526 = vst [vmem:[#allocation2 + $0x84] sm:$0xf] %v7298_v20  ;;  %7529 = vst [vmem:[#allocation2 + $0x90] sm:$0xf] %v7528_v43  ;;  %v7314_v15 = vsel %vm10694_vm10, %v7306_v26, %v7313_v17  ;;  %v7321_v59 = vor.u32 %v13255_v0, %v7318_v2  ;;  %v7322_v38 = vrot.slane %v7318_v2, 4  ;;  %v13254_v36 = vshll.u32 %v12673_v39, 16 }
 0x4e8   : >> { %7530 = vst [vmem:[#allocation2 + $0x9c] sm:$0xf] %v7314_v15  ;;  %v13253_v11 = vshrl.u32 %v12681_v57, 16  ;;  %v13256_v62 = vshll.u32 %v12681_v57, 16  ;;  %7617 = vst [vmem:[#allocation2 + $0xc4] sm:$0xf] %v12681_v57  ;;  %v12706_v17 = vpack.c.bf16 %v12384_v37, %v12384_v37  ;;  %v12714_v15 = vpack.c.bf16 %v12394_v48, %v12394_v48 }
 0x4e9   : >> { %v13252_v8 = vshrl.u32 %v12685_v27, 16  ;;  %7618 = vst [vmem:[#allocation2 + $0xd0] sm:$0xf] %v12685_v27  ;;  %v7532_v26 = vsel %vm10680_vm9, %v7321_v59, %v7531_v6  ;;  %v7326_v2 = vrot.slane %v13251_v22, 7  ;;  %v13257_v49 = vshll.u32 %v12685_v27, 16 }
 0x4ea   : >> { %7533 = vst [vmem:[#allocation2 + $0xa8] sm:$0xf] %v7532_v26  ;;  %v7334_v20 = vrot.slane %v13253_v11, 7  ;;  %v12718_v6 = vpack.c.bf16 %v12378_v3, %v12378_v3  ;;  %v7535_v37 = vld [vmem:[#allocation2 + $0xc0] sm:$0xf]  ;;  %v13258_v26 = vshrl.u32 %v12706_v17, 16 }
 0x4eb   : >> { %v7342_v43 = vrot.slane %v13252_v8, 7  ;;  %v7329_v59 = vor.u32 %v13254_v36, %v7326_v2  ;;  %v13263_v22 = vshll.u32 %v12706_v17, 16  ;;  %7619 = vst [vmem:[#allocation2 + $0xdc] sm:$0xf] %v12706_v17  ;;  %v12727_v8 = vpack.c.bf16 %v12388_v60, %v12388_v60  ;;  %7620 = vst [vmem:[#allocation2 + $0xe8] sm:$0xf] %v12714_v15 }
 0x4ec   : >> { %v7337_v48 = vor.u32 %v13256_v62, %v7334_v20  ;;  %v7338_v11 = vrot.slane %v7334_v20, 4  ;;  %v13260_v2 = vshrl.u32 %v12714_v15, 16  ;;  %7621 = vst [vmem:[#allocation2 + $0xf4] sm:$0xf] %v12718_v6  ;;  %v7350_v60 = vrot.slane %v13258_v26, 7 }
 0x4ed   : >> { %v7345_v3 = vor.u32 %v13257_v49, %v7342_v43  ;;  %v7330_v36 = vsel %vm10694_vm10, %v7322_v38, %v7329_v59  ;;  %v13262_v0 = vshll.u32 %v12714_v15, 16  ;;  %v13261_v62 = vshrl.u32 %v12718_v6, 16  ;;  %7622 = vst [vmem:[#allocation2 + $0x100] sm:$0xf] %v12727_v8  ;;  %v7539_v49 = vld [vmem:[#allocation2 + $0xd8] sm:$0xf] }
 0x4ee   : >> { %7534 = vst [vmem:[#allocation2 + $0xb4] sm:$0xf] %v7330_v36  ;;  %v7536_v20 = vsel %vm10680_vm9, %v7337_v48, %v7535_v37  ;;  %v7358_v38 = vrot.slane %v13260_v2, 7  ;;  %v13271_v59 = vshll.u32 %v12718_v6, 16  ;;  %v7353_v26 = vor.u32 %v13263_v22, %v7350_v60  ;;  %v7543_v48 = vld [vmem:[#allocation2 + $0xf0] sm:$0xf] }
 0x4ef   : >> { %v7346_v43 = vsel %vm10694_vm10, %v7338_v11, %v7345_v3  ;;  %7537 = vst [vmem:[#allocation2 + $0xc0] sm:$0xf] %v7536_v20  ;;  %v7354_v41 = vrot.slane %v7350_v60, 4  ;;  %v7366_v36 = vrot.slane %v13261_v62, 7  ;;  %v13266_v37 = vshrl.u32 %v12727_v8, 16 }
 0x4f0   : >> { %7538 = vst [vmem:[#allocation2 + $0xcc] sm:$0xf] %v7346_v43  ;;  %v7361_v11 = vor.u32 %v13262_v0, %v7358_v38  ;;  %v13270_v3 = vshll.u32 %v12727_v8, 16  ;;  %v12760_v2 = vpack.c.bf16 %v12402_v51, %v12402_v51  ;;  %v12764_v20 = vpack.c.bf16 %v12410_v31, %v12410_v31 }
 0x4f1   : >> { %v7540_v60 = vsel %vm10680_vm9, %v7353_v26, %v7539_v49  ;;  %v7369_v43 = vor.u32 %v13271_v59, %v7366_v36  ;;  %v7370_v62 = vrot.slane %v7366_v36, 4  ;;  %v7374_v38 = vrot.slane %v13266_v37, 7 }
 0x4f2   : >> { %7541 = vst [vmem:[#allocation2 + $0xd8] sm:$0xf] %v7540_v60  ;;  %v7362_v0 = vsel %vm10694_vm10, %v7354_v41, %v7361_v11  ;;  %v13265_v51 = vshrl.u32 %v12760_v2, 16  ;;  %v13268_v22 = vshll.u32 %v12760_v2, 16  ;;  %7623 = vst [vmem:[#allocation2 + $0x10c] sm:$0xf] %v12760_v2  ;;  %v12786_v41 = vpack.c.bf16 %v12398_v46, %v12398_v46 }
 0x4f3   : >> { %v13264_v31 = vshrl.u32 %v12764_v20, 16  ;;  %7624 = vst [vmem:[#allocation2 + $0x118] sm:$0xf] %v12764_v20  ;;  %7542 = vst [vmem:[#allocation2 + $0xe4] sm:$0xf] %v7362_v0  ;;  %v7544_v49 = vsel %vm10680_vm9, %v7369_v43, %v7543_v48  ;;  %v7377_v26 = vor.u32 %v13270_v3, %v7374_v38  ;;  %v13267_v36 = vshll.u32 %v12764_v20, 16 }
 0x4f4   : >> { %7545 = vst [vmem:[#allocation2 + $0xf0] sm:$0xf] %v7544_v49  ;;  %v7382_v11 = vrot.slane %v13265_v51, 7  ;;  %v12794_v0 = vpack.c.bf16 %v12406_v25, %v12406_v25  ;;  %v12798_v48 = vpack.c.bf16 %v12418_v54, %v12418_v54  ;;  %v7547_v46 = vld [vmem:[#allocation2 + $0x108] sm:$0xf]  ;;  %v13269_v38 = vshrl.u32 %v12786_v41, 16 }
 0x4f5   : >> { %v7390_v60 = vrot.slane %v13264_v31, 7  ;;  %v7378_v43 = vsel %vm10694_vm10, %v7370_v62, %v7377_v26  ;;  %v13285_v49 = vshll.u32 %v12786_v41, 16  ;;  %7625 = vst [vmem:[#allocation2 + $0x124] sm:$0xf] %v12786_v41  ;;  %v12807_v31 = vpack.c.bf16 %v12426_v33, %v12426_v33 }
 0x4f6   : >> { %7546 = vst [vmem:[#allocation2 + $0xfc] sm:$0xf] %v7378_v43  ;;  %v7385_v25 = vor.u32 %v13268_v22, %v7382_v11  ;;  %v7386_v54 = vrot.slane %v7382_v11, 4  ;;  %v13274_v62 = vshrl.u32 %v12794_v0, 16  ;;  %7626 = vst [vmem:[#allocation2 + $0x130] sm:$0xf] %v12794_v0 }
 0x4f7   : >> { %v7393_v51 = vor.u32 %v13267_v36, %v7390_v60  ;;  %7627 = vst [vmem:[#allocation2 + $0x13c] sm:$0xf] %v12798_v48  ;;  %v7398_v26 = vrot.slane %v13269_v38, 7  ;;  %v13276_v33 = vshll.u32 %v12794_v0, 16  ;;  %v13273_v43 = vshrl.u32 %v12798_v48, 16 }
 0x4f8   : >> { %v13282_v37 = vshll.u32 %v12798_v48, 16  ;;  %7628 = vst [vmem:[#allocation2 + $0x148] sm:$0xf] %v12807_v31  ;;  %v7548_v11 = vsel %vm10680_vm9, %v7385_v25, %v7547_v46  ;;  %v7551_v36 = vld [vmem:[#allocation2 + $0x120] sm:$0xf]  ;;  %v7406_v22 = vrot.slane %v13274_v62, 7 }
 0x4f9   : >> { %v7394_v60 = vsel %vm10694_vm10, %v7386_v54, %v7393_v51  ;;  %v13275_v38 = vshrl.u32 %v12807_v31, 16  ;;  %7549 = vst [vmem:[#allocation2 + $0x108] sm:$0xf] %v7548_v11  ;;  %v7401_v3 = vor.u32 %v13285_v49, %v7398_v26  ;;  %v7402_v59 = vrot.slane %v7398_v26, 4  ;;  %v7555_v25 = vld [vmem:[#allocation2 + $0x138] sm:$0xf] }
 0x4fa   : >> { %7550 = vst [vmem:[#allocation2 + $0x114] sm:$0xf] %v7394_v60  ;;  %v7414_v52 = vrot.slane %v13273_v43, 7  ;;  %v13280_v46 = vshll.u32 %v12807_v31, 16  ;;  %v7409_v51 = vor.u32 %v13276_v33, %v7406_v22  ;;  %v12840_v11 = vpack.c.bf16 %v12414_v24, %v12414_v24 }
 0x4fb   : >> { %v7422_v54 = vrot.slane %v13275_v38, 7  ;;  %v12844_v60 = vpack.c.bf16 %v12424_v21, %v12424_v21  ;;  %v7552_v26 = vsel %vm10680_vm9, %v7401_v3, %v7551_v36  ;;  %v12852_v22 = vpack.c.bf16 %v12434_v44, %v12434_v44 }
 0x4fc   : >> { %v7417_v43 = vor.u32 %v13282_v37, %v7414_v52  ;;  %v7418_v62 = vrot.slane %v7414_v52, 4  ;;  %7553 = vst [vmem:[#allocation2 + $0x120] sm:$0xf] %v7552_v26  ;;  %v7410_v24 = vsel %vm10694_vm10, %v7402_v59, %v7409_v51  ;;  %v13277_v21 = vshrl.u32 %v12840_v11, 16  ;;  %7629 = vst [vmem:[#allocation2 + $0x154] sm:$0xf] %v12840_v11 }
 0x4fd   : >> { %v7425_v38 = vor.u32 %v13280_v46, %v7422_v54  ;;  %v13281_v33 = vshll.u32 %v12840_v11, 16  ;;  %7630 = vst [vmem:[#allocation2 + $0x160] sm:$0xf] %v12844_v60  ;;  %7554 = vst [vmem:[#allocation2 + $0x12c] sm:$0xf] %v7410_v24  ;;  %v13278_v52 = vshrl.u32 %v12844_v60, 16 }
 0x4fe   : >> { %v7556_v44 = vsel %vm10680_vm9, %v7417_v43, %v7555_v25  ;;  %v13284_v3 = vshll.u32 %v12844_v60, 16  ;;  %v13279_v59 = vshrl.u32 %v12852_v22, 16  ;;  %7631 = vst [vmem:[#allocation2 + $0x16c] sm:$0xf] %v12852_v22  ;;  %v7430_v51 = vrot.slane %v13277_v21, 7 }
 0x4ff   : >> { %7557 = vst [vmem:[#allocation2 + $0x138] sm:$0xf] %v7556_v44  ;;  %v7426_v36 = vsel %vm10694_vm10, %v7418_v62, %v7425_v38  ;;  %v13283_v54 = vshll.u32 %v12852_v22, 16  ;;  %v12875_v43 = vpack.c.bf16 %v12442_v35, %v12442_v35  ;;  %v7559_v25 = vld [vmem:[#allocation2 + $0x150] sm:$0xf]  ;;  %v7438_v26 = vrot.slane %v13278_v52, 7 }
 0x500   : >> { %7558 = vst [vmem:[#allocation2 + $0x144] sm:$0xf] %v7426_v36  ;;  %v7446_v24 = vrot.slane %v13279_v59, 7  ;;  %v12883_v38 = vpack.c.bf16 %v12439_v53, %v12439_v53  ;;  %v12887_v62 = vpack.c.bf16 %v12444_v56, %v12444_v56  ;;  %v7433_v35 = vor.u32 %v13281_v33, %v7430_v51  ;;  %v7563_v36 = vld [vmem:[#allocation2 + $0x168] sm:$0xf] }
 0x501   : >> { %v7434_v44 = vrot.slane %v7430_v51, 4  ;;  %v7452_v21 = vshrl.u32 %v12875_v43, 16  ;;  %v7455_v52 = vshll.u32 %v12875_v43, 16  ;;  %7632 = vst [vmem:[#allocation2 + $0x178] sm:$0xf] %v12875_v43  ;;  %v7441_v59 = vor.u32 %v13284_v3, %v7438_v26 }
 0x502   : >> { %v7449_v53 = vor.u32 %v13283_v54, %v7446_v24  ;;  %v7450_v46 = vrot.slane %v7446_v24, 4  ;;  %v7460_v56 = vshrl.u32 %v12883_v38, 16  ;;  %7633 = vst [vmem:[#allocation2 + $0x184] sm:$0xf] %v12883_v38  ;;  %7634 = vst [vmem:[#allocation2 + $0x190] sm:$0xf] %v12887_v62  ;;  %v7560_v51 = vsel %vm10680_vm9, %v7433_v35, %v7559_v25 }
 0x503   : >> { %v7454_v33 = vrot.slane %v7452_v21, 7  ;;  %v7463_v37 = vshll.u32 %v12883_v38, 16  ;;  %v13286_v26 = vshrl.u32 %v12887_v62, 16  ;;  %7561 = vst [vmem:[#allocation2 + $0x150] sm:$0xf] %v7560_v51  ;;  %v7442_v24 = vsel %vm10694_vm10, %v7434_v44, %v7441_v59 }
 0x504   : >> { %v7564_v54 = vsel %vm10680_vm9, %v7449_v53, %v7563_v36  ;;  %v7462_v3 = vrot.slane %v7460_v56, 7  ;;  %v7471_v49 = vshll.u32 %v12887_v62, 16  ;;  %7562 = vst [vmem:[#allocation2 + $0x15c] sm:$0xf] %v7442_v24  ;;  %v7567_v35 = vld [vmem:[#allocation2 + $0x180] sm:$0xf] }
 0x505   : >> { %7565 = vst [vmem:[#allocation2 + $0x168] sm:$0xf] %v7564_v54  ;;  %v7457_v25 = vor.u32 %v7455_v52, %v7454_v33  ;;  %v7470_v51 = vrot.slane %v13286_v26, 7  ;;  %v7635_v59 = vrot.slane %v7220_v30, 4  ;;  %v7636_v44 = vrot.slane %v7223_v29, 5 }
 0x506   : >> { %v7465_v36 = vor.u32 %v7463_v37, %v7462_v3  ;;  %v7466_v53 = vrot.slane %v7462_v3, 4  ;;  %v7639_v54 = vrot.slane %v7231_v5, 5  ;;  %v7641_v33 = vrot.slane %v7228_v61, 4 }
 0x507   : >> { %v7458_v24 = vsel %vm10694_vm10, %v7450_v46, %v7457_v25  ;;  %v7473_v26 = vor.u32 %v7471_v49, %v7470_v51  ;;  %v7637_v30 = vor.u32 %v7636_v44, %v7635_v59  ;;  %v7644_v10 = vrot.slane %v7236_v28, 4  ;;  %v7812_v25 = vld [vmem:[#allocation2 + $0x2c] sm:$0xf] }
 0x508   : >> { %7566 = vst [vmem:[#allocation2 + $0x174] sm:$0xf] %v7458_v24  ;;  %v7568_v29 = vsel %vm10680_vm9, %v7465_v36, %v7567_v35  ;;  %v7642_v3 = vor.u32 %v7641_v33, %v7639_v54  ;;  %v7645_v5 = vrot.slane %v7239_v40, 5  ;;  %v7648_v18 = vrot.slane %v7247_v58, 5 }
 0x509   : >> { %7569 = vst [vmem:[#allocation2 + $0x180] sm:$0xf] %v7568_v29  ;;  %v7474_v61 = vsel %vm10694_vm10, %v7466_v53, %v7473_v26  ;;  %v7638_v46 = vrot.slane %v7637_v30, 4  ;;  %v7650_v28 = vrot.slane %v7244_v50, 4  ;;  %v7653_v23 = vrot.slane %v7252_v14, 4 }
 0x50a   : >> { %7570 = vst [vmem:[#allocation2 + $0x18c] sm:$0xf] %v7474_v61  ;;  %v7643_v35 = vrot.slane %v7642_v3, 4  ;;  %v7646_v51 = vor.u32 %v7645_v5, %v7644_v10  ;;  %v7654_v1 = vrot.slane %v7255_v7, 5  ;;  %v7657_v40 = vrot.slane %v7263_v13, 5 }
 0x50b   : >> { %v7640_v19 = vsel %vm11050_vm13, %v7638_v46, %v7639_v54  ;;  %v7651_v26 = vor.u32 %v7650_v28, %v7648_v18  ;;  %v13389_v59 = vshrl.u32 %v12534_v12, 16  ;;  %v13390_v50 = vshrl.u32 %v12538_v9, 16  ;;  %v7820_v61 = vld [vmem:[#allocation2 + $0x5c] sm:$0xf] }
 0x50c   : >> { %7811 = vst [vmem:[#allocation2 + $0x20] sm:$0xf] %v7640_v19  ;;  %v7813_v36 = vsel %vm11076_vm14, %v7643_v35, %v7812_v25  ;;  %v7647_v53 = vrot.slane %v7646_v51, 4  ;;  %v7655_v7 = vor.u32 %v7654_v1, %v7653_v23  ;;  %v13392_v33 = vshll.u32 %v12538_v9, 16  ;;  %v7824_v19 = vld [vmem:[#allocation2 + $0x74] sm:$0xf] }
 0x50d   : >> { %v7659_v4 = vrot.slane %v13389_v59, 4  ;;  %v7662_v44 = vrot.slane %v13390_v50, 4  ;;  %7814 = vst [vmem:[#allocation2 + $0x2c] sm:$0xf] %v7813_v36  ;;  %v7652_v24 = vrot.slane %v7651_v26, 4  ;;  %v13393_v30 = vshll.u32 %v12542_v55, 16 }
 0x50e   : >> { %v7663_v13 = vrot.slane %v13392_v33, 5  ;;  %v13394_v10 = vshrl.u32 %v12542_v55, 16  ;;  %v7649_v3 = vsel %vm11050_vm13, %v7647_v53, %v7648_v18  ;;  %v7656_v5 = vrot.slane %v7655_v7, 4 }
 0x50f   : >> { %v7660_v54 = vor.u32 %v7659_v4, %v7657_v40  ;;  %v7666_v12 = vrot.slane %v13393_v30, 5  ;;  %v13395_v25 = vshrl.u32 %v12608_v32, 16  ;;  %7815 = vst [vmem:[#allocation2 + $0x38] sm:$0xf] %v7649_v3  ;;  %v7817_v9 = vsel %vm11076_vm14, %v7652_v24, %v7816_v45 }
 0x510   : >> { %v7668_v29 = vrot.slane %v13394_v10, 4  ;;  %v7664_v46 = vor.u32 %v7663_v13, %v7662_v44  ;;  %v13396_v51 = vshll.u32 %v12608_v32, 16  ;;  %7818 = vst [vmem:[#allocation2 + $0x44] sm:$0xf] %v7817_v9  ;;  %v7658_v55 = vsel %vm11050_vm13, %v7656_v5, %v7657_v40 }
 0x511   : >> { %v7671_v28 = vrot.slane %v13395_v25, 4  ;;  %v7661_v23 = vrot.slane %v7660_v54, 4  ;;  %v7675_v26 = vrot.slane %v7295_v47, 5  ;;  %v13397_v59 = vshrl.u32 %v12612_v16, 16  ;;  %7819 = vst [vmem:[#allocation2 + $0x50] sm:$0xf] %v7658_v55 }
 0x512   : >> { %v7669_v35 = vor.u32 %v7668_v29, %v7666_v12  ;;  %v7672_v1 = vrot.slane %v13396_v51, 5  ;;  %v7665_v18 = vrot.slane %v7664_v46, 4  ;;  %v13398_v32 = vshrl.u32 %v12618_v63, 16  ;;  %v7828_v54 = vld [vmem:[#allocation2 + $0x8c] sm:$0xf] }
 0x513   : >> { %v7677_v4 = vrot.slane %v13397_v59, 4  ;;  %v7821_v50 = vsel %vm11076_vm14, %v7661_v23, %v7820_v61  ;;  %v13399_v7 = vshll.u32 %v12618_v63, 16  ;;  %v13400_v16 = vshll.u32 %v12622_v34, 16 }
 0x514   : >> { %v7670_v44 = vrot.slane %v7669_v35, 4  ;;  %v7673_v36 = vor.u32 %v7672_v1, %v7671_v28  ;;  %v7680_v53 = vrot.slane %v13398_v32, 4  ;;  %7822 = vst [vmem:[#allocation2 + $0x5c] sm:$0xf] %v7821_v50  ;;  %v7667_v40 = vsel %vm11050_vm13, %v7665_v18, %v7666_v12 }
 0x515   : >> { %v7678_v45 = vor.u32 %v7677_v4, %v7675_v26  ;;  %v7681_v47 = vrot.slane %v13399_v7, 5  ;;  %v7684_v33 = vrot.slane %v13400_v16, 5  ;;  %7823 = vst [vmem:[#allocation2 + $0x68] sm:$0xf] %v7667_v40  ;;  %v13401_v30 = vshrl.u32 %v12622_v34, 16 }
 0x516   : >> { %v7825_v13 = vsel %vm11076_vm14, %v7670_v44, %v7824_v19  ;;  %v7674_v24 = vrot.slane %v7673_v36, 4  ;;  %v13402_v29 = vshrl.u32 %v12626_v42, 16  ;;  %v13403_v63 = vshll.u32 %v12626_v42, 16  ;;  %v7832_v42 = vld [vmem:[#allocation2 + $0xa4] sm:$0xf] }
 0x517   : >> { %v7686_v10 = vrot.slane %v13401_v30, 4  ;;  %7826 = vst [vmem:[#allocation2 + $0x74] sm:$0xf] %v7825_v13  ;;  %v7679_v12 = vrot.slane %v7678_v45, 4  ;;  %v7682_v5 = vor.u32 %v7681_v47, %v7680_v53  ;;  %v13404_v46 = vshll.u32 %v12673_v39, 16 }
 0x518   : >> { %v7689_v3 = vrot.slane %v13402_v29, 4  ;;  %v7690_v61 = vrot.slane %v13403_v63, 5  ;;  %v7676_v28 = vsel %vm11050_vm13, %v7674_v24, %v7675_v26  ;;  %v13405_v23 = vshrl.u32 %v12673_v39, 16  ;;  %v7836_v40 = vld [vmem:[#allocation2 + $0xbc] sm:$0xf] }
 0x519   : >> { %v7693_v25 = vrot.slane %v13404_v46, 5  ;;  %v7687_v9 = vor.u32 %v7686_v10, %v7684_v33  ;;  %v13406_v35 = vshrl.u32 %v12681_v57, 16  ;;  %7827 = vst [vmem:[#allocation2 + $0x80] sm:$0xf] %v7676_v28  ;;  %v7829_v1 = vsel %vm11076_vm14, %v7679_v12, %v7828_v54  ;;  %v7840_v30 = vld [vmem:[#allocation2 + $0xd4] sm:$0xf] }
 0x51a   : >> { %v7695_v34 = vrot.slane %v13405_v23, 4  ;;  %v7683_v55 = vrot.slane %v7682_v5, 4  ;;  %v7691_v18 = vor.u32 %v7690_v61, %v7689_v3  ;;  %v13407_v19 = vshll.u32 %v12681_v57, 16  ;;  %7830 = vst [vmem:[#allocation2 + $0x8c] sm:$0xf] %v7829_v1 }
 0x51b   : >> { %v7698_v51 = vrot.slane %v13406_v35, 4  ;;  %v7688_v4 = vrot.slane %v7687_v9, 4  ;;  %v13408_v50 = vshll.u32 %v12685_v27, 16  ;;  %v13409_v44 = vshrl.u32 %v12685_v27, 16  ;;  %v7844_v1 = vld [vmem:[#allocation2 + $0xec] sm:$0xf] }
 0x51c   : >> { %v7699_v59 = vrot.slane %v13407_v19, 5  ;;  %v7696_v26 = vor.u32 %v7695_v34, %v7693_v25  ;;  %v7685_v32 = vsel %vm11050_vm13, %v7683_v55, %v7684_v33  ;;  %v7692_v53 = vrot.slane %v7691_v18, 4 }
 0x51d   : >> { %v7702_v39 = vrot.slane %v13408_v50, 5  ;;  %v7704_v36 = vrot.slane %v13409_v44, 4  ;;  %v13410_v7 = vshrl.u32 %v12706_v17, 16  ;;  %7831 = vst [vmem:[#allocation2 + $0x98] sm:$0xf] %v7685_v32  ;;  %v7833_v57 = vsel %vm11076_vm14, %v7688_v4, %v7832_v42 }
 0x51e   : >> { %v7700_v45 = vor.u32 %v7699_v59, %v7698_v51  ;;  %v7697_v16 = vrot.slane %v7696_v26, 4  ;;  %v13411_v24 = vshll.u32 %v12706_v17, 16  ;;  %7834 = vst [vmem:[#allocation2 + $0xa4] sm:$0xf] %v7833_v57  ;;  %v7694_v27 = vsel %vm11050_vm13, %v7692_v53, %v7693_v25 }
 0x51f   : >> { %v7707_v47 = vrot.slane %v13410_v7, 4  ;;  %v7705_v13 = vor.u32 %v7704_v36, %v7702_v39  ;;  %v13412_v10 = vshll.u32 %v12714_v15, 16  ;;  %v13413_v3 = vshrl.u32 %v12714_v15, 16  ;;  %7835 = vst [vmem:[#allocation2 + $0xb0] sm:$0xf] %v7694_v27 }
 0x520   : >> { %v7708_v54 = vrot.slane %v13411_v24, 5  ;;  %v7701_v33 = vrot.slane %v7700_v45, 4  ;;  %v7837_v5 = vsel %vm11076_vm14, %v7697_v16, %v7836_v40  ;;  %v13414_v17 = vshrl.u32 %v12718_v6, 16 }
 0x521   : >> { %v7711_v29 = vrot.slane %v13412_v10, 5  ;;  %v7713_v12 = vrot.slane %v13413_v3, 4  ;;  %v7706_v63 = vrot.slane %v7705_v13, 4  ;;  %7838 = vst [vmem:[#allocation2 + $0xbc] sm:$0xf] %v7837_v5  ;;  %v13415_v9 = vshll.u32 %v12718_v6, 16 }
 0x522   : >> { %v7709_v61 = vor.u32 %v7708_v54, %v7707_v47  ;;  %v7716_v46 = vrot.slane %v13414_v17, 4  ;;  %v7703_v25 = vsel %vm11050_vm13, %v7701_v33, %v7702_v39  ;;  %v13416_v15 = vshll.u32 %v12727_v8, 16 }
 0x523   : >> { %v7714_v28 = vor.u32 %v7713_v12, %v7711_v29  ;;  %v7717_v23 = vrot.slane %v13415_v9, 5  ;;  %7839 = vst [vmem:[#allocation2 + $0xc8] sm:$0xf] %v7703_v25  ;;  %v7841_v35 = vsel %vm11076_vm14, %v7706_v63, %v7840_v30  ;;  %v13417_v55 = vshrl.u32 %v12727_v8, 16 }
 0x524   : >> { %v7720_v34 = vrot.slane %v13416_v15, 5  ;;  %v7710_v51 = vrot.slane %v7709_v61, 4  ;;  %v13418_v18 = vshrl.u32 %v12760_v2, 16  ;;  %7842 = vst [vmem:[#allocation2 + $0xd4] sm:$0xf] %v7841_v35  ;;  %v13419_v6 = vshll.u32 %v12760_v2, 16 }
 0x525   : >> { %v7722_v42 = vrot.slane %v13417_v55, 4  ;;  %v7715_v59 = vrot.slane %v7714_v28, 4  ;;  %v7718_v4 = vor.u32 %v7717_v23, %v7716_v46  ;;  %v13420_v50 = vshll.u32 %v12764_v20, 16  ;;  %v7848_v2 = vld [vmem:[#allocation2 + $0x104] sm:$0xf] }
 0x526   : >> { %v7725_v19 = vrot.slane %v13418_v18, 4  ;;  %v7726_v26 = vrot.slane %v13419_v6, 5  ;;  %v7712_v44 = vsel %vm11050_vm13, %v7710_v51, %v7711_v29  ;;  %v13421_v32 = vshrl.u32 %v12764_v20, 16  ;;  %v7852_v29 = vld [vmem:[#allocation2 + $0x11c] sm:$0xf] }
 0x527   : >> { %v7729_v39 = vrot.slane %v13420_v50, 5  ;;  %v7723_v36 = vor.u32 %v7722_v42, %v7720_v34  ;;  %v13422_v53 = vshrl.u32 %v12786_v41, 16  ;;  %7843 = vst [vmem:[#allocation2 + $0xe0] sm:$0xf] %v7712_v44  ;;  %v7845_v45 = vsel %vm11076_vm14, %v7715_v59, %v7844_v1  ;;  %v7856_v28 = vld [vmem:[#allocation2 + $0x134] sm:$0xf] }
 0x528   : >> { %v7731_v8 = vrot.slane %v13421_v32, 4  ;;  %v7719_v7 = vrot.slane %v7718_v4, 4  ;;  %v7727_v47 = vor.u32 %v7726_v26, %v7725_v19  ;;  %v13423_v57 = vshll.u32 %v12786_v41, 16  ;;  %7846 = vst [vmem:[#allocation2 + $0xec] sm:$0xf] %v7845_v45 }
 0x529   : >> { %v7734_v40 = vrot.slane %v13422_v53, 4  ;;  %v7724_v13 = vrot.slane %v7723_v36, 4  ;;  %v13424_v54 = vshll.u32 %v12794_v0, 16  ;;  %v13425_v27 = vshrl.u32 %v12794_v0, 16  ;;  %v7860_v50 = vld [vmem:[#allocation2 + $0x14c] sm:$0xf] }
 0x52a   : >> { %v7735_v16 = vrot.slane %v13423_v57, 5  ;;  %v7732_v24 = vor.u32 %v7731_v8, %v7729_v39  ;;  %v7721_v30 = vsel %vm11050_vm13, %v7719_v7, %v7720_v34  ;;  %v7728_v10 = vrot.slane %v7727_v47, 4 }
 0x52b   : >> { %v7738_v20 = vrot.slane %v13424_v54, 5  ;;  %v7740_v33 = vrot.slane %v13425_v27, 4  ;;  %v13426_v12 = vshrl.u32 %v12798_v48, 16  ;;  %7847 = vst [vmem:[#allocation2 + $0xf8] sm:$0xf] %v7721_v30  ;;  %v7849_v41 = vsel %vm11076_vm14, %v7724_v13, %v7848_v2 }
 0x52c   : >> { %v7736_v3 = vor.u32 %v7735_v16, %v7734_v40  ;;  %v7733_v63 = vrot.slane %v7732_v24, 4  ;;  %v13427_v17 = vshll.u32 %v12798_v48, 16  ;;  %7850 = vst [vmem:[#allocation2 + $0x104] sm:$0xf] %v7849_v41  ;;  %v7730_v0 = vsel %vm11050_vm13, %v7728_v10, %v7729_v39 }
 0x52d   : >> { %v7743_v5 = vrot.slane %v13426_v12, 4  ;;  %v7741_v61 = vor.u32 %v7740_v33, %v7738_v20  ;;  %v13428_v9 = vshll.u32 %v12807_v31, 16  ;;  %v13429_v15 = vshrl.u32 %v12807_v31, 16  ;;  %7851 = vst [vmem:[#allocation2 + $0x110] sm:$0xf] %v7730_v0 }
 0x52e   : >> { %v7744_v46 = vrot.slane %v13427_v17, 5  ;;  %v7737_v25 = vrot.slane %v7736_v3, 4  ;;  %v7853_v35 = vsel %vm11076_vm14, %v7733_v63, %v7852_v29  ;;  %v13430_v48 = vshrl.u32 %v12840_v11, 16  ;;  %v7868_v33 = vld [vmem:[#allocation2 + $0x17c] sm:$0xf] }
 0x52f   : >> { %v7747_v23 = vrot.slane %v13428_v9, 5  ;;  %v7749_v34 = vrot.slane %v13429_v15, 4  ;;  %v7742_v51 = vrot.slane %v7741_v61, 4  ;;  %7854 = vst [vmem:[#allocation2 + $0x11c] sm:$0xf] %v7853_v35  ;;  %v13431_v19 = vshll.u32 %v12840_v11, 16 }
 0x530   : >> { %v7745_v1 = vor.u32 %v7744_v46, %v7743_v5  ;;  %v7752_v55 = vrot.slane %v13430_v48, 4  ;;  %v7739_v42 = vsel %vm11050_vm13, %v7737_v25, %v7738_v20  ;;  %v13432_v31 = vshll.u32 %v12844_v60, 16  ;;  %v7872_v3 = vld [vmem:[#allocation2 + $0x194] sm:$0xf] }
 0x531   : >> { %v7750_v18 = vor.u32 %v7749_v34, %v7747_v23  ;;  %v7753_v59 = vrot.slane %v13431_v19, 5  ;;  %7855 = vst [vmem:[#allocation2 + $0x128] sm:$0xf] %v7739_v42  ;;  %v7857_v6 = vsel %vm11076_vm14, %v7742_v51, %v7856_v28  ;;  %v13433_v39 = vshrl.u32 %v12844_v60, 16 }
 0x532   : >> { %v7756_v4 = vrot.slane %v13432_v31, 5  ;;  %v7746_v26 = vrot.slane %v7745_v1, 4  ;;  %v13434_v36 = vshrl.u32 %v12852_v22, 16  ;;  %7858 = vst [vmem:[#allocation2 + $0x134] sm:$0xf] %v7857_v6  ;;  %v13435_v11 = vshll.u32 %v12852_v22, 16 }
 0x533   : >> { %v7758_v44 = vrot.slane %v13433_v39, 4  ;;  %v7751_v8 = vrot.slane %v7750_v18, 4  ;;  %v7754_v53 = vor.u32 %v7753_v59, %v7752_v55  ;;  %v7765_v45 = vrot.slane %v7455_v52, 5  ;;  %v7864_v22 = vld [vmem:[#allocation2 + $0x164] sm:$0xf] }
 0x534   : >> { %v7761_v32 = vrot.slane %v13434_v36, 4  ;;  %v7762_v40 = vrot.slane %v13435_v11, 5  ;;  %v7748_v7 = vsel %vm11050_vm13, %v7746_v26, %v7747_v23  ;;  %v7767_v60 = vrot.slane %v7452_v21, 4 }
 0x535   : >> { %v7759_v2 = vor.u32 %v7758_v44, %v7756_v4  ;;  %v7770_v47 = vrot.slane %v7460_v56, 4  ;;  %7859 = vst [vmem:[#allocation2 + $0x140] sm:$0xf] %v7748_v7  ;;  %v7861_v57 = vsel %vm11076_vm14, %v7751_v8, %v7860_v50  ;;  %v7755_v16 = vrot.slane %v7754_v53, 4 }
 0x536   : >> { %v7763_v13 = vor.u32 %v7762_v40, %v7761_v32  ;;  %v7771_v52 = vrot.slane %v7463_v37, 5  ;;  %7862 = vst [vmem:[#allocation2 + $0x14c] sm:$0xf] %v7861_v57  ;;  %v7768_v54 = vor.u32 %v7767_v60, %v7765_v45  ;;  %v7774_v43 = vrot.slane %v7471_v49, 5 }
 0x537   : >> { %v7760_v24 = vrot.slane %v7759_v2, 4  ;;  %v13436_v21 = vshrl.u32 %v12887_v62, 16  ;;  %v7757_v56 = vsel %vm11050_vm13, %v7755_v16, %v7756_v4 }
 0x538   : >> { %v7764_v27 = vrot.slane %v7763_v13, 4  ;;  %v7772_v30 = vor.u32 %v7771_v52, %v7770_v47  ;;  %7863 = vst [vmem:[#allocation2 + $0x158] sm:$0xf] %v7757_v56  ;;  %v7769_v37 = vrot.slane %v7768_v54, 4 }
 0x539   : >> { %v7776_v20 = vrot.slane %v13436_v21, 4  ;;  %v7865_v38 = vsel %vm11076_vm14, %v7760_v24, %v7864_v22 }
 0x53a   : >> { %7866 = vst [vmem:[#allocation2 + $0x164] sm:$0xf] %v7865_v38  ;;  %v7766_v29 = vsel %vm11050_vm13, %v7764_v27, %v7765_v45  ;;  %v7773_v49 = vrot.slane %v7772_v30, 4  ;;  %v7869_v62 = vsel %vm11076_vm14, %v7769_v37, %v7868_v33 }
 0x53b   : >> { %v7777_v10 = vor.u32 %v7776_v20, %v7774_v43  ;;  %7867 = vst [vmem:[#allocation2 + $0x170] sm:$0xf] %v7766_v29  ;;  %7870 = vst [vmem:[#allocation2 + $0x17c] sm:$0xf] %v7869_v62 }
 0x53c   : >> { %v7775_v5 = vsel %vm11050_vm13, %v7773_v49, %v7774_v43 }
 0x53d   : >> { %v7778_v12 = vrot.slane %v7777_v10, 4  ;;  %7871 = vst [vmem:[#allocation2 + $0x188] sm:$0xf] %v7775_v5 }
 0x53f   : >> { %v7873_v41 = vsel %vm11076_vm14, %v7778_v12, %v7872_v3 }
 0x540   : >> { %7874 = vst [vmem:[#allocation2 + $0x194] sm:$0xf] %v7873_v41 }
 0x541 PF: >> { %s1129_s20 = sadd.s32 1, %s10405_s20  }
 0x542   : >> { %p1126_p1 = scmp.ge.s32.totalorder %s1129_s20, 2  }
 0x543   : > { %s8631_s25 = sshll.u32 (%p1126_p1), %s10459_s16, 12  ;;  %s7889_s8 = sshll.u32 (%p1126_p1), %s11256_s18, 4  ;;  %s13130_s8 = int_to_ptr.vmem [resolvable:$true] %s7889_s8 }
 0x544   : > { %1128 = sbr.rel (!%p1126_p1) target bundleno = 233 (0xe9), region = 107  ;;  %s13127_s29 = scalar_lea.hbm (%p1126_p1), %s13176_s3, %s8631_s25 }
 0x545   : > { %s7876_s9 = scalar_lea.sflag (%p1126_p1), [#allocation5], %s10565_s30  ;;  %s10329_s17 = scalar_lea.vmem (%p1126_p1), %s13130_s8, 4096 }
 0x546   : > { %p10330_p2 = scmp.ne.s32.totalorder (%p1126_p1), %s13130_s8, %s10329_s17  ;;  %p13437_p6 = scmp.ne.s32.totalorder (%p1126_p1), %s13292_s10, 0 }
 0x547   : > { %s10415_s21 = smov (%p1126_p1), [#allocation9]  }
 0x548   : > { %p10331_p12 = pnand (%p1126_p1), %p10330_p2, %p13437_p6  ;;  %s10333_s22 = sshll.u32 (%p1126_p1), %s10415_s21, 4  ;;  %s10334_s22 = int_to_ptr.vmem [resolvable:$false] %s10333_s22 }
 0x549   : > { %s10335_s16 = scalar_lea.vmem %s10334_s22, 8192  ;;  %p10336_p9 = scmp.lt.s32.totalorder %s13130_s8, %s10334_s22 }
 0x54a   : > { %p10332_p7 = pneg %p10331_p12  ;;  %p10337_p13 = scmp.lt.s32.totalorder %s10335_s16, %s10329_s17 }
 0x54c   : > { %p10338_p5 = por %p10337_p13, %p10336_p9 }
 0x54e   : > { %p10339_p0 = pnand %p10338_p5, %p10332_p7 }
 0x550   : > { %10342 = shalt.err (!%p10339_p0)
}
 0x551   : > { %s10343_s23 = scalar_lea.hbm %s13127_s29, 4096  ;;  %s10347_s4 = scalar_lea.hbm %s13176_s3, 8192 }
 0x552   : > { %p10344_p4 = scmp.ne.s32.totalorder %s13127_s29, %s10343_s23  ;;  %p10348_p11 = scmp.lt.s32.totalorder %s13127_s29, %s13176_s3 }
 0x553   : > { %p10349_p10 = scmp.lt.s32.totalorder %s10347_s4, %s10343_s23 }
 0x554   : > { %p10345_p8 = pnand %p10344_p4, %p13437_p6 }
 0x555   : > { %p10350_p1 = por %p10349_p10, %p10348_p11 }
 0x556   : > { %p10346_p3 = pneg %p10345_p8 }
 0x558   : > { %p10351_p2 = pnand %p10350_p1, %p10346_p3 }
 0x55a   : > { %10354 = shalt.err (!%p10351_p2)
}
 0x55b   : > { %s10416_s18 = smov 128   ;;  %s10417_s20 = smov 8  }
 0x55c   : > { %9746 = dma.vmem_to_hbm [thread:$0]  (%p13437_p6), %s13130_s8, 4096, %s13127_s29, %s7876_s9, %s10416_s18, %s10416_s18, %s10417_s20  }
 0x55d PF: > { %s7904_s25 = sand.u32 1, %s10389_s12   ;;  %p13438_p12 = scmp.ne.s32.totalorder %s13288_s19, 0 }
 0x55e   : > { %p13439_p7 = scmp.ge.s32.totalorder %s10401_s15, 2  ;;  %s7905_s27 = scalar_lea.sflag [#allocation5], %s7904_s25 }
 0x560   : > { %p9760_p9 = pnand %p13439_p7, %p13438_p12 }
 0x562   : > { %p9761_p13 = pneg %p9760_p9 }
 0x564   : > { %10384 = dma.done.wait (%p9761_p13), %s7905_s27, 4096  }
 0x565   : > { %10386 = vsyncadd (%p9761_p13), %s7905_s27, 4294963200  ;;  %p17_p5 = scmp.ge.s32.totalorder %s10510_s7, 4   ;;  %s13440_s12 = smov %s10393_s13 }
 0x566   : > { %s13441_s13 = smov %s10397_s14  ;;  %s13442_s14 = smov %s10526_s11 }
 0x567   : > { %s13443_s15 = smov %s10510_s7  ;;  %19 = sbr.rel (!%p17_p5) target bundleno = 6 (0x6), region = 118 }
 0x56c   :  { %7910 = vsyncpa [#allocation4], 1 }
 0x56d   :  { %7912 = vsyncpa [#allocation4 + $0x1], 1 }
 0x56e   :  { %7913 = vsyncpa [#allocation7], 1 }
 0x56f   :  { %7914 = vsyncpa [#allocation5], 1 }
 0x570   :  { %7916 = vsyncpa [#allocation5 + $0x1], 1 }

</bundles_post_ra>
